<compile_context>
chip_gen: v6e
topology: v6e:2x2x1
jax: 0.10.0
libtpu: 0.0.40
codegen_flags: <defaults>
</compile_context>

<pallas_src>
import functools

import numpy as np
import jax
import jax.numpy as jnp
from jax.experimental import pallas as pl
from jax.experimental.pallas import tpu as pltpu

# ---------------------------------------------------------------------------
# Model geometry (input_size=50, latent_size=32, as in the PyTorch module)
# ---------------------------------------------------------------------------
LANE = 128       # TPU lane width; per-tap output channel blocks are 128 lanes
KSZ = 12         # conv kernel size
STRIDE = 2
PAD = 5
OUT_PAD = 1
L_SIG = 50       # signal length
C_SIG = 6        # signal channels
LATENT = 32


def _conv_out(l):
    return (l - KSZ + 2 * PAD) // STRIDE + 1


def _convT_out(l):
    return (l - 1) * STRIDE - 2 * PAD + KSZ + OUT_PAD


L1 = _conv_out(L_SIG)          # 25
L2 = _conv_out(L1)             # 12
L3 = _conv_out(L2)             # 6
CONV_OUT = 64 * L3             # 384
D1 = _convT_out(L3)            # 13
D2 = _convT_out(D1)            # 27
D3 = _convT_out(D2)            # 55


def _round_up(n, m):
    return ((n + m - 1) // m) * m


ROWS_IN = _round_up(L_SIG, 8)   # 56: per-sample input rows (8-sublane aligned)
ROWS_OUT = _round_up(D3, 8)     # 56: per-sample output rows


# ---------------------------------------------------------------------------
# Fused Pallas kernel: whole forward pass for one sample per grid step
# ---------------------------------------------------------------------------
def _fused_forward_kernel(*refs, plan):
    """refs = (x_ref, *layer_param_refs, out_ref).

    plan entries (kind, act):
      ("tap", act)   consumes (W_wide, bias, routing) refs:
          h <- act( sum_t routing[t] @ (h[:, :Kin] @ W_wide)[:, t*C:(t+1)*C] + bias )
        (implements Conv1d / ConvTranspose1d / flatten+fc1 / map2+un-flatten)
      ("dense", act) consumes (W, bias) refs:
          h <- act( h[:, :Kin] @ W + bias )

    Kin = W.shape[0] (real input channels padded to 8 sublanes); the activation
    always carries >= Kin meaningful leading lanes (extra lanes are exact zeros).
    """
    x_ref, out_ref = refs[0], refs[-1]
    prm = refs[1:-1]
    h = x_ref[...]                                   # (ROWS_IN, 128)
    i = 0
    for kind, act in plan:
        w_ref, b_ref = prm[i], prm[i + 1]
        kin = w_ref.shape[0]
        # offset-0 lane slice: matches the reduced K dim of the packed weight
        hk = h if h.shape[1] == kin else h[:, :kin]
        if kind == "dense":
            i += 2
            h = jnp.dot(hk, w_ref[...], preferred_element_type=jnp.float32) + b_ref[...]
        else:  # "tap"
            r_ref = prm[i + 2]                       # ref, (taps, rows_out, rows_in)
            i += 3
            c = b_ref.shape[-1]
            taps = w_ref.shape[1] // c
            y = jnp.dot(hk, w_ref[...], preferred_element_type=jnp.float32)  # (rows_in, taps*c)
            acc = None
            for t in range(taps):
                part = jnp.dot(r_ref[t], y[:, t * c:(t + 1) * c],
                               preferred_element_type=jnp.float32)           # (rows_out, c)
                acc = part if acc is None else acc + part
            h = acc + b_ref[...]                     # bias may be (1,c) or (rows_out,c)
        if act == "relu":
            h = jnp.maximum(h, 0.0)
        # act is None for nn.LeakyReLU(True) (negative_slope == 1.0): identity,
        # resolved at trace time so no dead compare/select is emitted.
    out_ref[...] = h.astype(out_ref.dtype)


def _replicated_spec(shape):
    zero = (0,) * len(shape)
    return pl.BlockSpec(tuple(shape), lambda b, _z=zero: _z)


def fused_forward(operands, x2d, batch, plan):
    n_expected = sum(3 if kind == "tap" else 2 for kind, _ in plan)
    assert len(operands) == n_expected
    in_specs = [pl.BlockSpec((ROWS_IN, LANE), lambda b: (b, 0))]
    in_specs += [_replicated_spec(op.shape) for op in operands]
    out_spec = pl.BlockSpec((ROWS_OUT, LANE), lambda b: (b, 0))
    kernel = functools.partial(_fused_forward_kernel, plan=plan)
    return pl.pallas_call(
        kernel,
        out_shape=jax.ShapeDtypeStruct((batch * ROWS_OUT, LANE), jnp.float32),
        grid=(batch,),
        in_specs=in_specs,
        out_specs=out_spec,
        compiler_params=pltpu.CompilerParams(
            dimension_semantics=("parallel",),      # v7x: shard batch over both TCs
            vmem_limit_bytes=40 * 1024 * 1024,
        ),
    )(x2d, *operands)


def forward(operands, x, plan):
    """x: (B, 6, 50) NCL float32 -> (B, 6, 50); matches Conv1dAutoencoder.forward."""
    B = x.shape[0]
    # Boundary layout prep only (tiny): NCL -> (rows = length, lanes = channels).
    x2d = jnp.zeros((B, ROWS_IN, LANE), jnp.float32)
    x2d = x2d.at[:, :L_SIG, :C_SIG].set(jnp.transpose(x, (0, 2, 1)))
    x2d = x2d.reshape(B * ROWS_IN, LANE)
    out2d = fused_forward(operands, x2d, B, plan)
    out = out2d.reshape(B, ROWS_OUT, LANE)[:, :L_SIG, :C_SIG]   # crop to [:, :, :50]
    return jnp.transpose(out, (0, 2, 1))


# ---------------------------------------------------------------------------
# Weight packing: PyTorch layouts -> lane-padded kernel operands
# (K dim padded only to the real channel count rounded to 8 sublanes.)
# ---------------------------------------------------------------------------
def _conv_routing(k, stride, pad, l_in, l_out, in_cols=None, out_rows=None):
    in_cols = l_in if in_cols is None else in_cols
    out_rows = l_out if out_rows is None else out_rows
    r = np.zeros((k, out_rows, in_cols), np.float32)
    for t in range(k):
        for j in range(l_out):
            i = j * stride + t - pad
            if 0 <= i < l_in:
                r[t, j, i] = 1.0
    return r


def _convT_routing(k, stride, pad, l_in, l_out, out_rows=None):
    out_rows = l_out if out_rows is None else out_rows
    r = np.zeros((k, out_rows, l_in), np.float32)
    for t in range(k):
        for j in range(l_in):
            m = j * stride + t - pad
            if 0 <= m < l_out:
                r[t, m, j] = 1.0
    return r


def _pack_conv_w(w):       # torch Conv1d weight (C_out, C_in, k)
    w = np.asarray(w)
    c_out, c_in, k = w.shape
    kin = _round_up(c_in, 8)
    out = np.zeros((kin, k * LANE), np.float32)
    for t in range(k):
        out[:c_in, t * LANE:t * LANE + c_out] = w[:, :, t].T
    return out


def _pack_convT_w(w):      # torch ConvTranspose1d weight (C_in, C_out, k)
    w = np.asarray(w)
    c_in, c_out, k = w.shape
    kin = _round_up(c_in, 8)
    out = np.zeros((kin, k * LANE), np.float32)
    for t in range(k):
        out[:c_in, t * LANE:t * LANE + c_out] = w[:, :, t]
    return out


def _pack_dense_w(w, in_pad, out_pad):   # torch Linear weight (out, in)
    w = np.asarray(w)
    o, i = w.shape
    out = np.zeros((in_pad, out_pad), np.float32)
    out[:i, :o] = w.T
    return out


def _pack_bias(b, out_pad):
    b = np.asarray(b)
    out = np.zeros((1, out_pad), np.float32)
    out[0, :b.shape[0]] = b
    return out


def _pack_fc1_w(w):
    """fc1 weight (512, 384); flatten order of the conv output is f = c*L3 + l."""
    w = np.asarray(w)
    out = np.zeros((64, L3 * 512), np.float32)
    for l in range(L3):
        out[:, l * 512:(l + 1) * 512] = w[:, l::L3].T   # rows = channel c
    return out


def _pack_map2_w(w):
    """map2 weight (384, 512) with out-feature f = c*L3 + l.  Columns are permuted
    so the decoder's (rows = length l, lanes = channel c) layout is produced by the
    6-tap routing scatter directly: column l*LANE + c  <-  out-feature c*L3 + l."""
    w = np.asarray(w)
    out = np.zeros((512, L3 * LANE), np.float32)
    for l in range(L3):
        out[:, l * LANE:l * LANE + 64] = w[l::L3, :].T
    return out


def _pack_map2_b(b):
    b = np.asarray(b)
    out = np.zeros((L3, LANE), np.float32)
    for l in range(L3):
        out[l, :64] = b[l::L3]
    return out


def build_network(p):
    """Pack PyTorch-layout params into the fused kernel operand list + static plan."""
    ops, plan = [], []

    def tap(w_wide, bias, routing, act):
        ops.extend([w_wide, bias, routing])
        plan.append(("tap", act))

    def dense(w, bias, act):
        ops.extend([w, bias])
        plan.append(("dense", act))

    # --- encoder ---
    tap(_pack_conv_w(p["enc1"][0]), _pack_bias(p["enc1"][1], LANE),
        _conv_routing(KSZ, STRIDE, PAD, L_SIG, L1, in_cols=ROWS_IN), "relu")
    tap(_pack_conv_w(p["enc2"][0]), _pack_bias(p["enc2"][1], LANE),
        _conv_routing(KSZ, STRIDE, PAD, L1, L2), "relu")
    # nn.LeakyReLU(True): negative_slope == 1.0 -> identity (act=None)
    tap(_pack_conv_w(p["enc3"][0]), _pack_bias(p["enc3"][1], LANE),
        _conv_routing(KSZ, STRIDE, PAD, L2, L3), None)

    # --- flatten (channel-major NCL view) fused into fc1 ---
    r_fc1 = np.zeros((L3, 1, L3), np.float32)
    r_fc1[np.arange(L3), 0, np.arange(L3)] = 1.0
    tap(_pack_fc1_w(p["fc1"][0]), _pack_bias(p["fc1"][1], 512), r_fc1, None)

    # --- bottleneck ---
    dense(_pack_dense_w(p["fc2"][0], 512, LANE), _pack_bias(p["fc2"][1], LANE), None)
    dense(_pack_dense_w(p["map1"][0], LATENT, 512), _pack_bias(p["map1"][1], 512), None)

    # --- map2 with the un-flatten permutation folded into its packed columns;
    #     6-tap routing scatters (1, 6*128) into (rows = length, lanes = channels)
    r_unf = np.zeros((L3, L3, 1), np.float32)
    r_unf[np.arange(L3), np.arange(L3), 0] = 1.0
    tap(_pack_map2_w(p["map2"][0]), _pack_map2_b(p["map2"][1]), r_unf, None)

    # --- decoder (transpose convs; trailing LeakyReLU(True) identities skipped) ---
    tap(_pack_convT_w(p["dec1"][0]), _pack_bias(p["dec1"][1], LANE),
        _convT_routing(KSZ, STRIDE, PAD, L3, D1), None)
    tap(_pack_convT_w(p["dec2"][0]), _pack_bias(p["dec2"][1], LANE),
        _convT_routing(KSZ, STRIDE, PAD, D1, D2), None)
    tap(_pack_convT_w(p["dec3"][0]), _pack_bias(p["dec3"][1], LANE),
        _convT_routing(KSZ, STRIDE, PAD, D2, D3, out_rows=ROWS_OUT), None)

    return tuple(jnp.asarray(o, jnp.float32) for o in ops), tuple(plan)


# ---------------------------------------------------------------------------
# Deterministic parameters (PyTorch-default-style uniform init, PyTorch layouts)
# ---------------------------------------------------------------------------
def _uniform(key, shape, fan_in):
    bound = 1.0 / float(np.sqrt(fan_in))
    return jax.random.uniform(key, shape, jnp.float32, -bound, bound)


def init_params(key):
    ks = jax.random.split(key, 20)
    p = {}
    p["enc1"] = (_uniform(ks[0], (16, 6, KSZ), 6 * KSZ), _uniform(ks[1], (16,), 6 * KSZ))
    p["enc2"] = (_uniform(ks[2], (64, 16, KSZ), 16 * KSZ), _uniform(ks[3], (64,), 16 * KSZ))
    p["enc3"] = (_uniform(ks[4], (64, 64, KSZ), 64 * KSZ), _uniform(ks[5], (64,), 64 * KSZ))
    p["fc1"] = (_uniform(ks[6], (512, CONV_OUT), CONV_OUT), _uniform(ks[7], (512,), CONV_OUT))
    p["fc2"] = (_uniform(ks[8], (LATENT, 512), 512), _uniform(ks[9], (LATENT,), 512))
    p["map1"] = (_uniform(ks[10], (512, LATENT), LATENT), _uniform(ks[11], (512,), LATENT))
    p["map2"] = (_uniform(ks[12], (CONV_OUT, 512), 512), _uniform(ks[13], (CONV_OUT,), 512))
    # ConvTranspose1d weight layout (C_in, C_out, k); PyTorch default fan_in = C_out*k
    p["dec1"] = (_uniform(ks[14], (64, 64, KSZ), 64 * KSZ), _uniform(ks[15], (64,), 64 * KSZ))
    p["dec2"] = (_uniform(ks[16], (64, 16, KSZ), 16 * KSZ), _uniform(ks[17], (16,), 16 * KSZ))
    p["dec3"] = (_uniform(ks[18], (16, 6, KSZ), 6 * KSZ), _uniform(ks[19], (6,), 6 * KSZ))
    return p


# ---------------------------------------------------------------------------
# Pure-JAX reference of the PyTorch module (for a numerical self-check)
# ---------------------------------------------------------------------------
def _ref_conv1d(x, w, b, stride, padding):
    B, c_in, L = x.shape
    c_out, _, k = w.shape
    xp = jnp.pad(x, ((0, 0), (0, 0), (padding, padding)))
    l_out = (L - k + 2 * padding) // stride + 1
    idx = jnp.arange(l_out)[:, None] * stride + jnp.arange(k)[None, :]
    patches = xp[:, :, idx]                               # (B, c_in, l_out, k)
    patches = patches.transpose(0, 2, 1, 3).reshape(B * l_out, c_in * k)
    y = patches @ w.reshape(c_out, c_in * k).T + b
    return y.reshape(B, l_out, c_out).transpose(0, 2, 1)


def _ref_convT1d(x, w, b, stride, padding, output_padding):
    B, c_in, L = x.shape
    _, c_out, k = w.shape
    l_d = (L - 1) * stride + 1
    xd = jnp.zeros((B, c_in, l_d), x.dtype).at[:, :, ::stride].set(x)
    pad_l = k - 1 - padding
    pad_r = k - 1 - padding + output_padding
    xp = jnp.pad(xd, ((0, 0), (0, 0), (pad_l, pad_r)))
    w_conv = jnp.flip(w, axis=-1).transpose(1, 0, 2)       # (C_out, C_in, k)
    return _ref_conv1d(xp, w_conv, b, 1, 0)


def reference_forward(p, x):
    B = x.shape[0]
    h = jax.nn.relu(_ref_conv1d(x, p["enc1"][0], p["enc1"][1], 2, 5))
    h = jax.nn.relu(_ref_conv1d(h, p["enc2"][0], p["enc2"][1], 2, 5))
    h = _ref_conv1d(h, p["enc3"][0], p["enc3"][1], 2, 5)   # LeakyReLU(True) == identity
    h = h.reshape(B, -1)
    h = h @ p["fc1"][0].T + p["fc1"][1]
    h = h @ p["fc2"][0].T + p["fc2"][1]
    h = h @ p["map1"][0].T + p["map1"][1]
    h = h @ p["map2"][0].T + p["map2"][1]
    h = h.reshape(B, 64, -1)
    h = _ref_convT1d(h, p["dec1"][0], p["dec1"][1], 2, 5, 1)
    h = _ref_convT1d(h, p["dec2"][0], p["dec2"][1], 2, 5, 1)
    h = _ref_convT1d(h, p["dec3"][0], p["dec3"][1], 2, 5, 1)
    return h[:, :, :L_SIG]


# ---------------------------------------------------------------------------
if __name__ == "__main__":
    key = jax.random.PRNGKey(0)
    pkey, xkey = jax.random.split(key)
    params = init_params(pkey)
    operands, plan = build_network(params)

    x = jax.random.normal(xkey, (2, C_SIG, L_SIG), jnp.float32)

    fwd = jax.jit(forward, static_argnums=2)
    y = fwd(operands, x, plan)
    jax.block_until_ready(y)

    assert y.shape == (2, C_SIG, L_SIG) and y.dtype == jnp.float32

    # Numerical self-check against a pure-JAX implementation of the PyTorch module
    # (loose tolerance to absorb MXU matmul rounding differences).
    y_ref = jax.jit(reference_forward)(params, x)
    np.testing.assert_allclose(np.asarray(y), np.asarray(y_ref), rtol=5e-2, atol=5e-2)

    print("KERNEL_OK")
</pallas_src>

<mosaic_0001>
module attributes {stable_mosaic.version = 11 : i64} {
  func.func @_fused_forward_kernel(%arg0: i32, %arg1: memref<56x128xf32, #tpu.memory_space<vmem>>, %arg2: memref<8x1536xf32, #tpu.memory_space<vmem>>, %arg3: memref<1x128xf32, #tpu.memory_space<vmem>>, %arg4: memref<12x25x56xf32, #tpu.memory_space<vmem>>, %arg5: memref<16x1536xf32, #tpu.memory_space<vmem>>, %arg6: memref<1x128xf32, #tpu.memory_space<vmem>>, %arg7: memref<12x12x25xf32, #tpu.memory_space<vmem>>, %arg8: memref<64x1536xf32, #tpu.memory_space<vmem>>, %arg9: memref<1x128xf32, #tpu.memory_space<vmem>>, %arg10: memref<12x6x12xf32, #tpu.memory_space<vmem>>, %arg11: memref<64x3072xf32, #tpu.memory_space<vmem>>, %arg12: memref<1x512xf32, #tpu.memory_space<vmem>>, %arg13: memref<6x1x6xf32, #tpu.memory_space<vmem>>, %arg14: memref<512x128xf32, #tpu.memory_space<vmem>>, %arg15: memref<1x128xf32, #tpu.memory_space<vmem>>, %arg16: memref<32x512xf32, #tpu.memory_space<vmem>>, %arg17: memref<1x512xf32, #tpu.memory_space<vmem>>, %arg18: memref<512x768xf32, #tpu.memory_space<vmem>>, %arg19: memref<6x128xf32, #tpu.memory_space<vmem>>, %arg20: memref<6x6x1xf32, #tpu.memory_space<vmem>>, %arg21: memref<64x1536xf32, #tpu.memory_space<vmem>>, %arg22: memref<1x128xf32, #tpu.memory_space<vmem>>, %arg23: memref<12x13x6xf32, #tpu.memory_space<vmem>>, %arg24: memref<64x1536xf32, #tpu.memory_space<vmem>>, %arg25: memref<1x128xf32, #tpu.memory_space<vmem>>, %arg26: memref<12x27x13xf32, #tpu.memory_space<vmem>>, %arg27: memref<16x1536xf32, #tpu.memory_space<vmem>>, %arg28: memref<1x128xf32, #tpu.memory_space<vmem>>, %arg29: memref<12x56x27xf32, #tpu.memory_space<vmem>>, %arg30: memref<56x128xf32, #tpu.memory_space<vmem>>) attributes {dimension_semantics = [#tpu.dimension_semantics<parallel>], iteration_bounds = array<i64: 2>, scalar_prefetch = 0 : i64, scratch_operands = 0 : i64, tpu.core_type = #tpu.core_type<tc>, window_params = [{transform_indices = @transform_0, window_bounds = array<i64: 56, 128>}, {pipeline_mode = #tpu.pipeline_mode<synchronous>, transform_indices = @transform_1, window_bounds = array<i64: 8, 1536>}, {pipeline_mode = #tpu.pipeline_mode<synchronous>, transform_indices = @transform_2, window_bounds = array<i64: 1, 128>}, {pipeline_mode = #tpu.pipeline_mode<synchronous>, transform_indices = @transform_3, window_bounds = array<i64: 12, 25, 56>}, {pipeline_mode = #tpu.pipeline_mode<synchronous>, transform_indices = @transform_4, window_bounds = array<i64: 16, 1536>}, {pipeline_mode = #tpu.pipeline_mode<synchronous>, transform_indices = @transform_5, window_bounds = array<i64: 1, 128>}, {pipeline_mode = #tpu.pipeline_mode<synchronous>, transform_indices = @transform_6, window_bounds = array<i64: 12, 12, 25>}, {pipeline_mode = #tpu.pipeline_mode<synchronous>, transform_indices = @transform_7, window_bounds = array<i64: 64, 1536>}, {pipeline_mode = #tpu.pipeline_mode<synchronous>, transform_indices = @transform_8, window_bounds = array<i64: 1, 128>}, {pipeline_mode = #tpu.pipeline_mode<synchronous>, transform_indices = @transform_9, window_bounds = array<i64: 12, 6, 12>}, {pipeline_mode = #tpu.pipeline_mode<synchronous>, transform_indices = @transform_10, window_bounds = array<i64: 64, 3072>}, {pipeline_mode = #tpu.pipeline_mode<synchronous>, transform_indices = @transform_11, window_bounds = array<i64: 1, 512>}, {pipeline_mode = #tpu.pipeline_mode<synchronous>, transform_indices = @transform_12, window_bounds = array<i64: 6, 1, 6>}, {pipeline_mode = #tpu.pipeline_mode<synchronous>, transform_indices = @transform_13, window_bounds = array<i64: 512, 128>}, {pipeline_mode = #tpu.pipeline_mode<synchronous>, transform_indices = @transform_14, window_bounds = array<i64: 1, 128>}, {pipeline_mode = #tpu.pipeline_mode<synchronous>, transform_indices = @transform_15, window_bounds = array<i64: 32, 512>}, {pipeline_mode = #tpu.pipeline_mode<synchronous>, transform_indices = @transform_16, window_bounds = array<i64: 1, 512>}, {pipeline_mode = #tpu.pipeline_mode<synchronous>, transform_indices = @transform_17, window_bounds = array<i64: 512, 768>}, {pipeline_mode = #tpu.pipeline_mode<synchronous>, transform_indices = @transform_18, window_bounds = array<i64: 6, 128>}, {pipeline_mode = #tpu.pipeline_mode<synchronous>, transform_indices = @transform_19, window_bounds = array<i64: 6, 6, 1>}, {pipeline_mode = #tpu.pipeline_mode<synchronous>, transform_indices = @transform_20, window_bounds = array<i64: 64, 1536>}, {pipeline_mode = #tpu.pipeline_mode<synchronous>, transform_indices = @transform_21, window_bounds = array<i64: 1, 128>}, {pipeline_mode = #tpu.pipeline_mode<synchronous>, transform_indices = @transform_22, window_bounds = array<i64: 12, 13, 6>}, {pipeline_mode = #tpu.pipeline_mode<synchronous>, transform_indices = @transform_23, window_bounds = array<i64: 64, 1536>}, {pipeline_mode = #tpu.pipeline_mode<synchronous>, transform_indices = @transform_24, window_bounds = array<i64: 1, 128>}, {pipeline_mode = #tpu.pipeline_mode<synchronous>, transform_indices = @transform_25, window_bounds = array<i64: 12, 27, 13>}, {pipeline_mode = #tpu.pipeline_mode<synchronous>, transform_indices = @transform_26, window_bounds = array<i64: 16, 1536>}, {pipeline_mode = #tpu.pipeline_mode<synchronous>, transform_indices = @transform_27, window_bounds = array<i64: 1, 128>}, {pipeline_mode = #tpu.pipeline_mode<synchronous>, transform_indices = @transform_28, window_bounds = array<i64: 12, 56, 27>}, {transform_indices = @transform_29, window_bounds = array<i64: 56, 128>}]} {
    %c0 = arith.constant 0 : index
    %c0_0 = arith.constant 0 : index
    %0 = vector.load %arg1[%c0, %c0_0] : memref<56x128xf32, #tpu.memory_space<vmem>>, vector<56x128xf32>
    %1 = vector.extract_strided_slice %0 {offsets = [0, 0], sizes = [56, 8], strides = [1, 1]} : vector<56x128xf32> to vector<56x8xf32>
    %c0_1 = arith.constant 0 : index
    %c0_2 = arith.constant 0 : index
    %2 = vector.load %arg2[%c0_1, %c0_2] : memref<8x1536xf32, #tpu.memory_space<vmem>>, vector<8x1536xf32>
    %cst = arith.constant dense<0.000000e+00> : vector<56x1536xf32>
    %3 = tpu.matmul %1, %2, %cst {dimension_numbers = #tpu.dot_dimension_numbers<[1], [0], [0], [1], [0, 0, 1, 1], [], []>} : vector<56x8xf32>, vector<8x1536xf32>, vector<56x1536xf32> -> vector<56x1536xf32>
    %c0_3 = arith.constant 0 : index
    %c0_4 = arith.constant 0 : index
    %c0_5 = arith.constant 0 : index
    %4 = vector.load %arg4[%c0_3, %c0_4, %c0_5] : memref<12x25x56xf32, #tpu.memory_space<vmem>>, vector<1x25x56xf32>
    %5 = vector.shape_cast %4 : vector<1x25x56xf32> to vector<25x56xf32>
    %6 = vector.extract_strided_slice %3 {offsets = [0, 0], sizes = [56, 128], strides = [1, 1]} : vector<56x1536xf32> to vector<56x128xf32>
    %cst_6 = arith.constant dense<0.000000e+00> : vector<25x128xf32>
    %7 = tpu.matmul %5, %6, %cst_6 {dimension_numbers = #tpu.dot_dimension_numbers<[1], [0], [0], [1], [0, 0, 1, 1], [], []>} : vector<25x56xf32>, vector<56x128xf32>, vector<25x128xf32> -> vector<25x128xf32>
    %c1 = arith.constant 1 : index
    %c0_7 = arith.constant 0 : index
    %c0_8 = arith.constant 0 : index
    %8 = vector.load %arg4[%c1, %c0_7, %c0_8] : memref<12x25x56xf32, #tpu.memory_space<vmem>>, vector<1x25x56xf32>
    %9 = vector.shape_cast %8 : vector<1x25x56xf32> to vector<25x56xf32>
    %10 = vector.extract_strided_slice %3 {offsets = [0, 128], sizes = [56, 128], strides = [1, 1]} : vector<56x1536xf32> to vector<56x128xf32>
    %cst_9 = arith.constant dense<0.000000e+00> : vector<25x128xf32>
    %11 = tpu.matmul %9, %10, %cst_9 {dimension_numbers = #tpu.dot_dimension_numbers<[1], [0], [0], [1], [0, 0, 1, 1], [], []>} : vector<25x56xf32>, vector<56x128xf32>, vector<25x128xf32> -> vector<25x128xf32>
    %12 = arith.addf %7, %11 : vector<25x128xf32>
    %c2 = arith.constant 2 : index
    %c0_10 = arith.constant 0 : index
    %c0_11 = arith.constant 0 : index
    %13 = vector.load %arg4[%c2, %c0_10, %c0_11] : memref<12x25x56xf32, #tpu.memory_space<vmem>>, vector<1x25x56xf32>
    %14 = vector.shape_cast %13 : vector<1x25x56xf32> to vector<25x56xf32>
    %15 = vector.extract_strided_slice %3 {offsets = [0, 256], sizes = [56, 128], strides = [1, 1]} : vector<56x1536xf32> to vector<56x128xf32>
    %cst_12 = arith.constant dense<0.000000e+00> : vector<25x128xf32>
    %16 = tpu.matmul %14, %15, %cst_12 {dimension_numbers = #tpu.dot_dimension_numbers<[1], [0], [0], [1], [0, 0, 1, 1], [], []>} : vector<25x56xf32>, vector<56x128xf32>, vector<25x128xf32> -> vector<25x128xf32>
    %17 = arith.addf %12, %16 : vector<25x128xf32>
    %c3 = arith.constant 3 : index
    %c0_13 = arith.constant 0 : index
    %c0_14 = arith.constant 0 : index
    %18 = vector.load %arg4[%c3, %c0_13, %c0_14] : memref<12x25x56xf32, #tpu.memory_space<vmem>>, vector<1x25x56xf32>
    %19 = vector.shape_cast %18 : vector<1x25x56xf32> to vector<25x56xf32>
    %20 = vector.extract_strided_slice %3 {offsets = [0, 384], sizes = [56, 128], strides = [1, 1]} : vector<56x1536xf32> to vector<56x128xf32>
    %cst_15 = arith.constant dense<0.000000e+00> : vector<25x128xf32>
    %21 = tpu.matmul %19, %20, %cst_15 {dimension_numbers = #tpu.dot_dimension_numbers<[1], [0], [0], [1], [0, 0, 1, 1], [], []>} : vector<25x56xf32>, vector<56x128xf32>, vector<25x128xf32> -> vector<25x128xf32>
    %22 = arith.addf %17, %21 : vector<25x128xf32>
    %c4 = arith.constant 4 : index
    %c0_16 = arith.constant 0 : index
    %c0_17 = arith.constant 0 : index
    %23 = vector.load %arg4[%c4, %c0_16, %c0_17] : memref<12x25x56xf32, #tpu.memory_space<vmem>>, vector<1x25x56xf32>
    %24 = vector.shape_cast %23 : vector<1x25x56xf32> to vector<25x56xf32>
    %25 = vector.extract_strided_slice %3 {offsets = [0, 512], sizes = [56, 128], strides = [1, 1]} : vector<56x1536xf32> to vector<56x128xf32>
    %cst_18 = arith.constant dense<0.000000e+00> : vector<25x128xf32>
    %26 = tpu.matmul %24, %25, %cst_18 {dimension_numbers = #tpu.dot_dimension_numbers<[1], [0], [0], [1], [0, 0, 1, 1], [], []>} : vector<25x56xf32>, vector<56x128xf32>, vector<25x128xf32> -> vector<25x128xf32>
    %27 = arith.addf %22, %26 : vector<25x128xf32>
    %c5 = arith.constant 5 : index
    %c0_19 = arith.constant 0 : index
    %c0_20 = arith.constant 0 : index
    %28 = vector.load %arg4[%c5, %c0_19, %c0_20] : memref<12x25x56xf32, #tpu.memory_space<vmem>>, vector<1x25x56xf32>
    %29 = vector.shape_cast %28 : vector<1x25x56xf32> to vector<25x56xf32>
    %30 = vector.extract_strided_slice %3 {offsets = [0, 640], sizes = [56, 128], strides = [1, 1]} : vector<56x1536xf32> to vector<56x128xf32>
    %cst_21 = arith.constant dense<0.000000e+00> : vector<25x128xf32>
    %31 = tpu.matmul %29, %30, %cst_21 {dimension_numbers = #tpu.dot_dimension_numbers<[1], [0], [0], [1], [0, 0, 1, 1], [], []>} : vector<25x56xf32>, vector<56x128xf32>, vector<25x128xf32> -> vector<25x128xf32>
    %32 = arith.addf %27, %31 : vector<25x128xf32>
    %c6 = arith.constant 6 : index
    %c0_22 = arith.constant 0 : index
    %c0_23 = arith.constant 0 : index
    %33 = vector.load %arg4[%c6, %c0_22, %c0_23] : memref<12x25x56xf32, #tpu.memory_space<vmem>>, vector<1x25x56xf32>
    %34 = vector.shape_cast %33 : vector<1x25x56xf32> to vector<25x56xf32>
    %35 = vector.extract_strided_slice %3 {offsets = [0, 768], sizes = [56, 128], strides = [1, 1]} : vector<56x1536xf32> to vector<56x128xf32>
    %cst_24 = arith.constant dense<0.000000e+00> : vector<25x128xf32>
    %36 = tpu.matmul %34, %35, %cst_24 {dimension_numbers = #tpu.dot_dimension_numbers<[1], [0], [0], [1], [0, 0, 1, 1], [], []>} : vector<25x56xf32>, vector<56x128xf32>, vector<25x128xf32> -> vector<25x128xf32>
    %37 = arith.addf %32, %36 : vector<25x128xf32>
    %c7 = arith.constant 7 : index
    %c0_25 = arith.constant 0 : index
    %c0_26 = arith.constant 0 : index
    %38 = vector.load %arg4[%c7, %c0_25, %c0_26] : memref<12x25x56xf32, #tpu.memory_space<vmem>>, vector<1x25x56xf32>
    %39 = vector.shape_cast %38 : vector<1x25x56xf32> to vector<25x56xf32>
    %40 = vector.extract_strided_slice %3 {offsets = [0, 896], sizes = [56, 128], strides = [1, 1]} : vector<56x1536xf32> to vector<56x128xf32>
    %cst_27 = arith.constant dense<0.000000e+00> : vector<25x128xf32>
    %41 = tpu.matmul %39, %40, %cst_27 {dimension_numbers = #tpu.dot_dimension_numbers<[1], [0], [0], [1], [0, 0, 1, 1], [], []>} : vector<25x56xf32>, vector<56x128xf32>, vector<25x128xf32> -> vector<25x128xf32>
    %42 = arith.addf %37, %41 : vector<25x128xf32>
    %c8 = arith.constant 8 : index
    %c0_28 = arith.constant 0 : index
    %c0_29 = arith.constant 0 : index
    %43 = vector.load %arg4[%c8, %c0_28, %c0_29] : memref<12x25x56xf32, #tpu.memory_space<vmem>>, vector<1x25x56xf32>
    %44 = vector.shape_cast %43 : vector<1x25x56xf32> to vector<25x56xf32>
    %45 = vector.extract_strided_slice %3 {offsets = [0, 1024], sizes = [56, 128], strides = [1, 1]} : vector<56x1536xf32> to vector<56x128xf32>
    %cst_30 = arith.constant dense<0.000000e+00> : vector<25x128xf32>
    %46 = tpu.matmul %44, %45, %cst_30 {dimension_numbers = #tpu.dot_dimension_numbers<[1], [0], [0], [1], [0, 0, 1, 1], [], []>} : vector<25x56xf32>, vector<56x128xf32>, vector<25x128xf32> -> vector<25x128xf32>
    %47 = arith.addf %42, %46 : vector<25x128xf32>
    %c9 = arith.constant 9 : index
    %c0_31 = arith.constant 0 : index
    %c0_32 = arith.constant 0 : index
    %48 = vector.load %arg4[%c9, %c0_31, %c0_32] : memref<12x25x56xf32, #tpu.memory_space<vmem>>, vector<1x25x56xf32>
    %49 = vector.shape_cast %48 : vector<1x25x56xf32> to vector<25x56xf32>
    %50 = vector.extract_strided_slice %3 {offsets = [0, 1152], sizes = [56, 128], strides = [1, 1]} : vector<56x1536xf32> to vector<56x128xf32>
    %cst_33 = arith.constant dense<0.000000e+00> : vector<25x128xf32>
    %51 = tpu.matmul %49, %50, %cst_33 {dimension_numbers = #tpu.dot_dimension_numbers<[1], [0], [0], [1], [0, 0, 1, 1], [], []>} : vector<25x56xf32>, vector<56x128xf32>, vector<25x128xf32> -> vector<25x128xf32>
    %52 = arith.addf %47, %51 : vector<25x128xf32>
    %c10 = arith.constant 10 : index
    %c0_34 = arith.constant 0 : index
    %c0_35 = arith.constant 0 : index
    %53 = vector.load %arg4[%c10, %c0_34, %c0_35] : memref<12x25x56xf32, #tpu.memory_space<vmem>>, vector<1x25x56xf32>
    %54 = vector.shape_cast %53 : vector<1x25x56xf32> to vector<25x56xf32>
    %55 = vector.extract_strided_slice %3 {offsets = [0, 1280], sizes = [56, 128], strides = [1, 1]} : vector<56x1536xf32> to vector<56x128xf32>
    %cst_36 = arith.constant dense<0.000000e+00> : vector<25x128xf32>
    %56 = tpu.matmul %54, %55, %cst_36 {dimension_numbers = #tpu.dot_dimension_numbers<[1], [0], [0], [1], [0, 0, 1, 1], [], []>} : vector<25x56xf32>, vector<56x128xf32>, vector<25x128xf32> -> vector<25x128xf32>
    %57 = arith.addf %52, %56 : vector<25x128xf32>
    %c11 = arith.constant 11 : index
    %c0_37 = arith.constant 0 : index
    %c0_38 = arith.constant 0 : index
    %58 = vector.load %arg4[%c11, %c0_37, %c0_38] : memref<12x25x56xf32, #tpu.memory_space<vmem>>, vector<1x25x56xf32>
    %59 = vector.shape_cast %58 : vector<1x25x56xf32> to vector<25x56xf32>
    %60 = vector.extract_strided_slice %3 {offsets = [0, 1408], sizes = [56, 128], strides = [1, 1]} : vector<56x1536xf32> to vector<56x128xf32>
    %cst_39 = arith.constant dense<0.000000e+00> : vector<25x128xf32>
    %61 = tpu.matmul %59, %60, %cst_39 {dimension_numbers = #tpu.dot_dimension_numbers<[1], [0], [0], [1], [0, 0, 1, 1], [], []>} : vector<25x56xf32>, vector<56x128xf32>, vector<25x128xf32> -> vector<25x128xf32>
    %62 = arith.addf %57, %61 : vector<25x128xf32>
    %c0_40 = arith.constant 0 : index
    %c0_41 = arith.constant 0 : index
    %63 = vector.load %arg3[%c0_40, %c0_41] : memref<1x128xf32, #tpu.memory_space<vmem>>, vector<1x128xf32>
    %64 = vector.broadcast %63 : vector<1x128xf32> to vector<25x128xf32>
    %65 = arith.addf %62, %64 : vector<25x128xf32>
    %cst_42 = arith.constant 0.000000e+00 : f32
    %66 = vector.broadcast %cst_42 : f32 to vector<25x128xf32>
    %67 = arith.maximumf %65, %66 : vector<25x128xf32>
    %68 = vector.extract_strided_slice %67 {offsets = [0, 0], sizes = [25, 16], strides = [1, 1]} : vector<25x128xf32> to vector<25x16xf32>
    %c0_43 = arith.constant 0 : index
    %c0_44 = arith.constant 0 : index
    %69 = vector.load %arg5[%c0_43, %c0_44] : memref<16x1536xf32, #tpu.memory_space<vmem>>, vector<16x1536xf32>
    %cst_45 = arith.constant dense<0.000000e+00> : vector<25x1536xf32>
    %70 = tpu.matmul %68, %69, %cst_45 {dimension_numbers = #tpu.dot_dimension_numbers<[1], [0], [0], [1], [0, 0, 1, 1], [], []>} : vector<25x16xf32>, vector<16x1536xf32>, vector<25x1536xf32> -> vector<25x1536xf32>
    %c0_46 = arith.constant 0 : index
    %c0_47 = arith.constant 0 : index
    %c0_48 = arith.constant 0 : index
    %71 = vector.load %arg7[%c0_46, %c0_47, %c0_48] : memref<12x12x25xf32, #tpu.memory_space<vmem>>, vector<1x12x25xf32>
    %72 = vector.shape_cast %71 : vector<1x12x25xf32> to vector<12x25xf32>
    %73 = vector.extract_strided_slice %70 {offsets = [0, 0], sizes = [25, 128], strides = [1, 1]} : vector<25x1536xf32> to vector<25x128xf32>
    %cst_49 = arith.constant dense<0.000000e+00> : vector<12x128xf32>
    %74 = tpu.matmul %72, %73, %cst_49 {dimension_numbers = #tpu.dot_dimension_numbers<[1], [0], [0], [1], [0, 0, 1, 1], [], []>} : vector<12x25xf32>, vector<25x128xf32>, vector<12x128xf32> -> vector<12x128xf32>
    %c1_50 = arith.constant 1 : index
    %c0_51 = arith.constant 0 : index
    %c0_52 = arith.constant 0 : index
    %75 = vector.load %arg7[%c1_50, %c0_51, %c0_52] : memref<12x12x25xf32, #tpu.memory_space<vmem>>, vector<1x12x25xf32>
    %76 = vector.shape_cast %75 : vector<1x12x25xf32> to vector<12x25xf32>
    %77 = vector.extract_strided_slice %70 {offsets = [0, 128], sizes = [25, 128], strides = [1, 1]} : vector<25x1536xf32> to vector<25x128xf32>
    %cst_53 = arith.constant dense<0.000000e+00> : vector<12x128xf32>
    %78 = tpu.matmul %76, %77, %cst_53 {dimension_numbers = #tpu.dot_dimension_numbers<[1], [0], [0], [1], [0, 0, 1, 1], [], []>} : vector<12x25xf32>, vector<25x128xf32>, vector<12x128xf32> -> vector<12x128xf32>
    %79 = arith.addf %74, %78 : vector<12x128xf32>
    %c2_54 = arith.constant 2 : index
    %c0_55 = arith.constant 0 : index
    %c0_56 = arith.constant 0 : index
    %80 = vector.load %arg7[%c2_54, %c0_55, %c0_56] : memref<12x12x25xf32, #tpu.memory_space<vmem>>, vector<1x12x25xf32>
    %81 = vector.shape_cast %80 : vector<1x12x25xf32> to vector<12x25xf32>
    %82 = vector.extract_strided_slice %70 {offsets = [0, 256], sizes = [25, 128], strides = [1, 1]} : vector<25x1536xf32> to vector<25x128xf32>
    %cst_57 = arith.constant dense<0.000000e+00> : vector<12x128xf32>
    %83 = tpu.matmul %81, %82, %cst_57 {dimension_numbers = #tpu.dot_dimension_numbers<[1], [0], [0], [1], [0, 0, 1, 1], [], []>} : vector<12x25xf32>, vector<25x128xf32>, vector<12x128xf32> -> vector<12x128xf32>
    %84 = arith.addf %79, %83 : vector<12x128xf32>
    %c3_58 = arith.constant 3 : index
    %c0_59 = arith.constant 0 : index
    %c0_60 = arith.constant 0 : index
    %85 = vector.load %arg7[%c3_58, %c0_59, %c0_60] : memref<12x12x25xf32, #tpu.memory_space<vmem>>, vector<1x12x25xf32>
    %86 = vector.shape_cast %85 : vector<1x12x25xf32> to vector<12x25xf32>
    %87 = vector.extract_strided_slice %70 {offsets = [0, 384], sizes = [25, 128], strides = [1, 1]} : vector<25x1536xf32> to vector<25x128xf32>
    %cst_61 = arith.constant dense<0.000000e+00> : vector<12x128xf32>
    %88 = tpu.matmul %86, %87, %cst_61 {dimension_numbers = #tpu.dot_dimension_numbers<[1], [0], [0], [1], [0, 0, 1, 1], [], []>} : vector<12x25xf32>, vector<25x128xf32>, vector<12x128xf32> -> vector<12x128xf32>
    %89 = arith.addf %84, %88 : vector<12x128xf32>
    %c4_62 = arith.constant 4 : index
    %c0_63 = arith.constant 0 : index
    %c0_64 = arith.constant 0 : index
    %90 = vector.load %arg7[%c4_62, %c0_63, %c0_64] : memref<12x12x25xf32, #tpu.memory_space<vmem>>, vector<1x12x25xf32>
    %91 = vector.shape_cast %90 : vector<1x12x25xf32> to vector<12x25xf32>
    %92 = vector.extract_strided_slice %70 {offsets = [0, 512], sizes = [25, 128], strides = [1, 1]} : vector<25x1536xf32> to vector<25x128xf32>
    %cst_65 = arith.constant dense<0.000000e+00> : vector<12x128xf32>
    %93 = tpu.matmul %91, %92, %cst_65 {dimension_numbers = #tpu.dot_dimension_numbers<[1], [0], [0], [1], [0, 0, 1, 1], [], []>} : vector<12x25xf32>, vector<25x128xf32>, vector<12x128xf32> -> vector<12x128xf32>
    %94 = arith.addf %89, %93 : vector<12x128xf32>
    %c5_66 = arith.constant 5 : index
    %c0_67 = arith.constant 0 : index
    %c0_68 = arith.constant 0 : index
    %95 = vector.load %arg7[%c5_66, %c0_67, %c0_68] : memref<12x12x25xf32, #tpu.memory_space<vmem>>, vector<1x12x25xf32>
    %96 = vector.shape_cast %95 : vector<1x12x25xf32> to vector<12x25xf32>
    %97 = vector.extract_strided_slice %70 {offsets = [0, 640], sizes = [25, 128], strides = [1, 1]} : vector<25x1536xf32> to vector<25x128xf32>
    %cst_69 = arith.constant dense<0.000000e+00> : vector<12x128xf32>
    %98 = tpu.matmul %96, %97, %cst_69 {dimension_numbers = #tpu.dot_dimension_numbers<[1], [0], [0], [1], [0, 0, 1, 1], [], []>} : vector<12x25xf32>, vector<25x128xf32>, vector<12x128xf32> -> vector<12x128xf32>
    %99 = arith.addf %94, %98 : vector<12x128xf32>
    %c6_70 = arith.constant 6 : index
    %c0_71 = arith.constant 0 : index
    %c0_72 = arith.constant 0 : index
    %100 = vector.load %arg7[%c6_70, %c0_71, %c0_72] : memref<12x12x25xf32, #tpu.memory_space<vmem>>, vector<1x12x25xf32>
    %101 = vector.shape_cast %100 : vector<1x12x25xf32> to vector<12x25xf32>
    %102 = vector.extract_strided_slice %70 {offsets = [0, 768], sizes = [25, 128], strides = [1, 1]} : vector<25x1536xf32> to vector<25x128xf32>
    %cst_73 = arith.constant dense<0.000000e+00> : vector<12x128xf32>
    %103 = tpu.matmul %101, %102, %cst_73 {dimension_numbers = #tpu.dot_dimension_numbers<[1], [0], [0], [1], [0, 0, 1, 1], [], []>} : vector<12x25xf32>, vector<25x128xf32>, vector<12x128xf32> -> vector<12x128xf32>
    %104 = arith.addf %99, %103 : vector<12x128xf32>
    %c7_74 = arith.constant 7 : index
    %c0_75 = arith.constant 0 : index
    %c0_76 = arith.constant 0 : index
    %105 = vector.load %arg7[%c7_74, %c0_75, %c0_76] : memref<12x12x25xf32, #tpu.memory_space<vmem>>, vector<1x12x25xf32>
    %106 = vector.shape_cast %105 : vector<1x12x25xf32> to vector<12x25xf32>
    %107 = vector.extract_strided_slice %70 {offsets = [0, 896], sizes = [25, 128], strides = [1, 1]} : vector<25x1536xf32> to vector<25x128xf32>
    %cst_77 = arith.constant dense<0.000000e+00> : vector<12x128xf32>
    %108 = tpu.matmul %106, %107, %cst_77 {dimension_numbers = #tpu.dot_dimension_numbers<[1], [0], [0], [1], [0, 0, 1, 1], [], []>} : vector<12x25xf32>, vector<25x128xf32>, vector<12x128xf32> -> vector<12x128xf32>
    %109 = arith.addf %104, %108 : vector<12x128xf32>
    %c8_78 = arith.constant 8 : index
    %c0_79 = arith.constant 0 : index
    %c0_80 = arith.constant 0 : index
    %110 = vector.load %arg7[%c8_78, %c0_79, %c0_80] : memref<12x12x25xf32, #tpu.memory_space<vmem>>, vector<1x12x25xf32>
    %111 = vector.shape_cast %110 : vector<1x12x25xf32> to vector<12x25xf32>
    %112 = vector.extract_strided_slice %70 {offsets = [0, 1024], sizes = [25, 128], strides = [1, 1]} : vector<25x1536xf32> to vector<25x128xf32>
    %cst_81 = arith.constant dense<0.000000e+00> : vector<12x128xf32>
    %113 = tpu.matmul %111, %112, %cst_81 {dimension_numbers = #tpu.dot_dimension_numbers<[1], [0], [0], [1], [0, 0, 1, 1], [], []>} : vector<12x25xf32>, vector<25x128xf32>, vector<12x128xf32> -> vector<12x128xf32>
    %114 = arith.addf %109, %113 : vector<12x128xf32>
    %c9_82 = arith.constant 9 : index
    %c0_83 = arith.constant 0 : index
    %c0_84 = arith.constant 0 : index
    %115 = vector.load %arg7[%c9_82, %c0_83, %c0_84] : memref<12x12x25xf32, #tpu.memory_space<vmem>>, vector<1x12x25xf32>
    %116 = vector.shape_cast %115 : vector<1x12x25xf32> to vector<12x25xf32>
    %117 = vector.extract_strided_slice %70 {offsets = [0, 1152], sizes = [25, 128], strides = [1, 1]} : vector<25x1536xf32> to vector<25x128xf32>
    %cst_85 = arith.constant dense<0.000000e+00> : vector<12x128xf32>
    %118 = tpu.matmul %116, %117, %cst_85 {dimension_numbers = #tpu.dot_dimension_numbers<[1], [0], [0], [1], [0, 0, 1, 1], [], []>} : vector<12x25xf32>, vector<25x128xf32>, vector<12x128xf32> -> vector<12x128xf32>
    %119 = arith.addf %114, %118 : vector<12x128xf32>
    %c10_86 = arith.constant 10 : index
    %c0_87 = arith.constant 0 : index
    %c0_88 = arith.constant 0 : index
    %120 = vector.load %arg7[%c10_86, %c0_87, %c0_88] : memref<12x12x25xf32, #tpu.memory_space<vmem>>, vector<1x12x25xf32>
    %121 = vector.shape_cast %120 : vector<1x12x25xf32> to vector<12x25xf32>
    %122 = vector.extract_strided_slice %70 {offsets = [0, 1280], sizes = [25, 128], strides = [1, 1]} : vector<25x1536xf32> to vector<25x128xf32>
    %cst_89 = arith.constant dense<0.000000e+00> : vector<12x128xf32>
    %123 = tpu.matmul %121, %122, %cst_89 {dimension_numbers = #tpu.dot_dimension_numbers<[1], [0], [0], [1], [0, 0, 1, 1], [], []>} : vector<12x25xf32>, vector<25x128xf32>, vector<12x128xf32> -> vector<12x128xf32>
    %124 = arith.addf %119, %123 : vector<12x128xf32>
    %c11_90 = arith.constant 11 : index
    %c0_91 = arith.constant 0 : index
    %c0_92 = arith.constant 0 : index
    %125 = vector.load %arg7[%c11_90, %c0_91, %c0_92] : memref<12x12x25xf32, #tpu.memory_space<vmem>>, vector<1x12x25xf32>
    %126 = vector.shape_cast %125 : vector<1x12x25xf32> to vector<12x25xf32>
    %127 = vector.extract_strided_slice %70 {offsets = [0, 1408], sizes = [25, 128], strides = [1, 1]} : vector<25x1536xf32> to vector<25x128xf32>
    %cst_93 = arith.constant dense<0.000000e+00> : vector<12x128xf32>
    %128 = tpu.matmul %126, %127, %cst_93 {dimension_numbers = #tpu.dot_dimension_numbers<[1], [0], [0], [1], [0, 0, 1, 1], [], []>} : vector<12x25xf32>, vector<25x128xf32>, vector<12x128xf32> -> vector<12x128xf32>
    %129 = arith.addf %124, %128 : vector<12x128xf32>
    %c0_94 = arith.constant 0 : index
    %c0_95 = arith.constant 0 : index
    %130 = vector.load %arg6[%c0_94, %c0_95] : memref<1x128xf32, #tpu.memory_space<vmem>>, vector<1x128xf32>
    %131 = vector.broadcast %130 : vector<1x128xf32> to vector<12x128xf32>
    %132 = arith.addf %129, %131 : vector<12x128xf32>
    %cst_96 = arith.constant 0.000000e+00 : f32
    %133 = vector.broadcast %cst_96 : f32 to vector<12x128xf32>
    %134 = arith.maximumf %132, %133 : vector<12x128xf32>
    %135 = vector.extract_strided_slice %134 {offsets = [0, 0], sizes = [12, 64], strides = [1, 1]} : vector<12x128xf32> to vector<12x64xf32>
    %c0_97 = arith.constant 0 : index
    %c0_98 = arith.constant 0 : index
    %136 = vector.load %arg8[%c0_97, %c0_98] : memref<64x1536xf32, #tpu.memory_space<vmem>>, vector<64x1536xf32>
    %cst_99 = arith.constant dense<0.000000e+00> : vector<12x1536xf32>
    %137 = tpu.matmul %135, %136, %cst_99 {dimension_numbers = #tpu.dot_dimension_numbers<[1], [0], [0], [1], [0, 0, 1, 1], [], []>} : vector<12x64xf32>, vector<64x1536xf32>, vector<12x1536xf32> -> vector<12x1536xf32>
    %c0_100 = arith.constant 0 : index
    %c0_101 = arith.constant 0 : index
    %c0_102 = arith.constant 0 : index
    %138 = vector.load %arg10[%c0_100, %c0_101, %c0_102] : memref<12x6x12xf32, #tpu.memory_space<vmem>>, vector<1x6x12xf32>
    %139 = vector.shape_cast %138 : vector<1x6x12xf32> to vector<6x12xf32>
    %140 = vector.extract_strided_slice %137 {offsets = [0, 0], sizes = [12, 128], strides = [1, 1]} : vector<12x1536xf32> to vector<12x128xf32>
    %cst_103 = arith.constant dense<0.000000e+00> : vector<6x128xf32>
    %141 = tpu.matmul %139, %140, %cst_103 {dimension_numbers = #tpu.dot_dimension_numbers<[1], [0], [0], [1], [0, 0, 1, 1], [], []>} : vector<6x12xf32>, vector<12x128xf32>, vector<6x128xf32> -> vector<6x128xf32>
    %c1_104 = arith.constant 1 : index
    %c0_105 = arith.constant 0 : index
    %c0_106 = arith.constant 0 : index
    %142 = vector.load %arg10[%c1_104, %c0_105, %c0_106] : memref<12x6x12xf32, #tpu.memory_space<vmem>>, vector<1x6x12xf32>
    %143 = vector.shape_cast %142 : vector<1x6x12xf32> to vector<6x12xf32>
    %144 = vector.extract_strided_slice %137 {offsets = [0, 128], sizes = [12, 128], strides = [1, 1]} : vector<12x1536xf32> to vector<12x128xf32>
    %cst_107 = arith.constant dense<0.000000e+00> : vector<6x128xf32>
    %145 = tpu.matmul %143, %144, %cst_107 {dimension_numbers = #tpu.dot_dimension_numbers<[1], [0], [0], [1], [0, 0, 1, 1], [], []>} : vector<6x12xf32>, vector<12x128xf32>, vector<6x128xf32> -> vector<6x128xf32>
    %146 = arith.addf %141, %145 : vector<6x128xf32>
    %c2_108 = arith.constant 2 : index
    %c0_109 = arith.constant 0 : index
    %c0_110 = arith.constant 0 : index
    %147 = vector.load %arg10[%c2_108, %c0_109, %c0_110] : memref<12x6x12xf32, #tpu.memory_space<vmem>>, vector<1x6x12xf32>
    %148 = vector.shape_cast %147 : vector<1x6x12xf32> to vector<6x12xf32>
    %149 = vector.extract_strided_slice %137 {offsets = [0, 256], sizes = [12, 128], strides = [1, 1]} : vector<12x1536xf32> to vector<12x128xf32>
    %cst_111 = arith.constant dense<0.000000e+00> : vector<6x128xf32>
    %150 = tpu.matmul %148, %149, %cst_111 {dimension_numbers = #tpu.dot_dimension_numbers<[1], [0], [0], [1], [0, 0, 1, 1], [], []>} : vector<6x12xf32>, vector<12x128xf32>, vector<6x128xf32> -> vector<6x128xf32>
    %151 = arith.addf %146, %150 : vector<6x128xf32>
    %c3_112 = arith.constant 3 : index
    %c0_113 = arith.constant 0 : index
    %c0_114 = arith.constant 0 : index
    %152 = vector.load %arg10[%c3_112, %c0_113, %c0_114] : memref<12x6x12xf32, #tpu.memory_space<vmem>>, vector<1x6x12xf32>
    %153 = vector.shape_cast %152 : vector<1x6x12xf32> to vector<6x12xf32>
    %154 = vector.extract_strided_slice %137 {offsets = [0, 384], sizes = [12, 128], strides = [1, 1]} : vector<12x1536xf32> to vector<12x128xf32>
    %cst_115 = arith.constant dense<0.000000e+00> : vector<6x128xf32>
    %155 = tpu.matmul %153, %154, %cst_115 {dimension_numbers = #tpu.dot_dimension_numbers<[1], [0], [0], [1], [0, 0, 1, 1], [], []>} : vector<6x12xf32>, vector<12x128xf32>, vector<6x128xf32> -> vector<6x128xf32>
    %156 = arith.addf %151, %155 : vector<6x128xf32>
    %c4_116 = arith.constant 4 : index
    %c0_117 = arith.constant 0 : index
    %c0_118 = arith.constant 0 : index
    %157 = vector.load %arg10[%c4_116, %c0_117, %c0_118] : memref<12x6x12xf32, #tpu.memory_space<vmem>>, vector<1x6x12xf32>
    %158 = vector.shape_cast %157 : vector<1x6x12xf32> to vector<6x12xf32>
    %159 = vector.extract_strided_slice %137 {offsets = [0, 512], sizes = [12, 128], strides = [1, 1]} : vector<12x1536xf32> to vector<12x128xf32>
    %cst_119 = arith.constant dense<0.000000e+00> : vector<6x128xf32>
    %160 = tpu.matmul %158, %159, %cst_119 {dimension_numbers = #tpu.dot_dimension_numbers<[1], [0], [0], [1], [0, 0, 1, 1], [], []>} : vector<6x12xf32>, vector<12x128xf32>, vector<6x128xf32> -> vector<6x128xf32>
    %161 = arith.addf %156, %160 : vector<6x128xf32>
    %c5_120 = arith.constant 5 : index
    %c0_121 = arith.constant 0 : index
    %c0_122 = arith.constant 0 : index
    %162 = vector.load %arg10[%c5_120, %c0_121, %c0_122] : memref<12x6x12xf32, #tpu.memory_space<vmem>>, vector<1x6x12xf32>
    %163 = vector.shape_cast %162 : vector<1x6x12xf32> to vector<6x12xf32>
    %164 = vector.extract_strided_slice %137 {offsets = [0, 640], sizes = [12, 128], strides = [1, 1]} : vector<12x1536xf32> to vector<12x128xf32>
    %cst_123 = arith.constant dense<0.000000e+00> : vector<6x128xf32>
    %165 = tpu.matmul %163, %164, %cst_123 {dimension_numbers = #tpu.dot_dimension_numbers<[1], [0], [0], [1], [0, 0, 1, 1], [], []>} : vector<6x12xf32>, vector<12x128xf32>, vector<6x128xf32> -> vector<6x128xf32>
    %166 = arith.addf %161, %165 : vector<6x128xf32>
    %c6_124 = arith.constant 6 : index
    %c0_125 = arith.constant 0 : index
    %c0_126 = arith.constant 0 : index
    %167 = vector.load %arg10[%c6_124, %c0_125, %c0_126] : memref<12x6x12xf32, #tpu.memory_space<vmem>>, vector<1x6x12xf32>
    %168 = vector.shape_cast %167 : vector<1x6x12xf32> to vector<6x12xf32>
    %169 = vector.extract_strided_slice %137 {offsets = [0, 768], sizes = [12, 128], strides = [1, 1]} : vector<12x1536xf32> to vector<12x128xf32>
    %cst_127 = arith.constant dense<0.000000e+00> : vector<6x128xf32>
    %170 = tpu.matmul %168, %169, %cst_127 {dimension_numbers = #tpu.dot_dimension_numbers<[1], [0], [0], [1], [0, 0, 1, 1], [], []>} : vector<6x12xf32>, vector<12x128xf32>, vector<6x128xf32> -> vector<6x128xf32>
    %171 = arith.addf %166, %170 : vector<6x128xf32>
    %c7_128 = arith.constant 7 : index
    %c0_129 = arith.constant 0 : index
    %c0_130 = arith.constant 0 : index
    %172 = vector.load %arg10[%c7_128, %c0_129, %c0_130] : memref<12x6x12xf32, #tpu.memory_space<vmem>>, vector<1x6x12xf32>
    %173 = vector.shape_cast %172 : vector<1x6x12xf32> to vector<6x12xf32>
    %174 = vector.extract_strided_slice %137 {offsets = [0, 896], sizes = [12, 128], strides = [1, 1]} : vector<12x1536xf32> to vector<12x128xf32>
    %cst_131 = arith.constant dense<0.000000e+00> : vector<6x128xf32>
    %175 = tpu.matmul %173, %174, %cst_131 {dimension_numbers = #tpu.dot_dimension_numbers<[1], [0], [0], [1], [0, 0, 1, 1], [], []>} : vector<6x12xf32>, vector<12x128xf32>, vector<6x128xf32> -> vector<6x128xf32>
    %176 = arith.addf %171, %175 : vector<6x128xf32>
    %c8_132 = arith.constant 8 : index
    %c0_133 = arith.constant 0 : index
    %c0_134 = arith.constant 0 : index
    %177 = vector.load %arg10[%c8_132, %c0_133, %c0_134] : memref<12x6x12xf32, #tpu.memory_space<vmem>>, vector<1x6x12xf32>
    %178 = vector.shape_cast %177 : vector<1x6x12xf32> to vector<6x12xf32>
    %179 = vector.extract_strided_slice %137 {offsets = [0, 1024], sizes = [12, 128], strides = [1, 1]} : vector<12x1536xf32> to vector<12x128xf32>
    %cst_135 = arith.constant dense<0.000000e+00> : vector<6x128xf32>
    %180 = tpu.matmul %178, %179, %cst_135 {dimension_numbers = #tpu.dot_dimension_numbers<[1], [0], [0], [1], [0, 0, 1, 1], [], []>} : vector<6x12xf32>, vector<12x128xf32>, vector<6x128xf32> -> vector<6x128xf32>
    %181 = arith.addf %176, %180 : vector<6x128xf32>
    %c9_136 = arith.constant 9 : index
    %c0_137 = arith.constant 0 : index
    %c0_138 = arith.constant 0 : index
    %182 = vector.load %arg10[%c9_136, %c0_137, %c0_138] : memref<12x6x12xf32, #tpu.memory_space<vmem>>, vector<1x6x12xf32>
    %183 = vector.shape_cast %182 : vector<1x6x12xf32> to vector<6x12xf32>
    %184 = vector.extract_strided_slice %137 {offsets = [0, 1152], sizes = [12, 128], strides = [1, 1]} : vector<12x1536xf32> to vector<12x128xf32>
    %cst_139 = arith.constant dense<0.000000e+00> : vector<6x128xf32>
    %185 = tpu.matmul %183, %184, %cst_139 {dimension_numbers = #tpu.dot_dimension_numbers<[1], [0], [0], [1], [0, 0, 1, 1], [], []>} : vector<6x12xf32>, vector<12x128xf32>, vector<6x128xf32> -> vector<6x128xf32>
    %186 = arith.addf %181, %185 : vector<6x128xf32>
    %c10_140 = arith.constant 10 : index
    %c0_141 = arith.constant 0 : index
    %c0_142 = arith.constant 0 : index
    %187 = vector.load %arg10[%c10_140, %c0_141, %c0_142] : memref<12x6x12xf32, #tpu.memory_space<vmem>>, vector<1x6x12xf32>
    %188 = vector.shape_cast %187 : vector<1x6x12xf32> to vector<6x12xf32>
    %189 = vector.extract_strided_slice %137 {offsets = [0, 1280], sizes = [12, 128], strides = [1, 1]} : vector<12x1536xf32> to vector<12x128xf32>
    %cst_143 = arith.constant dense<0.000000e+00> : vector<6x128xf32>
    %190 = tpu.matmul %188, %189, %cst_143 {dimension_numbers = #tpu.dot_dimension_numbers<[1], [0], [0], [1], [0, 0, 1, 1], [], []>} : vector<6x12xf32>, vector<12x128xf32>, vector<6x128xf32> -> vector<6x128xf32>
    %191 = arith.addf %186, %190 : vector<6x128xf32>
    %c11_144 = arith.constant 11 : index
    %c0_145 = arith.constant 0 : index
    %c0_146 = arith.constant 0 : index
    %192 = vector.load %arg10[%c11_144, %c0_145, %c0_146] : memref<12x6x12xf32, #tpu.memory_space<vmem>>, vector<1x6x12xf32>
    %193 = vector.shape_cast %192 : vector<1x6x12xf32> to vector<6x12xf32>
    %194 = vector.extract_strided_slice %137 {offsets = [0, 1408], sizes = [12, 128], strides = [1, 1]} : vector<12x1536xf32> to vector<12x128xf32>
    %cst_147 = arith.constant dense<0.000000e+00> : vector<6x128xf32>
    %195 = tpu.matmul %193, %194, %cst_147 {dimension_numbers = #tpu.dot_dimension_numbers<[1], [0], [0], [1], [0, 0, 1, 1], [], []>} : vector<6x12xf32>, vector<12x128xf32>, vector<6x128xf32> -> vector<6x128xf32>
    %196 = arith.addf %191, %195 : vector<6x128xf32>
    %c0_148 = arith.constant 0 : index
    %c0_149 = arith.constant 0 : index
    %197 = vector.load %arg9[%c0_148, %c0_149] : memref<1x128xf32, #tpu.memory_space<vmem>>, vector<1x128xf32>
    %198 = vector.broadcast %197 : vector<1x128xf32> to vector<6x128xf32>
    %199 = arith.addf %196, %198 : vector<6x128xf32>
    %200 = vector.extract_strided_slice %199 {offsets = [0, 0], sizes = [6, 64], strides = [1, 1]} : vector<6x128xf32> to vector<6x64xf32>
    %c0_150 = arith.constant 0 : index
    %c0_151 = arith.constant 0 : index
    %201 = vector.load %arg11[%c0_150, %c0_151] : memref<64x3072xf32, #tpu.memory_space<vmem>>, vector<64x3072xf32>
    %cst_152 = arith.constant dense<0.000000e+00> : vector<6x3072xf32>
    %202 = tpu.matmul %200, %201, %cst_152 {dimension_numbers = #tpu.dot_dimension_numbers<[1], [0], [0], [1], [0, 0, 1, 1], [], []>} : vector<6x64xf32>, vector<64x3072xf32>, vector<6x3072xf32> -> vector<6x3072xf32>
    %c0_153 = arith.constant 0 : index
    %c0_154 = arith.constant 0 : index
    %c0_155 = arith.constant 0 : index
    %203 = vector.load %arg13[%c0_153, %c0_154, %c0_155] : memref<6x1x6xf32, #tpu.memory_space<vmem>>, vector<1x1x6xf32>
    %204 = vector.shape_cast %203 : vector<1x1x6xf32> to vector<1x6xf32>
    %205 = vector.extract_strided_slice %202 {offsets = [0, 0], sizes = [6, 512], strides = [1, 1]} : vector<6x3072xf32> to vector<6x512xf32>
    %cst_156 = arith.constant dense<0.000000e+00> : vector<1x512xf32>
    %206 = tpu.matmul %204, %205, %cst_156 {dimension_numbers = #tpu.dot_dimension_numbers<[1], [0], [0], [1], [0, 0, 1, 1], [], []>} : vector<1x6xf32>, vector<6x512xf32>, vector<1x512xf32> -> vector<1x512xf32>
    %c1_157 = arith.constant 1 : index
    %c0_158 = arith.constant 0 : index
    %c0_159 = arith.constant 0 : index
    %207 = vector.load %arg13[%c1_157, %c0_158, %c0_159] : memref<6x1x6xf32, #tpu.memory_space<vmem>>, vector<1x1x6xf32>
    %208 = vector.shape_cast %207 : vector<1x1x6xf32> to vector<1x6xf32>
    %209 = vector.extract_strided_slice %202 {offsets = [0, 512], sizes = [6, 512], strides = [1, 1]} : vector<6x3072xf32> to vector<6x512xf32>
    %cst_160 = arith.constant dense<0.000000e+00> : vector<1x512xf32>
    %210 = tpu.matmul %208, %209, %cst_160 {dimension_numbers = #tpu.dot_dimension_numbers<[1], [0], [0], [1], [0, 0, 1, 1], [], []>} : vector<1x6xf32>, vector<6x512xf32>, vector<1x512xf32> -> vector<1x512xf32>
    %211 = arith.addf %206, %210 : vector<1x512xf32>
    %c2_161 = arith.constant 2 : index
    %c0_162 = arith.constant 0 : index
    %c0_163 = arith.constant 0 : index
    %212 = vector.load %arg13[%c2_161, %c0_162, %c0_163] : memref<6x1x6xf32, #tpu.memory_space<vmem>>, vector<1x1x6xf32>
    %213 = vector.shape_cast %212 : vector<1x1x6xf32> to vector<1x6xf32>
    %214 = vector.extract_strided_slice %202 {offsets = [0, 1024], sizes = [6, 512], strides = [1, 1]} : vector<6x3072xf32> to vector<6x512xf32>
    %cst_164 = arith.constant dense<0.000000e+00> : vector<1x512xf32>
    %215 = tpu.matmul %213, %214, %cst_164 {dimension_numbers = #tpu.dot_dimension_numbers<[1], [0], [0], [1], [0, 0, 1, 1], [], []>} : vector<1x6xf32>, vector<6x512xf32>, vector<1x512xf32> -> vector<1x512xf32>
    %216 = arith.addf %211, %215 : vector<1x512xf32>
    %c3_165 = arith.constant 3 : index
    %c0_166 = arith.constant 0 : index
    %c0_167 = arith.constant 0 : index
    %217 = vector.load %arg13[%c3_165, %c0_166, %c0_167] : memref<6x1x6xf32, #tpu.memory_space<vmem>>, vector<1x1x6xf32>
    %218 = vector.shape_cast %217 : vector<1x1x6xf32> to vector<1x6xf32>
    %219 = vector.extract_strided_slice %202 {offsets = [0, 1536], sizes = [6, 512], strides = [1, 1]} : vector<6x3072xf32> to vector<6x512xf32>
    %cst_168 = arith.constant dense<0.000000e+00> : vector<1x512xf32>
    %220 = tpu.matmul %218, %219, %cst_168 {dimension_numbers = #tpu.dot_dimension_numbers<[1], [0], [0], [1], [0, 0, 1, 1], [], []>} : vector<1x6xf32>, vector<6x512xf32>, vector<1x512xf32> -> vector<1x512xf32>
    %221 = arith.addf %216, %220 : vector<1x512xf32>
    %c4_169 = arith.constant 4 : index
    %c0_170 = arith.constant 0 : index
    %c0_171 = arith.constant 0 : index
    %222 = vector.load %arg13[%c4_169, %c0_170, %c0_171] : memref<6x1x6xf32, #tpu.memory_space<vmem>>, vector<1x1x6xf32>
    %223 = vector.shape_cast %222 : vector<1x1x6xf32> to vector<1x6xf32>
    %224 = vector.extract_strided_slice %202 {offsets = [0, 2048], sizes = [6, 512], strides = [1, 1]} : vector<6x3072xf32> to vector<6x512xf32>
    %cst_172 = arith.constant dense<0.000000e+00> : vector<1x512xf32>
    %225 = tpu.matmul %223, %224, %cst_172 {dimension_numbers = #tpu.dot_dimension_numbers<[1], [0], [0], [1], [0, 0, 1, 1], [], []>} : vector<1x6xf32>, vector<6x512xf32>, vector<1x512xf32> -> vector<1x512xf32>
    %226 = arith.addf %221, %225 : vector<1x512xf32>
    %c5_173 = arith.constant 5 : index
    %c0_174 = arith.constant 0 : index
    %c0_175 = arith.constant 0 : index
    %227 = vector.load %arg13[%c5_173, %c0_174, %c0_175] : memref<6x1x6xf32, #tpu.memory_space<vmem>>, vector<1x1x6xf32>
    %228 = vector.shape_cast %227 : vector<1x1x6xf32> to vector<1x6xf32>
    %229 = vector.extract_strided_slice %202 {offsets = [0, 2560], sizes = [6, 512], strides = [1, 1]} : vector<6x3072xf32> to vector<6x512xf32>
    %cst_176 = arith.constant dense<0.000000e+00> : vector<1x512xf32>
    %230 = tpu.matmul %228, %229, %cst_176 {dimension_numbers = #tpu.dot_dimension_numbers<[1], [0], [0], [1], [0, 0, 1, 1], [], []>} : vector<1x6xf32>, vector<6x512xf32>, vector<1x512xf32> -> vector<1x512xf32>
    %231 = arith.addf %226, %230 : vector<1x512xf32>
    %c0_177 = arith.constant 0 : index
    %c0_178 = arith.constant 0 : index
    %232 = vector.load %arg12[%c0_177, %c0_178] : memref<1x512xf32, #tpu.memory_space<vmem>>, vector<1x512xf32>
    %233 = arith.addf %231, %232 : vector<1x512xf32>
    %c0_179 = arith.constant 0 : index
    %c0_180 = arith.constant 0 : index
    %234 = vector.load %arg14[%c0_179, %c0_180] : memref<512x128xf32, #tpu.memory_space<vmem>>, vector<512x128xf32>
    %cst_181 = arith.constant dense<0.000000e+00> : vector<1x128xf32>
    %235 = tpu.matmul %233, %234, %cst_181 {dimension_numbers = #tpu.dot_dimension_numbers<[1], [0], [0], [1], [0, 0, 1, 1], [], []>} : vector<1x512xf32>, vector<512x128xf32>, vector<1x128xf32> -> vector<1x128xf32>
    %c0_182 = arith.constant 0 : index
    %c0_183 = arith.constant 0 : index
    %236 = vector.load %arg15[%c0_182, %c0_183] : memref<1x128xf32, #tpu.memory_space<vmem>>, vector<1x128xf32>
    %237 = arith.addf %235, %236 : vector<1x128xf32>
    %238 = vector.extract_strided_slice %237 {offsets = [0, 0], sizes = [1, 32], strides = [1, 1]} : vector<1x128xf32> to vector<1x32xf32>
    %c0_184 = arith.constant 0 : index
    %c0_185 = arith.constant 0 : index
    %239 = vector.load %arg16[%c0_184, %c0_185] : memref<32x512xf32, #tpu.memory_space<vmem>>, vector<32x512xf32>
    %cst_186 = arith.constant dense<0.000000e+00> : vector<1x512xf32>
    %240 = tpu.matmul %238, %239, %cst_186 {dimension_numbers = #tpu.dot_dimension_numbers<[1], [0], [0], [1], [0, 0, 1, 1], [], []>} : vector<1x32xf32>, vector<32x512xf32>, vector<1x512xf32> -> vector<1x512xf32>
    %c0_187 = arith.constant 0 : index
    %c0_188 = arith.constant 0 : index
    %241 = vector.load %arg17[%c0_187, %c0_188] : memref<1x512xf32, #tpu.memory_space<vmem>>, vector<1x512xf32>
    %242 = arith.addf %240, %241 : vector<1x512xf32>
    %c0_189 = arith.constant 0 : index
    %c0_190 = arith.constant 0 : index
    %243 = vector.load %arg18[%c0_189, %c0_190] : memref<512x768xf32, #tpu.memory_space<vmem>>, vector<512x768xf32>
    %cst_191 = arith.constant dense<0.000000e+00> : vector<1x768xf32>
    %244 = tpu.matmul %242, %243, %cst_191 {dimension_numbers = #tpu.dot_dimension_numbers<[1], [0], [0], [1], [0, 0, 1, 1], [], []>} : vector<1x512xf32>, vector<512x768xf32>, vector<1x768xf32> -> vector<1x768xf32>
    %c0_192 = arith.constant 0 : index
    %c0_193 = arith.constant 0 : index
    %c0_194 = arith.constant 0 : index
    %245 = vector.load %arg20[%c0_192, %c0_193, %c0_194] : memref<6x6x1xf32, #tpu.memory_space<vmem>>, vector<1x6x1xf32>
    %246 = vector.shape_cast %245 : vector<1x6x1xf32> to vector<6x1xf32>
    %247 = vector.extract_strided_slice %244 {offsets = [0, 0], sizes = [1, 128], strides = [1, 1]} : vector<1x768xf32> to vector<1x128xf32>
    %cst_195 = arith.constant dense<0.000000e+00> : vector<6x128xf32>
    %248 = tpu.matmul %246, %247, %cst_195 {dimension_numbers = #tpu.dot_dimension_numbers<[1], [0], [0], [1], [0, 0, 1, 1], [], []>} : vector<6x1xf32>, vector<1x128xf32>, vector<6x128xf32> -> vector<6x128xf32>
    %c1_196 = arith.constant 1 : index
    %c0_197 = arith.constant 0 : index
    %c0_198 = arith.constant 0 : index
    %249 = vector.load %arg20[%c1_196, %c0_197, %c0_198] : memref<6x6x1xf32, #tpu.memory_space<vmem>>, vector<1x6x1xf32>
    %250 = vector.shape_cast %249 : vector<1x6x1xf32> to vector<6x1xf32>
    %251 = vector.extract_strided_slice %244 {offsets = [0, 128], sizes = [1, 128], strides = [1, 1]} : vector<1x768xf32> to vector<1x128xf32>
    %cst_199 = arith.constant dense<0.000000e+00> : vector<6x128xf32>
    %252 = tpu.matmul %250, %251, %cst_199 {dimension_numbers = #tpu.dot_dimension_numbers<[1], [0], [0], [1], [0, 0, 1, 1], [], []>} : vector<6x1xf32>, vector<1x128xf32>, vector<6x128xf32> -> vector<6x128xf32>
    %253 = arith.addf %248, %252 : vector<6x128xf32>
    %c2_200 = arith.constant 2 : index
    %c0_201 = arith.constant 0 : index
    %c0_202 = arith.constant 0 : index
    %254 = vector.load %arg20[%c2_200, %c0_201, %c0_202] : memref<6x6x1xf32, #tpu.memory_space<vmem>>, vector<1x6x1xf32>
    %255 = vector.shape_cast %254 : vector<1x6x1xf32> to vector<6x1xf32>
    %256 = vector.extract_strided_slice %244 {offsets = [0, 256], sizes = [1, 128], strides = [1, 1]} : vector<1x768xf32> to vector<1x128xf32>
    %cst_203 = arith.constant dense<0.000000e+00> : vector<6x128xf32>
    %257 = tpu.matmul %255, %256, %cst_203 {dimension_numbers = #tpu.dot_dimension_numbers<[1], [0], [0], [1], [0, 0, 1, 1], [], []>} : vector<6x1xf32>, vector<1x128xf32>, vector<6x128xf32> -> vector<6x128xf32>
    %258 = arith.addf %253, %257 : vector<6x128xf32>
    %c3_204 = arith.constant 3 : index
    %c0_205 = arith.constant 0 : index
    %c0_206 = arith.constant 0 : index
    %259 = vector.load %arg20[%c3_204, %c0_205, %c0_206] : memref<6x6x1xf32, #tpu.memory_space<vmem>>, vector<1x6x1xf32>
    %260 = vector.shape_cast %259 : vector<1x6x1xf32> to vector<6x1xf32>
    %261 = vector.extract_strided_slice %244 {offsets = [0, 384], sizes = [1, 128], strides = [1, 1]} : vector<1x768xf32> to vector<1x128xf32>
    %cst_207 = arith.constant dense<0.000000e+00> : vector<6x128xf32>
    %262 = tpu.matmul %260, %261, %cst_207 {dimension_numbers = #tpu.dot_dimension_numbers<[1], [0], [0], [1], [0, 0, 1, 1], [], []>} : vector<6x1xf32>, vector<1x128xf32>, vector<6x128xf32> -> vector<6x128xf32>
    %263 = arith.addf %258, %262 : vector<6x128xf32>
    %c4_208 = arith.constant 4 : index
    %c0_209 = arith.constant 0 : index
    %c0_210 = arith.constant 0 : index
    %264 = vector.load %arg20[%c4_208, %c0_209, %c0_210] : memref<6x6x1xf32, #tpu.memory_space<vmem>>, vector<1x6x1xf32>
    %265 = vector.shape_cast %264 : vector<1x6x1xf32> to vector<6x1xf32>
    %266 = vector.extract_strided_slice %244 {offsets = [0, 512], sizes = [1, 128], strides = [1, 1]} : vector<1x768xf32> to vector<1x128xf32>
    %cst_211 = arith.constant dense<0.000000e+00> : vector<6x128xf32>
    %267 = tpu.matmul %265, %266, %cst_211 {dimension_numbers = #tpu.dot_dimension_numbers<[1], [0], [0], [1], [0, 0, 1, 1], [], []>} : vector<6x1xf32>, vector<1x128xf32>, vector<6x128xf32> -> vector<6x128xf32>
    %268 = arith.addf %263, %267 : vector<6x128xf32>
    %c5_212 = arith.constant 5 : index
    %c0_213 = arith.constant 0 : index
    %c0_214 = arith.constant 0 : index
    %269 = vector.load %arg20[%c5_212, %c0_213, %c0_214] : memref<6x6x1xf32, #tpu.memory_space<vmem>>, vector<1x6x1xf32>
    %270 = vector.shape_cast %269 : vector<1x6x1xf32> to vector<6x1xf32>
    %271 = vector.extract_strided_slice %244 {offsets = [0, 640], sizes = [1, 128], strides = [1, 1]} : vector<1x768xf32> to vector<1x128xf32>
    %cst_215 = arith.constant dense<0.000000e+00> : vector<6x128xf32>
    %272 = tpu.matmul %270, %271, %cst_215 {dimension_numbers = #tpu.dot_dimension_numbers<[1], [0], [0], [1], [0, 0, 1, 1], [], []>} : vector<6x1xf32>, vector<1x128xf32>, vector<6x128xf32> -> vector<6x128xf32>
    %273 = arith.addf %268, %272 : vector<6x128xf32>
    %c0_216 = arith.constant 0 : index
    %c0_217 = arith.constant 0 : index
    %274 = vector.load %arg19[%c0_216, %c0_217] : memref<6x128xf32, #tpu.memory_space<vmem>>, vector<6x128xf32>
    %275 = arith.addf %273, %274 : vector<6x128xf32>
    %276 = vector.extract_strided_slice %275 {offsets = [0, 0], sizes = [6, 64], strides = [1, 1]} : vector<6x128xf32> to vector<6x64xf32>
    %c0_218 = arith.constant 0 : index
    %c0_219 = arith.constant 0 : index
    %277 = vector.load %arg21[%c0_218, %c0_219] : memref<64x1536xf32, #tpu.memory_space<vmem>>, vector<64x1536xf32>
    %cst_220 = arith.constant dense<0.000000e+00> : vector<6x1536xf32>
    %278 = tpu.matmul %276, %277, %cst_220 {dimension_numbers = #tpu.dot_dimension_numbers<[1], [0], [0], [1], [0, 0, 1, 1], [], []>} : vector<6x64xf32>, vector<64x1536xf32>, vector<6x1536xf32> -> vector<6x1536xf32>
    %c0_221 = arith.constant 0 : index
    %c0_222 = arith.constant 0 : index
    %c0_223 = arith.constant 0 : index
    %279 = vector.load %arg23[%c0_221, %c0_222, %c0_223] : memref<12x13x6xf32, #tpu.memory_space<vmem>>, vector<1x13x6xf32>
    %280 = vector.shape_cast %279 : vector<1x13x6xf32> to vector<13x6xf32>
    %281 = vector.extract_strided_slice %278 {offsets = [0, 0], sizes = [6, 128], strides = [1, 1]} : vector<6x1536xf32> to vector<6x128xf32>
    %cst_224 = arith.constant dense<0.000000e+00> : vector<13x128xf32>
    %282 = tpu.matmul %280, %281, %cst_224 {dimension_numbers = #tpu.dot_dimension_numbers<[1], [0], [0], [1], [0, 0, 1, 1], [], []>} : vector<13x6xf32>, vector<6x128xf32>, vector<13x128xf32> -> vector<13x128xf32>
    %c1_225 = arith.constant 1 : index
    %c0_226 = arith.constant 0 : index
    %c0_227 = arith.constant 0 : index
    %283 = vector.load %arg23[%c1_225, %c0_226, %c0_227] : memref<12x13x6xf32, #tpu.memory_space<vmem>>, vector<1x13x6xf32>
    %284 = vector.shape_cast %283 : vector<1x13x6xf32> to vector<13x6xf32>
    %285 = vector.extract_strided_slice %278 {offsets = [0, 128], sizes = [6, 128], strides = [1, 1]} : vector<6x1536xf32> to vector<6x128xf32>
    %cst_228 = arith.constant dense<0.000000e+00> : vector<13x128xf32>
    %286 = tpu.matmul %284, %285, %cst_228 {dimension_numbers = #tpu.dot_dimension_numbers<[1], [0], [0], [1], [0, 0, 1, 1], [], []>} : vector<13x6xf32>, vector<6x128xf32>, vector<13x128xf32> -> vector<13x128xf32>
    %287 = arith.addf %282, %286 : vector<13x128xf32>
    %c2_229 = arith.constant 2 : index
    %c0_230 = arith.constant 0 : index
    %c0_231 = arith.constant 0 : index
    %288 = vector.load %arg23[%c2_229, %c0_230, %c0_231] : memref<12x13x6xf32, #tpu.memory_space<vmem>>, vector<1x13x6xf32>
    %289 = vector.shape_cast %288 : vector<1x13x6xf32> to vector<13x6xf32>
    %290 = vector.extract_strided_slice %278 {offsets = [0, 256], sizes = [6, 128], strides = [1, 1]} : vector<6x1536xf32> to vector<6x128xf32>
    %cst_232 = arith.constant dense<0.000000e+00> : vector<13x128xf32>
    %291 = tpu.matmul %289, %290, %cst_232 {dimension_numbers = #tpu.dot_dimension_numbers<[1], [0], [0], [1], [0, 0, 1, 1], [], []>} : vector<13x6xf32>, vector<6x128xf32>, vector<13x128xf32> -> vector<13x128xf32>
    %292 = arith.addf %287, %291 : vector<13x128xf32>
    %c3_233 = arith.constant 3 : index
    %c0_234 = arith.constant 0 : index
    %c0_235 = arith.constant 0 : index
    %293 = vector.load %arg23[%c3_233, %c0_234, %c0_235] : memref<12x13x6xf32, #tpu.memory_space<vmem>>, vector<1x13x6xf32>
    %294 = vector.shape_cast %293 : vector<1x13x6xf32> to vector<13x6xf32>
    %295 = vector.extract_strided_slice %278 {offsets = [0, 384], sizes = [6, 128], strides = [1, 1]} : vector<6x1536xf32> to vector<6x128xf32>
    %cst_236 = arith.constant dense<0.000000e+00> : vector<13x128xf32>
    %296 = tpu.matmul %294, %295, %cst_236 {dimension_numbers = #tpu.dot_dimension_numbers<[1], [0], [0], [1], [0, 0, 1, 1], [], []>} : vector<13x6xf32>, vector<6x128xf32>, vector<13x128xf32> -> vector<13x128xf32>
    %297 = arith.addf %292, %296 : vector<13x128xf32>
    %c4_237 = arith.constant 4 : index
    %c0_238 = arith.constant 0 : index
    %c0_239 = arith.constant 0 : index
    %298 = vector.load %arg23[%c4_237, %c0_238, %c0_239] : memref<12x13x6xf32, #tpu.memory_space<vmem>>, vector<1x13x6xf32>
    %299 = vector.shape_cast %298 : vector<1x13x6xf32> to vector<13x6xf32>
    %300 = vector.extract_strided_slice %278 {offsets = [0, 512], sizes = [6, 128], strides = [1, 1]} : vector<6x1536xf32> to vector<6x128xf32>
    %cst_240 = arith.constant dense<0.000000e+00> : vector<13x128xf32>
    %301 = tpu.matmul %299, %300, %cst_240 {dimension_numbers = #tpu.dot_dimension_numbers<[1], [0], [0], [1], [0, 0, 1, 1], [], []>} : vector<13x6xf32>, vector<6x128xf32>, vector<13x128xf32> -> vector<13x128xf32>
    %302 = arith.addf %297, %301 : vector<13x128xf32>
    %c5_241 = arith.constant 5 : index
    %c0_242 = arith.constant 0 : index
    %c0_243 = arith.constant 0 : index
    %303 = vector.load %arg23[%c5_241, %c0_242, %c0_243] : memref<12x13x6xf32, #tpu.memory_space<vmem>>, vector<1x13x6xf32>
    %304 = vector.shape_cast %303 : vector<1x13x6xf32> to vector<13x6xf32>
    %305 = vector.extract_strided_slice %278 {offsets = [0, 640], sizes = [6, 128], strides = [1, 1]} : vector<6x1536xf32> to vector<6x128xf32>
    %cst_244 = arith.constant dense<0.000000e+00> : vector<13x128xf32>
    %306 = tpu.matmul %304, %305, %cst_244 {dimension_numbers = #tpu.dot_dimension_numbers<[1], [0], [0], [1], [0, 0, 1, 1], [], []>} : vector<13x6xf32>, vector<6x128xf32>, vector<13x128xf32> -> vector<13x128xf32>
    %307 = arith.addf %302, %306 : vector<13x128xf32>
    %c6_245 = arith.constant 6 : index
    %c0_246 = arith.constant 0 : index
    %c0_247 = arith.constant 0 : index
    %308 = vector.load %arg23[%c6_245, %c0_246, %c0_247] : memref<12x13x6xf32, #tpu.memory_space<vmem>>, vector<1x13x6xf32>
    %309 = vector.shape_cast %308 : vector<1x13x6xf32> to vector<13x6xf32>
    %310 = vector.extract_strided_slice %278 {offsets = [0, 768], sizes = [6, 128], strides = [1, 1]} : vector<6x1536xf32> to vector<6x128xf32>
    %cst_248 = arith.constant dense<0.000000e+00> : vector<13x128xf32>
    %311 = tpu.matmul %309, %310, %cst_248 {dimension_numbers = #tpu.dot_dimension_numbers<[1], [0], [0], [1], [0, 0, 1, 1], [], []>} : vector<13x6xf32>, vector<6x128xf32>, vector<13x128xf32> -> vector<13x128xf32>
    %312 = arith.addf %307, %311 : vector<13x128xf32>
    %c7_249 = arith.constant 7 : index
    %c0_250 = arith.constant 0 : index
    %c0_251 = arith.constant 0 : index
    %313 = vector.load %arg23[%c7_249, %c0_250, %c0_251] : memref<12x13x6xf32, #tpu.memory_space<vmem>>, vector<1x13x6xf32>
    %314 = vector.shape_cast %313 : vector<1x13x6xf32> to vector<13x6xf32>
    %315 = vector.extract_strided_slice %278 {offsets = [0, 896], sizes = [6, 128], strides = [1, 1]} : vector<6x1536xf32> to vector<6x128xf32>
    %cst_252 = arith.constant dense<0.000000e+00> : vector<13x128xf32>
    %316 = tpu.matmul %314, %315, %cst_252 {dimension_numbers = #tpu.dot_dimension_numbers<[1], [0], [0], [1], [0, 0, 1, 1], [], []>} : vector<13x6xf32>, vector<6x128xf32>, vector<13x128xf32> -> vector<13x128xf32>
    %317 = arith.addf %312, %316 : vector<13x128xf32>
    %c8_253 = arith.constant 8 : index
    %c0_254 = arith.constant 0 : index
    %c0_255 = arith.constant 0 : index
    %318 = vector.load %arg23[%c8_253, %c0_254, %c0_255] : memref<12x13x6xf32, #tpu.memory_space<vmem>>, vector<1x13x6xf32>
    %319 = vector.shape_cast %318 : vector<1x13x6xf32> to vector<13x6xf32>
    %320 = vector.extract_strided_slice %278 {offsets = [0, 1024], sizes = [6, 128], strides = [1, 1]} : vector<6x1536xf32> to vector<6x128xf32>
    %cst_256 = arith.constant dense<0.000000e+00> : vector<13x128xf32>
    %321 = tpu.matmul %319, %320, %cst_256 {dimension_numbers = #tpu.dot_dimension_numbers<[1], [0], [0], [1], [0, 0, 1, 1], [], []>} : vector<13x6xf32>, vector<6x128xf32>, vector<13x128xf32> -> vector<13x128xf32>
    %322 = arith.addf %317, %321 : vector<13x128xf32>
    %c9_257 = arith.constant 9 : index
    %c0_258 = arith.constant 0 : index
    %c0_259 = arith.constant 0 : index
    %323 = vector.load %arg23[%c9_257, %c0_258, %c0_259] : memref<12x13x6xf32, #tpu.memory_space<vmem>>, vector<1x13x6xf32>
    %324 = vector.shape_cast %323 : vector<1x13x6xf32> to vector<13x6xf32>
    %325 = vector.extract_strided_slice %278 {offsets = [0, 1152], sizes = [6, 128], strides = [1, 1]} : vector<6x1536xf32> to vector<6x128xf32>
    %cst_260 = arith.constant dense<0.000000e+00> : vector<13x128xf32>
    %326 = tpu.matmul %324, %325, %cst_260 {dimension_numbers = #tpu.dot_dimension_numbers<[1], [0], [0], [1], [0, 0, 1, 1], [], []>} : vector<13x6xf32>, vector<6x128xf32>, vector<13x128xf32> -> vector<13x128xf32>
    %327 = arith.addf %322, %326 : vector<13x128xf32>
    %c10_261 = arith.constant 10 : index
    %c0_262 = arith.constant 0 : index
    %c0_263 = arith.constant 0 : index
    %328 = vector.load %arg23[%c10_261, %c0_262, %c0_263] : memref<12x13x6xf32, #tpu.memory_space<vmem>>, vector<1x13x6xf32>
    %329 = vector.shape_cast %328 : vector<1x13x6xf32> to vector<13x6xf32>
    %330 = vector.extract_strided_slice %278 {offsets = [0, 1280], sizes = [6, 128], strides = [1, 1]} : vector<6x1536xf32> to vector<6x128xf32>
    %cst_264 = arith.constant dense<0.000000e+00> : vector<13x128xf32>
    %331 = tpu.matmul %329, %330, %cst_264 {dimension_numbers = #tpu.dot_dimension_numbers<[1], [0], [0], [1], [0, 0, 1, 1], [], []>} : vector<13x6xf32>, vector<6x128xf32>, vector<13x128xf32> -> vector<13x128xf32>
    %332 = arith.addf %327, %331 : vector<13x128xf32>
    %c11_265 = arith.constant 11 : index
    %c0_266 = arith.constant 0 : index
    %c0_267 = arith.constant 0 : index
    %333 = vector.load %arg23[%c11_265, %c0_266, %c0_267] : memref<12x13x6xf32, #tpu.memory_space<vmem>>, vector<1x13x6xf32>
    %334 = vector.shape_cast %333 : vector<1x13x6xf32> to vector<13x6xf32>
    %335 = vector.extract_strided_slice %278 {offsets = [0, 1408], sizes = [6, 128], strides = [1, 1]} : vector<6x1536xf32> to vector<6x128xf32>
    %cst_268 = arith.constant dense<0.000000e+00> : vector<13x128xf32>
    %336 = tpu.matmul %334, %335, %cst_268 {dimension_numbers = #tpu.dot_dimension_numbers<[1], [0], [0], [1], [0, 0, 1, 1], [], []>} : vector<13x6xf32>, vector<6x128xf32>, vector<13x128xf32> -> vector<13x128xf32>
    %337 = arith.addf %332, %336 : vector<13x128xf32>
    %c0_269 = arith.constant 0 : index
    %c0_270 = arith.constant 0 : index
    %338 = vector.load %arg22[%c0_269, %c0_270] : memref<1x128xf32, #tpu.memory_space<vmem>>, vector<1x128xf32>
    %339 = vector.broadcast %338 : vector<1x128xf32> to vector<13x128xf32>
    %340 = arith.addf %337, %339 : vector<13x128xf32>
    %341 = vector.extract_strided_slice %340 {offsets = [0, 0], sizes = [13, 64], strides = [1, 1]} : vector<13x128xf32> to vector<13x64xf32>
    %c0_271 = arith.constant 0 : index
    %c0_272 = arith.constant 0 : index
    %342 = vector.load %arg24[%c0_271, %c0_272] : memref<64x1536xf32, #tpu.memory_space<vmem>>, vector<64x1536xf32>
    %cst_273 = arith.constant dense<0.000000e+00> : vector<13x1536xf32>
    %343 = tpu.matmul %341, %342, %cst_273 {dimension_numbers = #tpu.dot_dimension_numbers<[1], [0], [0], [1], [0, 0, 1, 1], [], []>} : vector<13x64xf32>, vector<64x1536xf32>, vector<13x1536xf32> -> vector<13x1536xf32>
    %c0_274 = arith.constant 0 : index
    %c0_275 = arith.constant 0 : index
    %c0_276 = arith.constant 0 : index
    %344 = vector.load %arg26[%c0_274, %c0_275, %c0_276] : memref<12x27x13xf32, #tpu.memory_space<vmem>>, vector<1x27x13xf32>
    %345 = vector.shape_cast %344 : vector<1x27x13xf32> to vector<27x13xf32>
    %346 = vector.extract_strided_slice %343 {offsets = [0, 0], sizes = [13, 128], strides = [1, 1]} : vector<13x1536xf32> to vector<13x128xf32>
    %cst_277 = arith.constant dense<0.000000e+00> : vector<27x128xf32>
    %347 = tpu.matmul %345, %346, %cst_277 {dimension_numbers = #tpu.dot_dimension_numbers<[1], [0], [0], [1], [0, 0, 1, 1], [], []>} : vector<27x13xf32>, vector<13x128xf32>, vector<27x128xf32> -> vector<27x128xf32>
    %c1_278 = arith.constant 1 : index
    %c0_279 = arith.constant 0 : index
    %c0_280 = arith.constant 0 : index
    %348 = vector.load %arg26[%c1_278, %c0_279, %c0_280] : memref<12x27x13xf32, #tpu.memory_space<vmem>>, vector<1x27x13xf32>
    %349 = vector.shape_cast %348 : vector<1x27x13xf32> to vector<27x13xf32>
    %350 = vector.extract_strided_slice %343 {offsets = [0, 128], sizes = [13, 128], strides = [1, 1]} : vector<13x1536xf32> to vector<13x128xf32>
    %cst_281 = arith.constant dense<0.000000e+00> : vector<27x128xf32>
    %351 = tpu.matmul %349, %350, %cst_281 {dimension_numbers = #tpu.dot_dimension_numbers<[1], [0], [0], [1], [0, 0, 1, 1], [], []>} : vector<27x13xf32>, vector<13x128xf32>, vector<27x128xf32> -> vector<27x128xf32>
    %352 = arith.addf %347, %351 : vector<27x128xf32>
    %c2_282 = arith.constant 2 : index
    %c0_283 = arith.constant 0 : index
    %c0_284 = arith.constant 0 : index
    %353 = vector.load %arg26[%c2_282, %c0_283, %c0_284] : memref<12x27x13xf32, #tpu.memory_space<vmem>>, vector<1x27x13xf32>
    %354 = vector.shape_cast %353 : vector<1x27x13xf32> to vector<27x13xf32>
    %355 = vector.extract_strided_slice %343 {offsets = [0, 256], sizes = [13, 128], strides = [1, 1]} : vector<13x1536xf32> to vector<13x128xf32>
    %cst_285 = arith.constant dense<0.000000e+00> : vector<27x128xf32>
    %356 = tpu.matmul %354, %355, %cst_285 {dimension_numbers = #tpu.dot_dimension_numbers<[1], [0], [0], [1], [0, 0, 1, 1], [], []>} : vector<27x13xf32>, vector<13x128xf32>, vector<27x128xf32> -> vector<27x128xf32>
    %357 = arith.addf %352, %356 : vector<27x128xf32>
    %c3_286 = arith.constant 3 : index
    %c0_287 = arith.constant 0 : index
    %c0_288 = arith.constant 0 : index
    %358 = vector.load %arg26[%c3_286, %c0_287, %c0_288] : memref<12x27x13xf32, #tpu.memory_space<vmem>>, vector<1x27x13xf32>
    %359 = vector.shape_cast %358 : vector<1x27x13xf32> to vector<27x13xf32>
    %360 = vector.extract_strided_slice %343 {offsets = [0, 384], sizes = [13, 128], strides = [1, 1]} : vector<13x1536xf32> to vector<13x128xf32>
    %cst_289 = arith.constant dense<0.000000e+00> : vector<27x128xf32>
    %361 = tpu.matmul %359, %360, %cst_289 {dimension_numbers = #tpu.dot_dimension_numbers<[1], [0], [0], [1], [0, 0, 1, 1], [], []>} : vector<27x13xf32>, vector<13x128xf32>, vector<27x128xf32> -> vector<27x128xf32>
    %362 = arith.addf %357, %361 : vector<27x128xf32>
    %c4_290 = arith.constant 4 : index
    %c0_291 = arith.constant 0 : index
    %c0_292 = arith.constant 0 : index
    %363 = vector.load %arg26[%c4_290, %c0_291, %c0_292] : memref<12x27x13xf32, #tpu.memory_space<vmem>>, vector<1x27x13xf32>
    %364 = vector.shape_cast %363 : vector<1x27x13xf32> to vector<27x13xf32>
    %365 = vector.extract_strided_slice %343 {offsets = [0, 512], sizes = [13, 128], strides = [1, 1]} : vector<13x1536xf32> to vector<13x128xf32>
    %cst_293 = arith.constant dense<0.000000e+00> : vector<27x128xf32>
    %366 = tpu.matmul %364, %365, %cst_293 {dimension_numbers = #tpu.dot_dimension_numbers<[1], [0], [0], [1], [0, 0, 1, 1], [], []>} : vector<27x13xf32>, vector<13x128xf32>, vector<27x128xf32> -> vector<27x128xf32>
    %367 = arith.addf %362, %366 : vector<27x128xf32>
    %c5_294 = arith.constant 5 : index
    %c0_295 = arith.constant 0 : index
    %c0_296 = arith.constant 0 : index
    %368 = vector.load %arg26[%c5_294, %c0_295, %c0_296] : memref<12x27x13xf32, #tpu.memory_space<vmem>>, vector<1x27x13xf32>
    %369 = vector.shape_cast %368 : vector<1x27x13xf32> to vector<27x13xf32>
    %370 = vector.extract_strided_slice %343 {offsets = [0, 640], sizes = [13, 128], strides = [1, 1]} : vector<13x1536xf32> to vector<13x128xf32>
    %cst_297 = arith.constant dense<0.000000e+00> : vector<27x128xf32>
    %371 = tpu.matmul %369, %370, %cst_297 {dimension_numbers = #tpu.dot_dimension_numbers<[1], [0], [0], [1], [0, 0, 1, 1], [], []>} : vector<27x13xf32>, vector<13x128xf32>, vector<27x128xf32> -> vector<27x128xf32>
    %372 = arith.addf %367, %371 : vector<27x128xf32>
    %c6_298 = arith.constant 6 : index
    %c0_299 = arith.constant 0 : index
    %c0_300 = arith.constant 0 : index
    %373 = vector.load %arg26[%c6_298, %c0_299, %c0_300] : memref<12x27x13xf32, #tpu.memory_space<vmem>>, vector<1x27x13xf32>
    %374 = vector.shape_cast %373 : vector<1x27x13xf32> to vector<27x13xf32>
    %375 = vector.extract_strided_slice %343 {offsets = [0, 768], sizes = [13, 128], strides = [1, 1]} : vector<13x1536xf32> to vector<13x128xf32>
    %cst_301 = arith.constant dense<0.000000e+00> : vector<27x128xf32>
    %376 = tpu.matmul %374, %375, %cst_301 {dimension_numbers = #tpu.dot_dimension_numbers<[1], [0], [0], [1], [0, 0, 1, 1], [], []>} : vector<27x13xf32>, vector<13x128xf32>, vector<27x128xf32> -> vector<27x128xf32>
    %377 = arith.addf %372, %376 : vector<27x128xf32>
    %c7_302 = arith.constant 7 : index
    %c0_303 = arith.constant 0 : index
    %c0_304 = arith.constant 0 : index
    %378 = vector.load %arg26[%c7_302, %c0_303, %c0_304] : memref<12x27x13xf32, #tpu.memory_space<vmem>>, vector<1x27x13xf32>
    %379 = vector.shape_cast %378 : vector<1x27x13xf32> to vector<27x13xf32>
    %380 = vector.extract_strided_slice %343 {offsets = [0, 896], sizes = [13, 128], strides = [1, 1]} : vector<13x1536xf32> to vector<13x128xf32>
    %cst_305 = arith.constant dense<0.000000e+00> : vector<27x128xf32>
    %381 = tpu.matmul %379, %380, %cst_305 {dimension_numbers = #tpu.dot_dimension_numbers<[1], [0], [0], [1], [0, 0, 1, 1], [], []>} : vector<27x13xf32>, vector<13x128xf32>, vector<27x128xf32> -> vector<27x128xf32>
    %382 = arith.addf %377, %381 : vector<27x128xf32>
    %c8_306 = arith.constant 8 : index
    %c0_307 = arith.constant 0 : index
    %c0_308 = arith.constant 0 : index
    %383 = vector.load %arg26[%c8_306, %c0_307, %c0_308] : memref<12x27x13xf32, #tpu.memory_space<vmem>>, vector<1x27x13xf32>
    %384 = vector.shape_cast %383 : vector<1x27x13xf32> to vector<27x13xf32>
    %385 = vector.extract_strided_slice %343 {offsets = [0, 1024], sizes = [13, 128], strides = [1, 1]} : vector<13x1536xf32> to vector<13x128xf32>
    %cst_309 = arith.constant dense<0.000000e+00> : vector<27x128xf32>
    %386 = tpu.matmul %384, %385, %cst_309 {dimension_numbers = #tpu.dot_dimension_numbers<[1], [0], [0], [1], [0, 0, 1, 1], [], []>} : vector<27x13xf32>, vector<13x128xf32>, vector<27x128xf32> -> vector<27x128xf32>
    %387 = arith.addf %382, %386 : vector<27x128xf32>
    %c9_310 = arith.constant 9 : index
    %c0_311 = arith.constant 0 : index
    %c0_312 = arith.constant 0 : index
    %388 = vector.load %arg26[%c9_310, %c0_311, %c0_312] : memref<12x27x13xf32, #tpu.memory_space<vmem>>, vector<1x27x13xf32>
    %389 = vector.shape_cast %388 : vector<1x27x13xf32> to vector<27x13xf32>
    %390 = vector.extract_strided_slice %343 {offsets = [0, 1152], sizes = [13, 128], strides = [1, 1]} : vector<13x1536xf32> to vector<13x128xf32>
    %cst_313 = arith.constant dense<0.000000e+00> : vector<27x128xf32>
    %391 = tpu.matmul %389, %390, %cst_313 {dimension_numbers = #tpu.dot_dimension_numbers<[1], [0], [0], [1], [0, 0, 1, 1], [], []>} : vector<27x13xf32>, vector<13x128xf32>, vector<27x128xf32> -> vector<27x128xf32>
    %392 = arith.addf %387, %391 : vector<27x128xf32>
    %c10_314 = arith.constant 10 : index
    %c0_315 = arith.constant 0 : index
    %c0_316 = arith.constant 0 : index
    %393 = vector.load %arg26[%c10_314, %c0_315, %c0_316] : memref<12x27x13xf32, #tpu.memory_space<vmem>>, vector<1x27x13xf32>
    %394 = vector.shape_cast %393 : vector<1x27x13xf32> to vector<27x13xf32>
    %395 = vector.extract_strided_slice %343 {offsets = [0, 1280], sizes = [13, 128], strides = [1, 1]} : vector<13x1536xf32> to vector<13x128xf32>
    %cst_317 = arith.constant dense<0.000000e+00> : vector<27x128xf32>
    %396 = tpu.matmul %394, %395, %cst_317 {dimension_numbers = #tpu.dot_dimension_numbers<[1], [0], [0], [1], [0, 0, 1, 1], [], []>} : vector<27x13xf32>, vector<13x128xf32>, vector<27x128xf32> -> vector<27x128xf32>
    %397 = arith.addf %392, %396 : vector<27x128xf32>
    %c11_318 = arith.constant 11 : index
    %c0_319 = arith.constant 0 : index
    %c0_320 = arith.constant 0 : index
    %398 = vector.load %arg26[%c11_318, %c0_319, %c0_320] : memref<12x27x13xf32, #tpu.memory_space<vmem>>, vector<1x27x13xf32>
    %399 = vector.shape_cast %398 : vector<1x27x13xf32> to vector<27x13xf32>
    %400 = vector.extract_strided_slice %343 {offsets = [0, 1408], sizes = [13, 128], strides = [1, 1]} : vector<13x1536xf32> to vector<13x128xf32>
    %cst_321 = arith.constant dense<0.000000e+00> : vector<27x128xf32>
    %401 = tpu.matmul %399, %400, %cst_321 {dimension_numbers = #tpu.dot_dimension_numbers<[1], [0], [0], [1], [0, 0, 1, 1], [], []>} : vector<27x13xf32>, vector<13x128xf32>, vector<27x128xf32> -> vector<27x128xf32>
    %402 = arith.addf %397, %401 : vector<27x128xf32>
    %c0_322 = arith.constant 0 : index
    %c0_323 = arith.constant 0 : index
    %403 = vector.load %arg25[%c0_322, %c0_323] : memref<1x128xf32, #tpu.memory_space<vmem>>, vector<1x128xf32>
    %404 = vector.broadcast %403 : vector<1x128xf32> to vector<27x128xf32>
    %405 = arith.addf %402, %404 : vector<27x128xf32>
    %406 = vector.extract_strided_slice %405 {offsets = [0, 0], sizes = [27, 16], strides = [1, 1]} : vector<27x128xf32> to vector<27x16xf32>
    %c0_324 = arith.constant 0 : index
    %c0_325 = arith.constant 0 : index
    %407 = vector.load %arg27[%c0_324, %c0_325] : memref<16x1536xf32, #tpu.memory_space<vmem>>, vector<16x1536xf32>
    %cst_326 = arith.constant dense<0.000000e+00> : vector<27x1536xf32>
    %408 = tpu.matmul %406, %407, %cst_326 {dimension_numbers = #tpu.dot_dimension_numbers<[1], [0], [0], [1], [0, 0, 1, 1], [], []>} : vector<27x16xf32>, vector<16x1536xf32>, vector<27x1536xf32> -> vector<27x1536xf32>
    %c0_327 = arith.constant 0 : index
    %c0_328 = arith.constant 0 : index
    %c0_329 = arith.constant 0 : index
    %409 = vector.load %arg29[%c0_327, %c0_328, %c0_329] : memref<12x56x27xf32, #tpu.memory_space<vmem>>, vector<1x56x27xf32>
    %410 = vector.shape_cast %409 : vector<1x56x27xf32> to vector<56x27xf32>
    %411 = vector.extract_strided_slice %408 {offsets = [0, 0], sizes = [27, 128], strides = [1, 1]} : vector<27x1536xf32> to vector<27x128xf32>
    %cst_330 = arith.constant dense<0.000000e+00> : vector<56x128xf32>
    %412 = tpu.matmul %410, %411, %cst_330 {dimension_numbers = #tpu.dot_dimension_numbers<[1], [0], [0], [1], [0, 0, 1, 1], [], []>} : vector<56x27xf32>, vector<27x128xf32>, vector<56x128xf32> -> vector<56x128xf32>
    %c1_331 = arith.constant 1 : index
    %c0_332 = arith.constant 0 : index
    %c0_333 = arith.constant 0 : index
    %413 = vector.load %arg29[%c1_331, %c0_332, %c0_333] : memref<12x56x27xf32, #tpu.memory_space<vmem>>, vector<1x56x27xf32>
    %414 = vector.shape_cast %413 : vector<1x56x27xf32> to vector<56x27xf32>
    %415 = vector.extract_strided_slice %408 {offsets = [0, 128], sizes = [27, 128], strides = [1, 1]} : vector<27x1536xf32> to vector<27x128xf32>
    %cst_334 = arith.constant dense<0.000000e+00> : vector<56x128xf32>
    %416 = tpu.matmul %414, %415, %cst_334 {dimension_numbers = #tpu.dot_dimension_numbers<[1], [0], [0], [1], [0, 0, 1, 1], [], []>} : vector<56x27xf32>, vector<27x128xf32>, vector<56x128xf32> -> vector<56x128xf32>
    %417 = arith.addf %412, %416 : vector<56x128xf32>
    %c2_335 = arith.constant 2 : index
    %c0_336 = arith.constant 0 : index
    %c0_337 = arith.constant 0 : index
    %418 = vector.load %arg29[%c2_335, %c0_336, %c0_337] : memref<12x56x27xf32, #tpu.memory_space<vmem>>, vector<1x56x27xf32>
    %419 = vector.shape_cast %418 : vector<1x56x27xf32> to vector<56x27xf32>
    %420 = vector.extract_strided_slice %408 {offsets = [0, 256], sizes = [27, 128], strides = [1, 1]} : vector<27x1536xf32> to vector<27x128xf32>
    %cst_338 = arith.constant dense<0.000000e+00> : vector<56x128xf32>
    %421 = tpu.matmul %419, %420, %cst_338 {dimension_numbers = #tpu.dot_dimension_numbers<[1], [0], [0], [1], [0, 0, 1, 1], [], []>} : vector<56x27xf32>, vector<27x128xf32>, vector<56x128xf32> -> vector<56x128xf32>
    %422 = arith.addf %417, %421 : vector<56x128xf32>
    %c3_339 = arith.constant 3 : index
    %c0_340 = arith.constant 0 : index
    %c0_341 = arith.constant 0 : index
    %423 = vector.load %arg29[%c3_339, %c0_340, %c0_341] : memref<12x56x27xf32, #tpu.memory_space<vmem>>, vector<1x56x27xf32>
    %424 = vector.shape_cast %423 : vector<1x56x27xf32> to vector<56x27xf32>
    %425 = vector.extract_strided_slice %408 {offsets = [0, 384], sizes = [27, 128], strides = [1, 1]} : vector<27x1536xf32> to vector<27x128xf32>
    %cst_342 = arith.constant dense<0.000000e+00> : vector<56x128xf32>
    %426 = tpu.matmul %424, %425, %cst_342 {dimension_numbers = #tpu.dot_dimension_numbers<[1], [0], [0], [1], [0, 0, 1, 1], [], []>} : vector<56x27xf32>, vector<27x128xf32>, vector<56x128xf32> -> vector<56x128xf32>
    %427 = arith.addf %422, %426 : vector<56x128xf32>
    %c4_343 = arith.constant 4 : index
    %c0_344 = arith.constant 0 : index
    %c0_345 = arith.constant 0 : index
    %428 = vector.load %arg29[%c4_343, %c0_344, %c0_345] : memref<12x56x27xf32, #tpu.memory_space<vmem>>, vector<1x56x27xf32>
    %429 = vector.shape_cast %428 : vector<1x56x27xf32> to vector<56x27xf32>
    %430 = vector.extract_strided_slice %408 {offsets = [0, 512], sizes = [27, 128], strides = [1, 1]} : vector<27x1536xf32> to vector<27x128xf32>
    %cst_346 = arith.constant dense<0.000000e+00> : vector<56x128xf32>
    %431 = tpu.matmul %429, %430, %cst_346 {dimension_numbers = #tpu.dot_dimension_numbers<[1], [0], [0], [1], [0, 0, 1, 1], [], []>} : vector<56x27xf32>, vector<27x128xf32>, vector<56x128xf32> -> vector<56x128xf32>
    %432 = arith.addf %427, %431 : vector<56x128xf32>
    %c5_347 = arith.constant 5 : index
    %c0_348 = arith.constant 0 : index
    %c0_349 = arith.constant 0 : index
    %433 = vector.load %arg29[%c5_347, %c0_348, %c0_349] : memref<12x56x27xf32, #tpu.memory_space<vmem>>, vector<1x56x27xf32>
    %434 = vector.shape_cast %433 : vector<1x56x27xf32> to vector<56x27xf32>
    %435 = vector.extract_strided_slice %408 {offsets = [0, 640], sizes = [27, 128], strides = [1, 1]} : vector<27x1536xf32> to vector<27x128xf32>
    %cst_350 = arith.constant dense<0.000000e+00> : vector<56x128xf32>
    %436 = tpu.matmul %434, %435, %cst_350 {dimension_numbers = #tpu.dot_dimension_numbers<[1], [0], [0], [1], [0, 0, 1, 1], [], []>} : vector<56x27xf32>, vector<27x128xf32>, vector<56x128xf32> -> vector<56x128xf32>
    %437 = arith.addf %432, %436 : vector<56x128xf32>
    %c6_351 = arith.constant 6 : index
    %c0_352 = arith.constant 0 : index
    %c0_353 = arith.constant 0 : index
    %438 = vector.load %arg29[%c6_351, %c0_352, %c0_353] : memref<12x56x27xf32, #tpu.memory_space<vmem>>, vector<1x56x27xf32>
    %439 = vector.shape_cast %438 : vector<1x56x27xf32> to vector<56x27xf32>
    %440 = vector.extract_strided_slice %408 {offsets = [0, 768], sizes = [27, 128], strides = [1, 1]} : vector<27x1536xf32> to vector<27x128xf32>
    %cst_354 = arith.constant dense<0.000000e+00> : vector<56x128xf32>
    %441 = tpu.matmul %439, %440, %cst_354 {dimension_numbers = #tpu.dot_dimension_numbers<[1], [0], [0], [1], [0, 0, 1, 1], [], []>} : vector<56x27xf32>, vector<27x128xf32>, vector<56x128xf32> -> vector<56x128xf32>
    %442 = arith.addf %437, %441 : vector<56x128xf32>
    %c7_355 = arith.constant 7 : index
    %c0_356 = arith.constant 0 : index
    %c0_357 = arith.constant 0 : index
    %443 = vector.load %arg29[%c7_355, %c0_356, %c0_357] : memref<12x56x27xf32, #tpu.memory_space<vmem>>, vector<1x56x27xf32>
    %444 = vector.shape_cast %443 : vector<1x56x27xf32> to vector<56x27xf32>
    %445 = vector.extract_strided_slice %408 {offsets = [0, 896], sizes = [27, 128], strides = [1, 1]} : vector<27x1536xf32> to vector<27x128xf32>
    %cst_358 = arith.constant dense<0.000000e+00> : vector<56x128xf32>
    %446 = tpu.matmul %444, %445, %cst_358 {dimension_numbers = #tpu.dot_dimension_numbers<[1], [0], [0], [1], [0, 0, 1, 1], [], []>} : vector<56x27xf32>, vector<27x128xf32>, vector<56x128xf32> -> vector<56x128xf32>
    %447 = arith.addf %442, %446 : vector<56x128xf32>
    %c8_359 = arith.constant 8 : index
    %c0_360 = arith.constant 0 : index
    %c0_361 = arith.constant 0 : index
    %448 = vector.load %arg29[%c8_359, %c0_360, %c0_361] : memref<12x56x27xf32, #tpu.memory_space<vmem>>, vector<1x56x27xf32>
    %449 = vector.shape_cast %448 : vector<1x56x27xf32> to vector<56x27xf32>
    %450 = vector.extract_strided_slice %408 {offsets = [0, 1024], sizes = [27, 128], strides = [1, 1]} : vector<27x1536xf32> to vector<27x128xf32>
    %cst_362 = arith.constant dense<0.000000e+00> : vector<56x128xf32>
    %451 = tpu.matmul %449, %450, %cst_362 {dimension_numbers = #tpu.dot_dimension_numbers<[1], [0], [0], [1], [0, 0, 1, 1], [], []>} : vector<56x27xf32>, vector<27x128xf32>, vector<56x128xf32> -> vector<56x128xf32>
    %452 = arith.addf %447, %451 : vector<56x128xf32>
    %c9_363 = arith.constant 9 : index
    %c0_364 = arith.constant 0 : index
    %c0_365 = arith.constant 0 : index
    %453 = vector.load %arg29[%c9_363, %c0_364, %c0_365] : memref<12x56x27xf32, #tpu.memory_space<vmem>>, vector<1x56x27xf32>
    %454 = vector.shape_cast %453 : vector<1x56x27xf32> to vector<56x27xf32>
    %455 = vector.extract_strided_slice %408 {offsets = [0, 1152], sizes = [27, 128], strides = [1, 1]} : vector<27x1536xf32> to vector<27x128xf32>
    %cst_366 = arith.constant dense<0.000000e+00> : vector<56x128xf32>
    %456 = tpu.matmul %454, %455, %cst_366 {dimension_numbers = #tpu.dot_dimension_numbers<[1], [0], [0], [1], [0, 0, 1, 1], [], []>} : vector<56x27xf32>, vector<27x128xf32>, vector<56x128xf32> -> vector<56x128xf32>
    %457 = arith.addf %452, %456 : vector<56x128xf32>
    %c10_367 = arith.constant 10 : index
    %c0_368 = arith.constant 0 : index
    %c0_369 = arith.constant 0 : index
    %458 = vector.load %arg29[%c10_367, %c0_368, %c0_369] : memref<12x56x27xf32, #tpu.memory_space<vmem>>, vector<1x56x27xf32>
    %459 = vector.shape_cast %458 : vector<1x56x27xf32> to vector<56x27xf32>
    %460 = vector.extract_strided_slice %408 {offsets = [0, 1280], sizes = [27, 128], strides = [1, 1]} : vector<27x1536xf32> to vector<27x128xf32>
    %cst_370 = arith.constant dense<0.000000e+00> : vector<56x128xf32>
    %461 = tpu.matmul %459, %460, %cst_370 {dimension_numbers = #tpu.dot_dimension_numbers<[1], [0], [0], [1], [0, 0, 1, 1], [], []>} : vector<56x27xf32>, vector<27x128xf32>, vector<56x128xf32> -> vector<56x128xf32>
    %462 = arith.addf %457, %461 : vector<56x128xf32>
    %c11_371 = arith.constant 11 : index
    %c0_372 = arith.constant 0 : index
    %c0_373 = arith.constant 0 : index
    %463 = vector.load %arg29[%c11_371, %c0_372, %c0_373] : memref<12x56x27xf32, #tpu.memory_space<vmem>>, vector<1x56x27xf32>
    %464 = vector.shape_cast %463 : vector<1x56x27xf32> to vector<56x27xf32>
    %465 = vector.extract_strided_slice %408 {offsets = [0, 1408], sizes = [27, 128], strides = [1, 1]} : vector<27x1536xf32> to vector<27x128xf32>
    %cst_374 = arith.constant dense<0.000000e+00> : vector<56x128xf32>
    %466 = tpu.matmul %464, %465, %cst_374 {dimension_numbers = #tpu.dot_dimension_numbers<[1], [0], [0], [1], [0, 0, 1, 1], [], []>} : vector<56x27xf32>, vector<27x128xf32>, vector<56x128xf32> -> vector<56x128xf32>
    %467 = arith.addf %462, %466 : vector<56x128xf32>
    %c0_375 = arith.constant 0 : index
    %c0_376 = arith.constant 0 : index
    %468 = vector.load %arg28[%c0_375, %c0_376] : memref<1x128xf32, #tpu.memory_space<vmem>>, vector<1x128xf32>
    %469 = vector.broadcast %468 : vector<1x128xf32> to vector<56x128xf32>
    %470 = arith.addf %467, %469 : vector<56x128xf32>
    %c0_377 = arith.constant 0 : index
    %c0_378 = arith.constant 0 : index
    %471 = vector.load %arg30[%c0_377, %c0_378] : memref<56x128xf32, #tpu.memory_space<vmem>>, vector<56x128xf32>
    tpu.vector_store %arg30[%c0_377, %c0_378], %470 {strides = array<i32>} : memref<56x128xf32, #tpu.memory_space<vmem>>, vector<56x128xf32>,
    return
  }
  func.func @transform_0(%arg0: i32) -> (i32, i32) {
    %c0_i32 = arith.constant 0 : i32
    %c0_i32_0 = arith.constant 0 : i32
    return %arg0, %c0_i32 : i32, i32
  }
  func.func @transform_1(%arg0: i32) -> (i32, i32) {
    %c0_i32 = arith.constant 0 : i32
    %c0_i32_0 = arith.constant 0 : i32
    %c0_i32_1 = arith.constant 0 : i32
    return %c0_i32, %c0_i32_0 : i32, i32
  }
  func.func @transform_2(%arg0: i32) -> (i32, i32) {
    %c0_i32 = arith.constant 0 : i32
    %c0_i32_0 = arith.constant 0 : i32
    %c0_i32_1 = arith.constant 0 : i32
    return %c0_i32, %c0_i32_0 : i32, i32
  }
  func.func @transform_3(%arg0: i32) -> (i32, i32, i32) {
    %c0_i32 = arith.constant 0 : i32
    %c0_i32_0 = arith.constant 0 : i32
    %c0_i32_1 = arith.constant 0 : i32
    %c0_i32_2 = arith.constant 0 : i32
    return %c0_i32, %c0_i32_0, %c0_i32_1 : i32, i32, i32
  }
  func.func @transform_4(%arg0: i32) -> (i32, i32) {
    %c0_i32 = arith.constant 0 : i32
    %c0_i32_0 = arith.constant 0 : i32
    %c0_i32_1 = arith.constant 0 : i32
    return %c0_i32, %c0_i32_0 : i32, i32
  }
  func.func @transform_5(%arg0: i32) -> (i32, i32) {
    %c0_i32 = arith.constant 0 : i32
    %c0_i32_0 = arith.constant 0 : i32
    %c0_i32_1 = arith.constant 0 : i32
    return %c0_i32, %c0_i32_0 : i32, i32
  }
  func.func @transform_6(%arg0: i32) -> (i32, i32, i32) {
    %c0_i32 = arith.constant 0 : i32
    %c0_i32_0 = arith.constant 0 : i32
    %c0_i32_1 = arith.constant 0 : i32
    %c0_i32_2 = arith.constant 0 : i32
    return %c0_i32, %c0_i32_0, %c0_i32_1 : i32, i32, i32
  }
  func.func @transform_7(%arg0: i32) -> (i32, i32) {
    %c0_i32 = arith.constant 0 : i32
    %c0_i32_0 = arith.constant 0 : i32
    %c0_i32_1 = arith.constant 0 : i32
    return %c0_i32, %c0_i32_0 : i32, i32
  }
  func.func @transform_8(%arg0: i32) -> (i32, i32) {
    %c0_i32 = arith.constant 0 : i32
    %c0_i32_0 = arith.constant 0 : i32
    %c0_i32_1 = arith.constant 0 : i32
    return %c0_i32, %c0_i32_0 : i32, i32
  }
  func.func @transform_9(%arg0: i32) -> (i32, i32, i32) {
    %c0_i32 = arith.constant 0 : i32
    %c0_i32_0 = arith.constant 0 : i32
    %c0_i32_1 = arith.constant 0 : i32
    %c0_i32_2 = arith.constant 0 : i32
    return %c0_i32, %c0_i32_0, %c0_i32_1 : i32, i32, i32
  }
  func.func @transform_10(%arg0: i32) -> (i32, i32) {
    %c0_i32 = arith.constant 0 : i32
    %c0_i32_0 = arith.constant 0 : i32
    %c0_i32_1 = arith.constant 0 : i32
    return %c0_i32, %c0_i32_0 : i32, i32
  }
  func.func @transform_11(%arg0: i32) -> (i32, i32) {
    %c0_i32 = arith.constant 0 : i32
    %c0_i32_0 = arith.constant 0 : i32
    %c0_i32_1 = arith.constant 0 : i32
    return %c0_i32, %c0_i32_0 : i32, i32
  }
  func.func @transform_12(%arg0: i32) -> (i32, i32, i32) {
    %c0_i32 = arith.constant 0 : i32
    %c0_i32_0 = arith.constant 0 : i32
    %c0_i32_1 = arith.constant 0 : i32
    %c0_i32_2 = arith.constant 0 : i32
    return %c0_i32, %c0_i32_0, %c0_i32_1 : i32, i32, i32
  }
  func.func @transform_13(%arg0: i32) -> (i32, i32) {
    %c0_i32 = arith.constant 0 : i32
    %c0_i32_0 = arith.constant 0 : i32
    %c0_i32_1 = arith.constant 0 : i32
    return %c0_i32, %c0_i32_0 : i32, i32
  }
  func.func @transform_14(%arg0: i32) -> (i32, i32) {
    %c0_i32 = arith.constant 0 : i32
    %c0_i32_0 = arith.constant 0 : i32
    %c0_i32_1 = arith.constant 0 : i32
    return %c0_i32, %c0_i32_0 : i32, i32
  }
  func.func @transform_15(%arg0: i32) -> (i32, i32) {
    %c0_i32 = arith.constant 0 : i32
    %c0_i32_0 = arith.constant 0 : i32
    %c0_i32_1 = arith.constant 0 : i32
    return %c0_i32, %c0_i32_0 : i32, i32
  }
  func.func @transform_16(%arg0: i32) -> (i32, i32) {
    %c0_i32 = arith.constant 0 : i32
    %c0_i32_0 = arith.constant 0 : i32
    %c0_i32_1 = arith.constant 0 : i32
    return %c0_i32, %c0_i32_0 : i32, i32
  }
  func.func @transform_17(%arg0: i32) -> (i32, i32) {
    %c0_i32 = arith.constant 0 : i32
    %c0_i32_0 = arith.constant 0 : i32
    %c0_i32_1 = arith.constant 0 : i32
    return %c0_i32, %c0_i32_0 : i32, i32
  }
  func.func @transform_18(%arg0: i32) -> (i32, i32) {
    %c0_i32 = arith.constant 0 : i32
    %c0_i32_0 = arith.constant 0 : i32
    %c0_i32_1 = arith.constant 0 : i32
    return %c0_i32, %c0_i32_0 : i32, i32
  }
  func.func @transform_19(%arg0: i32) -> (i32, i32, i32) {
    %c0_i32 = arith.constant 0 : i32
    %c0_i32_0 = arith.constant 0 : i32
    %c0_i32_1 = arith.constant 0 : i32
    %c0_i32_2 = arith.constant 0 : i32
    return %c0_i32, %c0_i32_0, %c0_i32_1 : i32, i32, i32
  }
  func.func @transform_20(%arg0: i32) -> (i32, i32) {
    %c0_i32 = arith.constant 0 : i32
    %c0_i32_0 = arith.constant 0 : i32
    %c0_i32_1 = arith.constant 0 : i32
    return %c0_i32, %c0_i32_0 : i32, i32
  }
  func.func @transform_21(%arg0: i32) -> (i32, i32) {
    %c0_i32 = arith.constant 0 : i32
    %c0_i32_0 = arith.constant 0 : i32
    %c0_i32_1 = arith.constant 0 : i32
    return %c0_i32, %c0_i32_0 : i32, i32
  }
  func.func @transform_22(%arg0: i32) -> (i32, i32, i32) {
    %c0_i32 = arith.constant 0 : i32
    %c0_i32_0 = arith.constant 0 : i32
    %c0_i32_1 = arith.constant 0 : i32
    %c0_i32_2 = arith.constant 0 : i32
    return %c0_i32, %c0_i32_0, %c0_i32_1 : i32, i32, i32
  }
  func.func @transform_23(%arg0: i32) -> (i32, i32) {
    %c0_i32 = arith.constant 0 : i32
    %c0_i32_0 = arith.constant 0 : i32
    %c0_i32_1 = arith.constant 0 : i32
    return %c0_i32, %c0_i32_0 : i32, i32
  }
  func.func @transform_24(%arg0: i32) -> (i32, i32) {
    %c0_i32 = arith.constant 0 : i32
    %c0_i32_0 = arith.constant 0 : i32
    %c0_i32_1 = arith.constant 0 : i32
    return %c0_i32, %c0_i32_0 : i32, i32
  }
  func.func @transform_25(%arg0: i32) -> (i32, i32, i32) {
    %c0_i32 = arith.constant 0 : i32
    %c0_i32_0 = arith.constant 0 : i32
    %c0_i32_1 = arith.constant 0 : i32
    %c0_i32_2 = arith.constant 0 : i32
    return %c0_i32, %c0_i32_0, %c0_i32_1 : i32, i32, i32
  }
  func.func @transform_26(%arg0: i32) -> (i32, i32) {
    %c0_i32 = arith.constant 0 : i32
    %c0_i32_0 = arith.constant 0 : i32
    %c0_i32_1 = arith.constant 0 : i32
    return %c0_i32, %c0_i32_0 : i32, i32
  }
  func.func @transform_27(%arg0: i32) -> (i32, i32) {
    %c0_i32 = arith.constant 0 : i32
    %c0_i32_0 = arith.constant 0 : i32
    %c0_i32_1 = arith.constant 0 : i32
    return %c0_i32, %c0_i32_0 : i32, i32
  }
  func.func @transform_28(%arg0: i32) -> (i32, i32, i32) {
    %c0_i32 = arith.constant 0 : i32
    %c0_i32_0 = arith.constant 0 : i32
    %c0_i32_1 = arith.constant 0 : i32
    %c0_i32_2 = arith.constant 0 : i32
    return %c0_i32, %c0_i32_0, %c0_i32_1 : i32, i32, i32
  }
  func.func @transform_29(%arg0: i32) -> (i32, i32) {
    %c0_i32 = arith.constant 0 : i32
    %c0_i32_0 = arith.constant 0 : i32
    return %arg0, %c0_i32 : i32, i32
  }
}

</mosaic_0001>

<bundles_post_ra>
// kernel: forward.1
= control target key start
LH: loop header
LB: loop body
LE: loop exit
PB: predicated region body
PF: predicated region fallthrough
CT: control target
= control target key end

     0   :  { %s19229_s6 = smov 1   ;;  %s19230_s10 = smov 2   ;;  %s21644_s0 = inlined_call_operand.smem [shape: u32[30], index: -1, kind: input, shape index: {}] }
   0x1   :  { %s19300_s5 = sld [smem:[%s21644_s0]]   ;;  %s19231_s14 = smov 3  }
   0x2   :  { %s19305_s9 = sld [smem:[%s21644_s0 + %s19229_s6]]   ;;  %s19232_s18 = smov 4  }
   0x3   :  { %s19310_s13 = sld [smem:[%s21644_s0 + %s19230_s10]]   ;;  %s19233_s22 = smov 5  }
   0x4   :  { %s19315_s17 = sld [smem:[%s21644_s0 + %s19231_s14]]   ;;  %s19234_s26 = smov 6  }
   0x5   :  { %s19320_s21 = sld [smem:[%s21644_s0 + %s19232_s18]]   ;;  %s19235_s30 = smov 7  }
   0x6   :  { %s19325_s25 = sld [smem:[%s21644_s0 + %s19233_s22]]   ;;  %s19236_s4 = smov 8  }
   0x7   :  { %21662 = sst [smem:[#allocation48_spill]] %s19300_s5  ;;  %s19237_s10 = smov 9  }
   0x8   :  { %s19330_s29 = sld [smem:[%s21644_s0 + %s19234_s26]]   ;;  %s19238_s15 = smov 10  }
   0x9   :  { %21663 = sst [smem:[#allocation49_spill]] %s19310_s13  ;;  %s19239_s20 = smov 11  }
   0xa   :  { %s19335_s3 = sld [smem:[%s21644_s0 + %s19235_s30]]   ;;  %s19240_s26 = smov 12  }
   0xb   :  { %s19340_s8 = sld [smem:[%s21644_s0 + %s19236_s4]]   ;;  %s19241_s1 = smov 13  }
   0xc   :  { %s19345_s14 = sld [smem:[%s21644_s0 + %s19237_s10]]   ;;  %s19242_s7 = smov 14  }
   0xd   :  { %s19350_s19 = sld [smem:[%s21644_s0 + %s19238_s15]]   ;;  %s19243_s15 = smov 15  }
   0xe   :  { %s19355_s24 = sld [smem:[%s21644_s0 + %s19239_s20]]   ;;  %s19244_s22 = smov 16  }
   0xf   :  { %s19360_s30 = sld [smem:[%s21644_s0 + %s19240_s26]]   ;;  %s19245_s28 = smov 17  }
  0x10   :  { %21664 = sst [smem:[#allocation50_spill]] %s19335_s3 }
  0x11   :  { %21665 = sst [smem:[#allocation51_spill]] %s19340_s8 }
  0x12   :  { %21666 = sst [smem:[#allocation52_spill]] %s19345_s14 }
  0x13   :  { %21667 = sst [smem:[#allocation53_spill]] %s19350_s19 }
  0x14   :  { %s19365_s6 = sld [smem:[%s21644_s0 + %s19241_s1]]  }
  0x15   :  { %21668 = sst [smem:[#allocation54_spill]] %s19360_s30 }
  0x16   :  { %s19370_s12 = sld [smem:[%s21644_s0 + %s19242_s7]]   ;;  %s19246_s7 = smov 18  }
  0x17   :  { %s19375_s20 = sld [smem:[%s21644_s0 + %s19243_s15]]   ;;  %s19247_s15 = smov 19  }
  0x18   :  { %s19380_s27 = sld [smem:[%s21644_s0 + %s19244_s22]]   ;;  %s19248_s22 = smov 20  }
  0x19   :  { %s19385_s4 = sld [smem:[%s21644_s0 + %s19245_s28]]   ;;  %s19249_s28 = smov 21  }
  0x1a   :  { %21669 = sst [smem:[#allocation55_spill]] %s19365_s6 }
  0x1b   :  { %s19390_s19 = sld [smem:[%s21644_s0 + %s19246_s7]]   ;;  %s19250_s7 = smov 22  }
  0x1c   :  { %21670 = sst [smem:[#allocation56_spill]] %s19370_s12 }
  0x1d   :  { %s19395_s5 = sld [smem:[%s21644_s0 + %s19247_s15]]   ;;  %s19251_s15 = smov 23  }
  0x1e   :  { %21671 = sst [smem:[#allocation57_spill]] %s19380_s27 }
  0x1f   :  { %21672 = sst [smem:[#allocation58_spill]] %s19385_s4 }
  0x20   :  { %s19400_s27 = sld [smem:[%s21644_s0 + %s19248_s22]]   ;;  %s19252_s22 = smov 24  }
  0x21   :  { %21673 = sst [smem:[#allocation59_spill]] %s19390_s19 }
  0x22   :  { %s19405_s12 = sld [smem:[%s21644_s0 + %s19249_s28]]   ;;  %s19253_s28 = smov 25  }
  0x23   :  { %21674 = sst [smem:[#allocation60_spill]] %s19395_s5 }
  0x24   :  { %s19410_s19 = sld [smem:[%s21644_s0 + %s19250_s7]]   ;;  %s19254_s7 = smov 26  }
  0x25   :  { %s19415_s5 = sld [smem:[%s21644_s0 + %s19251_s15]]   ;;  %s19255_s15 = smov 27  }
  0x26   :  { %s19420_s30 = sld [smem:[%s21644_s0 + %s19252_s22]]   ;;  %s19256_s22 = smov 28  }
  0x27   :  { %s19440_s14 = sld [smem:[%s21644_s0 + %s19256_s22]]  }
  0x28   :  { %21675 = sst [smem:[#allocation61_spill]] %s19405_s12 }
  0x29   :  { %s19425_s12 = sld [smem:[%s21644_s0 + %s19253_s28]]   ;;  %s19257_s28 = smov 29  }
  0x2a   :  { %21676 = sst [smem:[#allocation62_spill]] %s19410_s19 }
  0x2b   :  { %21677 = sst [smem:[#allocation63_spill]] %s19415_s5 }
  0x2c   :  { %s19430_s19 = sld [smem:[%s21644_s0 + %s19254_s7]]  }
  0x2d   :  { %s19435_s5 = sld [smem:[%s21644_s0 + %s19255_s15]]  }
  0x2f   :  { %21678 = sst [smem:[#allocation64_spill]] %s19425_s12 }
  0x30   :  { %s19445_s12 = sld [smem:[%s21644_s0 + %s19257_s28]]  }
  0x31   :  { %64 = vsyncpa [#allocation3], 0 }
  0x32   :  { %65 = vsyncpa [#allocation5], 0 }
  0x33   :  { %66 = vsyncpa [#allocation8], 0 }
  0x34   :  { %67 = vsyncpa [#allocation11], 0 }
  0x35   :  { %68 = vsyncpa [#allocation14], 0 }
  0x36   :  { %69 = vsyncpa [#allocation17], 0 }
  0x37   :  { %70 = vsyncpa [#allocation20], 0 }
  0x38   :  { %71 = vsyncpa [#allocation23], 0 }
  0x39   :  { %72 = vsyncpa [#allocation26], 0 }
  0x3a   :  { %73 = vsyncpa [#allocation29], 0 }
  0x3b   :  { %74 = vsyncpa [#allocation32], 0 }
  0x3c   :  { %75 = vsyncpa [#allocation35], 0  ;;  %s19447_s7 = smov 0  }
  0x3d LB: > { %s19258_s0 = smov [#allocation4]   ;;  %s21652_s11 = sadd.s32 4294967295, %s19227_s7   ;;  %s19227_s7 = sphi %s19447_s7, %s81_s7  }
  0x3e   : > { %s750_s10 = sshll.u32 %s19258_s0, 4  ;;  %p16068_p0 = scmp.ge.s32.totalorder %s19227_s7, 1  ;;  %s751_s10 = int_to_ptr.vmem [resolvable:$true] %s750_s10 }
  0x3f   : > { %p726_p1 = scmp.lt.s32.totalorder %s19227_s7, 3  ;;  %p19457_p2 = scmp.eq.s32.totalorder %s21652_s11, 0 }
  0x40   : > { %s19259_s18 = smov [#allocation7]   ;;  %s19260_s26 = smov [#allocation10]  }
  0x41   : > { %s21679_s15 = scalar_select %p19457_p2, 1, 0 }
  0x42   : > { %p19461_p3 = pnand %p16068_p0, %p726_p1  ;;  %s773_s22 = sshll.u32 %s19259_s18, 4  ;;  %s19467_s22 = int_to_ptr.vmem [resolvable:$true] %s773_s22 }
  0x43   : > { %s797_s28 = sshll.u32 %s19260_s26, 4  ;;  %s18612_s2 = scalar_lea.vmem %s751_s10, 16  ;;  %s798_s28 = int_to_ptr.vmem [resolvable:$true] %s797_s28 }
  0x44   : > { %s21680_s16 = scalar_select %p19461_p3, 1, 0 }
  0x45   : > { %p18419_p4 = pneg %p19461_p3  ;;  %p18613_p7 = scmp.ne.s32.totalorder %s751_s10, %s18612_s2 }
  0x46   : > { %s18619_s0 = scalar_lea.vmem %s751_s10, 32  ;;  %p18620_p10 = scmp.lt.s32.totalorder %s751_s10, %s751_s10 }
  0x47   : > { %p19471_p5 = pnand %p19457_p2, %p18419_p4  ;;  %p18621_p11 = scmp.lt.s32.totalorder %s18619_s0, %s18612_s2 }
  0x49   : > { %p19477_p6 = pneg %p19471_p5  ;;  %p18622_p12 = por %p18621_p11, %p18620_p10 }
  0x4b   : > { %p18615_p8 = pnand %p18613_p7, %p19477_p6 }
  0x4d   : > { %p18616_p9 = pneg %p18615_p8 }
  0x4f   : > { %p18623_p13 = pnand %p18622_p12, %p18616_p9 }
  0x51   : > { %18626 = shalt.err (!%p18623_p13)
}
  0x52   : > { %s21683_s13 = sld [smem:[#allocation49_spill]]  ;;  %s18638_s18 = scalar_lea.vmem %s19467_s22, 3072 }
  0x53   : > { %p18639_p0 = scmp.ne.s32.totalorder %s19467_s22, %s18638_s18  ;;  %p18646_p7 = scmp.lt.s32.totalorder %s19467_s22, %s19467_s22 }
  0x54   : > { %p18647_p8 = scmp.lt.s32.totalorder %s18638_s18, %s18638_s18 }
  0x55   : > { %p18641_p1 = pnand %p18639_p0, %p19477_p6 }
  0x56   : > { %p18648_p2 = por %p18647_p8, %p18646_p7 }
  0x57   : > { %p18642_p4 = pneg %p18641_p1 }
  0x58   : > { %18425 = dma.hbm_to_vmem [thread:$0]  (!%p19471_p5), %s21683_s13, 16, %s751_s10, [#allocation5]  }
  0x59   : > { %p18649_p10 = pnand %p18648_p2, %p18642_p4 }
  0x5b   : > { %18652 = shalt.err (!%p18649_p10)
}
  0x5c   : > { %s21653_s26 = smov 1536   ;;  %s21655_s2 = smov 96  }
  0x5d   : > { %18431 = dma.hbm_to_vmem [thread:$0]  (!%p19471_p5), %s19320_s21, 3072, %s19467_s22, [#allocation8], %s21653_s26, %s21653_s26, %s21655_s2  }
  0x5e   : > { %s19263_s10 = smov [#allocation13]   ;;  %s18664_s11 = scalar_lea.vmem %s798_s28, 3072 }
  0x5f   : > { %s824_s0 = sshll.u32 %s19263_s10, 4  ;;  %p18665_p9 = scmp.ne.s32.totalorder %s798_s28, %s18664_s11  ;;  %s825_s0 = int_to_ptr.vmem [resolvable:$true] %s824_s0 }
  0x60   : > { %p18672_p12 = scmp.lt.s32.totalorder %s798_s28, %s798_s28  ;;  %p18673_p13 = scmp.lt.s32.totalorder %s18664_s11, %s18664_s11 }
  0x61   : > { %p18667_p11 = pnand %p18665_p9, %p19477_p6 }
  0x62   : > { %p18674_p0 = por %p18673_p13, %p18672_p12 }
  0x63   : > { %p18668_p2 = pneg %p18667_p11 }
  0x65   : > { %p18675_p1 = pnand %p18674_p0, %p18668_p2 }
  0x67   : > { %18678 = shalt.err (!%p18675_p1)
}
  0x68   : > { %s21657_s18 = smov 128   ;;  %s21660_s13 = smov 8  }
  0x69   : > { %18437 = dma.hbm_to_vmem [thread:$0]  (!%p19471_p5), %s19330_s29, 3072, %s798_s28, [#allocation11], %s21657_s18, %s21657_s18, %s21660_s13  }
  0x6a   : > { %s18690_s22 = scalar_lea.vmem %s825_s0, 16  ;;  %s18697_s11 = scalar_lea.vmem %s825_s0, 32 }
  0x6b   : > { %p18691_p4 = scmp.ne.s32.totalorder %s825_s0, %s18690_s22  ;;  %p18698_p10 = scmp.lt.s32.totalorder %s825_s0, %s825_s0 }
  0x6c   : > { %p18699_p9 = scmp.lt.s32.totalorder %s18697_s11, %s18690_s22 }
  0x6d   : > { %p18693_p7 = pnand %p18691_p4, %p19477_p6 }
  0x6e   : > { %p18700_p11 = por %p18699_p9, %p18698_p10 }
  0x6f   : > { %p18694_p8 = pneg %p18693_p7 }
  0x71   : > { %p18701_p2 = pnand %p18700_p11, %p18694_p8 }
  0x73   : > { %18704 = shalt.err (!%p18701_p2)
}
  0x74   : > { %s21684_s8 = sld [smem:[#allocation51_spill]]  ;;  %s19266_s10 = smov [#allocation16]  }
  0x75   : > { %s851_s26 = sshll.u32 %s19266_s10, 4  ;;  %s19267_s28 = smov [#allocation19]   ;;  %s852_s26 = int_to_ptr.vmem [resolvable:$true] %s851_s26 }
  0x76   : > { %s874_s2 = sshll.u32 %s19267_s28, 4  ;;  %s18716_s18 = scalar_lea.vmem %s852_s26, 64  ;;  %s875_s2 = int_to_ptr.vmem [resolvable:$true] %s874_s2 }
  0x77   : > { %p18717_p12 = scmp.ne.s32.totalorder %s852_s26, %s18716_s18  ;;  %p18724_p1 = scmp.lt.s32.totalorder %s852_s26, %s852_s26 }
  0x78   : > { %p18725_p4 = scmp.lt.s32.totalorder %s18716_s18, %s18716_s18 }
  0x79   : > { %p18719_p13 = pnand %p18717_p12, %p19477_p6 }
  0x7a   : > { %18443 = dma.hbm_to_vmem [thread:$0]  (!%p19471_p5), %s21684_s8, 16, %s825_s0, [#allocation14]  }
  0x7b   : > { %p18720_p0 = pneg %p18719_p13  ;;  %p18726_p7 = por %p18725_p4, %p18724_p1 }
  0x7d   : > { %p18727_p8 = pnand %p18726_p7, %p18720_p0 }
  0x7f   : > { %18730 = shalt.err (!%p18727_p8)
}
  0x80   : > { %18449 = dma.hbm_to_vmem [thread:$0]  (!%p19471_p5), %s19355_s24, 64, %s852_s26, [#allocation17]  }
  0x81   : > { %s18742_s0 = scalar_lea.vmem %s875_s2, 8192  ;;  %p18750_p2 = scmp.lt.s32.totalorder %s875_s2, %s875_s2 }
  0x82   : > { %p18743_p10 = scmp.ne.s32.totalorder %s875_s2, %s18742_s0  ;;  %p18751_p3 = scmp.lt.s32.totalorder %s18742_s0, %s18742_s0 }
  0x84   : > { %p18745_p9 = pnand %p18743_p10, %p19477_p6  ;;  %p18752_p12 = por %p18751_p3, %p18750_p2 }
  0x86   : > { %p18746_p11 = pneg %p18745_p9 }
  0x88   : > { %p18753_p13 = pnand %p18752_p12, %p18746_p11 }
  0x8a   : > { %18756 = shalt.err (!%p18753_p13)
}
  0x8b   : > { %s21685_s18 = smov 128   ;;  %s21686_s6 = sld [smem:[#allocation55_spill]] }
  0x8c   : > { %s19268_s26 = smov [#allocation22]  }
  0x8d   : > { %s898_s22 = sshll.u32 %s19268_s26, 4  ;;  %s899_s22 = int_to_ptr.vmem [resolvable:$true] %s898_s22 }
  0x8e   : > { %s18768_s11 = scalar_lea.vmem %s899_s22, 2048  ;;  %p18776_p7 = scmp.lt.s32.totalorder %s899_s22, %s899_s22 }
  0x8f   : > { %p18769_p0 = scmp.ne.s32.totalorder %s899_s22, %s18768_s11  ;;  %p18777_p3 = scmp.lt.s32.totalorder %s18768_s11, %s18768_s11 }
  0x91   : > { %18455 = dma.hbm_to_vmem [thread:$0]  (!%p19471_p5), %s21686_s6, 8192, %s875_s2, [#allocation20], %s21685_s18, %s21685_s18, %s21660_s13  }
  0x92   : > { %p18771_p1 = pnand %p18769_p0, %p19477_p6  ;;  %p18778_p8 = por %p18777_p3, %p18776_p7 }
  0x94   : > { %p18772_p4 = pneg %p18771_p1 }
  0x96   : > { %p18779_p10 = pnand %p18778_p8, %p18772_p4 }
  0x98   : > { %18782 = shalt.err (!%p18779_p10)
}
  0x99   : > { %s19269_s10 = smov 512   ;;  %s19270_s28 = smov 32  }
  0x9a   : > { %18461 = dma.hbm_to_vmem [thread:$0]  (!%p19471_p5), %s19375_s20, 2048, %s899_s22, [#allocation23], %s19269_s10, %s19269_s10, %s19270_s28  }
  0x9b   : > { %s19271_s2 = smov [#allocation25]  }
  0x9c   : > { %s922_s0 = sshll.u32 %s19271_s2, 4  ;;  %s923_s0 = int_to_ptr.vmem [resolvable:$true] %s922_s0 }
  0x9d   : > { %s18794_s26 = scalar_lea.vmem %s923_s0, 49152  ;;  %p18802_p12 = scmp.lt.s32.totalorder %s923_s0, %s923_s0 }
  0x9e   : > { %p18795_p9 = scmp.ne.s32.totalorder %s923_s0, %s18794_s26  ;;  %p18803_p13 = scmp.lt.s32.totalorder %s18794_s26, %s18794_s26 }
  0xa0   : > { %p18797_p11 = pnand %p18795_p9, %p19477_p6  ;;  %p18804_p0 = por %p18803_p13, %p18802_p12 }
  0xa2   : > { %p18798_p2 = pneg %p18797_p11 }
  0xa4   : > { %p18805_p1 = pnand %p18804_p0, %p18798_p2 }
  0xa6   : > { %18808 = shalt.err (!%p18805_p1)
}
  0xa7   : > { %s19272_s11 = smov 768   ;;  %s21687_s4 = sld [smem:[#allocation58_spill]] }
  0xa8   : > { %s19273_s13 = smov 48   ;;  %s19274_s22 = smov [#allocation28]  }
  0xa9   : > { %s949_s10 = sshll.u32 %s19274_s22, 4  ;;  %s19275_s28 = smov [#allocation31]   ;;  %s950_s10 = int_to_ptr.vmem [resolvable:$true] %s949_s10 }
  0xaa   : > { %s980_s2 = sshll.u32 %s19275_s28, 4  ;;  %s18820_s6 = scalar_lea.vmem %s950_s10, 12288  ;;  %s981_s2 = int_to_ptr.vmem [resolvable:$true] %s980_s2 }
  0xab   : > { %p18821_p4 = scmp.ne.s32.totalorder %s950_s10, %s18820_s6  ;;  %p18828_p8 = scmp.lt.s32.totalorder %s950_s10, %s950_s10 }
  0xac   : > { %p18829_p10 = scmp.lt.s32.totalorder %s18820_s6, %s18820_s6 }
  0xad   : > { %18467 = dma.hbm_to_vmem [thread:$0]  (!%p19471_p5), %s21687_s4, 49152, %s923_s0, [#allocation26], %s19272_s11, %s19272_s11, %s19273_s13  }
  0xae   : > { %p18823_p7 = pnand %p18821_p4, %p19477_p6  ;;  %p18830_p9 = por %p18829_p10, %p18828_p8 }
  0xb0   : > { %p18824_p3 = pneg %p18823_p7 }
  0xb2   : > { %p18831_p11 = pnand %p18830_p9, %p18824_p3 }
  0xb4   : > { %18834 = shalt.err (!%p18831_p11)
}
  0xb5   : > { %s21688_s26 = smov 96   ;;  %s21689_s8 = smov 1536  }
  0xb6   : > { %18473 = dma.hbm_to_vmem [thread:$0]  (!%p19471_p5), %s19400_s27, 12288, %s950_s10, [#allocation29], %s21689_s8, %s21689_s8, %s21688_s26  }
  0xb7   : > { %s18846_s13 = scalar_lea.vmem %s981_s2, 16  ;;  %s18853_s0 = scalar_lea.vmem %s981_s2, 32 }
  0xb8   : > { %p18847_p2 = scmp.ne.s32.totalorder %s981_s2, %s18846_s13  ;;  %p18854_p0 = scmp.lt.s32.totalorder %s981_s2, %s981_s2 }
  0xb9   : > { %p18855_p1 = scmp.lt.s32.totalorder %s18853_s0, %s18846_s13 }
  0xba   : > { %p18849_p12 = pnand %p18847_p2, %p19477_p6 }
  0xbb   : > { %p18856_p4 = por %p18855_p1, %p18854_p0 }
  0xbc   : > { %p18850_p13 = pneg %p18849_p12 }
  0xbe   : > { %p18857_p7 = pnand %p18856_p4, %p18850_p13 }
  0xc0   : > { %18860 = shalt.err (!%p18857_p7)
}
  0xc1   : > { %18479 = dma.hbm_to_vmem [thread:$0]  (!%p19471_p5), %s19420_s30, 16, %s981_s2, [#allocation32]  }
  0xc2   : > { %s19276_s6 = smov [#allocation2]   ;;  %s19277_s22 = smov [#allocation6]  }
  0xc3   : > { %s739_s11 = sshll.u32 %s19276_s6, 4  ;;  %s760_s10 = sshll.u32 %s19277_s22, 4  ;;  %s740_s11 = int_to_ptr.vmem [resolvable:$true] %s739_s11  ;;  %s761_s10 = int_to_ptr.vmem [resolvable:$true] %s760_s10 }
  0xc4   : > { %s18872_s28 = scalar_lea.vmem %s740_s11, 1536  ;;  %p18880_p9 = scmp.lt.s32.totalorder %s740_s11, %s740_s11 }
  0xc5   : > { %p18873_p3 = scmp.ne.s32.totalorder %s740_s11, %s18872_s28  ;;  %p18881_p11 = scmp.lt.s32.totalorder %s18872_s28, %s18872_s28 }
  0xc7   : > { %p18875_p8 = pnand %p18873_p3, %p19477_p6  ;;  %p18882_p2 = por %p18881_p11, %p18880_p9 }
  0xc9   : > { %p18876_p10 = pneg %p18875_p8 }
  0xcb   : > { %p18883_p12 = pnand %p18882_p2, %p18876_p10 }
  0xcd   : > { %18886 = shalt.err (!%p18883_p12)
}
  0xce   : > { %18422 = dma.hbm_to_vmem [thread:$0]  (!%p19471_p5), %s19305_s9, 1536, %s740_s11, [#allocation3]  }
  0xcf   : > { %s18898_s2 = scalar_lea.vmem %s761_s10, 6144  ;;  %p18906_p4 = scmp.lt.s32.totalorder %s761_s10, %s761_s10 }
  0xd0   : > { %p18899_p13 = scmp.ne.s32.totalorder %s761_s10, %s18898_s2  ;;  %p18907_p7 = scmp.lt.s32.totalorder %s18898_s2, %s18898_s2 }
  0xd2   : > { %p18901_p0 = pnand %p18899_p13, %p19477_p6  ;;  %p18908_p3 = por %p18907_p7, %p18906_p4 }
  0xd4   : > { %p18902_p1 = pneg %p18901_p0 }
  0xd6   : > { %p18909_p8 = pnand %p18908_p3, %p18902_p1 }
  0xd8   : > { %18912 = shalt.err (!%p18909_p8)
}
  0xd9   : > { %s21690_s13 = smov 8   ;;  %s19278_s0 = smov [#allocation9]  }
  0xda   : > { %18428 = dma.hbm_to_vmem [thread:$0]  (!%p19471_p5), %s19315_s17, 6144, %s761_s10, [#allocation5], %s21685_s18, %s21685_s18, %s21690_s13  }
  0xdb   : > { %s787_s6 = sshll.u32 %s19278_s0, 4  ;;  %s19279_s11 = smov [#allocation12]   ;;  %s788_s6 = int_to_ptr.vmem [resolvable:$true] %s787_s6 }
  0xdc   : > { %s810_s22 = sshll.u32 %s19279_s11, 4  ;;  %s18924_s28 = scalar_lea.vmem %s788_s6, 16  ;;  %s811_s22 = int_to_ptr.vmem [resolvable:$true] %s810_s22 }
  0xdd   : > { %p18925_p10 = scmp.ne.s32.totalorder %s788_s6, %s18924_s28  ;;  %s18931_s2 = scalar_lea.vmem %s788_s6, 32 }
  0xde   : > { %p18932_p2 = scmp.lt.s32.totalorder %s788_s6, %s788_s6  ;;  %p18933_p12 = scmp.lt.s32.totalorder %s18931_s2, %s18924_s28 }
  0xdf   : > { %p18927_p9 = pnand %p18925_p10, %p19477_p6 }
  0xe0   : > { %p18934_p13 = por %p18933_p12, %p18932_p2 }
  0xe1   : > { %p18928_p11 = pneg %p18927_p9 }
  0xe3   : > { %p18935_p0 = pnand %p18934_p13, %p18928_p11 }
  0xe5   : > { %18938 = shalt.err (!%p18935_p0)
}
  0xe6   : > { %18434 = dma.hbm_to_vmem [thread:$0]  (!%p19471_p5), %s19325_s25, 16, %s788_s6, [#allocation8]  }
  0xe7   : > { %s18950_s10 = scalar_lea.vmem %s811_s22, 12288  ;;  %p18958_p3 = scmp.lt.s32.totalorder %s811_s22, %s811_s22 }
  0xe8   : > { %p18951_p1 = scmp.ne.s32.totalorder %s811_s22, %s18950_s10  ;;  %p18959_p8 = scmp.lt.s32.totalorder %s18950_s10, %s18950_s10 }
  0xea   : > { %p18953_p4 = pnand %p18951_p1, %p19477_p6  ;;  %p18960_p10 = por %p18959_p8, %p18958_p3 }
  0xec   : > { %p18954_p7 = pneg %p18953_p4 }
  0xee   : > { %p18961_p9 = pnand %p18960_p10, %p18954_p7 }
  0xf0   : > { %18964 = shalt.err (!%p18961_p9)
}
  0xf1   : > { %s21691_s3 = sld [smem:[#allocation50_spill]]  ;;  %s19280_s0 = smov [#allocation15]  }
  0xf2   : > { %s834_s6 = sshll.u32 %s19280_s0, 4  ;;  %s19281_s11 = smov [#allocation18]   ;;  %s835_s6 = int_to_ptr.vmem [resolvable:$true] %s834_s6 }
  0xf3   : > { %s861_s28 = sshll.u32 %s19281_s11, 4  ;;  %s18976_s2 = scalar_lea.vmem %s835_s6, 1536  ;;  %s862_s28 = int_to_ptr.vmem [resolvable:$true] %s861_s28 }
  0xf4   : > { %p18977_p11 = scmp.ne.s32.totalorder %s835_s6, %s18976_s2  ;;  %p18984_p13 = scmp.lt.s32.totalorder %s835_s6, %s835_s6 }
  0xf5   : > { %p18985_p0 = scmp.lt.s32.totalorder %s18976_s2, %s18976_s2 }
  0xf6   : > { %p18979_p2 = pnand %p18977_p11, %p19477_p6 }
  0xf7   : > { %18440 = dma.hbm_to_vmem [thread:$0]  (!%p19471_p5), %s21691_s3, 12288, %s811_s22, [#allocation11], %s21689_s8, %s21689_s8, %s21688_s26  }
  0xf8   : > { %p18980_p12 = pneg %p18979_p2  ;;  %p18986_p1 = por %p18985_p0, %p18984_p13 }
  0xfa   : > { %p18987_p4 = pnand %p18986_p1, %p18980_p12 }
  0xfc   : > { %18990 = shalt.err (!%p18987_p4)
}
  0xfd   : > { %s21692_s22 = sld [smem:[#allocation52_spill]]  ;;  %s19002_s10 = scalar_lea.vmem %s862_s28, 96 }
  0xfe   : > { %p19003_p7 = scmp.ne.s32.totalorder %s862_s28, %s19002_s10  ;;  %p19010_p10 = scmp.lt.s32.totalorder %s862_s28, %s862_s28 }
  0xff   : > { %p19011_p9 = scmp.lt.s32.totalorder %s19002_s10, %s19002_s10 }
 0x100   : > { %p19005_p3 = pnand %p19003_p7, %p19477_p6 }
 0x101   : > { %p19012_p11 = por %p19011_p9, %p19010_p10 }
 0x102   : > { %p19006_p8 = pneg %p19005_p3 }
 0x103   : > { %18446 = dma.hbm_to_vmem [thread:$0]  (!%p19471_p5), %s21692_s22, 1536, %s835_s6, [#allocation14], %s21685_s18, %s21685_s18, %s21690_s13  }
 0x104   : > { %p19013_p2 = pnand %p19012_p11, %p19006_p8 }
 0x106   : > { %19016 = shalt.err (!%p19013_p2)
}
 0x107   : > { %s19282_s0 = smov 16   ;;  %s21693_s11 = sld [smem:[#allocation54_spill]] }
 0x108   : > { %s19283_s2 = smov 1   ;;  %s19284_s3 = smov [#allocation21]  }
 0x109   : > { %s888_s18 = sshll.u32 %s19284_s3, 4  ;;  %s19285_s13 = smov [#allocation24]   ;;  %s889_s18 = int_to_ptr.vmem [resolvable:$true] %s888_s18 }
 0x10a   : > { %s912_s6 = sshll.u32 %s19285_s13, 4  ;;  %s19028_s22 = scalar_lea.vmem %s889_s18, 16  ;;  %s913_s6 = int_to_ptr.vmem [resolvable:$true] %s912_s6 }
 0x10b   : > { %p19029_p12 = scmp.ne.s32.totalorder %s889_s18, %s19028_s22  ;;  %s19035_s10 = scalar_lea.vmem %s889_s18, 32 }
 0x10c   : > { %p19036_p1 = scmp.lt.s32.totalorder %s889_s18, %s889_s18  ;;  %p19037_p4 = scmp.lt.s32.totalorder %s19035_s10, %s19028_s22 }
 0x10d   : > { %18452 = dma.hbm_to_vmem [thread:$0]  (!%p19471_p5), %s21693_s11, 96, %s862_s28, [#allocation17], %s19282_s0, %s19282_s0, %s19283_s2  }
 0x10e   : > { %p19031_p13 = pnand %p19029_p12, %p19477_p6  ;;  %p19038_p7 = por %p19037_p4, %p19036_p1 }
 0x110   : > { %p19032_p0 = pneg %p19031_p13 }
 0x112   : > { %p19039_p3 = pnand %p19038_p7, %p19032_p0 }
 0x114   : > { %19042 = shalt.err (!%p19039_p3)
}
 0x115   : > { %s21694_s4 = sld [smem:[#allocation56_spill]]  ;;  %s19054_s3 = scalar_lea.vmem %s913_s6, 64 }
 0x116   : > { %p19055_p8 = scmp.ne.s32.totalorder %s913_s6, %s19054_s3  ;;  %p19062_p11 = scmp.lt.s32.totalorder %s913_s6, %s913_s6 }
 0x117   : > { %p19063_p2 = scmp.lt.s32.totalorder %s19054_s3, %s19054_s3 }
 0x118   : > { %p19057_p10 = pnand %p19055_p8, %p19477_p6 }
 0x119   : > { %p19064_p12 = por %p19063_p2, %p19062_p11 }
 0x11a   : > { %p19058_p9 = pneg %p19057_p10 }
 0x11b   : > { %18458 = dma.hbm_to_vmem [thread:$0]  (!%p19471_p5), %s21694_s4, 16, %s889_s18, [#allocation20]  }
 0x11c   : > { %p19065_p13 = pnand %p19064_p12, %p19058_p9 }
 0x11e   : > { %19068 = shalt.err (!%p19065_p13)
}
 0x11f   : > { %s21695_s28 = sld [smem:[#allocation57_spill]]  ;;  %s19286_s0 = smov [#allocation27]  }
 0x120   : > { %s936_s11 = sshll.u32 %s19286_s0, 4  ;;  %s19287_s4 = smov [#allocation30]   ;;  %s937_s11 = int_to_ptr.vmem [resolvable:$true] %s936_s11 }
 0x121   : > { %s963_s2 = sshll.u32 %s19287_s4, 4  ;;  %s19080_s18 = scalar_lea.vmem %s937_s11, 128  ;;  %s964_s2 = int_to_ptr.vmem [resolvable:$true] %s963_s2 }
 0x122   : > { %p19081_p0 = scmp.ne.s32.totalorder %s937_s11, %s19080_s18  ;;  %p19088_p7 = scmp.lt.s32.totalorder %s937_s11, %s937_s11 }
 0x123   : > { %p19089_p3 = scmp.lt.s32.totalorder %s19080_s18, %s19080_s18 }
 0x124   : > { %p19083_p1 = pnand %p19081_p0, %p19477_p6 }
 0x125   : > { %18464 = dma.hbm_to_vmem [thread:$0]  (!%p19471_p5), %s21695_s28, 64, %s913_s6, [#allocation23]  }
 0x126   : > { %p19084_p4 = pneg %p19083_p1  ;;  %p19090_p8 = por %p19089_p3, %p19088_p7 }
 0x128   : > { %p19091_p10 = pnand %p19090_p8, %p19084_p4 }
 0x12a   : > { %19094 = shalt.err (!%p19091_p10)
}
 0x12b   : > { %s21696_s13 = sld [smem:[#allocation59_spill]]  ;;  %s19106_s6 = scalar_lea.vmem %s964_s2, 16 }
 0x12c   : > { %p19107_p9 = scmp.ne.s32.totalorder %s964_s2, %s19106_s6  ;;  %s19113_s22 = scalar_lea.vmem %s964_s2, 32 }
 0x12d   : > { %p19114_p12 = scmp.lt.s32.totalorder %s964_s2, %s964_s2  ;;  %p19115_p13 = scmp.lt.s32.totalorder %s19113_s22, %s19106_s6 }
 0x12e   : > { %p19109_p11 = pnand %p19107_p9, %p19477_p6 }
 0x12f   : > { %p19116_p0 = por %p19115_p13, %p19114_p12 }
 0x130   : > { %p19110_p2 = pneg %p19109_p11 }
 0x131   : > { %18470 = dma.hbm_to_vmem [thread:$0]  (!%p19471_p5), %s21696_s13, 128, %s937_s11, [#allocation26]  }
 0x132   : > { %p19117_p1 = pnand %p19116_p0, %p19110_p2 }
 0x134   : > { %19120 = shalt.err (!%p19117_p1)
}
 0x135   : > { %s21697_s10 = sld [smem:[#allocation61_spill]]  ;;  %s19288_s3 = smov [#allocation33]  }
 0x136   : > { %s993_s28 = sshll.u32 %s19288_s3, 4  ;;  %s19289_s0 = smov [#allocation34]   ;;  %s994_s28 = int_to_ptr.vmem [resolvable:$true] %s993_s28 }
 0x137   : > { %s1007_s11 = sshll.u32 %s19289_s0, 4  ;;  %s19132_s4 = scalar_lea.vmem %s994_s28, 3072  ;;  %s1008_s11 = int_to_ptr.vmem [resolvable:$true] %s1007_s11 }
 0x138   : > { %p19133_p4 = scmp.ne.s32.totalorder %s994_s28, %s19132_s4  ;;  %p19140_p8 = scmp.lt.s32.totalorder %s994_s28, %s994_s28 }
 0x139   : > { %p19141_p10 = scmp.lt.s32.totalorder %s19132_s4, %s19132_s4 }
 0x13a   : > { %p19135_p7 = pnand %p19133_p4, %p19477_p6 }
 0x13b   : > { %18476 = dma.hbm_to_vmem [thread:$0]  (!%p19471_p5), %s21697_s10, 16, %s964_s2, [#allocation29]  }
 0x13c   : > { %p19136_p3 = pneg %p19135_p7  ;;  %p19142_p9 = por %p19141_p10, %p19140_p8 }
 0x13e   : > { %p19143_p11 = pnand %p19142_p9, %p19136_p3 }
 0x140   : > { %19146 = shalt.err (!%p19143_p11)
}
 0x141   : > { %18482 = dma.hbm_to_vmem [thread:$0]  (!%p19471_p5), %s19430_s19, 3072, %s994_s28, [#allocation32], %s21689_s8, %s21689_s8, %s21688_s26  }
 0x142   : > { %s19158_s2 = scalar_lea.vmem %s1008_s11, 16  ;;  %s19165_s18 = scalar_lea.vmem %s1008_s11, 32 }
 0x143   : > { %p19159_p2 = scmp.ne.s32.totalorder %s1008_s11, %s19158_s2  ;;  %p19166_p0 = scmp.lt.s32.totalorder %s1008_s11, %s1008_s11 }
 0x144   : > { %p19167_p1 = scmp.lt.s32.totalorder %s19165_s18, %s19158_s2 }
 0x145   : > { %p19161_p12 = pnand %p19159_p2, %p19477_p6 }
 0x146   : > { %p19168_p4 = por %p19167_p1, %p19166_p0 }
 0x147   : > { %p19162_p13 = pneg %p19161_p12 }
 0x149   : > { %p19169_p7 = pnand %p19168_p4, %p19162_p13 }
 0x14b   : > { %19172 = shalt.err (!%p19169_p7)
}
 0x14c   : > { %18485 = dma.hbm_to_vmem [thread:$0]  (!%p19471_p5), %s19435_s5, 16, %s1008_s11, [#allocation35]  }
 0x14d   : > { %p21698_p3 = scmp.ne.s32.totalorder %s21680_s16, 0 }
 0x14e   : > { %p21699_p8 = scmp.ne.s32.totalorder (!%p21698_p3), %s21679_s15, 0 }
 0x14f   : > { %1032 = sbr.rel (%p21698_p3) target bundleno = 4695 (0x1257), region = 136 }
 0x154   : > { %19178 = dma.done.wait (%p21699_p8), [#allocation3], 1536  }
 0x155   : > { %19180 = vsyncadd (%p21699_p8), [#allocation3], 4294965760 }
 0x156   : > { %19182 = dma.done.wait (%p21699_p8), [#allocation5], 6160  }
 0x157   : > { %19184 = vsyncadd (%p21699_p8), [#allocation5], 4294961136 }
 0x158   : > { %19186 = dma.done.wait (%p21699_p8), [#allocation8], 3088  }
 0x159   : > { %19188 = vsyncadd (%p21699_p8), [#allocation8], 4294964208 }
 0x15a   : > { %19190 = dma.done.wait (%p21699_p8), [#allocation11], 15360  }
 0x15b   : > { %19192 = vsyncadd (%p21699_p8), [#allocation11], 4294951936 }
 0x15c   : > { %19194 = dma.done.wait (%p21699_p8), [#allocation14], 1552  }
 0x15d   : > { %19196 = vsyncadd (%p21699_p8), [#allocation14], 4294965744 }
 0x15e   : > { %19198 = dma.done.wait (%p21699_p8), [#allocation17], 160  }
 0x15f   : > { %19200 = vsyncadd (%p21699_p8), [#allocation17], 4294967136 }
 0x160   : > { %19202 = dma.done.wait (%p21699_p8), [#allocation20], 8208  }
 0x161   : > { %19204 = vsyncadd (%p21699_p8), [#allocation20], 4294959088 }
 0x162   : > { %19206 = dma.done.wait (%p21699_p8), [#allocation23], 2112  }
 0x163   : > { %19208 = vsyncadd (%p21699_p8), [#allocation23], 4294965184 }
 0x164   : > { %19210 = dma.done.wait (%p21699_p8), [#allocation26], 49280  }
 0x165   : > { %19212 = vsyncadd (%p21699_p8), [#allocation26], 4294918016 }
 0x166   : > { %19214 = dma.done.wait (%p21699_p8), [#allocation29], 12304  }
 0x167   : > { %19216 = vsyncadd (%p21699_p8), [#allocation29], 4294954992 }
 0x168   : > { %19218 = dma.done.wait (%p21699_p8), [#allocation32], 3088  }
 0x169   : > { %19220 = vsyncadd (%p21699_p8), [#allocation32], 4294964208 }
 0x16a   : > { %19222 = dma.done.wait (%p21699_p8), [#allocation35], 16  }
 0x16b   : > { %19224 = vsyncadd (%p21699_p8), [#allocation35], 4294967280  ;;  %s21700_s8 = sadd.s32 4294967295, %s19227_s7   ;;  %s21701_s16 = sld [smem:[#allocation48_spill]]  ;;  %v19290_v0 = vmov 0.0   ;;  %v1212_v1 = vld [vmem:[#allocation2 + $0x8] sm:$0xff] }
 0x16c   : > { %s1192_s23 = smul.u32 7, %s21700_s8  ;;  %1309 = vmatprep.mubr.f32.mxu0 %v19290_v0  ;;  %1416 = vmatprep.mubr.f32.mxu1 %v19290_v0  ;;  %v1211_v2 = vld [vmem:[#allocation2] sm:$0xff]  ;;  %vm1223_vm0 = vcmask 64512   ;;  %v1214_v3 = vld [vmem:[#allocation2 + $0x18] sm:$0xff]  ;;  %v1213_v5 = vld [vmem:[#allocation2 + $0x10] sm:$0xff]  ;;  %vm1896_vm1 = vcmask 457728  }
 0x16d   : > { %1275 = vmatprep.subr.mxu0 %v1212_v1  ;;  %1382 = vmatprep.subr.mxu1 %v1214_v3  ;;  %v1216_v6 = vld [vmem:[#allocation2 + $0x28] sm:$0xff]  ;;  %v1215_v7 = vld [vmem:[#allocation2 + $0x20] sm:$0xff]  ;;  %v1218_v9 = vld [vmem:[#allocation2 + $0x38] sm:$0xff]  ;;  %vm3190_vm2 = vcmask 130048   ;;  %vm3742_vm3 = vcmask 203776   ;;  %vm3749_vm4 = vcmask 1040384  }
 0x16e   : > { %p1193_p5 = scmp.lt.s32.totalorder %s1192_s23, 13  ;;  %1276 = vmatpush1.msra.mxu0 %v1211_v2  ;;  %1383 = vmatpush1.msra.mxu1 %v1213_v5  ;;  %v1217_v10 = vld [vmem:[#allocation2 + $0x30] sm:$0xff]  ;;  %v1220_v11 = vld [vmem:[#allocation2 + $0x48] sm:$0xff]  ;;  %v1222_v12 = vld [vmem:[#allocation2 + $0x58] sm:$0xff]  ;;  %vm4909_vm5 = vcmask 523264   ;;  %vm19291_vm6 = vmmov 0  }
 0x16f   : > { %1489 = vmatprep.subr.mxu0 %v1216_v6  ;;  %1596 = vmatprep.subr.mxu1 %v1218_v9  ;;  %v1219_v18 = vld [vmem:[#allocation2 + $0x40] sm:$0xff]  ;;  %v1221_v19 = vld [vmem:[#allocation2 + $0x50] sm:$0xff]  ;;  %vm5385_vm7 = vcmask 1043456   ;;  %vm5381_vm8 = vcmask 97280   ;;  %s21702_s26 = sld [smem:[#allocation53_spill]]  ;;  %vm7387_vm9 = vcmask 1045504  }
 0x170   : > { %s21708_s23 = smov (!%p1193_p5, %s1192_s23), 13  ;;  %v1887_v20 = vld [vmem:[#allocation6] sm:$0xff]  ;;  %v1888_v59 = vld [vmem:[#allocation6 + $0x8] sm:$0xff]  ;;  %vm7383_vm10 = vcmask 48128   ;;  %vm8620_vm11 = vcmask 261120   ;;  %s21703_s13 = sld [smem:[#allocation60_spill]] }
 0x171   : > { %s16115_s1 = sshll.u32 %s21708_s23, 3  ;;  %v1892_v21 = vld [vmem:[#allocation6 + $0x20] sm:$0xff]  ;;  %v1893_v62 = vld [vmem:[#allocation6 + $0x28] sm:$0xff]  ;;  %vm9579_vm12 = vcmask 7168   ;;  %s21704_s6 = sld [smem:[#allocation62_spill]]  ;;  %vm12220_vm13 = vcmask 105472  }
 0x172   : > { %s19680_s15 = scalar_lea.vmem %s21701_s16, %s16115_s1  ;;  %s21705_s22 = sld [smem:[#allocation63_spill]]  ;;  %vm12233_vm14 = vcmask 1044480   ;;  %vm14130_vm15 = vcmask 1042432  }
 0x173   : > { %v19683_v4 = vld [vmem:[%s19680_s15] sm:$0xff]  ;;  %v19689_v8 = vld [vmem:[%s19680_s15 + $0x8] sm:$0xff]  ;;  %v19698_v13 = vld [vmem:[%s19680_s15 + $0x10] sm:$0xff]  ;;  %s21706_s10 = sld [smem:[#allocation64_spill]]  ;;  %s21613_s3 = scalar_lea.vmem %s19445_s12, %s16115_s1 }
 0x174   : > { %16117 = vmatmul.mubr.msk.f32.vlgmr.msra.gmra.mxu0 %vm1223_vm0, %v19683_v4  ;;  %16124 = vmatmul.mubr.msk.f32.vlgmr.msra.gmra.mxu1 %vm1223_vm0, %v19683_v4  ;;  %v19707_v14 = vld [vmem:[%s19680_s15 + $0x18] sm:$0xff]  ;;  %v19716_v15 = vld [vmem:[%s19680_s15 + $0x20] sm:$0xff]  ;;  %v19725_v16 = vld [vmem:[%s19680_s15 + $0x28] sm:$0xff] }
 0x175   : > { %1315 = vmatprep.mubr.f32.mxu0 %v19290_v0  ;;  %1422 = vmatprep.mubr.f32.mxu1 %v19290_v0  ;;  %v19734_v17 = vld [vmem:[%s19680_s15 + $0x30] sm:$0xff] }
 0x176   : > { %1490 = vmatpush1.msra.mxu0 %v1215_v7  ;;  %1597 = vmatpush1.msra.mxu1 %v1217_v10  ;;  %v1894_v10 = vld [vmem:[#allocation6 + $0x30] sm:$0xff] }
 0x177   : > { %1703 = vmatprep.subr.mxu0 %v1220_v11  ;;  %1810 = vmatprep.subr.mxu1 %v1222_v12  ;;  %v1895_v11 = vld [vmem:[#allocation6 + $0x38] sm:$0x1] }
 0x178   : > { %16118 = vmatmul.mubr.msk.f32.gmra.mxu0 %vm1223_vm0, %v19689_v8  ;;  %16125 = vmatmul.mubr.msk.f32.gmra.mxu1 %vm1223_vm0, %v19689_v8 }
 0x179   : > { %1321 = vmatprep.mubr.f32.mxu0 %v19290_v0  ;;  %1428 = vmatprep.mubr.f32.mxu1 %v19290_v0 }
 0x17c   : > { %16119 = vmatmul.mubr.msk.f32.gmra.mxu0 %vm1223_vm0, %v19698_v13  ;;  %16126 = vmatmul.mubr.msk.f32.gmra.mxu1 %vm1223_vm0, %v19698_v13 }
 0x17d   : > { %1327 = vmatprep.mubr.f32.mxu0 %v19290_v0  ;;  %1434 = vmatprep.mubr.f32.mxu1 %v19290_v0 }
 0x180   : > { %16120 = vmatmul.mubr.msk.f32.gmra.mxu0 %vm1223_vm0, %v19707_v14  ;;  %16127 = vmatmul.mubr.msk.f32.gmra.mxu1 %vm1223_vm0, %v19707_v14 }
 0x181   : > { %1333 = vmatprep.mubr.f32.mxu0 %v19290_v0  ;;  %1440 = vmatprep.mubr.f32.mxu1 %v19290_v0 }
 0x184   : > { %16121 = vmatmul.mubr.msk.f32.gmra.mxu0 %vm1223_vm0, %v19716_v15  ;;  %16128 = vmatmul.mubr.msk.f32.gmra.mxu1 %vm1223_vm0, %v19716_v15 }
 0x185   : > { %1339 = vmatprep.mubr.f32.mxu0 %v19290_v0  ;;  %1446 = vmatprep.mubr.f32.mxu1 %v19290_v0 }
 0x188   : > { %16122 = vmatmul.mubr.msk.f32.gmra.mxu0 %vm1223_vm0, %v19725_v16  ;;  %16129 = vmatmul.mubr.msk.f32.gmra.mxu1 %vm1223_vm0, %v19725_v16 }
 0x189   : > { %1345 = vmatprep.mubr.f32.mxu0 %v19290_v0  ;;  %1452 = vmatprep.mubr.f32.mxu1 %v19290_v0 }
 0x18c   : > { %16123 = vmatmul.mubr.msk.f32.gmra.mxu0 %vm1223_vm0, %v19734_v17  ;;  %16130 = vmatmul.mubr.msk.f32.gmra.mxu1 %vm1223_vm0, %v19734_v17 }
 0x18d   : > { %1523 = vmatprep.mubr.f32.mxu0 %v19290_v0  ;;  %1630 = vmatprep.mubr.f32.mxu1 %v19290_v0 }
 0x190   : > { %16131 = vmatmul.mubr.msk.f32.vlgmr.msra.gmra.mxu0 %vm1223_vm0, %v19683_v4  ;;  %16138 = vmatmul.mubr.msk.f32.vlgmr.msra.gmra.mxu1 %vm1223_vm0, %v19683_v4 }
 0x191   : > { %1529 = vmatprep.mubr.f32.mxu0 %v19290_v0  ;;  %1704 = vmatpush1.msra.mxu0 %v1219_v18  ;;  %v2092_v18 = vld [vmem:[#allocation6 + $0x40] sm:$0xff] }
 0x192   : > { %1636 = vmatprep.mubr.f32.mxu1 %v19290_v0  ;;  %1811 = vmatpush1.msra.mxu1 %v1221_v19 }
 0x194   : > { %16132 = vmatmul.mubr.msk.f32.gmra.mxu0 %vm1223_vm0, %v19689_v8  ;;  %16139 = vmatmul.mubr.msk.f32.gmra.mxu1 %vm1223_vm0, %v19689_v8 }
 0x195   : > { %1535 = vmatprep.mubr.f32.mxu0 %v19290_v0  ;;  %1642 = vmatprep.mubr.f32.mxu1 %v19290_v0 }
 0x198   : > { %16133 = vmatmul.mubr.msk.f32.gmra.mxu0 %vm1223_vm0, %v19698_v13  ;;  %16140 = vmatmul.mubr.msk.f32.gmra.mxu1 %vm1223_vm0, %v19698_v13 }
 0x199   : > { %1541 = vmatprep.mubr.f32.mxu0 %v19290_v0  ;;  %1648 = vmatprep.mubr.f32.mxu1 %v19290_v0 }
 0x19c   : > { %16134 = vmatmul.mubr.msk.f32.gmra.mxu0 %vm1223_vm0, %v19707_v14  ;;  %16141 = vmatmul.mubr.msk.f32.gmra.mxu1 %vm1223_vm0, %v19707_v14 }
 0x19d   : > { %1547 = vmatprep.mubr.f32.mxu0 %v19290_v0  ;;  %1654 = vmatprep.mubr.f32.mxu1 %v19290_v0 }
 0x1a0   : > { %16135 = vmatmul.mubr.msk.f32.gmra.mxu0 %vm1223_vm0, %v19716_v15  ;;  %16142 = vmatmul.mubr.msk.f32.gmra.mxu1 %vm1223_vm0, %v19716_v15 }
 0x1a1   : > { %1553 = vmatprep.mubr.f32.mxu0 %v19290_v0  ;;  %1660 = vmatprep.mubr.f32.mxu1 %v19290_v0 }
 0x1a4   : > { %16136 = vmatmul.mubr.msk.f32.gmra.mxu0 %vm1223_vm0, %v19725_v16  ;;  %16143 = vmatmul.mubr.msk.f32.gmra.mxu1 %vm1223_vm0, %v19725_v16 }
 0x1a5   : > { %1559 = vmatprep.mubr.f32.mxu0 %v19290_v0  ;;  %1666 = vmatprep.mubr.f32.mxu1 %v19290_v0 }
 0x1a8   : > { %16137 = vmatmul.mubr.msk.f32.gmra.mxu0 %vm1223_vm0, %v19734_v17  ;;  %16144 = vmatmul.mubr.msk.f32.gmra.mxu1 %vm1223_vm0, %v19734_v17 }
 0x1a9   : > { %1737 = vmatprep.mubr.f32.mxu0 %v19290_v0  ;;  %1844 = vmatprep.mubr.f32.mxu1 %v19290_v0 }
 0x1ac   : > { %16145 = vmatmul.mubr.msk.f32.vlgmr.msra.gmra.mxu0 %vm1223_vm0, %v19683_v4  ;;  %16152 = vmatmul.mubr.msk.f32.vlgmr.msra.gmra.mxu1 %vm1223_vm0, %v19683_v4 }
 0x1ad   : > { %1743 = vmatprep.mubr.f32.mxu0 %v19290_v0  ;;  %1850 = vmatprep.mubr.f32.mxu1 %v19290_v0 }
 0x1b0   : > { %16146 = vmatmul.mubr.msk.f32.gmra.mxu0 %vm1223_vm0, %v19689_v8  ;;  %16153 = vmatmul.mubr.msk.f32.gmra.mxu1 %vm1223_vm0, %v19689_v8 }
 0x1b1   : > { %1749 = vmatprep.mubr.f32.mxu0 %v19290_v0  ;;  %1856 = vmatprep.mubr.f32.mxu1 %v19290_v0 }
 0x1b4   : > { %16147 = vmatmul.mubr.msk.f32.gmra.mxu0 %vm1223_vm0, %v19698_v13  ;;  %16154 = vmatmul.mubr.msk.f32.gmra.mxu1 %vm1223_vm0, %v19698_v13 }
 0x1b5   : > { %1755 = vmatprep.mubr.f32.mxu0 %v19290_v0  ;;  %1862 = vmatprep.mubr.f32.mxu1 %v19290_v0 }
 0x1b8   : > { %16148 = vmatmul.mubr.msk.f32.gmra.mxu0 %vm1223_vm0, %v19707_v14  ;;  %16155 = vmatmul.mubr.msk.f32.gmra.mxu1 %vm1223_vm0, %v19707_v14  ;;  %v1889_v14 = vld [vmem:[#allocation6 + $0x10] sm:$0xff] }
 0x1b9   : > { %1761 = vmatprep.mubr.f32.mxu0 %v19290_v0  ;;  %1868 = vmatprep.mubr.f32.mxu1 %v19290_v0 }
 0x1bc   : > { %16149 = vmatmul.mubr.msk.f32.gmra.mxu0 %vm1223_vm0, %v19716_v15  ;;  %16156 = vmatmul.mubr.msk.f32.gmra.mxu1 %vm1223_vm0, %v19716_v15  ;;  %v1890_v15 = vld [vmem:[#allocation6 + $0x18] sm:$0x1] }
 0x1bd   : > { %1767 = vmatprep.mubr.f32.mxu0 %v19290_v0  ;;  %1874 = vmatprep.mubr.f32.mxu1 %v19290_v0 }
 0x1c0   : > { %16150 = vmatmul.mubr.msk.f32.gmra.mxu0 %vm1223_vm0, %v19725_v16  ;;  %16157 = vmatmul.mubr.msk.f32.gmra.mxu1 %vm1223_vm0, %v19725_v16 }
 0x1c1   : > { %1773 = vmatprep.mubr.f32.mxu0 %v19290_v0  ;;  %1880 = vmatprep.mubr.f32.mxu1 %v19290_v0 }
 0x1c4   : > { %16151 = vmatmul.mubr.msk.f32.gmra.mxu0 %vm1223_vm0, %v19734_v17  ;;  %16158 = vmatmul.mubr.msk.f32.gmra.mxu1 %vm1223_vm0, %v19734_v17  ;;  %vm14108_vm0 = vcmask 220160  }
 0x1c5   : > { %17351 = vmatprep.mubr.msk.f32.mxu1 %vm1896_vm1, %v1887_v20  ;;  %17331 = vmatprep.mubr.msk.f32.mxu0 %vm1896_vm1, %v1892_v21  ;;  %v2198_v21 = vld [vmem:[#allocation6 + $0x60] sm:$0xff] }
 0x234   : > { %v19829_v22 = vpop.f32.mrf.mxu0  ;;  %v19831_v23 = vpop.f32.mrf.mxu1 }
 0x236   : > { %v19833_v24 = vpop.f32.mrf.mxu0  ;;  %v19835_v25 = vpop.f32.mrf.mxu1 }
 0x238   : > { %v1317_v26 = vpop.f32.mrf.mxu0  ;;  %v19837_v27 = vpop.f32.mrf.mxu1 }
 0x23a   : > { %v1319_v28 = vpop.f32.mrf.mxu0  ;;  %v19839_v29 = vpop.f32.mrf.mxu1 }
 0x23c   : > { %v1323_v30 = vpop.f32.mrf.mxu0  ;;  %v19841_v31 = vpop.f32.mrf.mxu1 }
 0x23e   : > { %v1325_v32 = vpop.f32.mrf.mxu0  ;;  %v19843_v33 = vpop.f32.mrf.mxu1 }
 0x240   : > { %v1329_v34 = vpop.f32.mrf.mxu0  ;;  %v19845_v35 = vpop.f32.mrf.mxu1 }
 0x242   : > { %v1331_v36 = vpop.f32.mrf.mxu0  ;;  %v19847_v37 = vpop.f32.mrf.mxu1 }
 0x244   : > { %v1335_v38 = vpop.f32.mrf.mxu0  ;;  %v19849_v39 = vpop.f32.mrf.mxu1 }
 0x246   : > { %v1337_v40 = vpop.f32.mrf.mxu0  ;;  %v19851_v41 = vpop.f32.mrf.mxu1 }
 0x248   : > { %v1341_v42 = vpop.f32.mrf.mxu0  ;;  %v19853_v43 = vpop.f32.mrf.mxu1 }
 0x24a   : > { %v1343_v44 = vpop.f32.mrf.mxu0  ;;  %v1450_v45 = vpop.f32.mrf.mxu1 }
 0x24c   : > { %v1347_v46 = vpop.f32.mrf.mxu0  ;;  %v1454_v47 = vpop.f32.mrf.mxu1 }
 0x24d   : > { %17337 = vmatprep.subr.mxu1 %v1347_v46 }
 0x24e   : > { %v1349_v48 = vpop.f32.mrf.mxu0  ;;  %17338 = vmatpush3.msra.mxu1 %v1347_v46  ;;  %v1456_v49 = vpop.f32.mrf.mxu1 }
 0x24f   : > { %17317 = vmatprep.subr.mxu0 %v1349_v48  ;;  %17339 = vmatprep.subr.mxu1 %v1341_v42 }
 0x250   : > { %v19855_v50 = vpop.f32.mrf.mxu0  ;;  %17318 = vmatpush3.msra.mxu0 %v1349_v48  ;;  %17340 = vmatpush3.msra.mxu1 %v1341_v42  ;;  %v19857_v51 = vpop.f32.mrf.mxu1  ;;  %v2305_v42 = vld [vmem:[#allocation6 + $0x88] sm:$0xff]  ;;  %v2306_v48 = vld [vmem:[#allocation6 + $0x90] sm:$0xff] }
 0x251   : > { %17319 = vmatprep.subr.mxu0 %v1343_v44  ;;  %17341 = vmatprep.subr.mxu1 %v1335_v38 }
 0x252   : > { %v19859_v52 = vpop.f32.mrf.mxu0  ;;  %17320 = vmatpush3.msra.mxu0 %v1343_v44  ;;  %17342 = vmatpush3.msra.mxu1 %v1335_v38  ;;  %v19861_v53 = vpop.f32.mrf.mxu1  ;;  %v2410_v44 = vld [vmem:[#allocation6 + $0xa0] sm:$0xff] }
 0x253   : > { %17321 = vmatprep.subr.mxu0 %v1337_v40  ;;  %17343 = vmatprep.subr.mxu1 %v1329_v34 }
 0x254   : > { %v19863_v54 = vpop.f32.mrf.mxu0  ;;  %17322 = vmatpush3.msra.mxu0 %v1337_v40  ;;  %17344 = vmatpush3.msra.mxu1 %v1329_v34  ;;  %v19865_v55 = vpop.f32.mrf.mxu1  ;;  %v2201_v34 = vld [vmem:[#allocation6 + $0x78] sm:$0x1] }
 0x255   : > { %17323 = vmatprep.subr.mxu0 %v1331_v36  ;;  %17345 = vmatprep.subr.mxu1 %v1323_v30 }
 0x256   : > { %v19867_v56 = vpop.f32.mrf.mxu0  ;;  %17324 = vmatpush3.msra.mxu0 %v1331_v36  ;;  %17346 = vmatpush3.msra.mxu1 %v1323_v30  ;;  %v19869_v57 = vpop.f32.mrf.mxu1  ;;  %v2095_v30 = vld [vmem:[#allocation6 + $0x58] sm:$0x1] }
 0x257   : > { %17325 = vmatprep.subr.mxu0 %v1325_v32  ;;  %17347 = vmatprep.subr.mxu1 %v1317_v26 }
 0x258   : > { %v19871_v58 = vpop.f32.mrf.mxu0  ;;  %17326 = vmatpush3.msra.mxu0 %v1325_v32  ;;  %17348 = vmatpush3.msra.mxu1 %v1317_v26  ;;  %v19874_v60 = vpop.f32.mrf.mxu1 }
 0x259   : > { %17327 = vmatprep.subr.mxu0 %v1319_v28  ;;  %17349 = vmatprep.subr.mxu1 %v19829_v22 }
 0x25a   : > { %v19876_v61 = vpop.f32.mrf.mxu0  ;;  %17328 = vmatpush3.msra.mxu0 %v1319_v28  ;;  %17350 = vmatpush3.msra.mxu1 %v19829_v22  ;;  %v19880_v63 = vpop.f32.mrf.mxu1  ;;  %v2093_v22 = vld [vmem:[#allocation6 + $0x48] sm:$0xff] }
 0x25b   : > { %17329 = vmatprep.subr.mxu0 %v19833_v24  ;;  %17377 = vmatprep.subr.mxu1 %v1456_v49  ;;  %v2199_v28 = vld [vmem:[#allocation6 + $0x68] sm:$0xff] }
 0x25c   : > { %v19882_v1 = vpop.f32.mrf.mxu0  ;;  %17330 = vmatpush3.msra.mxu0 %v19833_v24  ;;  %17352 = vmatmul.mubr.msk.f32.vlgmr.msra.gmra.mxu1 %vm1896_vm1, %v1888_v59  ;;  %v19886_v2 = vpop.f32.mrf.mxu1 }
 0x25d   : > { %17378 = vmatpush3.msra.mxu1 %v1456_v49  ;;  %17357 = vmatprep.subr.mxu0 %v1454_v47  ;;  %v2307_v49 = vld [vmem:[#allocation6 + $0x98] sm:$0x1] }
 0x25e   : > { %17379 = vmatprep.subr.mxu1 %v1450_v45  ;;  %v19888_v3 = vpop.f32.mrf.mxu0  ;;  %17332 = vmatmul.mubr.msk.f32.vlgmr.msra.gmra.mxu0 %vm1896_vm1, %v1893_v62  ;;  %v19891_v4 = vpop.f32.mrf.mxu1 }
 0x25f   : > { %17358 = vmatpush3.msra.mxu0 %v1454_v47  ;;  %17380 = vmatpush3.msra.mxu1 %v1450_v45  ;;  %v2411_v45 = vld [vmem:[#allocation6 + $0xa8] sm:$0xff] }
 0x260   : > { %17359 = vmatprep.subr.mxu0 %v19853_v43  ;;  %17381 = vmatprep.subr.mxu1 %v19851_v41  ;;  %v19895_v5 = vpop.f32.mrf.mxu0  ;;  %v19899_v6 = vpop.f32.mrf.mxu1 }
 0x261   : > { %17360 = vmatpush3.msra.mxu0 %v19853_v43  ;;  %17382 = vmatpush3.msra.mxu1 %v19851_v41  ;;  %v2304_v41 = vld [vmem:[#allocation6 + $0x80] sm:$0xff] }
 0x262   : > { %17361 = vmatprep.subr.mxu0 %v19849_v39  ;;  %17383 = vmatprep.subr.mxu1 %v19847_v37  ;;  %v19903_v7 = vpop.f32.mrf.mxu0  ;;  %v19907_v8 = vpop.f32.mrf.mxu1 }
 0x263   : > { %17362 = vmatpush3.msra.mxu0 %v19849_v39  ;;  %17384 = vmatpush3.msra.mxu1 %v19847_v37 }
 0x264   : > { %17363 = vmatprep.subr.mxu0 %v19845_v35  ;;  %17385 = vmatprep.subr.mxu1 %v19843_v33  ;;  %v1555_v9 = vpop.f32.mrf.mxu0  ;;  %v19913_v12 = vpop.f32.mrf.mxu1 }
 0x265   : > { %17364 = vmatpush3.msra.mxu0 %v19845_v35  ;;  %17386 = vmatpush3.msra.mxu1 %v19843_v33 }
 0x266   : > { %17365 = vmatprep.subr.mxu0 %v19841_v31  ;;  %17387 = vmatprep.subr.mxu1 %v19839_v29  ;;  %v1557_v13 = vpop.f32.mrf.mxu0  ;;  %v19919_v16 = vpop.f32.mrf.mxu1 }
 0x267   : > { %17334 = vmatprep.mubr.msk.f32.mxu0 %vm1896_vm1, %v1894_v10  ;;  %17366 = vmatpush3.msra.mxu0 %v19841_v31  ;;  %v2729_v10 = vld [vmem:[#allocation6 + $0x108] sm:$0xff] }
 0x268   : > { %17388 = vmatpush3.msra.mxu1 %v19839_v29  ;;  %17335 = vmatmul.mubr.msk.f32.gmra.mxu0 %vm1896_vm1, %v1895_v11  ;;  %v1561_v17 = vpop.f32.mrf.mxu0  ;;  %v19925_v19 = vpop.f32.mrf.mxu1  ;;  %v2094_v29 = vld [vmem:[#allocation6 + $0x50] sm:$0xff]  ;;  %v2834_v11 = vld [vmem:[#allocation6 + $0x120] sm:$0xff] }
 0x269   : > { %17354 = vmatprep.mubr.msk.f32.mxu1 %vm1896_vm1, %v1889_v14  ;;  %17367 = vmatprep.subr.mxu0 %v19837_v27  ;;  %v2730_v14 = vld [vmem:[#allocation6 + $0x110] sm:$0xff] }
 0x26a   : > { %17389 = vmatprep.subr.mxu1 %v19835_v25  ;;  %17355 = vmatmul.mubr.msk.f32.gmra.mxu1 %vm1896_vm1, %v1890_v15  ;;  %v1563_v20 = vpop.f32.mrf.mxu0  ;;  %v19931_v24 = vpop.f32.mrf.mxu1  ;;  %v2731_v15 = vld [vmem:[#allocation6 + $0x118] sm:$0x1] }
 0x26b   : > { %17368 = vmatpush3.msra.mxu0 %v19837_v27  ;;  %17390 = vmatpush3.msra.mxu1 %v19835_v25 }
 0x26c   : > { %17369 = vmatprep.subr.mxu0 %v19831_v23  ;;  %17371 = vmatprep.mubr.msk.f32.mxu0 %vm1896_vm1, %v2092_v18  ;;  %v19935_v26 = vpop.f32.mrf.mxu0  ;;  %v19942_v25 = vpop.f32.mrf.mxu1  ;;  %v2940_v18 = vld [vmem:[#allocation6 + $0x140] sm:$0xff] }
 0x26d   : > { %17370 = vmatpush3.msra.mxu0 %v19831_v23  ;;  %17391 = vmatprep.mubr.msk.f32.mxu1 %vm1896_vm1, %v2198_v21  ;;  %v2200_v23 = vld [vmem:[#allocation6 + $0x70] sm:$0xff] }
 0x26e   : > { %17372 = vmatmul.mubr.msk.f32.vlgmr.msra.gmra.mxu0 %vm1896_vm1, %v2093_v22  ;;  %17397 = vmatprep.subr.mxu0 %v1561_v17  ;;  %v19940_v27 = vpop.f32.mrf.mxu0  ;;  %v19950_v33 = vpop.f32.mrf.mxu1  ;;  %v2942_v21 = vld [vmem:[#allocation6 + $0x150] sm:$0xff]  ;;  %v3047_v22 = vld [vmem:[#allocation6 + $0x168] sm:$0xff] }
 0x26f   : > { %17417 = vmatprep.subr.mxu1 %v1563_v20  ;;  %17392 = vmatmul.mubr.msk.f32.vlgmr.msra.gmra.mxu1 %vm1896_vm1, %v2199_v28  ;;  %v3049_v28 = vld [vmem:[#allocation6 + $0x178] sm:$0x1] }
 0x270   : > { %17398 = vmatpush3.msra.mxu0 %v1561_v17  ;;  %17418 = vmatpush3.msra.mxu1 %v1563_v20  ;;  %v19945_v31 = vpop.f32.mrf.mxu0  ;;  %v19963_v37 = vpop.f32.mrf.mxu1  ;;  %v2837_v17 = vld [vmem:[#allocation6 + $0x138] sm:$0x1]  ;;  %v3046_v20 = vld [vmem:[#allocation6 + $0x160] sm:$0xff] }
 0x271   : > { %17399 = vmatprep.subr.mxu0 %v1555_v9  ;;  %17419 = vmatprep.subr.mxu1 %v1557_v13 }
 0x272   : > { %17374 = vmatprep.mubr.msk.f32.mxu0 %vm1896_vm1, %v2094_v29  ;;  %17400 = vmatpush3.msra.mxu0 %v1555_v9  ;;  %v19948_v32 = vpop.f32.mrf.mxu0  ;;  %v19977_v40 = vpop.f32.mrf.mxu1  ;;  %v2728_v9 = vld [vmem:[#allocation6 + $0x100] sm:$0xff] }
 0x273   : > { %17420 = vmatpush3.msra.mxu1 %v1557_v13  ;;  %17375 = vmatmul.mubr.msk.f32.gmra.mxu0 %vm1896_vm1, %v2095_v30  ;;  %v2835_v13 = vld [vmem:[#allocation6 + $0x128] sm:$0xff]  ;;  %v3178_v29 = vld [vmem:[#allocation7 + $0x60] sm:$0xff]  ;;  %v3180_v30 = vld [vmem:[#allocation7 + $0x70] sm:$0xff] }
 0x274   : > { %17401 = vmatprep.subr.mxu0 %v19895_v5  ;;  %17421 = vmatprep.subr.mxu1 %v19903_v7  ;;  %v19955_v35 = vpop.f32.mrf.mxu0  ;;  %v19989_v46 = vpop.f32.mrf.mxu1 }
 0x275   : > { %17394 = vmatprep.mubr.msk.f32.mxu1 %vm1896_vm1, %v2200_v23  ;;  %17402 = vmatpush3.msra.mxu0 %v19895_v5  ;;  %v2519_v5 = vld [vmem:[#allocation6 + $0xd8] sm:$0x1] }
 0x276   : > { %17422 = vmatpush3.msra.mxu1 %v19903_v7  ;;  %17403 = vmatprep.subr.mxu0 %v19882_v1  ;;  %v19961_v36 = vpop.f32.mrf.mxu0  ;;  %v3169_v23 = vld [vmem:[#allocation7 + $0x18] sm:$0xff] }
 0x277   : > { %17395 = vmatmul.mubr.msk.f32.gmra.mxu1 %vm1896_vm1, %v2201_v34  ;;  %17423 = vmatprep.subr.mxu1 %v19888_v3  ;;  %v3183_v34 = vld [vmem:[#allocation7 + $0x88] sm:$0xff] }
 0x278   : > { %17404 = vmatpush3.msra.mxu0 %v19882_v1  ;;  %17424 = vmatpush3.msra.mxu1 %v19888_v3  ;;  %v19969_v38 = vpop.f32.mrf.mxu0  ;;  %v2516_v1 = vld [vmem:[#allocation6 + $0xc0] sm:$0xff] }
 0x279   : > { %17405 = vmatprep.subr.mxu0 %v19871_v58  ;;  %17425 = vmatprep.subr.mxu1 %v19876_v61 }
 0x27a   : > { %17406 = vmatpush3.msra.mxu0 %v19871_v58  ;;  %17426 = vmatpush3.msra.mxu1 %v19876_v61  ;;  %v19975_v39 = vpop.f32.mrf.mxu0 }
 0x27b   : > { %17407 = vmatprep.subr.mxu0 %v19863_v54  ;;  %17427 = vmatprep.subr.mxu1 %v19867_v56 }
 0x27c   : > { %17408 = vmatpush3.msra.mxu0 %v19863_v54  ;;  %17428 = vmatpush3.msra.mxu1 %v19867_v56  ;;  %v19983_v43 = vpop.f32.mrf.mxu0  ;;  %v2413_v56 = vld [vmem:[#allocation6 + $0xb8] sm:$0x1] }
 0x27d   : > { %17409 = vmatprep.subr.mxu0 %v19855_v50  ;;  %17429 = vmatprep.subr.mxu1 %v19859_v52 }
 0x27e   : > { %17410 = vmatpush3.msra.mxu0 %v19855_v50  ;;  %17411 = vmatprep.mubr.msk.f32.mxu0 %vm1896_vm1, %v2304_v41  ;;  %v19995_v47 = vpop.f32.mrf.mxu0  ;;  %v20001_v50 = vpop.f32.mrf.mxu1 }
 0x27f   : > { %17430 = vmatpush3.msra.mxu1 %v19859_v52  ;;  %17412 = vmatmul.mubr.msk.f32.vlgmr.msra.gmra.mxu0 %vm1896_vm1, %v2305_v42  ;;  %v2412_v52 = vld [vmem:[#allocation6 + $0xb0] sm:$0xff] }
 0x280   : > { %17431 = vmatprep.mubr.msk.f32.mxu1 %vm1896_vm1, %v2410_v44  ;;  %17437 = vmatprep.subr.mxu0 %v19925_v19  ;;  %v1769_v54 = vpop.f32.mrf.mxu0  ;;  %v20011_v58 = vpop.f32.mrf.mxu1 }
 0x281   : > { %17457 = vmatprep.subr.mxu1 %v19931_v24  ;;  %17432 = vmatmul.mubr.msk.f32.vlgmr.msra.gmra.mxu1 %vm1896_vm1, %v2411_v45 }
 0x282   : > { %17438 = vmatpush3.msra.mxu0 %v19925_v19  ;;  %17458 = vmatpush3.msra.mxu1 %v19931_v24  ;;  %v1771_v59 = vpop.f32.mrf.mxu0  ;;  %v20021_v61 = vpop.f32.mrf.mxu1  ;;  %v2941_v19 = vld [vmem:[#allocation6 + $0x148] sm:$0xff]  ;;  %v3048_v24 = vld [vmem:[#allocation6 + $0x170] sm:$0xff] }
 0x283   : > { %17439 = vmatprep.subr.mxu0 %v19913_v12  ;;  %17459 = vmatprep.subr.mxu1 %v19919_v16 }
 0x284   : > { %17414 = vmatprep.mubr.msk.f32.mxu0 %vm1896_vm1, %v2306_v48  ;;  %17440 = vmatpush3.msra.mxu0 %v19913_v12  ;;  %v1775_v62 = vpop.f32.mrf.mxu0  ;;  %v20031_v3 = vpop.f32.mrf.mxu1 }
 0x285   : > { %17460 = vmatpush3.msra.mxu1 %v19919_v16  ;;  %17415 = vmatmul.mubr.msk.f32.gmra.mxu0 %vm1896_vm1, %v2307_v49  ;;  %v2836_v16 = vld [vmem:[#allocation6 + $0x130] sm:$0xff] }
 0x286   : > { %17441 = vmatprep.subr.mxu0 %v19899_v6  ;;  %17461 = vmatprep.subr.mxu1 %v19907_v8 }
 0x287   : > { %17434 = vmatprep.mubr.msk.f32.mxu1 %vm1896_vm1, %v2412_v52  ;;  %17442 = vmatpush3.msra.mxu0 %v19899_v6  ;;  %v2625_v6 = vld [vmem:[#allocation6 + $0xf8] sm:$0x1] }
 0x288   : > { %17462 = vmatpush3.msra.mxu1 %v19907_v8  ;;  %17443 = vmatprep.subr.mxu0 %v19886_v2 }
 0x289   : > { %17435 = vmatmul.mubr.msk.f32.gmra.mxu1 %vm1896_vm1, %v2413_v56  ;;  %17463 = vmatprep.subr.mxu1 %v19891_v4 }
 0x28a   : > { %17444 = vmatpush3.msra.mxu0 %v19886_v2  ;;  %17464 = vmatpush3.msra.mxu1 %v19891_v4  ;;  %v2517_v2 = vld [vmem:[#allocation6 + $0xc8] sm:$0xff]  ;;  %v1777_v4 = vpop.f32.mrf.mxu0 }
 0x28b   : > { %17445 = vmatprep.subr.mxu0 %v19874_v60  ;;  %17465 = vmatprep.subr.mxu1 %v19880_v63 }
 0x28c   : > { %17446 = vmatpush3.msra.mxu0 %v19874_v60  ;;  %17466 = vmatpush3.msra.mxu1 %v19880_v63  ;;  %v2622_v60 = vld [vmem:[#allocation6 + $0xe0] sm:$0xff]  ;;  %v2623_v63 = vld [vmem:[#allocation6 + $0xe8] sm:$0xff] }
 0x28d   : > { %17447 = vmatprep.subr.mxu0 %v19865_v55  ;;  %17467 = vmatprep.subr.mxu1 %v19869_v57 }
 0x28e   : > { %17448 = vmatpush3.msra.mxu0 %v19865_v55  ;;  %17468 = vmatpush3.msra.mxu1 %v19869_v57  ;;  %v20040_v55 = vpop.f32.mrf.mxu1  ;;  %v2518_v57 = vld [vmem:[#allocation6 + $0xd0] sm:$0xff] }
 0x28f   : > { %17449 = vmatprep.subr.mxu0 %v19857_v51  ;;  %17469 = vmatprep.subr.mxu1 %v19861_v53 }
 0x290   : > { %17450 = vmatpush3.msra.mxu0 %v19857_v51  ;;  %17451 = vmatprep.mubr.msk.f32.mxu0 %vm1896_vm1, %v2516_v1  ;;  %v2624_v51 = vld [vmem:[#allocation6 + $0xf0] sm:$0xff] }
 0x291   : > { %17470 = vmatpush3.msra.mxu1 %v19861_v53  ;;  %17452 = vmatmul.mubr.msk.f32.vlgmr.msra.gmra.mxu0 %vm1896_vm1, %v2517_v2  ;;  %v1876_v53 = vpop.f32.mrf.mxu1 }
 0x292   : > { %17471 = vmatprep.mubr.msk.f32.mxu1 %vm1896_vm1, %v2622_v60  ;;  %17477 = vmatprep.subr.mxu0 %v1775_v62 }
 0x293   : > { %17497 = vmatprep.subr.mxu1 %v1777_v4  ;;  %17472 = vmatmul.mubr.msk.f32.vlgmr.msra.gmra.mxu1 %vm1896_vm1, %v2623_v63  ;;  %v1878_v7 = vpop.f32.mrf.mxu1 }
 0x294   : > { %17478 = vmatpush3.msra.mxu0 %v1775_v62  ;;  %17498 = vmatpush3.msra.mxu1 %v1777_v4 }
 0x295   : > { %17479 = vmatprep.subr.mxu0 %v1769_v54  ;;  %17499 = vmatprep.subr.mxu1 %v1771_v59  ;;  %v1882_v8 = vpop.f32.mrf.mxu1 }
 0x296   : > { %17454 = vmatprep.mubr.msk.f32.mxu0 %vm1896_vm1, %v2518_v57  ;;  %17480 = vmatpush3.msra.mxu0 %v1769_v54 }
 0x297   : > { %17500 = vmatpush3.msra.mxu1 %v1771_v59  ;;  %17455 = vmatmul.mubr.msk.f32.gmra.mxu0 %vm1896_vm1, %v2519_v5  ;;  %v1884_v12 = vpop.f32.mrf.mxu1 }
 0x298   : > { %17481 = vmatprep.subr.mxu0 %v19983_v43  ;;  %17501 = vmatprep.subr.mxu1 %v19995_v47 }
 0x299   : > { %17474 = vmatprep.mubr.msk.f32.mxu1 %vm1896_vm1, %v2624_v51  ;;  %17482 = vmatpush3.msra.mxu0 %v19983_v43 }
 0x29a   : > { %17502 = vmatpush3.msra.mxu1 %v19995_v47  ;;  %17483 = vmatprep.subr.mxu0 %v19969_v38 }
 0x29b   : > { %17475 = vmatmul.mubr.msk.f32.gmra.mxu1 %vm1896_vm1, %v2625_v6  ;;  %17503 = vmatprep.subr.mxu1 %v19975_v39 }
 0x29c   : > { %17484 = vmatpush3.msra.mxu0 %v19969_v38  ;;  %17504 = vmatpush3.msra.mxu1 %v19975_v39 }
 0x29d   : > { %17485 = vmatprep.subr.mxu0 %v19955_v35  ;;  %17505 = vmatprep.subr.mxu1 %v19961_v36 }
 0x29e   : > { %17486 = vmatpush3.msra.mxu0 %v19955_v35  ;;  %17506 = vmatpush3.msra.mxu1 %v19961_v36  ;;  %v3185_v35 = vld [vmem:[#allocation7 + $0x98] sm:$0xff] }
 0x29f   : > { %17487 = vmatprep.subr.mxu0 %v19945_v31  ;;  %17507 = vmatprep.subr.mxu1 %v19948_v32 }
 0x2a0   : > { %17488 = vmatpush3.msra.mxu0 %v19945_v31  ;;  %17508 = vmatpush3.msra.mxu1 %v19948_v32  ;;  %v3167_v31 = vld [vmem:[#allocation7 + $0x8] sm:$0xff]  ;;  %v3166_v32 = vld [vmem:[#allocation7] sm:$0xff] }
 0x2a1   : > { %17489 = vmatprep.subr.mxu0 %v19935_v26  ;;  %17509 = vmatprep.subr.mxu1 %v19940_v27 }
 0x2a2   : > { %17490 = vmatpush3.msra.mxu0 %v19935_v26  ;;  %17491 = vmatprep.mubr.msk.f32.mxu0 %vm1896_vm1, %v2728_v9  ;;  %v2943_v26 = vld [vmem:[#allocation6 + $0x158] sm:$0x1] }
 0x2a3   : > { %17510 = vmatpush3.msra.mxu1 %v19940_v27  ;;  %17492 = vmatmul.mubr.msk.f32.vlgmr.msra.gmra.mxu0 %vm1896_vm1, %v2729_v10  ;;  %v3179_v27 = vld [vmem:[#allocation7 + $0x68] sm:$0xff] }
 0x2a4   : > { %17511 = vmatprep.mubr.msk.f32.mxu1 %vm1896_vm1, %v2834_v11  ;;  %17517 = vmatprep.subr.mxu0 %v1882_v8 }
 0x2a5   : > { %17537 = vmatprep.subr.mxu1 %v1884_v12  ;;  %17512 = vmatmul.mubr.msk.f32.vlgmr.msra.gmra.mxu1 %vm1896_vm1, %v2835_v13 }
 0x2a6   : > { %17518 = vmatpush3.msra.mxu0 %v1882_v8  ;;  %17538 = vmatpush3.msra.mxu1 %v1884_v12 }
 0x2a7   : > { %17519 = vmatprep.subr.mxu0 %v1876_v53  ;;  %17539 = vmatprep.subr.mxu1 %v1878_v7 }
 0x2a8   : > { %17494 = vmatprep.mubr.msk.f32.mxu0 %vm1896_vm1, %v2730_v14  ;;  %17520 = vmatpush3.msra.mxu0 %v1876_v53 }
 0x2a9   : > { %17540 = vmatpush3.msra.mxu1 %v1878_v7  ;;  %17495 = vmatmul.mubr.msk.f32.gmra.mxu0 %vm1896_vm1, %v2731_v15 }
 0x2aa   : > { %17521 = vmatprep.subr.mxu0 %v20031_v3  ;;  %17541 = vmatprep.subr.mxu1 %v20040_v55 }
 0x2ab   : > { %17514 = vmatprep.mubr.msk.f32.mxu1 %vm1896_vm1, %v2836_v16  ;;  %17522 = vmatpush3.msra.mxu0 %v20031_v3 }
 0x2ac   : > { %17542 = vmatpush3.msra.mxu1 %v20040_v55  ;;  %17523 = vmatprep.subr.mxu0 %v20011_v58 }
 0x2ad   : > { %17515 = vmatmul.mubr.msk.f32.gmra.mxu1 %vm1896_vm1, %v2837_v17  ;;  %17543 = vmatprep.subr.mxu1 %v20021_v61 }
 0x2ae   : > { %17524 = vmatpush3.msra.mxu0 %v20011_v58  ;;  %17544 = vmatpush3.msra.mxu1 %v20021_v61 }
 0x2af   : > { %17525 = vmatprep.subr.mxu0 %v19989_v46  ;;  %17545 = vmatprep.subr.mxu1 %v20001_v50 }
 0x2b0   : > { %17526 = vmatpush3.msra.mxu0 %v19989_v46  ;;  %17546 = vmatpush3.msra.mxu1 %v20001_v50 }
 0x2b1   : > { %17527 = vmatprep.subr.mxu0 %v19963_v37  ;;  %17547 = vmatprep.subr.mxu1 %v19977_v40 }
 0x2b2   : > { %17528 = vmatpush3.msra.mxu0 %v19963_v37  ;;  %17548 = vmatpush3.msra.mxu1 %v19977_v40 }
 0x2b3   : > { %17529 = vmatprep.subr.mxu0 %v19942_v25  ;;  %17549 = vmatprep.subr.mxu1 %v19950_v33 }
 0x2b4   : > { %17530 = vmatpush3.msra.mxu0 %v19942_v25  ;;  %17531 = vmatprep.mubr.msk.f32.mxu0 %vm1896_vm1, %v2940_v18  ;;  %v3181_v25 = vld [vmem:[#allocation7 + $0x78] sm:$0xff] }
 0x2b5   : > { %17550 = vmatpush3.msra.mxu1 %v19950_v33  ;;  %17532 = vmatmul.mubr.msk.f32.vlgmr.msra.gmra.mxu0 %vm1896_vm1, %v2941_v19  ;;  %v3168_v33 = vld [vmem:[#allocation7 + $0x10] sm:$0xff] }
 0x2b6   : > { %17551 = vmatprep.mubr.msk.f32.mxu1 %vm1896_vm1, %v3046_v20  ;;  %17534 = vmatprep.mubr.msk.f32.mxu0 %vm1896_vm1, %v2942_v21 }
 0x2b7   : > { %17552 = vmatmul.mubr.msk.f32.vlgmr.msra.gmra.mxu1 %vm1896_vm1, %v3047_v22  ;;  %3231 = vmatprep.subr.mxu0 %v3179_v27 }
 0x2b8   : > { %17554 = vmatprep.mubr.msk.f32.mxu1 %vm1896_vm1, %v3048_v24  ;;  %3320 = vmatprep.subr.mxu1 %v3181_v25 }
 0x2b9   : > { %17535 = vmatmul.mubr.msk.f32.gmra.mxu0 %vm1896_vm1, %v2943_v26  ;;  %3321 = vmatpush1.msra.mxu1 %v3180_v30 }
 0x2ba   : > { %3267 = vmatprep.mubr.f32.mxu0 %v19290_v0  ;;  %3232 = vmatpush1.msra.mxu0 %v3178_v29 }
 0x2bb   : > { %17555 = vmatmul.mubr.msk.f32.gmra.mxu1 %vm1896_vm1, %v3049_v28  ;;  %3233 = vmatprep.subr.mxu0 %v3167_v31 }
 0x2bc   : > { %3356 = vmatprep.mubr.f32.mxu1 %v19290_v0  ;;  %3322 = vmatprep.subr.mxu1 %v3169_v23 }
 0x2bd   : > { %3234 = vmatpush1.msra.mxu0 %v3166_v32  ;;  %3323 = vmatpush1.msra.mxu1 %v3168_v33 }
 0x2be   : > { %3409 = vmatprep.subr.mxu0 %v3183_v34  ;;  %3498 = vmatprep.subr.mxu1 %v3185_v35 }
 0x31c   : > { %v17353_v37 = vpop.f32.mrf.mxu1 }
 0x31e   : > { %v17333_v36 = vpop.f32.mrf.mxu0  ;;  %v2072_v40 = vpop.f32.mrf.mxu1 }
 0x31f   : > { %v2078_v4 = vadd.f32 %v17353_v37, %v17333_v36 }
 0x320   : > { %v1975_v38 = vpop.f32.mrf.mxu0 }
 0x321   : > { %v2073_v55 = vadd.f32 %v2072_v40, %v1975_v38 }
 0x328   : > { %v17336_v39 = vpop.f32.mrf.mxu0 }
 0x32a   : > { %v1985_v41 = vpop.f32.mrf.mxu0  ;;  %v17356_v42 = vpop.f32.mrf.mxu1 }
 0x32b   : > { %v2088_v9 = vadd.f32 %v17356_v42, %v17336_v39 }
 0x32c   : > { %v2082_v43 = vpop.f32.mrf.mxu1 }
 0x32d   : > { %v2083_v6 = vadd.f32 %v2082_v43, %v1985_v41 }
 0x32e   : > { %v17373_v44 = vpop.f32.mrf.mxu0 }
 0x32f   : > { %v17393_v45 = vpop.f32.mrf.mxu1  ;;  %v2194_v57 = vadd.f32 %v17373_v44, %v2078_v4 }
 0x330   : > { %v2174_v46 = vpop.f32.mrf.mxu0 }
 0x331   : > { %v2280_v47 = vpop.f32.mrf.mxu1  ;;  %v2193_v51 = vadd.f32 %v2174_v46, %v2073_v55  ;;  %v2300_v7 = vadd.f32 %v17393_v45, %v2194_v57 }
 0x333   : > { %v17376_v48 = vpop.f32.mrf.mxu0  ;;  %v2299_v10 = vadd.f32 %v2280_v47, %v2193_v51 }
 0x334   : > { %v2196_v14 = vadd.f32 %v17376_v48, %v2088_v9 }
 0x335   : > { %v2184_v50 = vpop.f32.mrf.mxu0 }
 0x336   : > { %v2195_v11 = vadd.f32 %v2184_v50, %v2083_v6  ;;  %v3184_v6 = vld [vmem:[#allocation7 + $0x90] sm:$0xff] }
 0x337   : > { %v17396_v49 = vpop.f32.mrf.mxu1 }
 0x338   : > { %v2302_v21 = vadd.f32 %v17396_v49, %v2196_v14  ;;  %v3187_v14 = vld [vmem:[#allocation7 + $0xa8] sm:$0xff] }
 0x339   : > { %v2290_v52 = vpop.f32.mrf.mxu1 }
 0x33a   : > { %v2301_v18 = vadd.f32 %v2290_v52, %v2195_v11 }
 0x33f   : > { %v17413_v54 = vpop.f32.mrf.mxu0 }
 0x340   : > { %v2406_v12 = vadd.f32 %v17413_v54, %v2300_v7  ;;  %v3171_v7 = vld [vmem:[#allocation7 + $0x28] sm:$0xff] }
 0x341   : > { %v17433_v56 = vpop.f32.mrf.mxu1  ;;  %v2386_v58 = vpop.f32.mrf.mxu0 }
 0x342   : > { %v2405_v15 = vadd.f32 %v2386_v58, %v2299_v10  ;;  %v2512_v19 = vadd.f32 %v17433_v56, %v2406_v12  ;;  %v3170_v12 = vld [vmem:[#allocation7 + $0x20] sm:$0xff] }
 0x343   : > { %v2492_v59 = vpop.f32.mrf.mxu1 }
 0x344   : > { %v2511_v22 = vadd.f32 %v2492_v59, %v2405_v15  ;;  %v3189_v15 = vld [vmem:[#allocation7 + $0xb8] sm:$0xff] }
 0x345   : > { %v17416_v61 = vpop.f32.mrf.mxu0 }
 0x346   : > { %v2408_v27 = vadd.f32 %v17416_v61, %v2302_v21  ;;  %v3175_v21 = vld [vmem:[#allocation7 + $0x48] sm:$0xff] }
 0x347   : > { %v2396_v1 = vpop.f32.mrf.mxu0 }
 0x348   : > { %v2407_v24 = vadd.f32 %v2396_v1, %v2301_v18 }
 0x349   : > { %v17436_v62 = vpop.f32.mrf.mxu1 }
 0x34a   : > { %v2514_v32 = vadd.f32 %v17436_v62, %v2408_v27  ;;  %v16207_v62 = vld [vmem:[#allocation4] ss:$0 sm:$0xff]  ;;  %v3740_v27 = vld [vmem:[#allocation10 + $0x10] sm:$0xff] }
 0x34b   : > { %v2502_v2 = vpop.f32.mrf.mxu1 }
 0x34c   : > { %v2513_v30 = vadd.f32 %v2502_v2, %v2407_v24  ;;  %v3174_v24 = vld [vmem:[#allocation7 + $0x40] sm:$0xff] }
 0x351   : > { %v17453_v3 = vpop.f32.mrf.mxu0 }
 0x352   : > { %v2618_v26 = vadd.f32 %v17453_v3, %v2512_v19  ;;  %v3186_v19 = vld [vmem:[#allocation7 + $0xa0] sm:$0xff] }
 0x353   : > { %v17473_v60 = vpop.f32.mrf.mxu1  ;;  %v2598_v63 = vpop.f32.mrf.mxu0 }
 0x354   : > { %v2617_v25 = vadd.f32 %v2598_v63, %v2511_v22  ;;  %v2724_v31 = vadd.f32 %v17473_v60, %v2618_v26  ;;  %v3177_v22 = vld [vmem:[#allocation7 + $0x58] sm:$0xff]  ;;  %v3176_v26 = vld [vmem:[#allocation7 + $0x50] sm:$0xff] }
 0x355   : > { %v2704_v5 = vpop.f32.mrf.mxu1 }
 0x356   : > { %v2723_v33 = vadd.f32 %v2704_v5, %v2617_v25 }
 0x357   : > { %v17456_v53 = vpop.f32.mrf.mxu0 }
 0x358   : > { %v2620_v37 = vadd.f32 %v17456_v53, %v2514_v32  ;;  %v3182_v53 = vld [vmem:[#allocation7 + $0x80] sm:$0xff] }
 0x359   : > { %v2608_v13 = vpop.f32.mrf.mxu0 }
 0x35a   : > { %v2619_v34 = vadd.f32 %v2608_v13, %v2513_v30  ;;  %v3172_v13 = vld [vmem:[#allocation7 + $0x30] sm:$0xff] }
 0x35b   : > { %v17476_v8 = vpop.f32.mrf.mxu1 }
 0x35c   : > { %v2726_v44 = vadd.f32 %v17476_v8, %v2620_v37  ;;  %v3173_v8 = vld [vmem:[#allocation7 + $0x38] sm:$0xff] }
 0x35d   : > { %v2714_v16 = vpop.f32.mrf.mxu1 }
 0x35e   : > { %v2725_v40 = vadd.f32 %v2714_v16, %v2619_v34 }
 0x363   : > { %v17493_v17 = vpop.f32.mrf.mxu0 }
 0x364   : > { %v2830_v35 = vadd.f32 %v17493_v17, %v2724_v31 }
 0x365   : > { %v17513_v20 = vpop.f32.mrf.mxu1  ;;  %v2810_v28 = vpop.f32.mrf.mxu0 }
 0x366   : > { %v2829_v38 = vadd.f32 %v2810_v28, %v2723_v33  ;;  %v2936_v41 = vadd.f32 %v17513_v20, %v2830_v35  ;;  %v3188_v20 = vld [vmem:[#allocation7 + $0xb0] sm:$0xff]  ;;  %v3737_v28 = vld [vmem:[#allocation10] sm:$0xff] }
 0x367   : > { %v2916_v29 = vpop.f32.mrf.mxu1 }
 0x368   : > { %v2935_v45 = vadd.f32 %v2916_v29, %v2829_v38 }
 0x369   : > { %v17496_v23 = vpop.f32.mrf.mxu0 }
 0x36a   : > { %v2832_v50 = vadd.f32 %v17496_v23, %v2726_v44 }
 0x36b   : > { %v2820_v39 = vpop.f32.mrf.mxu0 }
 0x36c   : > { %v2831_v46 = vadd.f32 %v2820_v39, %v2725_v40 }
 0x36d   : > { %v17516_v36 = vpop.f32.mrf.mxu1 }
 0x36e   : > { %v2938_v3 = vadd.f32 %v17516_v36, %v2832_v50  ;;  %v3741_v50 = vld [vmem:[#allocation10 + $0x18] sm:$0xf] }
 0x36f   : > { %v2926_v42 = vpop.f32.mrf.mxu1 }
 0x370   : > { %v2937_v58 = vadd.f32 %v2926_v42, %v2831_v46 }
 0x375   : > { %v17533_v43 = vpop.f32.mrf.mxu0 }
 0x376   : > { %v3042_v47 = vadd.f32 %v17533_v43, %v2936_v41 }
 0x377   : > { %v3022_v48 = vpop.f32.mrf.mxu0  ;;  %v17553_v49 = vpop.f32.mrf.mxu1 }
 0x378   : > { %v3041_v52 = vadd.f32 %v3022_v48, %v2935_v45  ;;  %v3148_v59 = vadd.f32 %v17553_v49, %v3042_v47  ;;  %v3738_v47 = vld [vmem:[#allocation10 + $0x8] sm:$0xf] }
 0x379   : > { %v17536_v54 = vpop.f32.mrf.mxu0  ;;  %v3128_v56 = vpop.f32.mrf.mxu1 }
 0x37a   : > { %v3147_v61 = vadd.f32 %v3128_v56, %v3041_v52  ;;  %v3159_v55 = vadd.f32 %v16207_v62, %v3148_v59  ;;  %v3044_v57 = vadd.f32 %v17536_v54, %v2938_v3  ;;  %v4002_v3 = vld [vmem:[#allocation10 + $0x30] sm:$0xff] }
 0x37b   : > { %v3032_v1 = vpop.f32.mrf.mxu0  ;;  %v17556_v2 = vpop.f32.mrf.mxu1 }
 0x37c   : > { %v3158_v60 = vadd.f32 %v16207_v62, %v3147_v61  ;;  %v3043_v4 = vadd.f32 %v3032_v1, %v2937_v58  ;;  %v20113_v9 = vmax.f32 %v3159_v55, 0.0  ;;  %v3150_v10 = vadd.f32 %v17556_v2, %v3044_v57  ;;  %v4003_v55 = vld [vmem:[#allocation10 + $0x38] sm:$0xf] }
 0x37d   : > { %v3138_v63 = vpop.f32.mrf.mxu1 }
 0x37e   : > { %v20105_v5 = vmax.f32 %v3158_v60, 0.0  ;;  %v3149_v51 = vadd.f32 %v3138_v63, %v3043_v4  ;;  %v3161_v16 = vadd.f32 %v16207_v62, %v3150_v10  ;;  %v3914_v60 = vld [vmem:[#allocation10 + $0x28] sm:$0xf]  ;;  %v4180_v10 = vld [vmem:[#allocation10 + $0x50] sm:$0xff] }
 0x380   : > { %16208 = vmatmul.mubr.msk.f32.vlgmr.msra.gmra.mxu0 %vm3190_vm2, %v20105_v5  ;;  %16212 = vmatmul.mubr.msk.f32.vlgmr.msra.gmra.mxu1 %vm3190_vm2, %v20105_v5  ;;  %v3160_v11 = vadd.f32 %v16207_v62, %v3149_v51  ;;  %v3165_v18 = vmax.f32 %v3161_v16, 0.0  ;;  %v3913_v62 = vld [vmem:[#allocation10 + $0x20] sm:$0xff] }
 0x381   : > { %3273 = vmatprep.mubr.f32.mxu0 %v19290_v0  ;;  %3362 = vmatprep.mubr.f32.mxu1 %v19290_v0 }
 0x382   : > { %3410 = vmatpush1.msra.mxu0 %v3182_v53  ;;  %3499 = vmatpush1.msra.mxu1 %v3184_v6  ;;  %v3164_v17 = vmax.f32 %v3160_v11, 0.0  ;;  %v4091_v6 = vld [vmem:[#allocation10 + $0x40] sm:$0xff] }
 0x383   : > { %3411 = vmatprep.subr.mxu0 %v3171_v7  ;;  %3500 = vmatprep.subr.mxu1 %v3173_v8 }
 0x384   : > { %16209 = vmatmul.mubr.msk.f32.gmra.mxu0 %vm3190_vm2, %v20113_v9  ;;  %16213 = vmatmul.mubr.msk.f32.gmra.mxu1 %vm3190_vm2, %v20113_v9 }
 0x385   : > { %3279 = vmatprep.mubr.f32.mxu0 %v19290_v0  ;;  %3368 = vmatprep.mubr.f32.mxu1 %v19290_v0 }
 0x386   : > { %3412 = vmatpush1.msra.mxu0 %v3170_v12  ;;  %3501 = vmatpush1.msra.mxu1 %v3172_v13  ;;  %v4181_v12 = vld [vmem:[#allocation10 + $0x58] sm:$0xf] }
 0x387   : > { %3587 = vmatprep.subr.mxu0 %v3187_v14  ;;  %3676 = vmatprep.subr.mxu1 %v3189_v15 }
 0x388   : > { %16210 = vmatmul.mubr.msk.f32.gmra.mxu0 %vm3190_vm2, %v3164_v17  ;;  %16214 = vmatmul.mubr.msk.f32.gmra.mxu1 %vm3190_vm2, %v3164_v17 }
 0x389   : > { %3285 = vmatprep.mubr.f32.mxu0 %v19290_v0  ;;  %3374 = vmatprep.mubr.f32.mxu1 %v19290_v0 }
 0x38c   : > { %16211 = vmatmul.mubr.msk.f32.gmra.mxu0 %vm3190_vm2, %v3165_v18  ;;  %16215 = vmatmul.mubr.msk.f32.gmra.mxu1 %vm3190_vm2, %v3165_v18 }
 0x38d   : > { %3445 = vmatprep.mubr.f32.mxu0 %v19290_v0  ;;  %3534 = vmatprep.mubr.f32.mxu1 %v19290_v0 }
 0x390   : > { %16216 = vmatmul.mubr.msk.f32.vlgmr.msra.gmra.mxu0 %vm3190_vm2, %v20105_v5  ;;  %16220 = vmatmul.mubr.msk.f32.vlgmr.msra.gmra.mxu1 %vm3190_vm2, %v20105_v5 }
 0x391   : > { %3451 = vmatprep.mubr.f32.mxu0 %v19290_v0  ;;  %3540 = vmatprep.mubr.f32.mxu1 %v19290_v0 }
 0x392   : > { %3588 = vmatpush1.msra.mxu0 %v3186_v19  ;;  %3677 = vmatpush1.msra.mxu1 %v3188_v20  ;;  %v4358_v19 = vld [vmem:[#allocation10 + $0x70] sm:$0xff] }
 0x393   : > { %3589 = vmatprep.subr.mxu0 %v3175_v21  ;;  %3678 = vmatprep.subr.mxu1 %v3177_v22  ;;  %v4359_v22 = vld [vmem:[#allocation10 + $0x78] sm:$0xf] }
 0x394   : > { %16217 = vmatmul.mubr.msk.f32.gmra.mxu0 %vm3190_vm2, %v20113_v9  ;;  %16221 = vmatmul.mubr.msk.f32.gmra.mxu1 %vm3190_vm2, %v20113_v9 }
 0x395   : > { %3457 = vmatprep.mubr.f32.mxu0 %v19290_v0  ;;  %3546 = vmatprep.mubr.f32.mxu1 %v19290_v0 }
 0x396   : > { %3590 = vmatpush1.msra.mxu0 %v3174_v24  ;;  %3679 = vmatpush1.msra.mxu1 %v3176_v26  ;;  %v4447_v26 = vld [vmem:[#allocation10 + $0x80] sm:$0xff] }
 0x398   : > { %16218 = vmatmul.mubr.msk.f32.gmra.mxu0 %vm3190_vm2, %v3164_v17  ;;  %16222 = vmatmul.mubr.msk.f32.gmra.mxu1 %vm3190_vm2, %v3164_v17 }
 0x399   : > { %3463 = vmatprep.mubr.f32.mxu0 %v19290_v0  ;;  %3552 = vmatprep.mubr.f32.mxu1 %v19290_v0 }
 0x39c   : > { %16219 = vmatmul.mubr.msk.f32.gmra.mxu0 %vm3190_vm2, %v3165_v18  ;;  %16223 = vmatmul.mubr.msk.f32.gmra.mxu1 %vm3190_vm2, %v3165_v18 }
 0x39d   : > { %3623 = vmatprep.mubr.f32.mxu0 %v19290_v0  ;;  %3712 = vmatprep.mubr.f32.mxu1 %v19290_v0 }
 0x3a0   : > { %16224 = vmatmul.mubr.msk.f32.vlgmr.msra.gmra.mxu0 %vm3190_vm2, %v20105_v5  ;;  %16228 = vmatmul.mubr.msk.f32.vlgmr.msra.gmra.mxu1 %vm3190_vm2, %v20105_v5 }
 0x3a1   : > { %3629 = vmatprep.mubr.f32.mxu0 %v19290_v0  ;;  %3718 = vmatprep.mubr.f32.mxu1 %v19290_v0 }
 0x3a4   : > { %16225 = vmatmul.mubr.msk.f32.gmra.mxu0 %vm3190_vm2, %v20113_v9  ;;  %16229 = vmatmul.mubr.msk.f32.gmra.mxu1 %vm3190_vm2, %v20113_v9  ;;  %v4092_v9 = vld [vmem:[#allocation10 + $0x48] sm:$0xf] }
 0x3a5   : > { %3635 = vmatprep.mubr.f32.mxu0 %v19290_v0  ;;  %3724 = vmatprep.mubr.f32.mxu1 %v19290_v0 }
 0x3a8   : > { %16226 = vmatmul.mubr.msk.f32.gmra.mxu0 %vm3190_vm2, %v3164_v17  ;;  %16230 = vmatmul.mubr.msk.f32.gmra.mxu1 %vm3190_vm2, %v3164_v17  ;;  %v4269_v17 = vld [vmem:[#allocation10 + $0x60] sm:$0xff] }
 0x3a9   : > { %3641 = vmatprep.mubr.f32.mxu0 %v19290_v0  ;;  %3730 = vmatprep.mubr.f32.mxu1 %v19290_v0 }
 0x3ac   : > { %16227 = vmatmul.mubr.msk.f32.gmra.mxu0 %vm3190_vm2, %v3165_v18  ;;  %16231 = vmatmul.mubr.msk.f32.gmra.mxu1 %vm3190_vm2, %v3165_v18  ;;  %v4270_v18 = vld [vmem:[#allocation10 + $0x68] sm:$0xf] }
 0x3ad   : > { %17576 = vmatprep.mubr.msk.f32.mxu1 %vm3742_vm3, %v3737_v28  ;;  %17565 = vmatprep.mubr.msk.f32.mxu0 %vm3742_vm3, %v3740_v27  ;;  %v4448_v27 = vld [vmem:[#allocation10 + $0x88] sm:$0xf] }
 0x440   : > { %v3269_v25 = vpop.f32.mrf.mxu0  ;;  %v20169_v29 = vpop.f32.mrf.mxu1 }
 0x442   : > { %v3271_v30 = vpop.f32.mrf.mxu0  ;;  %v3360_v31 = vpop.f32.mrf.mxu1 }
 0x444   : > { %v3275_v23 = vpop.f32.mrf.mxu0  ;;  %v3364_v32 = vpop.f32.mrf.mxu1 }
 0x446   : > { %v3277_v33 = vpop.f32.mrf.mxu0  ;;  %v3366_v34 = vpop.f32.mrf.mxu1 }
 0x448   : > { %v3281_v35 = vpop.f32.mrf.mxu0  ;;  %v3370_v36 = vpop.f32.mrf.mxu1 }
 0x44a   : > { %v3283_v37 = vpop.f32.mrf.mxu0  ;;  %v3372_v38 = vpop.f32.mrf.mxu1 }
 0x44c   : > { %v3287_v39 = vpop.f32.mrf.mxu0  ;;  %v3376_v40 = vpop.f32.mrf.mxu1 }
 0x44d   : > { %17568 = vmatprep.subr.msk.mxu1 %vm3749_vm4, %v3287_v39 }
 0x44e   : > { %v3289_v41 = vpop.f32.mrf.mxu0  ;;  %v3378_v42 = vpop.f32.mrf.mxu1  ;;  %17569 = vmatpush3.msk.msra.mxu1 %vm3749_vm4, %v3287_v39  ;;  %v4888_v39 = vld [vmem:[#allocation12 + $0x258] sm:$0xff] }
 0x44f   : > { %17557 = vmatprep.subr.msk.mxu0 %vm3749_vm4, %v3289_v41  ;;  %17570 = vmatprep.subr.mxu1 %v3281_v35 }
 0x450   : > { %v20174_v43 = vpop.f32.mrf.mxu0  ;;  %v20176_v44 = vpop.f32.mrf.mxu1  ;;  %17558 = vmatpush3.msk.msra.mxu0 %vm3749_vm4, %v3289_v41  ;;  %17571 = vmatpush3.msra.mxu1 %v3281_v35  ;;  %v4900_v35 = vld [vmem:[#allocation12 + $0x2b8] sm:$0xff]  ;;  %v4887_v41 = vld [vmem:[#allocation12 + $0x250] sm:$0xff] }
 0x451   : > { %17559 = vmatprep.subr.mxu0 %v3283_v37  ;;  %17572 = vmatprep.subr.mxu1 %v3275_v23 }
 0x452   : > { %v20179_v45 = vpop.f32.mrf.mxu0  ;;  %v20181_v46 = vpop.f32.mrf.mxu1  ;;  %17560 = vmatpush3.msra.mxu0 %v3283_v37  ;;  %17573 = vmatpush3.msra.mxu1 %v3275_v23  ;;  %v4626_v23 = vld [vmem:[#allocation10 + $0xa8] sm:$0xf]  ;;  %v4899_v37 = vld [vmem:[#allocation12 + $0x2b0] sm:$0xff] }
 0x453   : > { %17561 = vmatprep.subr.mxu0 %v3277_v33  ;;  %17574 = vmatprep.subr.mxu1 %v3269_v25 }
 0x454   : > { %v3453_v48 = vpop.f32.mrf.mxu0  ;;  %v20183_v49 = vpop.f32.mrf.mxu1  ;;  %17562 = vmatpush3.msra.mxu0 %v3277_v33  ;;  %17575 = vmatpush3.msra.mxu1 %v3269_v25  ;;  %v4536_v25 = vld [vmem:[#allocation10 + $0x90] sm:$0xff]  ;;  %v4715_v33 = vld [vmem:[#allocation10 + $0xb8] sm:$0xf] }
 0x455   : > { %17563 = vmatprep.subr.mxu0 %v3271_v30  ;;  %17590 = vmatprep.subr.msk.mxu1 %vm3749_vm4, %v3378_v42 }
 0x456   : > { %v3455_v52 = vpop.f32.mrf.mxu0  ;;  %v20186_v54 = vpop.f32.mrf.mxu1  ;;  %17564 = vmatpush3.msra.mxu0 %v3271_v30  ;;  %17577 = vmatmul.mubr.msk.f32.vlgmr.msra.gmra.mxu1 %vm3742_vm3, %v3738_v47  ;;  %v4864_v47 = vld [vmem:[#allocation12 + $0x198] sm:$0xff] }
 0x457   : > { %17591 = vmatpush3.msk.msra.mxu1 %vm3749_vm4, %v3378_v42  ;;  %17579 = vmatprep.subr.msk.mxu0 %vm3749_vm4, %v3376_v40  ;;  %v4874_v42 = vld [vmem:[#allocation12 + $0x1e8] sm:$0xff] }
 0x458   : > { %17592 = vmatprep.subr.mxu1 %v3372_v38  ;;  %v3459_v56 = vpop.f32.mrf.mxu0  ;;  %v20191_v58 = vpop.f32.mrf.mxu1  ;;  %17566 = vmatmul.mubr.msk.f32.vlgmr.msra.gmra.mxu0 %vm3742_vm3, %v3741_v50  ;;  %v4850_v50 = vld [vmem:[#allocation12 + $0x128] sm:$0xff] }
 0x459   : > { %17580 = vmatpush3.msk.msra.mxu0 %vm3749_vm4, %v3376_v40  ;;  %17593 = vmatpush3.msra.mxu1 %v3372_v38  ;;  %v4886_v38 = vld [vmem:[#allocation12 + $0x248] sm:$0xff]  ;;  %v4885_v40 = vld [vmem:[#allocation12 + $0x240] sm:$0xff] }
 0x45a   : > { %17581 = vmatprep.subr.mxu0 %v3370_v36  ;;  %17594 = vmatprep.subr.mxu1 %v3366_v34  ;;  %v3461_v59 = vpop.f32.mrf.mxu0  ;;  %v3550_v61 = vpop.f32.mrf.mxu1 }
 0x45b   : > { %17582 = vmatpush3.msra.mxu0 %v3370_v36  ;;  %17595 = vmatpush3.msra.mxu1 %v3366_v34  ;;  %v4898_v34 = vld [vmem:[#allocation12 + $0x2a8] sm:$0xff]  ;;  %v4897_v36 = vld [vmem:[#allocation12 + $0x2a0] sm:$0xff] }
 0x45c   : > { %17583 = vmatprep.subr.mxu0 %v3364_v32  ;;  %17596 = vmatprep.subr.mxu1 %v3360_v31  ;;  %v3465_v1 = vpop.f32.mrf.mxu0  ;;  %v3554_v2 = vpop.f32.mrf.mxu1 }
 0x45d   : > { %17584 = vmatpush3.msra.mxu0 %v3364_v32  ;;  %17597 = vmatpush3.msra.mxu1 %v3360_v31  ;;  %v4625_v31 = vld [vmem:[#allocation10 + $0xa0] sm:$0xff]  ;;  %v4714_v32 = vld [vmem:[#allocation10 + $0xb0] sm:$0xff] }
 0x45e   : > { %17585 = vmatprep.subr.mxu0 %v20169_v29  ;;  %v3467_v4 = vpop.f32.mrf.mxu0  ;;  %v3556_v63 = vpop.f32.mrf.mxu1  ;;  %17587 = vmatprep.mubr.msk.f32.mxu0 %vm3742_vm3, %v3913_v62  ;;  %v4839_v62 = vld [vmem:[#allocation12 + $0xd0] sm:$0xff] }
 0x45f   : > { %17586 = vmatpush3.msra.mxu0 %v20169_v29  ;;  %17598 = vmatprep.mubr.msk.f32.mxu1 %vm3742_vm3, %v4002_v3  ;;  %v4537_v29 = vld [vmem:[#allocation10 + $0x98] sm:$0xf]  ;;  %v4825_v3 = vld [vmem:[#allocation12 + $0x60] sm:$0xff] }
 0x460   : > { %17588 = vmatmul.mubr.msk.f32.vlgmr.msra.gmra.mxu0 %vm3742_vm3, %v3914_v60  ;;  %17601 = vmatprep.subr.msk.mxu0 %vm3749_vm4, %v3465_v1  ;;  %v20201_v57 = vpop.f32.mrf.mxu0  ;;  %v20205_v5 = vpop.f32.mrf.mxu1  ;;  %v4827_v60 = vld [vmem:[#allocation12 + $0x70] sm:$0xff] }
 0x461   : > { %17612 = vmatprep.subr.msk.mxu1 %vm3749_vm4, %v3467_v4  ;;  %17599 = vmatmul.mubr.msk.f32.vlgmr.msra.gmra.mxu1 %vm3742_vm3, %v4003_v55  ;;  %v4813_v55 = vld [vmem:[#allocation12] sm:$0xff] }
 0x462   : > { %17602 = vmatpush3.msk.msra.mxu0 %vm3749_vm4, %v3465_v1  ;;  %17613 = vmatpush3.msk.msra.mxu1 %vm3749_vm4, %v3467_v4  ;;  %v20209_v51 = vpop.f32.mrf.mxu0  ;;  %v20211_v7 = vpop.f32.mrf.mxu1  ;;  %v4826_v1 = vld [vmem:[#allocation12 + $0x68] sm:$0xff] }
 0x463   : > { %17603 = vmatprep.subr.mxu0 %v3459_v56  ;;  %17614 = vmatprep.subr.mxu1 %v3461_v59  ;;  %v4814_v4 = vld [vmem:[#allocation12 + $0x8] sm:$0xff] }
 0x464   : > { %17604 = vmatpush3.msra.mxu0 %v3459_v56  ;;  %17615 = vmatpush3.msra.mxu1 %v3461_v59  ;;  %v3631_v53 = vpop.f32.mrf.mxu0  ;;  %v20219_v13 = vpop.f32.mrf.mxu1  ;;  %v4851_v56 = vld [vmem:[#allocation12 + $0x130] sm:$0xff]  ;;  %v4840_v59 = vld [vmem:[#allocation12 + $0xd8] sm:$0xff] }
 0x465   : > { %17605 = vmatprep.subr.mxu0 %v3453_v48  ;;  %17616 = vmatprep.subr.mxu1 %v3455_v52 }
 0x466   : > { %17606 = vmatpush3.msra.mxu0 %v3453_v48  ;;  %17617 = vmatpush3.msra.mxu1 %v3455_v52  ;;  %v3633_v8 = vpop.f32.mrf.mxu0  ;;  %v3722_v15 = vpop.f32.mrf.mxu1  ;;  %v4861_v48 = vld [vmem:[#allocation12 + $0x180] sm:$0xff]  ;;  %v4852_v52 = vld [vmem:[#allocation12 + $0x138] sm:$0xff] }
 0x467   : > { %17607 = vmatprep.subr.mxu0 %v20174_v43  ;;  %17618 = vmatprep.subr.mxu1 %v20179_v45 }
 0x468   : > { %17608 = vmatpush3.msra.mxu0 %v20174_v43  ;;  %17609 = vmatprep.mubr.msk.f32.mxu0 %vm3742_vm3, %v4091_v6  ;;  %v3637_v11 = vpop.f32.mrf.mxu0  ;;  %v3726_v20 = vpop.f32.mrf.mxu1  ;;  %v4876_v43 = vld [vmem:[#allocation12 + $0x1f8] sm:$0xff] }
 0x469   : > { %17619 = vmatpush3.msra.mxu1 %v20179_v45  ;;  %17610 = vmatmul.mubr.msk.f32.vlgmr.msra.gmra.mxu0 %vm3742_vm3, %v4092_v9  ;;  %v4875_v45 = vld [vmem:[#allocation12 + $0x1f0] sm:$0xff] }
 0x46a   : > { %17620 = vmatprep.mubr.msk.f32.mxu1 %vm3742_vm3, %v4180_v10  ;;  %17623 = vmatprep.subr.msk.mxu0 %vm3749_vm4, %v3554_v2  ;;  %v3639_v14 = vpop.f32.mrf.mxu0  ;;  %v3728_v24 = vpop.f32.mrf.mxu1 }
 0x46b   : > { %17634 = vmatprep.subr.msk.mxu1 %vm3749_vm4, %v3556_v63  ;;  %17621 = vmatmul.mubr.msk.f32.vlgmr.msra.gmra.mxu1 %vm3742_vm3, %v4181_v12 }
 0x46c   : > { %17624 = vmatpush3.msk.msra.mxu0 %vm3749_vm4, %v3554_v2  ;;  %17635 = vmatpush3.msk.msra.mxu1 %vm3749_vm4, %v3556_v63  ;;  %v3643_v16 = vpop.f32.mrf.mxu0  ;;  %v3732_v28 = vpop.f32.mrf.mxu1  ;;  %v4828_v2 = vld [vmem:[#allocation12 + $0x78] sm:$0xff] }
 0x46d   : > { %17625 = vmatprep.subr.mxu0 %v20191_v58  ;;  %17636 = vmatprep.subr.mxu1 %v3550_v61  ;;  %v4816_v63 = vld [vmem:[#allocation12 + $0x18] sm:$0xff] }
 0x46e   : > { %17626 = vmatpush3.msra.mxu0 %v20191_v58  ;;  %17637 = vmatpush3.msra.mxu1 %v3550_v61  ;;  %v3645_v21 = vpop.f32.mrf.mxu0  ;;  %v3734_v30 = vpop.f32.mrf.mxu1  ;;  %v4838_v58 = vld [vmem:[#allocation12 + $0xc8] sm:$0xff]  ;;  %v4837_v61 = vld [vmem:[#allocation12 + $0xc0] sm:$0xff] }
 0x46f   : > { %17627 = vmatprep.subr.mxu0 %v20183_v49  ;;  %17638 = vmatprep.subr.mxu1 %v20186_v54 }
 0x470   : > { %17628 = vmatpush3.msra.mxu0 %v20183_v49  ;;  %17639 = vmatpush3.msra.mxu1 %v20186_v54  ;;  %v4863_v49 = vld [vmem:[#allocation12 + $0x190] sm:$0xff]  ;;  %v4849_v54 = vld [vmem:[#allocation12 + $0x120] sm:$0xff] }
 0x471   : > { %17629 = vmatprep.subr.mxu0 %v20176_v44  ;;  %17640 = vmatprep.subr.mxu1 %v20181_v46 }
 0x472   : > { %17630 = vmatpush3.msra.mxu0 %v20176_v44  ;;  %17631 = vmatprep.mubr.msk.f32.mxu0 %vm3742_vm3, %v4269_v17  ;;  %v4873_v44 = vld [vmem:[#allocation12 + $0x1e0] sm:$0xff] }
 0x473   : > { %17641 = vmatpush3.msra.mxu1 %v20181_v46  ;;  %17632 = vmatmul.mubr.msk.f32.vlgmr.msra.gmra.mxu0 %vm3742_vm3, %v4270_v18  ;;  %v4862_v46 = vld [vmem:[#allocation12 + $0x188] sm:$0xff] }
 0x474   : > { %17642 = vmatprep.mubr.msk.f32.mxu1 %vm3742_vm3, %v4358_v19  ;;  %17645 = vmatprep.subr.msk.mxu0 %vm3749_vm4, %v3643_v16 }
 0x475   : > { %17656 = vmatprep.subr.msk.mxu1 %vm3749_vm4, %v3645_v21  ;;  %17643 = vmatmul.mubr.msk.f32.vlgmr.msra.gmra.mxu1 %vm3742_vm3, %v4359_v22 }
 0x476   : > { %17646 = vmatpush3.msk.msra.mxu0 %vm3749_vm4, %v3643_v16  ;;  %17657 = vmatpush3.msk.msra.mxu1 %vm3749_vm4, %v3645_v21 }
 0x477   : > { %17647 = vmatprep.subr.mxu0 %v3637_v11  ;;  %17658 = vmatprep.subr.mxu1 %v3639_v14 }
 0x478   : > { %17648 = vmatpush3.msra.mxu0 %v3637_v11  ;;  %17659 = vmatpush3.msra.mxu1 %v3639_v14 }
 0x479   : > { %17649 = vmatprep.subr.mxu0 %v3631_v53  ;;  %17660 = vmatprep.subr.mxu1 %v3633_v8 }
 0x47a   : > { %17650 = vmatpush3.msra.mxu0 %v3631_v53  ;;  %17661 = vmatpush3.msra.mxu1 %v3633_v8 }
 0x47b   : > { %17651 = vmatprep.subr.mxu0 %v20201_v57  ;;  %17662 = vmatprep.subr.mxu1 %v20209_v51 }
 0x47c   : > { %17652 = vmatpush3.msra.mxu0 %v20201_v57  ;;  %17653 = vmatprep.mubr.msk.f32.mxu0 %vm3742_vm3, %v4447_v26  ;;  %v4815_v57 = vld [vmem:[#allocation12 + $0x10] sm:$0xff] }
 0x47d   : > { %17663 = vmatpush3.msra.mxu1 %v20209_v51  ;;  %17654 = vmatmul.mubr.msk.f32.vlgmr.msra.gmra.mxu0 %vm3742_vm3, %v4448_v27  ;;  %v4904_v51 = vld [vmem:[#allocation12 + $0x2d8] sm:$0xff] }
 0x47e   : > { %17664 = vmatprep.mubr.msk.f32.mxu1 %vm3742_vm3, %v4536_v25  ;;  %17667 = vmatprep.subr.msk.mxu0 %vm3749_vm4, %v3732_v28 }
 0x47f   : > { %17678 = vmatprep.subr.msk.mxu1 %vm3749_vm4, %v3734_v30  ;;  %17665 = vmatmul.mubr.msk.f32.vlgmr.msra.gmra.mxu1 %vm3742_vm3, %v4537_v29 }
 0x480   : > { %17668 = vmatpush3.msk.msra.mxu0 %vm3749_vm4, %v3732_v28  ;;  %17679 = vmatpush3.msk.msra.mxu1 %vm3749_vm4, %v3734_v30 }
 0x481   : > { %17669 = vmatprep.subr.mxu0 %v3726_v20  ;;  %17680 = vmatprep.subr.mxu1 %v3728_v24 }
 0x482   : > { %17670 = vmatpush3.msra.mxu0 %v3726_v20  ;;  %17681 = vmatpush3.msra.mxu1 %v3728_v24 }
 0x483   : > { %17671 = vmatprep.subr.mxu0 %v20219_v13  ;;  %17682 = vmatprep.subr.mxu1 %v3722_v15 }
 0x484   : > { %17672 = vmatpush3.msra.mxu0 %v20219_v13  ;;  %17683 = vmatpush3.msra.mxu1 %v3722_v15 }
 0x485   : > { %17673 = vmatprep.subr.mxu0 %v20205_v5  ;;  %17684 = vmatprep.subr.mxu1 %v20211_v7 }
 0x486   : > { %17674 = vmatpush3.msra.mxu0 %v20205_v5  ;;  %17675 = vmatprep.mubr.msk.f32.mxu0 %vm3742_vm3, %v4625_v31  ;;  %v4902_v5 = vld [vmem:[#allocation12 + $0x2c8] sm:$0xff] }
 0x487   : > { %17685 = vmatpush3.msra.mxu1 %v20211_v7  ;;  %17676 = vmatmul.mubr.msk.f32.vlgmr.msra.gmra.mxu0 %vm3742_vm3, %v4626_v23 }
 0x488   : > { %17686 = vmatprep.mubr.msk.f32.mxu1 %vm3742_vm3, %v4714_v32  ;;  %4980 = vmatprep.mubr.f32.mxu0 %v19290_v0 }
 0x489   : > { %17687 = vmatmul.mubr.msk.f32.vlgmr.msra.gmra.mxu1 %vm3742_vm3, %v4715_v33  ;;  %4932 = vmatprep.subr.mxu0 %v4898_v34 }
 0x48a   : > { %5057 = vmatprep.mubr.f32.mxu1 %v19290_v0  ;;  %5009 = vmatprep.subr.mxu1 %v4900_v35 }
 0x48b   : > { %4933 = vmatpush1.msra.mxu0 %v4897_v36  ;;  %5010 = vmatpush1.msra.mxu1 %v4899_v37 }
 0x48c   : > { %4934 = vmatprep.subr.mxu0 %v4886_v38  ;;  %5011 = vmatprep.subr.mxu1 %v4888_v39 }
 0x48d   : > { %4935 = vmatpush1.msra.mxu0 %v4885_v40  ;;  %5012 = vmatpush1.msra.mxu1 %v4887_v41 }
 0x48e   : > { %4936 = vmatprep.subr.mxu0 %v4874_v42  ;;  %5013 = vmatprep.subr.mxu1 %v4876_v43 }
 0x48f   : > { %4937 = vmatpush1.msra.mxu0 %v4873_v44  ;;  %5014 = vmatpush1.msra.mxu1 %v4875_v45 }
 0x490   : > { %4938 = vmatprep.subr.mxu0 %v4862_v46  ;;  %5015 = vmatprep.subr.mxu1 %v4864_v47 }
 0x491   : > { %4939 = vmatpush1.msra.mxu0 %v4861_v48  ;;  %5016 = vmatpush1.msra.mxu1 %v4863_v49 }
 0x492   : > { %4940 = vmatprep.subr.mxu0 %v4850_v50  ;;  %5017 = vmatprep.subr.mxu1 %v4852_v52  ;;  %v16268_v50 = vld [vmem:[#allocation9] ss:$0 sm:$0xff] }
 0x493   : > { %4941 = vmatpush1.msra.mxu0 %v4849_v54  ;;  %5018 = vmatpush1.msra.mxu1 %v4851_v56 }
 0x494   : > { %4942 = vmatprep.subr.mxu0 %v4838_v58  ;;  %5019 = vmatprep.subr.mxu1 %v4840_v59  ;;  %v4901_v58 = vld [vmem:[#allocation12 + $0x2c0] sm:$0xff]  ;;  %v4903_v59 = vld [vmem:[#allocation12 + $0x2d0] sm:$0xff] }
 0x495   : > { %4943 = vmatpush1.msra.mxu0 %v4837_v61  ;;  %5020 = vmatpush1.msra.mxu1 %v4839_v62  ;;  %v4890_v61 = vld [vmem:[#allocation12 + $0x268] sm:$0xff]  ;;  %v4892_v62 = vld [vmem:[#allocation12 + $0x278] sm:$0xff] }
 0x496   : > { %4944 = vmatprep.subr.mxu0 %v4826_v1  ;;  %5021 = vmatprep.subr.mxu1 %v4828_v2  ;;  %v4889_v2 = vld [vmem:[#allocation12 + $0x260] sm:$0xff] }
 0x497   : > { %4945 = vmatpush1.msra.mxu0 %v4825_v3  ;;  %5022 = vmatpush1.msra.mxu1 %v4827_v60  ;;  %v4891_v3 = vld [vmem:[#allocation12 + $0x270] sm:$0xff]  ;;  %v4878_v60 = vld [vmem:[#allocation12 + $0x208] sm:$0xff] }
 0x498   : > { %4946 = vmatprep.subr.mxu0 %v4814_v4  ;;  %5023 = vmatprep.subr.mxu1 %v4816_v63  ;;  %v4880_v4 = vld [vmem:[#allocation12 + $0x218] sm:$0xff] }
 0x499   : > { %4947 = vmatpush1.msra.mxu0 %v4813_v55  ;;  %5024 = vmatpush1.msra.mxu1 %v4815_v57  ;;  %v4877_v55 = vld [vmem:[#allocation12 + $0x200] sm:$0xff]  ;;  %v4879_v57 = vld [vmem:[#allocation12 + $0x210] sm:$0xff] }
 0x49a   : > { %5086 = vmatprep.subr.mxu0 %v4902_v5  ;;  %5163 = vmatprep.subr.mxu1 %v4904_v51  ;;  %v4866_v5 = vld [vmem:[#allocation12 + $0x1a8] sm:$0xff]  ;;  %v4868_v51 = vld [vmem:[#allocation12 + $0x1b8] sm:$0xff] }
 0x516   : > { %v17578_v6 = vpop.f32.mrf.mxu1 }
 0x518   : > { %v17567_v53 = vpop.f32.mrf.mxu0  ;;  %v3903_v9 = vpop.f32.mrf.mxu1 }
 0x519   : > { %v3909_v12 = vadd.f32 %v17578_v6, %v17567_v53  ;;  %v4865_v53 = vld [vmem:[#allocation12 + $0x1a0] sm:$0xff]  ;;  %v4867_v6 = vld [vmem:[#allocation12 + $0x1b0] sm:$0xff] }
 0x51a   : > { %v3819_v7 = vpop.f32.mrf.mxu0 }
 0x51b   : > { %v3904_v13 = vadd.f32 %v3903_v9, %v3819_v7  ;;  %v4854_v7 = vld [vmem:[#allocation12 + $0x148] sm:$0xff]  ;;  %v4853_v9 = vld [vmem:[#allocation12 + $0x140] sm:$0xff] }
 0x520   : > { %v17589_v8 = vpop.f32.mrf.mxu0 }
 0x521   : > { %v17600_v11 = vpop.f32.mrf.mxu1  ;;  %v4000_v15 = vadd.f32 %v17589_v8, %v3909_v12  ;;  %v4856_v8 = vld [vmem:[#allocation12 + $0x158] sm:$0xff] }
 0x522   : > { %v3990_v10 = vpop.f32.mrf.mxu0  ;;  %v4844_v12 = vld [vmem:[#allocation12 + $0xf8] sm:$0xff] }
 0x523   : > { %v3999_v16 = vadd.f32 %v3990_v10, %v3904_v13  ;;  %v4079_v17 = vpop.f32.mrf.mxu1  ;;  %v4089_v20 = vadd.f32 %v17600_v11, %v4000_v15  ;;  %v4855_v10 = vld [vmem:[#allocation12 + $0x150] sm:$0xff]  ;;  %v4842_v11 = vld [vmem:[#allocation12 + $0xe8] sm:$0xff]  ;;  %v4841_v13 = vld [vmem:[#allocation12 + $0xe0] sm:$0xff] }
 0x524   : > { %v4830_v15 = vld [vmem:[#allocation12 + $0x88] sm:$0xff] }
 0x525   : > { %v4088_v21 = vadd.f32 %v4079_v17, %v3999_v16  ;;  %v4832_v16 = vld [vmem:[#allocation12 + $0x98] sm:$0xff]  ;;  %v4829_v17 = vld [vmem:[#allocation12 + $0x80] sm:$0xff] }
 0x529   : > { %v17611_v14 = vpop.f32.mrf.mxu0 }
 0x52a   : > { %v4178_v24 = vadd.f32 %v17611_v14, %v4089_v20  ;;  %v4843_v14 = vld [vmem:[#allocation12 + $0xf0] sm:$0xff]  ;;  %v4820_v20 = vld [vmem:[#allocation12 + $0x38] sm:$0xff] }
 0x52b   : > { %v4168_v18 = vpop.f32.mrf.mxu0  ;;  %v17622_v19 = vpop.f32.mrf.mxu1 }
 0x52c   : > { %v4177_v26 = vadd.f32 %v4168_v18, %v4088_v21  ;;  %v4267_v29 = vadd.f32 %v17622_v19, %v4178_v24  ;;  %v4831_v18 = vld [vmem:[#allocation12 + $0x90] sm:$0xff]  ;;  %v4818_v19 = vld [vmem:[#allocation12 + $0x28] sm:$0xff]  ;;  %v4817_v21 = vld [vmem:[#allocation12 + $0x20] sm:$0xff] }
 0x52d   : > { %v4257_v28 = vpop.f32.mrf.mxu1  ;;  %v4906_v24 = vld [vmem:[#allocation12 + $0x2e8] sm:$0xff] }
 0x52e   : > { %v4266_v30 = vadd.f32 %v4257_v28, %v4177_v26  ;;  %v4908_v26 = vld [vmem:[#allocation12 + $0x2f8] sm:$0xff]  ;;  %v4905_v28 = vld [vmem:[#allocation12 + $0x2e0] sm:$0xff] }
 0x533   : > { %v17633_v22 = vpop.f32.mrf.mxu0 }
 0x534   : > { %v4356_v23 = vadd.f32 %v17633_v22, %v4267_v29  ;;  %v4819_v22 = vld [vmem:[#allocation12 + $0x30] sm:$0xff]  ;;  %v4896_v29 = vld [vmem:[#allocation12 + $0x298] sm:$0xff] }
 0x535   : > { %v4346_v27 = vpop.f32.mrf.mxu0  ;;  %v17644_v25 = vpop.f32.mrf.mxu1 }
 0x536   : > { %v4355_v32 = vadd.f32 %v4346_v27, %v4266_v30  ;;  %v4445_v36 = vadd.f32 %v17644_v25, %v4356_v23  ;;  %v4907_v27 = vld [vmem:[#allocation12 + $0x2f0] sm:$0xff]  ;;  %v4894_v25 = vld [vmem:[#allocation12 + $0x288] sm:$0xff]  ;;  %v4893_v30 = vld [vmem:[#allocation12 + $0x280] sm:$0xff] }
 0x537   : > { %v4435_v33 = vpop.f32.mrf.mxu1  ;;  %v4882_v23 = vld [vmem:[#allocation12 + $0x228] sm:$0xff] }
 0x538   : > { %v4444_v37 = vadd.f32 %v4435_v33, %v4355_v32  ;;  %v4884_v32 = vld [vmem:[#allocation12 + $0x238] sm:$0xff]  ;;  %v4881_v33 = vld [vmem:[#allocation12 + $0x220] sm:$0xff] }
 0x53d   : > { %v17655_v31 = vpop.f32.mrf.mxu0 }
 0x53e   : > { %v4534_v38 = vadd.f32 %v17655_v31, %v4445_v36  ;;  %v4895_v31 = vld [vmem:[#allocation12 + $0x290] sm:$0xff]  ;;  %v4872_v36 = vld [vmem:[#allocation12 + $0x1d8] sm:$0xff] }
 0x53f   : > { %v4524_v34 = vpop.f32.mrf.mxu0  ;;  %v17666_v35 = vpop.f32.mrf.mxu1 }
 0x540   : > { %v4533_v39 = vadd.f32 %v4524_v34, %v4444_v37  ;;  %v4623_v42 = vadd.f32 %v17666_v35, %v4534_v38  ;;  %v4883_v34 = vld [vmem:[#allocation12 + $0x230] sm:$0xff]  ;;  %v4870_v35 = vld [vmem:[#allocation12 + $0x1c8] sm:$0xff]  ;;  %v4869_v37 = vld [vmem:[#allocation12 + $0x1c0] sm:$0xff] }
 0x541   : > { %v4613_v40 = vpop.f32.mrf.mxu1  ;;  %v4871_v38 = vld [vmem:[#allocation12 + $0x1d0] sm:$0xff] }
 0x542   : > { %v4622_v43 = vadd.f32 %v4613_v40, %v4533_v39  ;;  %v4858_v39 = vld [vmem:[#allocation12 + $0x168] sm:$0xff]  ;;  %v4860_v40 = vld [vmem:[#allocation12 + $0x178] sm:$0xff] }
 0x547   : > { %v17677_v41 = vpop.f32.mrf.mxu0 }
 0x548   : > { %v4712_v46 = vadd.f32 %v17677_v41, %v4623_v42  ;;  %v4857_v41 = vld [vmem:[#allocation12 + $0x160] sm:$0xff]  ;;  %v4859_v42 = vld [vmem:[#allocation12 + $0x170] sm:$0xff] }
 0x549   : > { %v4702_v44 = vpop.f32.mrf.mxu0  ;;  %v17688_v45 = vpop.f32.mrf.mxu1 }
 0x54a   : > { %v4711_v47 = vadd.f32 %v4702_v44, %v4622_v43  ;;  %v4801_v52 = vadd.f32 %v17688_v45, %v4712_v46  ;;  %v4846_v43 = vld [vmem:[#allocation12 + $0x108] sm:$0xff]  ;;  %v4848_v44 = vld [vmem:[#allocation12 + $0x118] sm:$0xff]  ;;  %v4845_v45 = vld [vmem:[#allocation12 + $0x100] sm:$0xff] }
 0x54b   : > { %v4791_v48 = vpop.f32.mrf.mxu1  ;;  %v4847_v46 = vld [vmem:[#allocation12 + $0x110] sm:$0xff] }
 0x54c   : > { %v4800_v49 = vadd.f32 %v4791_v48, %v4711_v47  ;;  %v4810_v1 = vadd.f32 %v16268_v50, %v4801_v52  ;;  %v4834_v47 = vld [vmem:[#allocation12 + $0xa8] sm:$0xff]  ;;  %v4836_v48 = vld [vmem:[#allocation12 + $0xb8] sm:$0xff] }
 0x54d   : > { %v4822_v52 = vld [vmem:[#allocation12 + $0x48] sm:$0xff] }
 0x54e   : > { %v4809_v54 = vadd.f32 %v16268_v50, %v4800_v49  ;;  %v20275_v63 = vmax.f32 %v4810_v1, 0.0  ;;  %v4833_v49 = vld [vmem:[#allocation12 + $0xa0] sm:$0xff]  ;;  %v4835_v50 = vld [vmem:[#allocation12 + $0xb0] sm:$0xff] }
 0x550   : > { %v20269_v56 = vmax.f32 %v4809_v54, 0.0  ;;  %v4824_v54 = vld [vmem:[#allocation12 + $0x58] sm:$0xff] }
 0x552   : > { %16269 = vmatmul.mubr.msk.f32.vlgmr.msra.gmra.mxu0 %vm4909_vm5, %v20269_v56  ;;  %16271 = vmatmul.mubr.msk.f32.vlgmr.msra.gmra.mxu1 %vm4909_vm5, %v20269_v56 }
 0x553   : > { %5087 = vmatpush1.msra.mxu0 %v4901_v58  ;;  %5164 = vmatpush1.msra.mxu1 %v4903_v59  ;;  %v4821_v58 = vld [vmem:[#allocation12 + $0x40] sm:$0xff]  ;;  %v4823_v59 = vld [vmem:[#allocation12 + $0x50] sm:$0xff] }
 0x554   : > { %5088 = vmatprep.subr.mxu0 %v4890_v61  ;;  %5165 = vmatprep.subr.mxu1 %v4892_v62 }
 0x555   : > { %5089 = vmatpush1.msra.mxu0 %v4889_v2  ;;  %5166 = vmatpush1.msra.mxu1 %v4891_v3 }
 0x556   : > { %4986 = vmatprep.mubr.f32.mxu0 %v19290_v0  ;;  %5063 = vmatprep.mubr.f32.mxu1 %v19290_v0 }
 0x557   : > { %5090 = vmatprep.subr.mxu0 %v4878_v60  ;;  %5167 = vmatprep.subr.mxu1 %v4880_v4  ;;  %v5378_v4 = vld [vmem:[#allocation15] sm:$0x3f] }
 0x558   : > { %16270 = vmatmul.mubr.msk.f32.gmra.mxu0 %vm4909_vm5, %v20275_v63  ;;  %16272 = vmatmul.mubr.msk.f32.gmra.mxu1 %vm4909_vm5, %v20275_v63 }
 0x559   : > { %5091 = vmatpush1.msra.mxu0 %v4877_v55  ;;  %5168 = vmatpush1.msra.mxu1 %v4879_v57  ;;  %v5536_v57 = vld [vmem:[#allocation15 + $0x10] sm:$0x3f] }
 0x55a   : > { %5092 = vmatprep.subr.mxu0 %v4866_v5  ;;  %5169 = vmatprep.subr.mxu1 %v4868_v51  ;;  %v5615_v5 = vld [vmem:[#allocation15 + $0x18] sm:$0x3f] }
 0x55b   : > { %5093 = vmatpush1.msra.mxu0 %v4865_v53  ;;  %5170 = vmatpush1.msra.mxu1 %v4867_v6 }
 0x55c   : > { %5094 = vmatprep.subr.mxu0 %v4854_v7  ;;  %5171 = vmatprep.subr.mxu1 %v4856_v8 }
 0x55d   : > { %5095 = vmatpush1.msra.mxu0 %v4853_v9  ;;  %5172 = vmatpush1.msra.mxu1 %v4855_v10  ;;  %v5694_v10 = vld [vmem:[#allocation15 + $0x20] sm:$0x3f] }
 0x55e   : > { %5096 = vmatprep.subr.mxu0 %v4842_v11  ;;  %5173 = vmatprep.subr.mxu1 %v4844_v12  ;;  %v5773_v12 = vld [vmem:[#allocation15 + $0x28] sm:$0x3f] }
 0x55f   : > { %5097 = vmatpush1.msra.mxu0 %v4841_v13  ;;  %5174 = vmatpush1.msra.mxu1 %v4843_v14  ;;  %v5852_v14 = vld [vmem:[#allocation15 + $0x30] sm:$0x3f] }
 0x560   : > { %5098 = vmatprep.subr.mxu0 %v4830_v15  ;;  %5175 = vmatprep.subr.mxu1 %v4832_v16  ;;  %v5931_v15 = vld [vmem:[#allocation15 + $0x38] sm:$0x3f] }
 0x561   : > { %5099 = vmatpush1.msra.mxu0 %v4829_v17  ;;  %5176 = vmatpush1.msra.mxu1 %v4831_v18 }
 0x562   : > { %5100 = vmatprep.subr.mxu0 %v4818_v19  ;;  %5177 = vmatprep.subr.mxu1 %v4820_v20 }
 0x563   : > { %5101 = vmatpush1.msra.mxu0 %v4817_v21  ;;  %5134 = vmatprep.mubr.f32.mxu0 %v19290_v0  ;;  %v6010_v21 = vld [vmem:[#allocation15 + $0x40] sm:$0x3f] }
 0x564   : > { %5178 = vmatpush1.msra.mxu1 %v4819_v22  ;;  %5211 = vmatprep.mubr.f32.mxu1 %v19290_v0 }
 0x565   : > { %16273 = vmatmul.mubr.msk.f32.vlgmr.msra.gmra.mxu0 %vm4909_vm5, %v20269_v56  ;;  %16275 = vmatmul.mubr.msk.f32.vlgmr.msra.gmra.mxu1 %vm4909_vm5, %v20269_v56 }
 0x566   : > { %5240 = vmatprep.subr.mxu0 %v4906_v24  ;;  %5317 = vmatprep.subr.mxu1 %v4908_v26  ;;  %v6089_v24 = vld [vmem:[#allocation15 + $0x48] sm:$0x3f] }
 0x567   : > { %5241 = vmatpush1.msra.mxu0 %v4905_v28  ;;  %5318 = vmatpush1.msra.mxu1 %v4907_v27  ;;  %v6168_v28 = vld [vmem:[#allocation15 + $0x50] sm:$0x3f] }
 0x568   : > { %5242 = vmatprep.subr.mxu0 %v4894_v25  ;;  %5319 = vmatprep.subr.mxu1 %v4896_v29  ;;  %v6247_v25 = vld [vmem:[#allocation15 + $0x58] sm:$0x3f]  ;;  %v6502_v29 = vld [vmem:[%s21702_s26 + $0x548] sm:$0xff] }
 0x569   : > { %5140 = vmatprep.mubr.f32.mxu0 %v19290_v0  ;;  %5217 = vmatprep.mubr.f32.mxu1 %v19290_v0 }
 0x56a   : > { %5243 = vmatpush1.msra.mxu0 %v4893_v30  ;;  %5320 = vmatpush1.msra.mxu1 %v4895_v31  ;;  %v6504_v30 = vld [vmem:[%s21702_s26 + $0x558] sm:$0xff]  ;;  %v6501_v31 = vld [vmem:[%s21702_s26 + $0x540] sm:$0xff] }
 0x56b   : > { %16274 = vmatmul.mubr.msk.f32.gmra.mxu0 %vm4909_vm5, %v20275_v63  ;;  %16276 = vmatmul.mubr.msk.f32.gmra.mxu1 %vm4909_vm5, %v20275_v63 }
 0x56c   : > { %5244 = vmatprep.subr.mxu0 %v4882_v23  ;;  %5321 = vmatprep.subr.mxu1 %v4884_v32  ;;  %v6503_v23 = vld [vmem:[%s21702_s26 + $0x550] sm:$0xff]  ;;  %v6478_v32 = vld [vmem:[%s21702_s26 + $0x488] sm:$0xff] }
 0x56d   : > { %5245 = vmatpush1.msra.mxu0 %v4881_v33  ;;  %5322 = vmatpush1.msra.mxu1 %v4883_v34  ;;  %v6480_v33 = vld [vmem:[%s21702_s26 + $0x498] sm:$0xff]  ;;  %v6477_v34 = vld [vmem:[%s21702_s26 + $0x480] sm:$0xff] }
 0x56e   : > { %5246 = vmatprep.subr.mxu0 %v4870_v35  ;;  %5323 = vmatprep.subr.mxu1 %v4872_v36  ;;  %v6479_v35 = vld [vmem:[%s21702_s26 + $0x490] sm:$0xff]  ;;  %v6454_v36 = vld [vmem:[%s21702_s26 + $0x3c8] sm:$0xff] }
 0x56f   : > { %5247 = vmatpush1.msra.mxu0 %v4869_v37  ;;  %5324 = vmatpush1.msra.mxu1 %v4871_v38  ;;  %v6456_v37 = vld [vmem:[%s21702_s26 + $0x3d8] sm:$0xff]  ;;  %v6453_v38 = vld [vmem:[%s21702_s26 + $0x3c0] sm:$0xff] }
 0x570   : > { %5248 = vmatprep.subr.mxu0 %v4858_v39  ;;  %5325 = vmatprep.subr.mxu1 %v4860_v40  ;;  %v6455_v39 = vld [vmem:[%s21702_s26 + $0x3d0] sm:$0xff]  ;;  %v6430_v40 = vld [vmem:[%s21702_s26 + $0x308] sm:$0xff] }
 0x571   : > { %5249 = vmatpush1.msra.mxu0 %v4857_v41  ;;  %5326 = vmatpush1.msra.mxu1 %v4859_v42  ;;  %v6432_v41 = vld [vmem:[%s21702_s26 + $0x318] sm:$0xff]  ;;  %v6429_v42 = vld [vmem:[%s21702_s26 + $0x300] sm:$0xff] }
 0x572   : > { %5250 = vmatprep.subr.mxu0 %v4846_v43  ;;  %5327 = vmatprep.subr.mxu1 %v4848_v44  ;;  %v6431_v43 = vld [vmem:[%s21702_s26 + $0x310] sm:$0xff]  ;;  %v6406_v44 = vld [vmem:[%s21702_s26 + $0x248] sm:$0xff] }
 0x573   : > { %5251 = vmatpush1.msra.mxu0 %v4845_v45  ;;  %5328 = vmatpush1.msra.mxu1 %v4847_v46  ;;  %v6408_v45 = vld [vmem:[%s21702_s26 + $0x258] sm:$0xff]  ;;  %v6405_v46 = vld [vmem:[%s21702_s26 + $0x240] sm:$0xff] }
 0x574   : > { %5252 = vmatprep.subr.mxu0 %v4834_v47  ;;  %5329 = vmatprep.subr.mxu1 %v4836_v48  ;;  %v6407_v47 = vld [vmem:[%s21702_s26 + $0x250] sm:$0xff]  ;;  %v6382_v48 = vld [vmem:[%s21702_s26 + $0x188] sm:$0xff] }
 0x575   : > { %5253 = vmatpush1.msra.mxu0 %v4833_v49  ;;  %5330 = vmatpush1.msra.mxu1 %v4835_v50  ;;  %v6384_v49 = vld [vmem:[%s21702_s26 + $0x198] sm:$0xff]  ;;  %v6381_v50 = vld [vmem:[%s21702_s26 + $0x180] sm:$0xff] }
 0x576   : > { %5254 = vmatprep.subr.mxu0 %v4822_v52  ;;  %5331 = vmatprep.subr.mxu1 %v4824_v54  ;;  %v6383_v52 = vld [vmem:[%s21702_s26 + $0x190] sm:$0xff]  ;;  %v6358_v54 = vld [vmem:[%s21702_s26 + $0xc8] sm:$0xff] }
 0x577   : > { %5255 = vmatpush1.msra.mxu0 %v4821_v58  ;;  %5288 = vmatprep.mubr.f32.mxu0 %v19290_v0  ;;  %v6360_v58 = vld [vmem:[%s21702_s26 + $0xd8] sm:$0xff] }
 0x578   : > { %5332 = vmatpush1.msra.mxu1 %v4823_v59  ;;  %5365 = vmatprep.mubr.f32.mxu1 %v19290_v0  ;;  %v6357_v59 = vld [vmem:[%s21702_s26 + $0xc0] sm:$0xff] }
 0x579   : > { %16277 = vmatmul.mubr.msk.f32.vlgmr.msra.gmra.mxu0 %vm4909_vm5, %v20269_v56  ;;  %16279 = vmatmul.mubr.msk.f32.vlgmr.msra.gmra.mxu1 %vm4909_vm5, %v20269_v56 }
 0x57a   : > { %5294 = vmatprep.mubr.f32.mxu0 %v19290_v0  ;;  %5371 = vmatprep.mubr.f32.mxu1 %v19290_v0 }
 0x57b   : > { %17696 = vmatprep.subr.mxu1 %v19290_v0  ;;  %17689 = vmatprep.subr.mxu0 %v19290_v0 }
 0x57d   : > { %16278 = vmatmul.mubr.msk.f32.gmra.mxu0 %vm4909_vm5, %v20275_v63  ;;  %16280 = vmatmul.mubr.msk.f32.gmra.mxu1 %vm4909_vm5, %v20275_v63  ;;  %v5380_v63 = vld [vmem:[#allocation15 + $0x8] sm:$0x3f] }
 0x57e   : > { %17700 = vmatprep.mubr.msk.f32.mxu1 %vm19291_vm6, %v19290_v0  ;;  %17693 = vmatprep.mubr.msk.f32.mxu0 %vm19291_vm6, %v19290_v0 }
 0x612   : > { %v4982_v56 = vpop.f32.mrf.mxu0  ;;  %v5059_v61 = vpop.f32.mrf.mxu1 }
 0x614   : > { %v4984_v62 = vpop.f32.mrf.mxu0  ;;  %v5061_v1 = vpop.f32.mrf.mxu1 }
 0x618   : > { %v4988_v2 = vpop.f32.mrf.mxu0  ;;  %v5065_v3 = vpop.f32.mrf.mxu1 }
 0x619   : > { %17697 = vmatpush3.msk.msra.mxu1 %vm5385_vm7, %v4988_v2  ;;  %v6335_v2 = vld [vmem:[%s21702_s26 + $0x10] sm:$0xff] }
 0x61a   : > { %v4990_v60 = vpop.f32.mrf.mxu0  ;;  %17698 = vmatprep.subr.mxu1 %v19290_v0  ;;  %v5067_v55 = vpop.f32.mrf.mxu1 }
 0x61b   : > { %17690 = vmatpush3.msk.msra.mxu0 %vm5385_vm7, %v4990_v60  ;;  %17699 = vmatpush3.msra.mxu1 %v4982_v56  ;;  %v6359_v56 = vld [vmem:[%s21702_s26 + $0xd0] sm:$0xff]  ;;  %v6508_v60 = vld [vmem:[%s21702_s26 + $0x578] sm:$0xff] }
 0x61c   : > { %17691 = vmatprep.subr.mxu0 %v19290_v0  ;;  %17710 = vmatprep.subr.mxu1 %v19290_v0 }
 0x61d   : > { %17692 = vmatpush3.msra.mxu0 %v4984_v62  ;;  %17701 = vmatmul.mubr.msk.f32.vlgmr.msra.gmra.mxu1 %vm5381_vm8, %v5378_v4  ;;  %v6336_v62 = vld [vmem:[%s21702_s26 + $0x18] sm:$0xff] }
 0x61e   : > { %17711 = vmatpush3.msk.msra.mxu1 %vm5385_vm7, %v5067_v55  ;;  %17703 = vmatprep.subr.mxu0 %v19290_v0 }
 0x61f   : > { %17712 = vmatprep.subr.mxu1 %v19290_v0  ;;  %17694 = vmatmul.mubr.msk.f32.vlgmr.msra.gmra.mxu0 %vm5381_vm8, %v5380_v63 }
 0x620   : > { %17704 = vmatpush3.msk.msra.mxu0 %vm5385_vm7, %v5065_v3  ;;  %17713 = vmatpush3.msra.mxu1 %v5061_v1  ;;  %v6333_v1 = vld [vmem:[%s21702_s26] sm:$0xff]  ;;  %v6506_v3 = vld [vmem:[%s21702_s26 + $0x568] sm:$0xff] }
 0x621   : > { %17705 = vmatprep.subr.mxu0 %v19290_v0  ;;  %17707 = vmatprep.mubr.msk.f32.mxu0 %vm19291_vm6, %v19290_v0 }
 0x622   : > { %17706 = vmatpush3.msra.mxu0 %v5059_v61  ;;  %17714 = vmatprep.mubr.msk.f32.mxu1 %vm19291_vm6, %v19290_v0  ;;  %v6334_v61 = vld [vmem:[%s21702_s26 + $0x8] sm:$0xff] }
 0x623   : > { %17717 = vmatprep.subr.mxu0 %v19290_v0  ;;  %17708 = vmatmul.mubr.msk.f32.vlgmr.msra.gmra.mxu0 %vm5381_vm8, %v5536_v57 }
 0x624   : > { %17724 = vmatprep.subr.mxu1 %v19290_v0  ;;  %17715 = vmatmul.mubr.msk.f32.vlgmr.msra.gmra.mxu1 %vm5381_vm8, %v5615_v5 }
 0x625   : > { %v5136_v51 = vpop.f32.mrf.mxu0  ;;  %17721 = vmatprep.mubr.msk.f32.mxu0 %vm19291_vm6, %v19290_v0  ;;  %17728 = vmatprep.mubr.msk.f32.mxu1 %vm19291_vm6, %v19290_v0  ;;  %v5213_v53 = vpop.f32.mrf.mxu1 }
 0x627   : > { %v5138_v6 = vpop.f32.mrf.mxu0  ;;  %v5215_v7 = vpop.f32.mrf.mxu1 }
 0x62b   : > { %v5142_v8 = vpop.f32.mrf.mxu0  ;;  %v5219_v11 = vpop.f32.mrf.mxu1 }
 0x62c   : > { %17718 = vmatpush3.msk.msra.mxu0 %vm5385_vm7, %v5142_v8 }
 0x62d   : > { %v5144_v9 = vpop.f32.mrf.mxu0  ;;  %17719 = vmatprep.subr.mxu0 %v19290_v0  ;;  %v5221_v13 = vpop.f32.mrf.mxu1 }
 0x62e   : > { %17720 = vmatpush3.msra.mxu0 %v5136_v51  ;;  %17725 = vmatpush3.msk.msra.mxu1 %vm5385_vm7, %v5144_v9 }
 0x62f   : > { %17726 = vmatprep.subr.mxu1 %v19290_v0  ;;  %17731 = vmatprep.subr.mxu0 %v19290_v0 }
 0x630   : > { %17722 = vmatmul.mubr.msk.f32.vlgmr.msra.gmra.mxu0 %vm5381_vm8, %v5694_v10  ;;  %17727 = vmatpush3.msra.mxu1 %v5138_v6 }
 0x631   : > { %17732 = vmatpush3.msk.msra.mxu0 %vm5385_vm7, %v5219_v11  ;;  %17738 = vmatprep.subr.mxu1 %v19290_v0 }
 0x632   : > { %17733 = vmatprep.subr.mxu0 %v19290_v0  ;;  %17729 = vmatmul.mubr.msk.f32.vlgmr.msra.gmra.mxu1 %vm5381_vm8, %v5773_v12 }
 0x633   : > { %17734 = vmatpush3.msra.mxu0 %v5213_v53  ;;  %17739 = vmatpush3.msk.msra.mxu1 %vm5385_vm7, %v5221_v13 }
 0x634   : > { %17740 = vmatprep.subr.mxu1 %v19290_v0  ;;  %17735 = vmatprep.mubr.msk.f32.mxu0 %vm19291_vm6, %v19290_v0 }
 0x635   : > { %17741 = vmatpush3.msra.mxu1 %v5215_v7  ;;  %17736 = vmatmul.mubr.msk.f32.vlgmr.msra.gmra.mxu0 %vm5381_vm8, %v5852_v14 }
 0x636   : > { %17745 = vmatprep.subr.mxu0 %v19290_v0  ;;  %17742 = vmatprep.mubr.msk.f32.mxu1 %vm19291_vm6, %v19290_v0 }
 0x637   : > { %17743 = vmatmul.mubr.msk.f32.vlgmr.msra.gmra.mxu1 %vm5381_vm8, %v5931_v15  ;;  %17752 = vmatprep.subr.mxu1 %v19290_v0 }
 0x638   : > { %17749 = vmatprep.mubr.msk.f32.mxu0 %vm19291_vm6, %v19290_v0  ;;  %17756 = vmatprep.mubr.msk.f32.mxu1 %vm19291_vm6, %v19290_v0 }
 0x639   : > { %v5290_v16 = vpop.f32.mrf.mxu0  ;;  %v5367_v17 = vpop.f32.mrf.mxu1 }
 0x63b   : > { %v5292_v18 = vpop.f32.mrf.mxu0  ;;  %v5369_v19 = vpop.f32.mrf.mxu1 }
 0x63d   : > { %v5296_v20 = vpop.f32.mrf.mxu0  ;;  %v5373_v26 = vpop.f32.mrf.mxu1 }
 0x63e   : > { %17746 = vmatpush3.msk.msra.mxu0 %vm5385_vm7, %v5296_v20 }
 0x63f   : > { %v5298_v22 = vpop.f32.mrf.mxu0  ;;  %17747 = vmatprep.subr.mxu0 %v19290_v0  ;;  %v5375_v27 = vpop.f32.mrf.mxu1 }
 0x640   : > { %17748 = vmatpush3.msra.mxu0 %v5290_v16  ;;  %17753 = vmatpush3.msk.msra.mxu1 %vm5385_vm7, %v5298_v22 }
 0x641   : > { %17750 = vmatmul.mubr.msk.f32.vlgmr.msra.gmra.mxu0 %vm5381_vm8, %v6010_v21  ;;  %17754 = vmatprep.subr.mxu1 %v19290_v0 }
 0x642   : > { %17759 = vmatprep.subr.mxu0 %v19290_v0  ;;  %17755 = vmatpush3.msra.mxu1 %v5292_v18 }
 0x643   : > { %17760 = vmatpush3.msk.msra.mxu0 %vm5385_vm7, %v5373_v26  ;;  %17757 = vmatmul.mubr.msk.f32.vlgmr.msra.gmra.mxu1 %vm5381_vm8, %v6089_v24 }
 0x644   : > { %17761 = vmatprep.subr.mxu0 %v19290_v0  ;;  %17766 = vmatprep.subr.mxu1 %v19290_v0 }
 0x645   : > { %17762 = vmatpush3.msra.mxu0 %v5367_v17  ;;  %17763 = vmatprep.mubr.msk.f32.mxu0 %vm19291_vm6, %v19290_v0 }
 0x646   : > { %17767 = vmatpush3.msk.msra.mxu1 %vm5385_vm7, %v5375_v27  ;;  %17764 = vmatmul.mubr.msk.f32.vlgmr.msra.gmra.mxu0 %vm5381_vm8, %v6168_v28 }
 0x647   : > { %17768 = vmatprep.subr.mxu1 %v19290_v0  ;;  %17770 = vmatprep.mubr.msk.f32.mxu1 %vm19291_vm6, %v19290_v0 }
 0x648   : > { %17769 = vmatpush3.msra.mxu1 %v5369_v19  ;;  %6592 = vmatprep.mubr.f32.mxu0 %v19290_v0 }
 0x649   : > { %17771 = vmatmul.mubr.msk.f32.vlgmr.msra.gmra.mxu1 %vm5381_vm8, %v6247_v25  ;;  %6544 = vmatprep.subr.mxu0 %v6502_v29 }
 0x64a   : > { %6663 = vmatprep.mubr.f32.mxu1 %v19290_v0  ;;  %6615 = vmatprep.subr.mxu1 %v6504_v30 }
 0x64b   : > { %6545 = vmatpush1.msra.mxu0 %v6501_v31  ;;  %6616 = vmatpush1.msra.mxu1 %v6503_v23 }
 0x64c   : > { %6546 = vmatprep.subr.mxu0 %v6478_v32  ;;  %6617 = vmatprep.subr.mxu1 %v6480_v33  ;;  %v16305_v32 = vld [vmem:[#allocation13] ss:$0 sm:$0xff] }
 0x64d   : > { %6547 = vmatpush1.msra.mxu0 %v6477_v34  ;;  %6618 = vmatpush1.msra.mxu1 %v6479_v35 }
 0x64e   : > { %6548 = vmatprep.subr.mxu0 %v6454_v36  ;;  %6619 = vmatprep.subr.mxu1 %v6456_v37  ;;  %v6505_v36 = vld [vmem:[%s21702_s26 + $0x560] sm:$0xff]  ;;  %v6507_v37 = vld [vmem:[%s21702_s26 + $0x570] sm:$0xff] }
 0x64f   : > { %6549 = vmatpush1.msra.mxu0 %v6453_v38  ;;  %6620 = vmatpush1.msra.mxu1 %v6455_v39  ;;  %v6482_v38 = vld [vmem:[%s21702_s26 + $0x4a8] sm:$0xff]  ;;  %v6484_v39 = vld [vmem:[%s21702_s26 + $0x4b8] sm:$0xff] }
 0x650   : > { %6550 = vmatprep.subr.mxu0 %v6430_v40  ;;  %6621 = vmatprep.subr.mxu1 %v6432_v41  ;;  %v6481_v40 = vld [vmem:[%s21702_s26 + $0x4a0] sm:$0xff]  ;;  %v6483_v41 = vld [vmem:[%s21702_s26 + $0x4b0] sm:$0xff] }
 0x651   : > { %6551 = vmatpush1.msra.mxu0 %v6429_v42  ;;  %6622 = vmatpush1.msra.mxu1 %v6431_v43  ;;  %v6458_v42 = vld [vmem:[%s21702_s26 + $0x3e8] sm:$0xff]  ;;  %v6460_v43 = vld [vmem:[%s21702_s26 + $0x3f8] sm:$0xff] }
 0x652   : > { %6552 = vmatprep.subr.mxu0 %v6406_v44  ;;  %6623 = vmatprep.subr.mxu1 %v6408_v45  ;;  %v6457_v44 = vld [vmem:[%s21702_s26 + $0x3e0] sm:$0xff]  ;;  %v6459_v45 = vld [vmem:[%s21702_s26 + $0x3f0] sm:$0xff] }
 0x653   : > { %6553 = vmatpush1.msra.mxu0 %v6405_v46  ;;  %6624 = vmatpush1.msra.mxu1 %v6407_v47  ;;  %v6434_v46 = vld [vmem:[%s21702_s26 + $0x328] sm:$0xff]  ;;  %v6436_v47 = vld [vmem:[%s21702_s26 + $0x338] sm:$0xff] }
 0x654   : > { %6554 = vmatprep.subr.mxu0 %v6382_v48  ;;  %6625 = vmatprep.subr.mxu1 %v6384_v49  ;;  %v6433_v48 = vld [vmem:[%s21702_s26 + $0x320] sm:$0xff]  ;;  %v6435_v49 = vld [vmem:[%s21702_s26 + $0x330] sm:$0xff] }
 0x655   : > { %6555 = vmatpush1.msra.mxu0 %v6381_v50  ;;  %6626 = vmatpush1.msra.mxu1 %v6383_v52  ;;  %v6410_v50 = vld [vmem:[%s21702_s26 + $0x268] sm:$0xff]  ;;  %v6412_v52 = vld [vmem:[%s21702_s26 + $0x278] sm:$0xff] }
 0x656   : > { %6556 = vmatprep.subr.mxu0 %v6358_v54  ;;  %6627 = vmatprep.subr.mxu1 %v6360_v58  ;;  %v6409_v54 = vld [vmem:[%s21702_s26 + $0x260] sm:$0xff]  ;;  %v6411_v58 = vld [vmem:[%s21702_s26 + $0x270] sm:$0xff] }
 0x657   : > { %6557 = vmatpush1.msra.mxu0 %v6357_v59  ;;  %6628 = vmatpush1.msra.mxu1 %v6359_v56  ;;  %v6386_v59 = vld [vmem:[%s21702_s26 + $0x1a8] sm:$0xff]  ;;  %v6388_v56 = vld [vmem:[%s21702_s26 + $0x1b8] sm:$0xff] }
 0x658   : > { %6558 = vmatprep.subr.mxu0 %v6334_v61  ;;  %6629 = vmatprep.subr.mxu1 %v6336_v62  ;;  %v6385_v61 = vld [vmem:[%s21702_s26 + $0x1a0] sm:$0xff]  ;;  %v6387_v62 = vld [vmem:[%s21702_s26 + $0x1b0] sm:$0xff] }
 0x659   : > { %6559 = vmatpush1.msra.mxu0 %v6333_v1  ;;  %6630 = vmatpush1.msra.mxu1 %v6335_v2  ;;  %v6362_v1 = vld [vmem:[%s21702_s26 + $0xe8] sm:$0xff]  ;;  %v6364_v2 = vld [vmem:[%s21702_s26 + $0xf8] sm:$0xff] }
 0x65a   : > { %6686 = vmatprep.subr.mxu0 %v6506_v3  ;;  %6757 = vmatprep.subr.mxu1 %v6508_v60  ;;  %v6361_v3 = vld [vmem:[%s21702_s26 + $0xe0] sm:$0xff]  ;;  %v6363_v60 = vld [vmem:[%s21702_s26 + $0xf0] sm:$0xff] }
 0x6dd   : > { %v5531_v4 = vpop.f32.mrf.mxu1 }
 0x6df   : > { %v5455_v63 = vpop.f32.mrf.mxu0  ;;  %v17702_v55 = vpop.f32.mrf.mxu1 }
 0x6e0   : > { %v5532_v7 = vadd.f32 %v5531_v4, %v5455_v63  ;;  %v6338_v4 = vld [vmem:[%s21702_s26 + $0x28] sm:$0xff]  ;;  %v6340_v63 = vld [vmem:[%s21702_s26 + $0x38] sm:$0xff]  ;;  %v6337_v55 = vld [vmem:[%s21702_s26 + $0x20] sm:$0xff] }
 0x6e1   : > { %v17695_v57 = vpop.f32.mrf.mxu0 }
 0x6e2   : > { %v6339_v57 = vld [vmem:[%s21702_s26 + $0x30] sm:$0xff] }
 0x6e3   : > { %v5609_v5 = vpop.f32.mrf.mxu0 }
 0x6e4   : > { %v5688_v51 = vpop.f32.mrf.mxu1  ;;  %v5613_v8 = vadd.f32 %v5609_v5, %v5532_v7  ;;  %v6510_v5 = vld [vmem:[%s21702_s26 + $0x588] sm:$0xff] }
 0x6e5   : > { %v17709_v53 = vpop.f32.mrf.mxu0  ;;  %v6486_v7 = vld [vmem:[%s21702_s26 + $0x4c8] sm:$0xff] }
 0x6e6   : > { %v17716_v6 = vpop.f32.mrf.mxu1  ;;  %v5692_v9 = vadd.f32 %v5688_v51, %v5613_v8  ;;  %v6512_v51 = vld [vmem:[%s21702_s26 + $0x598] sm:$0xff]  ;;  %v6509_v53 = vld [vmem:[%s21702_s26 + $0x580] sm:$0xff] }
 0x6e7   : > { %v6511_v6 = vld [vmem:[%s21702_s26 + $0x590] sm:$0xff]  ;;  %v6488_v8 = vld [vmem:[%s21702_s26 + $0x4d8] sm:$0xff] }
 0x6f0   : > { %v5767_v10 = vpop.f32.mrf.mxu0 }
 0x6f1   : > { %v5771_v13 = vadd.f32 %v5767_v10, %v5692_v9  ;;  %v6485_v9 = vld [vmem:[%s21702_s26 + $0x4c0] sm:$0xff]  ;;  %v6487_v10 = vld [vmem:[%s21702_s26 + $0x4d0] sm:$0xff] }
 0x6f2   : > { %v17723_v11 = vpop.f32.mrf.mxu0  ;;  %v5846_v12 = vpop.f32.mrf.mxu1 }
 0x6f3   : > { %v5850_v18 = vadd.f32 %v5846_v12, %v5771_v13  ;;  %v6462_v11 = vld [vmem:[%s21702_s26 + $0x408] sm:$0xff]  ;;  %v6464_v12 = vld [vmem:[%s21702_s26 + $0x418] sm:$0xff]  ;;  %v6461_v13 = vld [vmem:[%s21702_s26 + $0x400] sm:$0xff] }
 0x6f4   : > { %v17730_v14 = vpop.f32.mrf.mxu1 }
 0x6f5   : > { %v5925_v15 = vpop.f32.mrf.mxu0  ;;  %v6463_v14 = vld [vmem:[%s21702_s26 + $0x410] sm:$0xff] }
 0x6f6   : > { %v5929_v20 = vadd.f32 %v5925_v15, %v5850_v18  ;;  %v6438_v15 = vld [vmem:[%s21702_s26 + $0x348] sm:$0xff]  ;;  %v6439_v18 = vld [vmem:[%s21702_s26 + $0x350] sm:$0xff] }
 0x6f7   : > { %v17737_v16 = vpop.f32.mrf.mxu0  ;;  %v6004_v17 = vpop.f32.mrf.mxu1 }
 0x6f8   : > { %v6008_v21 = vadd.f32 %v6004_v17, %v5929_v20  ;;  %v6440_v16 = vld [vmem:[%s21702_s26 + $0x358] sm:$0xff]  ;;  %v6437_v17 = vld [vmem:[%s21702_s26 + $0x340] sm:$0xff] }
 0x6f9   : > { %v17744_v19 = vpop.f32.mrf.mxu1  ;;  %v6416_v20 = vld [vmem:[%s21702_s26 + $0x298] sm:$0xff] }
 0x6fa   : > { %v6414_v19 = vld [vmem:[%s21702_s26 + $0x288] sm:$0xff] }
 0x701   : > { %v6083_v22 = vpop.f32.mrf.mxu0 }
 0x702   : > { %v6087_v24 = vadd.f32 %v6083_v22, %v6008_v21  ;;  %v6413_v21 = vld [vmem:[%s21702_s26 + $0x280] sm:$0xff]  ;;  %v6415_v22 = vld [vmem:[%s21702_s26 + $0x290] sm:$0xff] }
 0x703   : > { %v17751_v26 = vpop.f32.mrf.mxu0  ;;  %v6162_v28 = vpop.f32.mrf.mxu1 }
 0x704   : > { %v6166_v27 = vadd.f32 %v6162_v28, %v6087_v24  ;;  %v6390_v24 = vld [vmem:[%s21702_s26 + $0x1c8] sm:$0xff]  ;;  %v6392_v26 = vld [vmem:[%s21702_s26 + $0x1d8] sm:$0xff]  ;;  %v6389_v28 = vld [vmem:[%s21702_s26 + $0x1c0] sm:$0xff] }
 0x705   : > { %v17758_v25 = vpop.f32.mrf.mxu1 }
 0x706   : > { %v6241_v29 = vpop.f32.mrf.mxu0  ;;  %v6366_v25 = vld [vmem:[%s21702_s26 + $0x108] sm:$0xff] }
 0x707   : > { %v6245_v30 = vadd.f32 %v6241_v29, %v6166_v27  ;;  %v6391_v27 = vld [vmem:[%s21702_s26 + $0x1d0] sm:$0xff]  ;;  %v6368_v29 = vld [vmem:[%s21702_s26 + $0x118] sm:$0xff] }
 0x708   : > { %v17765_v31 = vpop.f32.mrf.mxu0 }
 0x709   : > { %v6320_v23 = vpop.f32.mrf.mxu1  ;;  %v6367_v31 = vld [vmem:[%s21702_s26 + $0x110] sm:$0xff] }
 0x70a   : > { %v6324_v33 = vadd.f32 %v6320_v23, %v6245_v30  ;;  %v6365_v30 = vld [vmem:[%s21702_s26 + $0x100] sm:$0xff]  ;;  %v6342_v23 = vld [vmem:[%s21702_s26 + $0x48] sm:$0xff] }
 0x70b   : > { %v17772_v34 = vpop.f32.mrf.mxu1 }
 0x70c   : > { %v20415_v35 = vadd.f32 %v16305_v32, %v6324_v33  ;;  %v6344_v32 = vld [vmem:[%s21702_s26 + $0x58] sm:$0xff]  ;;  %v6341_v33 = vld [vmem:[%s21702_s26 + $0x40] sm:$0xff]  ;;  %v6343_v34 = vld [vmem:[%s21702_s26 + $0x50] sm:$0xff] }
 0x70e   : > { %16306 = vmatmul.mubr.msk.f32.vlgmr.msra.gmra.mxu0 %vm4909_vm5, %v20415_v35  ;;  %16307 = vmatmul.mubr.msk.f32.vlgmr.msra.gmra.mxu1 %vm4909_vm5, %v20415_v35 }
 0x70f   : > { %6687 = vmatpush1.msra.mxu0 %v6505_v36  ;;  %6758 = vmatpush1.msra.mxu1 %v6507_v37  ;;  %v6514_v36 = vld [vmem:[%s21702_s26 + $0x5a8] sm:$0xff]  ;;  %v6516_v37 = vld [vmem:[%s21702_s26 + $0x5b8] sm:$0xff] }
 0x710   : > { %6688 = vmatprep.subr.mxu0 %v6482_v38  ;;  %6759 = vmatprep.subr.mxu1 %v6484_v39  ;;  %v6513_v38 = vld [vmem:[%s21702_s26 + $0x5a0] sm:$0xff]  ;;  %v6515_v39 = vld [vmem:[%s21702_s26 + $0x5b0] sm:$0xff] }
 0x711   : > { %6689 = vmatpush1.msra.mxu0 %v6481_v40  ;;  %6760 = vmatpush1.msra.mxu1 %v6483_v41  ;;  %v6490_v40 = vld [vmem:[%s21702_s26 + $0x4e8] sm:$0xff]  ;;  %v6492_v41 = vld [vmem:[%s21702_s26 + $0x4f8] sm:$0xff] }
 0x712   : > { %6690 = vmatprep.subr.mxu0 %v6458_v42  ;;  %6761 = vmatprep.subr.mxu1 %v6460_v43  ;;  %v6489_v42 = vld [vmem:[%s21702_s26 + $0x4e0] sm:$0xff]  ;;  %v6491_v43 = vld [vmem:[%s21702_s26 + $0x4f0] sm:$0xff] }
 0x713   : > { %6691 = vmatpush1.msra.mxu0 %v6457_v44  ;;  %6762 = vmatpush1.msra.mxu1 %v6459_v45  ;;  %v6466_v44 = vld [vmem:[%s21702_s26 + $0x428] sm:$0xff]  ;;  %v6468_v45 = vld [vmem:[%s21702_s26 + $0x438] sm:$0xff] }
 0x714   : > { %6692 = vmatprep.subr.mxu0 %v6434_v46  ;;  %6763 = vmatprep.subr.mxu1 %v6436_v47  ;;  %v6465_v46 = vld [vmem:[%s21702_s26 + $0x420] sm:$0xff]  ;;  %v6467_v47 = vld [vmem:[%s21702_s26 + $0x430] sm:$0xff] }
 0x715   : > { %6693 = vmatpush1.msra.mxu0 %v6433_v48  ;;  %6764 = vmatpush1.msra.mxu1 %v6435_v49  ;;  %v6442_v48 = vld [vmem:[%s21702_s26 + $0x368] sm:$0xff]  ;;  %v6444_v49 = vld [vmem:[%s21702_s26 + $0x378] sm:$0xff] }
 0x716   : > { %6694 = vmatprep.subr.mxu0 %v6410_v50  ;;  %6765 = vmatprep.subr.mxu1 %v6412_v52  ;;  %v6441_v50 = vld [vmem:[%s21702_s26 + $0x360] sm:$0xff]  ;;  %v6443_v52 = vld [vmem:[%s21702_s26 + $0x370] sm:$0xff] }
 0x717   : > { %6695 = vmatpush1.msra.mxu0 %v6409_v54  ;;  %6766 = vmatpush1.msra.mxu1 %v6411_v58  ;;  %v6418_v54 = vld [vmem:[%s21702_s26 + $0x2a8] sm:$0xff]  ;;  %v6420_v58 = vld [vmem:[%s21702_s26 + $0x2b8] sm:$0xff] }
 0x718   : > { %6696 = vmatprep.subr.mxu0 %v6386_v59  ;;  %6767 = vmatprep.subr.mxu1 %v6388_v56  ;;  %v6417_v59 = vld [vmem:[%s21702_s26 + $0x2a0] sm:$0xff]  ;;  %v6419_v56 = vld [vmem:[%s21702_s26 + $0x2b0] sm:$0xff] }
 0x719   : > { %6697 = vmatpush1.msra.mxu0 %v6385_v61  ;;  %6768 = vmatpush1.msra.mxu1 %v6387_v62  ;;  %v6394_v61 = vld [vmem:[%s21702_s26 + $0x1e8] sm:$0xff]  ;;  %v6396_v62 = vld [vmem:[%s21702_s26 + $0x1f8] sm:$0xff] }
 0x71a   : > { %6698 = vmatprep.subr.mxu0 %v6362_v1  ;;  %6769 = vmatprep.subr.mxu1 %v6364_v2  ;;  %v6393_v1 = vld [vmem:[%s21702_s26 + $0x1e0] sm:$0xff]  ;;  %v6395_v2 = vld [vmem:[%s21702_s26 + $0x1f0] sm:$0xff] }
 0x71b   : > { %6699 = vmatpush1.msra.mxu0 %v6361_v3  ;;  %6770 = vmatpush1.msra.mxu1 %v6363_v60  ;;  %v6370_v3 = vld [vmem:[%s21702_s26 + $0x128] sm:$0xff]  ;;  %v6372_v60 = vld [vmem:[%s21702_s26 + $0x138] sm:$0xff] }
 0x71c   : > { %6700 = vmatprep.subr.mxu0 %v6338_v4  ;;  %6771 = vmatprep.subr.mxu1 %v6340_v63  ;;  %v6369_v4 = vld [vmem:[%s21702_s26 + $0x120] sm:$0xff]  ;;  %v6371_v63 = vld [vmem:[%s21702_s26 + $0x130] sm:$0xff] }
 0x71d   : > { %6701 = vmatpush1.msra.mxu0 %v6337_v55  ;;  %6734 = vmatprep.mubr.f32.mxu0 %v19290_v0  ;;  %v6346_v55 = vld [vmem:[%s21702_s26 + $0x68] sm:$0xff] }
 0x71e   : > { %6772 = vmatpush1.msra.mxu1 %v6339_v57  ;;  %6805 = vmatprep.mubr.f32.mxu1 %v19290_v0  ;;  %v6348_v57 = vld [vmem:[%s21702_s26 + $0x78] sm:$0xff] }
 0x71f   : > { %16308 = vmatmul.mubr.msk.f32.vlgmr.msra.gmra.mxu0 %vm4909_vm5, %v20415_v35  ;;  %16309 = vmatmul.mubr.msk.f32.vlgmr.msra.gmra.mxu1 %vm4909_vm5, %v20415_v35 }
 0x720   : > { %6828 = vmatprep.subr.mxu0 %v6510_v5  ;;  %6899 = vmatprep.subr.mxu1 %v6512_v51  ;;  %v6345_v5 = vld [vmem:[%s21702_s26 + $0x60] sm:$0xff]  ;;  %v6347_v51 = vld [vmem:[%s21702_s26 + $0x70] sm:$0xff] }
 0x721   : > { %6829 = vmatpush1.msra.mxu0 %v6509_v53  ;;  %6900 = vmatpush1.msra.mxu1 %v6511_v6  ;;  %v6518_v53 = vld [vmem:[%s21702_s26 + $0x5c8] sm:$0xff]  ;;  %v6520_v6 = vld [vmem:[%s21702_s26 + $0x5d8] sm:$0xff] }
 0x722   : > { %6830 = vmatprep.subr.mxu0 %v6486_v7  ;;  %6901 = vmatprep.subr.mxu1 %v6488_v8  ;;  %v6517_v7 = vld [vmem:[%s21702_s26 + $0x5c0] sm:$0xff]  ;;  %v6519_v8 = vld [vmem:[%s21702_s26 + $0x5d0] sm:$0xff] }
 0x723   : > { %6831 = vmatpush1.msra.mxu0 %v6485_v9  ;;  %6902 = vmatpush1.msra.mxu1 %v6487_v10  ;;  %v6494_v9 = vld [vmem:[%s21702_s26 + $0x508] sm:$0xff]  ;;  %v6496_v10 = vld [vmem:[%s21702_s26 + $0x518] sm:$0xff] }
 0x724   : > { %6832 = vmatprep.subr.mxu0 %v6462_v11  ;;  %6903 = vmatprep.subr.mxu1 %v6464_v12  ;;  %v6493_v11 = vld [vmem:[%s21702_s26 + $0x500] sm:$0xff]  ;;  %v6495_v12 = vld [vmem:[%s21702_s26 + $0x510] sm:$0xff] }
 0x725   : > { %6833 = vmatpush1.msra.mxu0 %v6461_v13  ;;  %6904 = vmatpush1.msra.mxu1 %v6463_v14  ;;  %v6470_v13 = vld [vmem:[%s21702_s26 + $0x448] sm:$0xff]  ;;  %v6472_v14 = vld [vmem:[%s21702_s26 + $0x458] sm:$0xff] }
 0x726   : > { %6834 = vmatprep.subr.mxu0 %v6438_v15  ;;  %6905 = vmatprep.subr.mxu1 %v6440_v16  ;;  %v6469_v15 = vld [vmem:[%s21702_s26 + $0x440] sm:$0xff]  ;;  %v6471_v16 = vld [vmem:[%s21702_s26 + $0x450] sm:$0xff] }
 0x727   : > { %6835 = vmatpush1.msra.mxu0 %v6437_v17  ;;  %6906 = vmatpush1.msra.mxu1 %v6439_v18  ;;  %v6446_v17 = vld [vmem:[%s21702_s26 + $0x388] sm:$0xff]  ;;  %v6448_v18 = vld [vmem:[%s21702_s26 + $0x398] sm:$0xff] }
 0x728   : > { %6836 = vmatprep.subr.mxu0 %v6414_v19  ;;  %6907 = vmatprep.subr.mxu1 %v6416_v20  ;;  %v6445_v19 = vld [vmem:[%s21702_s26 + $0x380] sm:$0xff]  ;;  %v6447_v20 = vld [vmem:[%s21702_s26 + $0x390] sm:$0xff] }
 0x729   : > { %6837 = vmatpush1.msra.mxu0 %v6413_v21  ;;  %6908 = vmatpush1.msra.mxu1 %v6415_v22  ;;  %v6422_v21 = vld [vmem:[%s21702_s26 + $0x2c8] sm:$0xff]  ;;  %v6424_v22 = vld [vmem:[%s21702_s26 + $0x2d8] sm:$0xff] }
 0x72a   : > { %6838 = vmatprep.subr.mxu0 %v6390_v24  ;;  %6909 = vmatprep.subr.mxu1 %v6392_v26  ;;  %v6421_v24 = vld [vmem:[%s21702_s26 + $0x2c0] sm:$0xff]  ;;  %v6423_v26 = vld [vmem:[%s21702_s26 + $0x2d0] sm:$0xff] }
 0x72b   : > { %6839 = vmatpush1.msra.mxu0 %v6389_v28  ;;  %6910 = vmatpush1.msra.mxu1 %v6391_v27  ;;  %v6398_v28 = vld [vmem:[%s21702_s26 + $0x208] sm:$0xff]  ;;  %v6400_v27 = vld [vmem:[%s21702_s26 + $0x218] sm:$0xff] }
 0x72c   : > { %6840 = vmatprep.subr.mxu0 %v6366_v25  ;;  %6911 = vmatprep.subr.mxu1 %v6368_v29  ;;  %v6397_v25 = vld [vmem:[%s21702_s26 + $0x200] sm:$0xff]  ;;  %v6399_v29 = vld [vmem:[%s21702_s26 + $0x210] sm:$0xff] }
 0x72d   : > { %6841 = vmatpush1.msra.mxu0 %v6365_v30  ;;  %6912 = vmatpush1.msra.mxu1 %v6367_v31  ;;  %v6374_v30 = vld [vmem:[%s21702_s26 + $0x148] sm:$0xff]  ;;  %v6376_v31 = vld [vmem:[%s21702_s26 + $0x158] sm:$0xff] }
 0x72e   : > { %6842 = vmatprep.subr.mxu0 %v6342_v23  ;;  %6913 = vmatprep.subr.mxu1 %v6344_v32  ;;  %v6373_v23 = vld [vmem:[%s21702_s26 + $0x140] sm:$0xff]  ;;  %v6375_v32 = vld [vmem:[%s21702_s26 + $0x150] sm:$0xff] }
 0x72f   : > { %6843 = vmatpush1.msra.mxu0 %v6341_v33  ;;  %6876 = vmatprep.mubr.f32.mxu0 %v19290_v0  ;;  %v6350_v33 = vld [vmem:[%s21702_s26 + $0x88] sm:$0xff] }
 0x730   : > { %6914 = vmatpush1.msra.mxu1 %v6343_v34  ;;  %6947 = vmatprep.mubr.f32.mxu1 %v19290_v0  ;;  %v6352_v34 = vld [vmem:[%s21702_s26 + $0x98] sm:$0xff] }
 0x731   : > { %16310 = vmatmul.mubr.msk.f32.vlgmr.msra.gmra.mxu0 %vm4909_vm5, %v20415_v35  ;;  %16311 = vmatmul.mubr.msk.f32.vlgmr.msra.gmra.mxu1 %vm4909_vm5, %v20415_v35 }
 0x732   : > { %6970 = vmatprep.subr.mxu0 %v6514_v36  ;;  %7041 = vmatprep.subr.mxu1 %v6516_v37  ;;  %v6349_v36 = vld [vmem:[%s21702_s26 + $0x80] sm:$0xff]  ;;  %v6351_v37 = vld [vmem:[%s21702_s26 + $0x90] sm:$0xff] }
 0x733   : > { %6971 = vmatpush1.msra.mxu0 %v6513_v38  ;;  %7042 = vmatpush1.msra.mxu1 %v6515_v39  ;;  %v6522_v38 = vld [vmem:[%s21702_s26 + $0x5e8] sm:$0xff]  ;;  %v6524_v39 = vld [vmem:[%s21702_s26 + $0x5f8] sm:$0xff] }
 0x734   : > { %6972 = vmatprep.subr.mxu0 %v6490_v40  ;;  %7043 = vmatprep.subr.mxu1 %v6492_v41  ;;  %v6521_v40 = vld [vmem:[%s21702_s26 + $0x5e0] sm:$0xff]  ;;  %v6523_v41 = vld [vmem:[%s21702_s26 + $0x5f0] sm:$0xff] }
 0x735   : > { %6973 = vmatpush1.msra.mxu0 %v6489_v42  ;;  %7044 = vmatpush1.msra.mxu1 %v6491_v43  ;;  %v6498_v42 = vld [vmem:[%s21702_s26 + $0x528] sm:$0xff]  ;;  %v6500_v43 = vld [vmem:[%s21702_s26 + $0x538] sm:$0xff] }
 0x736   : > { %6974 = vmatprep.subr.mxu0 %v6466_v44  ;;  %7045 = vmatprep.subr.mxu1 %v6468_v45  ;;  %v6497_v44 = vld [vmem:[%s21702_s26 + $0x520] sm:$0xff]  ;;  %v6499_v45 = vld [vmem:[%s21702_s26 + $0x530] sm:$0xff] }
 0x737   : > { %6975 = vmatpush1.msra.mxu0 %v6465_v46  ;;  %7046 = vmatpush1.msra.mxu1 %v6467_v47  ;;  %v6474_v46 = vld [vmem:[%s21702_s26 + $0x468] sm:$0xff]  ;;  %v6476_v47 = vld [vmem:[%s21702_s26 + $0x478] sm:$0xff] }
 0x738   : > { %6976 = vmatprep.subr.mxu0 %v6442_v48  ;;  %7047 = vmatprep.subr.mxu1 %v6444_v49  ;;  %v6473_v48 = vld [vmem:[%s21702_s26 + $0x460] sm:$0xff]  ;;  %v6475_v49 = vld [vmem:[%s21702_s26 + $0x470] sm:$0xff] }
 0x739   : > { %6977 = vmatpush1.msra.mxu0 %v6441_v50  ;;  %7048 = vmatpush1.msra.mxu1 %v6443_v52  ;;  %v6450_v50 = vld [vmem:[%s21702_s26 + $0x3a8] sm:$0xff]  ;;  %v6452_v52 = vld [vmem:[%s21702_s26 + $0x3b8] sm:$0xff] }
 0x73a   : > { %6978 = vmatprep.subr.mxu0 %v6418_v54  ;;  %7049 = vmatprep.subr.mxu1 %v6420_v58  ;;  %v6449_v54 = vld [vmem:[%s21702_s26 + $0x3a0] sm:$0xff]  ;;  %v6451_v58 = vld [vmem:[%s21702_s26 + $0x3b0] sm:$0xff] }
 0x73b   : > { %6979 = vmatpush1.msra.mxu0 %v6417_v59  ;;  %7050 = vmatpush1.msra.mxu1 %v6419_v56  ;;  %v6426_v59 = vld [vmem:[%s21702_s26 + $0x2e8] sm:$0xff]  ;;  %v6428_v56 = vld [vmem:[%s21702_s26 + $0x2f8] sm:$0xff] }
 0x73c   : > { %6980 = vmatprep.subr.mxu0 %v6394_v61  ;;  %7051 = vmatprep.subr.mxu1 %v6396_v62  ;;  %v6425_v61 = vld [vmem:[%s21702_s26 + $0x2e0] sm:$0xff]  ;;  %v6427_v62 = vld [vmem:[%s21702_s26 + $0x2f0] sm:$0xff] }
 0x73d   : > { %6981 = vmatpush1.msra.mxu0 %v6393_v1  ;;  %7052 = vmatpush1.msra.mxu1 %v6395_v2  ;;  %v6402_v1 = vld [vmem:[%s21702_s26 + $0x228] sm:$0xff]  ;;  %v6404_v2 = vld [vmem:[%s21702_s26 + $0x238] sm:$0xff] }
 0x73e   : > { %6982 = vmatprep.subr.mxu0 %v6370_v3  ;;  %7053 = vmatprep.subr.mxu1 %v6372_v60  ;;  %v6401_v3 = vld [vmem:[%s21702_s26 + $0x220] sm:$0xff]  ;;  %v6403_v60 = vld [vmem:[%s21702_s26 + $0x230] sm:$0xff] }
 0x73f   : > { %6983 = vmatpush1.msra.mxu0 %v6369_v4  ;;  %7054 = vmatpush1.msra.mxu1 %v6371_v63  ;;  %v6378_v4 = vld [vmem:[%s21702_s26 + $0x168] sm:$0xff]  ;;  %v6380_v63 = vld [vmem:[%s21702_s26 + $0x178] sm:$0xff] }
 0x740   : > { %6984 = vmatprep.subr.mxu0 %v6346_v55  ;;  %7055 = vmatprep.subr.mxu1 %v6348_v57  ;;  %v6377_v55 = vld [vmem:[%s21702_s26 + $0x160] sm:$0xff]  ;;  %v6379_v57 = vld [vmem:[%s21702_s26 + $0x170] sm:$0xff] }
 0x741   : > { %6985 = vmatpush1.msra.mxu0 %v6345_v5  ;;  %7018 = vmatprep.mubr.f32.mxu0 %v19290_v0  ;;  %v6354_v5 = vld [vmem:[%s21702_s26 + $0xa8] sm:$0xff] }
 0x742   : > { %7056 = vmatpush1.msra.mxu1 %v6347_v51  ;;  %7089 = vmatprep.mubr.f32.mxu1 %v19290_v0  ;;  %v6356_v51 = vld [vmem:[%s21702_s26 + $0xb8] sm:$0xff] }
 0x743   : > { %16312 = vmatmul.mubr.msk.f32.vlgmr.msra.gmra.mxu0 %vm4909_vm5, %v20415_v35  ;;  %16313 = vmatmul.mubr.msk.f32.vlgmr.msra.gmra.mxu1 %vm4909_vm5, %v20415_v35 }
 0x744   : > { %7112 = vmatprep.subr.mxu0 %v6518_v53  ;;  %7183 = vmatprep.subr.mxu1 %v6520_v6  ;;  %v6353_v53 = vld [vmem:[%s21702_s26 + $0xa0] sm:$0xff]  ;;  %v6355_v6 = vld [vmem:[%s21702_s26 + $0xb0] sm:$0xff] }
 0x745   : > { %7113 = vmatpush1.msra.mxu0 %v6517_v7  ;;  %7184 = vmatpush1.msra.mxu1 %v6519_v8 }
 0x746   : > { %7114 = vmatprep.subr.mxu0 %v6494_v9  ;;  %7185 = vmatprep.subr.mxu1 %v6496_v10 }
 0x747   : > { %7115 = vmatpush1.msra.mxu0 %v6493_v11  ;;  %7186 = vmatpush1.msra.mxu1 %v6495_v12 }
 0x748   : > { %7116 = vmatprep.subr.mxu0 %v6470_v13  ;;  %7187 = vmatprep.subr.mxu1 %v6472_v14 }
 0x749   : > { %7117 = vmatpush1.msra.mxu0 %v6469_v15  ;;  %7188 = vmatpush1.msra.mxu1 %v6471_v16  ;;  %v7382_v15 = vld [vmem:[#allocation18 + $0x1] sm:$0x1] }
 0x74a   : > { %7118 = vmatprep.subr.mxu0 %v6446_v17  ;;  %7189 = vmatprep.subr.mxu1 %v6448_v18 }
 0x74b   : > { %7119 = vmatpush1.msra.mxu0 %v6445_v19  ;;  %7190 = vmatpush1.msra.mxu1 %v6447_v20  ;;  %v7700_v20 = vld [vmem:[#allocation18 + $0x2] sm:$0x1] }
 0x74c   : > { %7120 = vmatprep.subr.mxu0 %v6422_v21  ;;  %7191 = vmatprep.subr.mxu1 %v6424_v22 }
 0x74d   : > { %7121 = vmatpush1.msra.mxu0 %v6421_v24  ;;  %7192 = vmatpush1.msra.mxu1 %v6423_v26 }
 0x74e   : > { %7122 = vmatprep.subr.mxu0 %v6398_v28  ;;  %7193 = vmatprep.subr.mxu1 %v6400_v27  ;;  %v7863_v28 = vld [vmem:[#allocation18 + $0x3] sm:$0x1] }
 0x74f   : > { %7123 = vmatpush1.msra.mxu0 %v6397_v25  ;;  %7194 = vmatpush1.msra.mxu1 %v6399_v29 }
 0x750   : > { %7124 = vmatprep.subr.mxu0 %v6374_v30  ;;  %7195 = vmatprep.subr.mxu1 %v6376_v31  ;;  %v8026_v31 = vld [vmem:[#allocation18 + $0x4] sm:$0x1] }
 0x751   : > { %7125 = vmatpush1.msra.mxu0 %v6373_v23  ;;  %7196 = vmatpush1.msra.mxu1 %v6375_v32 }
 0x752   : > { %7126 = vmatprep.subr.mxu0 %v6350_v33  ;;  %7197 = vmatprep.subr.mxu1 %v6352_v34 }
 0x753   : > { %7127 = vmatpush1.msra.mxu0 %v6349_v36  ;;  %7160 = vmatprep.mubr.f32.mxu0 %v19290_v0  ;;  %v8189_v36 = vld [vmem:[#allocation18 + $0x5] sm:$0x1] }
 0x754   : > { %7198 = vmatpush1.msra.mxu1 %v6351_v37  ;;  %7231 = vmatprep.mubr.f32.mxu1 %v19290_v0  ;;  %v8408_v37 = vld [vmem:[#allocation19 + $0xf8] sm:$0xff] }
 0x755   : > { %16314 = vmatmul.mubr.msk.f32.vlgmr.msra.gmra.mxu0 %vm4909_vm5, %v20415_v35  ;;  %16315 = vmatmul.mubr.msk.f32.vlgmr.msra.gmra.mxu1 %vm4909_vm5, %v20415_v35 }
 0x756   : > { %7254 = vmatprep.subr.mxu0 %v6522_v38  ;;  %7325 = vmatprep.subr.mxu1 %v6524_v39  ;;  %v8440_v38 = vld [vmem:[#allocation19 + $0x1f8] sm:$0xff] }
 0x757   : > { %7255 = vmatpush1.msra.mxu0 %v6521_v40  ;;  %7326 = vmatpush1.msra.mxu1 %v6523_v41  ;;  %v8392_v39 = vld [vmem:[#allocation19 + $0x78] sm:$0xff]  ;;  %v8407_v41 = vld [vmem:[#allocation19 + $0xf0] sm:$0xff] }
 0x758   : > { %7256 = vmatprep.subr.mxu0 %v6498_v42  ;;  %7327 = vmatprep.subr.mxu1 %v6500_v43  ;;  %v8424_v40 = vld [vmem:[#allocation19 + $0x178] sm:$0xff]  ;;  %v8439_v42 = vld [vmem:[#allocation19 + $0x1f0] sm:$0xff] }
 0x759   : > { %7257 = vmatpush1.msra.mxu0 %v6497_v44  ;;  %7328 = vmatpush1.msra.mxu1 %v6499_v45  ;;  %v8391_v43 = vld [vmem:[#allocation19 + $0x70] sm:$0xff]  ;;  %v8406_v45 = vld [vmem:[#allocation19 + $0xe8] sm:$0xff] }
 0x75a   : > { %7258 = vmatprep.subr.mxu0 %v6474_v46  ;;  %7329 = vmatprep.subr.mxu1 %v6476_v47  ;;  %v8423_v44 = vld [vmem:[#allocation19 + $0x170] sm:$0xff]  ;;  %v8438_v46 = vld [vmem:[#allocation19 + $0x1e8] sm:$0xff] }
 0x75b   : > { %7259 = vmatpush1.msra.mxu0 %v6473_v48  ;;  %7330 = vmatpush1.msra.mxu1 %v6475_v49  ;;  %v8390_v47 = vld [vmem:[#allocation19 + $0x68] sm:$0xff]  ;;  %v8405_v49 = vld [vmem:[#allocation19 + $0xe0] sm:$0xff] }
 0x75c   : > { %7260 = vmatprep.subr.mxu0 %v6450_v50  ;;  %7331 = vmatprep.subr.mxu1 %v6452_v52  ;;  %v8422_v48 = vld [vmem:[#allocation19 + $0x168] sm:$0xff]  ;;  %v8437_v50 = vld [vmem:[#allocation19 + $0x1e0] sm:$0xff] }
 0x75d   : > { %7261 = vmatpush1.msra.mxu0 %v6449_v54  ;;  %7332 = vmatpush1.msra.mxu1 %v6451_v58  ;;  %v8389_v52 = vld [vmem:[#allocation19 + $0x60] sm:$0xff]  ;;  %v8404_v58 = vld [vmem:[#allocation19 + $0xd8] sm:$0xff] }
 0x75e   : > { %7262 = vmatprep.subr.mxu0 %v6426_v59  ;;  %7333 = vmatprep.subr.mxu1 %v6428_v56  ;;  %v8421_v54 = vld [vmem:[#allocation19 + $0x160] sm:$0xff]  ;;  %v8436_v59 = vld [vmem:[#allocation19 + $0x1d8] sm:$0xff] }
 0x75f   : > { %7263 = vmatpush1.msra.mxu0 %v6425_v61  ;;  %7334 = vmatpush1.msra.mxu1 %v6427_v62  ;;  %v8388_v56 = vld [vmem:[#allocation19 + $0x58] sm:$0xff]  ;;  %v8403_v62 = vld [vmem:[#allocation19 + $0xd0] sm:$0xff] }
 0x760   : > { %7264 = vmatprep.subr.mxu0 %v6402_v1  ;;  %7335 = vmatprep.subr.mxu1 %v6404_v2  ;;  %v8420_v61 = vld [vmem:[#allocation19 + $0x158] sm:$0xff]  ;;  %v8435_v1 = vld [vmem:[#allocation19 + $0x1d0] sm:$0xff] }
 0x761   : > { %7265 = vmatpush1.msra.mxu0 %v6401_v3  ;;  %7336 = vmatpush1.msra.mxu1 %v6403_v60  ;;  %v8387_v2 = vld [vmem:[#allocation19 + $0x50] sm:$0xff]  ;;  %v8402_v60 = vld [vmem:[#allocation19 + $0xc8] sm:$0xff] }
 0x762   : > { %7266 = vmatprep.subr.mxu0 %v6378_v4  ;;  %7337 = vmatprep.subr.mxu1 %v6380_v63  ;;  %v8419_v3 = vld [vmem:[#allocation19 + $0x150] sm:$0xff]  ;;  %v8434_v4 = vld [vmem:[#allocation19 + $0x1c8] sm:$0xff] }
 0x763   : > { %7267 = vmatpush1.msra.mxu0 %v6377_v55  ;;  %7338 = vmatpush1.msra.mxu1 %v6379_v57  ;;  %v8386_v63 = vld [vmem:[#allocation19 + $0x48] sm:$0xff]  ;;  %v8401_v57 = vld [vmem:[#allocation19 + $0xc0] sm:$0xff] }
 0x764   : > { %7268 = vmatprep.subr.mxu0 %v6354_v5  ;;  %7339 = vmatprep.subr.mxu1 %v6356_v51  ;;  %v8418_v55 = vld [vmem:[#allocation19 + $0x148] sm:$0xff]  ;;  %v8433_v5 = vld [vmem:[#allocation19 + $0x1c0] sm:$0xff] }
 0x765   : > { %7269 = vmatpush1.msra.mxu0 %v6353_v53  ;;  %7302 = vmatprep.mubr.f32.mxu0 %v19290_v0  ;;  %v8385_v51 = vld [vmem:[#allocation19 + $0x40] sm:$0xff] }
 0x766   : > { %7340 = vmatpush1.msra.mxu1 %v6355_v6  ;;  %7373 = vmatprep.mubr.f32.mxu1 %v19290_v0  ;;  %v8417_v53 = vld [vmem:[#allocation19 + $0x140] sm:$0xff]  ;;  %v8400_v6 = vld [vmem:[#allocation19 + $0xb8] sm:$0xff] }
 0x767   : > { %16316 = vmatmul.mubr.msk.f32.vlgmr.msra.gmra.mxu0 %vm4909_vm5, %v20415_v35  ;;  %16317 = vmatmul.mubr.msk.f32.vlgmr.msra.gmra.mxu1 %vm4909_vm5, %v20415_v35  ;;  %v7380_v35 = vld [vmem:[#allocation18] sm:$0x1] }
 0x768   : > { %7464 = vmatprep.mubr.f32.mxu0 %v19290_v0  ;;  %7535 = vmatprep.mubr.f32.mxu1 %v19290_v0 }
 0x7ce   : > { %v6594_v7 = vpop.f32.mrf.mxu0  ;;  %v6665_v8 = vpop.f32.mrf.mxu1 }
 0x7d0   : > { %v6596_v9 = vpop.f32.mrf.mxu0  ;;  %v6667_v10 = vpop.f32.mrf.mxu1 }
 0x7df   : > { %v6736_v11 = vpop.f32.mrf.mxu0  ;;  %v6807_v12 = vpop.f32.mrf.mxu1 }
 0x7e1   : > { %v6738_v13 = vpop.f32.mrf.mxu0  ;;  %v6809_v14 = vpop.f32.mrf.mxu1 }
 0x7e2   : > { %16318 = vmatprep.subr.msk.mxu0 %vm7387_vm9, %v6738_v13  ;;  %16321 = vmatprep.subr.msk.mxu1 %vm7387_vm9, %v6809_v14  ;;  %v8415_v13 = vld [vmem:[#allocation19 + $0x130] sm:$0xff]  ;;  %v8398_v14 = vld [vmem:[#allocation19 + $0xa8] sm:$0xff] }
 0x7e3   : > { %16319 = vmatpush1.msk.msra.mxu0 %vm7387_vm9, %v6736_v11  ;;  %16322 = vmatpush1.msk.msra.mxu1 %vm7387_vm9, %v6807_v12  ;;  %v8431_v11 = vld [vmem:[#allocation19 + $0x1b0] sm:$0xff] }
 0x7e4   : > { %16324 = vmatprep.subr.msk.mxu0 %vm7387_vm9, %v6596_v9  ;;  %16327 = vmatprep.subr.msk.mxu1 %vm7387_vm9, %v6667_v10  ;;  %v8416_v9 = vld [vmem:[#allocation19 + $0x138] sm:$0xff]  ;;  %v8399_v10 = vld [vmem:[#allocation19 + $0xb0] sm:$0xff] }
 0x7e5   : > { %16320 = vmatmul.mubr.msk.f32.vlgmr.msra.gmra.mxu0 %vm7383_vm10, %v7382_v15  ;;  %16323 = vmatmul.mubr.msk.f32.vlgmr.msra.gmra.mxu1 %vm7383_vm10, %v7382_v15  ;;  %v8383_v12 = vld [vmem:[#allocation19 + $0x30] sm:$0xff]  ;;  %v8430_v15 = vld [vmem:[#allocation19 + $0x1a8] sm:$0xff] }
 0x7e6   : > { %16325 = vmatpush1.msk.msra.mxu0 %vm7387_vm9, %v6594_v7  ;;  %16328 = vmatpush1.msk.msra.mxu1 %vm7387_vm9, %v6665_v8  ;;  %v8432_v7 = vld [vmem:[#allocation19 + $0x1b8] sm:$0xff] }
 0x7e7   : > { %7621 = vmatprep.mubr.f32.mxu0 %v19290_v0  ;;  %7692 = vmatprep.mubr.f32.mxu1 %v19290_v0  ;;  %v8384_v8 = vld [vmem:[#allocation19 + $0x38] sm:$0xff] }
 0x7e9   : > { %16326 = vmatmul.mubr.msk.f32.vlgmr.msra.gmra.mxu0 %vm7383_vm10, %v7380_v35  ;;  %16329 = vmatmul.mubr.msk.f32.vlgmr.msra.gmra.mxu1 %vm7383_vm10, %v7380_v35  ;;  %v8382_v35 = vld [vmem:[#allocation19 + $0x28] sm:$0xff] }
 0x7ea   : > { %7780 = vmatprep.mubr.f32.mxu0 %v19290_v0  ;;  %7851 = vmatprep.mubr.f32.mxu1 %v19290_v0 }
 0x7f1   : > { %v6878_v16 = vpop.f32.mrf.mxu0  ;;  %v6949_v17 = vpop.f32.mrf.mxu1 }
 0x7f3   : > { %v6880_v18 = vpop.f32.mrf.mxu0  ;;  %v6951_v19 = vpop.f32.mrf.mxu1 }
 0x7f4   : > { %16330 = vmatprep.subr.msk.mxu0 %vm7387_vm9, %v6880_v18  ;;  %16333 = vmatprep.subr.msk.mxu1 %vm7387_vm9, %v6951_v19  ;;  %v8429_v18 = vld [vmem:[#allocation19 + $0x1a0] sm:$0xff] }
 0x7f5   : > { %16331 = vmatpush1.msk.msra.mxu0 %vm7387_vm9, %v6878_v16  ;;  %16334 = vmatpush1.msk.msra.mxu1 %vm7387_vm9, %v6949_v17  ;;  %v8414_v16 = vld [vmem:[#allocation19 + $0x128] sm:$0xff]  ;;  %v8397_v17 = vld [vmem:[#allocation19 + $0xa0] sm:$0xff] }
 0x7f6   : > { %16332 = vmatmul.mubr.msk.f32.vlgmr.msra.gmra.mxu0 %vm7383_vm10, %v7700_v20  ;;  %16335 = vmatmul.mubr.msk.f32.vlgmr.msra.gmra.mxu1 %vm7383_vm10, %v7700_v20  ;;  %v8381_v19 = vld [vmem:[#allocation19 + $0x20] sm:$0xff] }
 0x7f7   : > { %7943 = vmatprep.mubr.f32.mxu0 %v19290_v0  ;;  %8014 = vmatprep.mubr.f32.mxu1 %v19290_v0  ;;  %v8413_v20 = vld [vmem:[#allocation19 + $0x120] sm:$0xff] }
 0x803   : > { %v7020_v21 = vpop.f32.mrf.mxu0  ;;  %v7091_v22 = vpop.f32.mrf.mxu1 }
 0x805   : > { %v7022_v24 = vpop.f32.mrf.mxu0  ;;  %v7093_v26 = vpop.f32.mrf.mxu1 }
 0x806   : > { %16336 = vmatprep.subr.msk.mxu0 %vm7387_vm9, %v7022_v24  ;;  %16339 = vmatprep.subr.msk.mxu1 %vm7387_vm9, %v7093_v26  ;;  %v8380_v24 = vld [vmem:[#allocation19 + $0x18] sm:$0xff] }
 0x807   : > { %16337 = vmatpush1.msk.msra.mxu0 %vm7387_vm9, %v7020_v21  ;;  %16340 = vmatpush1.msk.msra.mxu1 %vm7387_vm9, %v7091_v22  ;;  %v8396_v21 = vld [vmem:[#allocation19 + $0x98] sm:$0xff] }
 0x808   : > { %16338 = vmatmul.mubr.msk.f32.vlgmr.msra.gmra.mxu0 %vm7383_vm10, %v7863_v28  ;;  %16341 = vmatmul.mubr.msk.f32.vlgmr.msra.gmra.mxu1 %vm7383_vm10, %v7863_v28  ;;  %v8428_v22 = vld [vmem:[#allocation19 + $0x198] sm:$0xff]  ;;  %v8395_v28 = vld [vmem:[#allocation19 + $0x90] sm:$0xff] }
 0x809   : > { %8106 = vmatprep.mubr.f32.mxu0 %v19290_v0  ;;  %8177 = vmatprep.mubr.f32.mxu1 %v19290_v0  ;;  %v8412_v26 = vld [vmem:[#allocation19 + $0x118] sm:$0xff] }
 0x815   : > { %v7162_v27 = vpop.f32.mrf.mxu0  ;;  %v7233_v25 = vpop.f32.mrf.mxu1 }
 0x817   : > { %v7164_v29 = vpop.f32.mrf.mxu0  ;;  %v7235_v30 = vpop.f32.mrf.mxu1 }
 0x818   : > { %16342 = vmatprep.subr.msk.mxu0 %vm7387_vm9, %v7164_v29  ;;  %16345 = vmatprep.subr.msk.mxu1 %vm7387_vm9, %v7235_v30  ;;  %v8411_v29 = vld [vmem:[#allocation19 + $0x110] sm:$0xff]  ;;  %v8394_v30 = vld [vmem:[#allocation19 + $0x88] sm:$0xff] }
 0x819   : > { %16343 = vmatpush1.msk.msra.mxu0 %vm7387_vm9, %v7162_v27  ;;  %16346 = vmatpush1.msk.msra.mxu1 %vm7387_vm9, %v7233_v25  ;;  %v8427_v27 = vld [vmem:[#allocation19 + $0x190] sm:$0xff] }
 0x81a   : > { %16344 = vmatmul.mubr.msk.f32.vlgmr.msra.gmra.mxu0 %vm7383_vm10, %v8026_v31  ;;  %16347 = vmatmul.mubr.msk.f32.vlgmr.msra.gmra.mxu1 %vm7383_vm10, %v8026_v31  ;;  %v8379_v25 = vld [vmem:[#allocation19 + $0x10] sm:$0xff]  ;;  %v8426_v31 = vld [vmem:[#allocation19 + $0x188] sm:$0xff] }
 0x81b   : > { %8269 = vmatprep.mubr.f32.mxu0 %v19290_v0  ;;  %8340 = vmatprep.mubr.f32.mxu1 %v19290_v0 }
 0x827   : > { %v7304_v23 = vpop.f32.mrf.mxu0  ;;  %v7375_v32 = vpop.f32.mrf.mxu1 }
 0x829   : > { %v7306_v33 = vpop.f32.mrf.mxu0  ;;  %v7377_v34 = vpop.f32.mrf.mxu1 }
 0x82a   : > { %16348 = vmatprep.subr.msk.mxu0 %vm7387_vm9, %v7306_v33  ;;  %16351 = vmatprep.subr.msk.mxu1 %vm7387_vm9, %v7377_v34  ;;  %v8393_v33 = vld [vmem:[#allocation19 + $0x80] sm:$0xff] }
 0x82b   : > { %16349 = vmatpush1.msk.msra.mxu0 %vm7387_vm9, %v7304_v23  ;;  %16352 = vmatpush1.msk.msra.mxu1 %vm7387_vm9, %v7375_v32  ;;  %v8378_v23 = vld [vmem:[#allocation19 + $0x8] sm:$0xff]  ;;  %v8425_v34 = vld [vmem:[#allocation19 + $0x180] sm:$0xff] }
 0x82c   : > { %16350 = vmatmul.mubr.msk.f32.vlgmr.msra.gmra.mxu0 %vm7383_vm10, %v8189_v36  ;;  %16353 = vmatmul.mubr.msk.f32.vlgmr.msra.gmra.mxu1 %vm7383_vm10, %v8189_v36  ;;  %v8410_v32 = vld [vmem:[#allocation19 + $0x108] sm:$0xff]  ;;  %v8377_v36 = vld [vmem:[#allocation19] sm:$0xff] }
 0x82d   : > { %16995 = vmatprep.subr.mxu0 %v8408_v37  ;;  %17030 = vmatprep.subr.mxu1 %v8440_v38  ;;  %v8409_v37 = vld [vmem:[#allocation19 + $0x100] sm:$0xff] }
 0x82e   : > { %16996 = vmatpush3.msra.mxu0 %v8392_v39  ;;  %17031 = vmatpush3.msra.mxu1 %v8424_v40 }
 0x82f   : > { %16997 = vmatprep.subr.mxu0 %v8407_v41  ;;  %17032 = vmatprep.subr.mxu1 %v8439_v42 }
 0x830   : > { %16998 = vmatpush3.msra.mxu0 %v8391_v43  ;;  %17033 = vmatpush3.msra.mxu1 %v8423_v44 }
 0x831   : > { %16999 = vmatprep.subr.mxu0 %v8406_v45  ;;  %17034 = vmatprep.subr.mxu1 %v8438_v46 }
 0x832   : > { %17000 = vmatpush3.msra.mxu0 %v8390_v47  ;;  %17035 = vmatpush3.msra.mxu1 %v8422_v48 }
 0x833   : > { %17001 = vmatprep.subr.mxu0 %v8405_v49  ;;  %17036 = vmatprep.subr.mxu1 %v8437_v50 }
 0x834   : > { %17002 = vmatpush3.msra.mxu0 %v8389_v52  ;;  %17037 = vmatpush3.msra.mxu1 %v8421_v54 }
 0x835   : > { %17003 = vmatprep.subr.mxu0 %v8404_v58  ;;  %17038 = vmatprep.subr.mxu1 %v8436_v59 }
 0x836   : > { %17004 = vmatpush3.msra.mxu0 %v8388_v56  ;;  %17039 = vmatpush3.msra.mxu1 %v8420_v61 }
 0x837   : > { %17005 = vmatprep.subr.mxu0 %v8403_v62  ;;  %17040 = vmatprep.subr.mxu1 %v8435_v1  ;;  %v8353_v1 = vlaneseq }
 0x838   : > { %17006 = vmatpush3.msra.mxu0 %v8387_v2  ;;  %17041 = vmatpush3.msra.mxu1 %v8419_v3 }
 0x839   : > { %17007 = vmatprep.subr.mxu0 %v8402_v60  ;;  %17042 = vmatprep.subr.mxu1 %v8434_v4 }
 0x83a   : > { %17008 = vmatpush3.msra.mxu0 %v8386_v63  ;;  %17043 = vmatpush3.msra.mxu1 %v8418_v55 }
 0x83b   : > { %17009 = vmatprep.subr.mxu0 %v8401_v57  ;;  %17044 = vmatprep.subr.mxu1 %v8433_v5  ;;  %v20657_v57 = vshrl.u32 %v8353_v1, 7 }
 0x83c   : > { %17010 = vmatpush3.msra.mxu0 %v8385_v51  ;;  %17045 = vmatpush3.msra.mxu1 %v8417_v53 }
 0x83d   : > { %17011 = vmatprep.subr.mxu0 %v8400_v6  ;;  %17046 = vmatprep.subr.mxu1 %v8432_v7  ;;  %v8359_v7 = vsub.s32 1, %v20657_v57 }
 0x83e   : > { %17012 = vmatpush3.msra.mxu0 %v8384_v8  ;;  %17047 = vmatpush3.msra.mxu1 %v8416_v9  ;;  %v8367_v8 = vsub.s32 3, %v20657_v57 }
 0x83f   : > { %17013 = vmatprep.subr.mxu0 %v8399_v10  ;;  %17048 = vmatprep.subr.mxu1 %v8431_v11  ;;  %v8355_v11 = vsub.s32 0, %v20657_v57 }
 0x840   : > { %17014 = vmatpush3.msra.mxu0 %v8383_v12  ;;  %17049 = vmatpush3.msra.mxu1 %v8415_v13  ;;  %v8363_v12 = vsub.s32 2, %v20657_v57  ;;  %v8351_v13 = vld [vmem:[#allocation16] sm:$0xf]  ;;  %v9045_v57 = vld [vmem:[#allocation25 + $0x8b8] sm:$0xff] }
 0x841   : > { %17015 = vmatprep.subr.mxu0 %v8398_v14  ;;  %17050 = vmatprep.subr.mxu1 %v8430_v15 }
 0x842   : > { %17016 = vmatpush3.msra.mxu0 %v8382_v35  ;;  %17051 = vmatpush3.msra.mxu1 %v8414_v16 }
 0x843   : > { %17017 = vmatprep.subr.mxu0 %v8397_v17  ;;  %17052 = vmatprep.subr.mxu1 %v8429_v18 }
 0x844   : > { %17018 = vmatpush3.msra.mxu0 %v8381_v19  ;;  %17053 = vmatpush3.msra.mxu1 %v8413_v20  ;;  %v8360_v19 = vrot.slane %v8351_v13, %v8359_v7  ;;  %v8368_v20 = vrot.slane %v8351_v13, %v8367_v8 }
 0x845   : > { %17019 = vmatprep.subr.mxu0 %v8396_v21  ;;  %17054 = vmatprep.subr.mxu1 %v8428_v22  ;;  %v8356_v22 = vrot.slane %v8351_v13, %v8355_v11 }
 0x846   : > { %17020 = vmatpush3.msra.mxu0 %v8380_v24  ;;  %17055 = vmatpush3.msra.mxu1 %v8412_v26  ;;  %v8364_v26 = vrot.slane %v8351_v13, %v8363_v12  ;;  %v8839_v13 = vld [vmem:[#allocation25 + $0x248] sm:$0xff] }
 0x847   : > { %17021 = vmatprep.subr.mxu0 %v8395_v28  ;;  %17056 = vmatprep.subr.mxu1 %v8427_v27 }
 0x848   : > { %17022 = vmatpush3.msra.mxu0 %v8379_v25  ;;  %17057 = vmatpush3.msra.mxu1 %v8411_v29 }
 0x849   : > { %17023 = vmatprep.subr.mxu0 %v8394_v30  ;;  %17058 = vmatprep.subr.mxu1 %v8426_v31 }
 0x84a   : > { %17024 = vmatpush3.msra.mxu0 %v8378_v23  ;;  %17059 = vmatpush3.msra.mxu1 %v8410_v32 }
 0x84b   : > { %17025 = vmatprep.subr.mxu0 %v8393_v33  ;;  %17060 = vmatprep.subr.mxu1 %v8425_v34  ;;  %v8595_v33 = vld [vmem:[#allocation22 + $0x68] sm:$0xff]  ;;  %v8597_v34 = vld [vmem:[#allocation22 + $0x78] sm:$0xff] }
 0x84c   : > { %17026 = vmatpush3.msra.mxu0 %v8377_v36  ;;  %17061 = vmatpush3.msra.mxu1 %v8409_v37  ;;  %v8594_v36 = vld [vmem:[#allocation22 + $0x60] sm:$0xff]  ;;  %v8596_v37 = vld [vmem:[#allocation22 + $0x70] sm:$0xff] }
 0x84d   : > { %8648 = vmatprep.subr.mxu0 %v8595_v33  ;;  %8719 = vmatprep.subr.mxu1 %v8597_v34  ;;  %v9001_v33 = vld [vmem:[#allocation25 + $0x758] sm:$0xff]  ;;  %v8808_v34 = vld [vmem:[#allocation25 + $0x150] sm:$0xff] }
 0x8a5   : > { %v7466_v38 = vpop.f32.mrf.mxu0  ;;  %v7537_v39 = vpop.f32.mrf.mxu1 }
 0x8a7   : > { %v7468_v40 = vpop.f32.mrf.mxu0  ;;  %v7539_v41 = vpop.f32.mrf.mxu1 }
 0x8a9   : > { %v7623_v42 = vpop.f32.mrf.mxu0  ;;  %v7694_v43 = vpop.f32.mrf.mxu1 }
 0x8aa   : > { %v7624_v54 = vadd.f32 %v7623_v42, %v7466_v38  ;;  %v7695_v58 = vadd.f32 %v7694_v43, %v7537_v39  ;;  %v8591_v38 = vld [vmem:[#allocation22 + $0x48] sm:$0xff]  ;;  %v8593_v39 = vld [vmem:[#allocation22 + $0x58] sm:$0xff] }
 0x8ab   : > { %v7625_v44 = vpop.f32.mrf.mxu0  ;;  %v7696_v45 = vpop.f32.mrf.mxu1  ;;  %v8587_v42 = vld [vmem:[#allocation22 + $0x28] sm:$0xff]  ;;  %v8589_v43 = vld [vmem:[#allocation22 + $0x38] sm:$0xff] }
 0x8ac   : > { %v7626_v59 = vadd.f32 %v7625_v44, %v7468_v40  ;;  %v7697_v56 = vadd.f32 %v7696_v45, %v7539_v41  ;;  %v8590_v40 = vld [vmem:[#allocation22 + $0x40] sm:$0xff]  ;;  %v8592_v41 = vld [vmem:[#allocation22 + $0x50] sm:$0xff] }
 0x8ad   : > { %v8586_v44 = vld [vmem:[#allocation22 + $0x20] sm:$0xff]  ;;  %v8588_v45 = vld [vmem:[#allocation22 + $0x30] sm:$0xff] }
 0x8b6   : > { %v7782_v46 = vpop.f32.mrf.mxu0  ;;  %v7853_v47 = vpop.f32.mrf.mxu1 }
 0x8b7   : > { %v7858_v2 = vadd.f32 %v7782_v46, %v7624_v54  ;;  %v7860_v3 = vadd.f32 %v7853_v47, %v7695_v58  ;;  %v8583_v46 = vld [vmem:[#allocation22 + $0x8] sm:$0xff]  ;;  %v8585_v47 = vld [vmem:[#allocation22 + $0x18] sm:$0xff] }
 0x8b8   : > { %v7784_v48 = vpop.f32.mrf.mxu0  ;;  %v7855_v49 = vpop.f32.mrf.mxu1 }
 0x8b9   : > { %v7859_v60 = vadd.f32 %v7784_v48, %v7626_v59  ;;  %v7861_v4 = vadd.f32 %v7855_v49, %v7697_v56  ;;  %v8582_v48 = vld [vmem:[#allocation22] sm:$0xff]  ;;  %v8584_v49 = vld [vmem:[#allocation22 + $0x10] sm:$0xff]  ;;  %v8441_v59 = vld [vmem:[#allocation21] sm:$0x1] }
 0x8c8   : > { %v7945_v50 = vpop.f32.mrf.mxu0  ;;  %v8016_v52 = vpop.f32.mrf.mxu1 }
 0x8c9   : > { %v8021_v5 = vadd.f32 %v7945_v50, %v7858_v2  ;;  %v8023_v51 = vadd.f32 %v8016_v52, %v7860_v3  ;;  %v8857_v50 = vld [vmem:[#allocation25 + $0x2d8] sm:$0xff] }
 0x8ca   : > { %v7947_v61 = vpop.f32.mrf.mxu0  ;;  %v8018_v62 = vpop.f32.mrf.mxu1  ;;  %v9049_v52 = vld [vmem:[#allocation25 + $0x8d8] sm:$0xff] }
 0x8cb   : > { %v8022_v53 = vadd.f32 %v7947_v61, %v7859_v60  ;;  %v8024_v6 = vadd.f32 %v8018_v62, %v7861_v4  ;;  %v8856_v60 = vld [vmem:[#allocation25 + $0x2d0] sm:$0xff] }
 0x8cc   : > { %v9048_v4 = vld [vmem:[#allocation25 + $0x8d0] sm:$0xff] }
 0x8da   : > { %v8108_v63 = vpop.f32.mrf.mxu0  ;;  %v8179_v55 = vpop.f32.mrf.mxu1 }
 0x8db   : > { %v8184_v14 = vadd.f32 %v8108_v63, %v8021_v5  ;;  %v8186_v15 = vadd.f32 %v8179_v55, %v8023_v51  ;;  %v8851_v63 = vld [vmem:[#allocation25 + $0x2a8] sm:$0xff]  ;;  %v8850_v5 = vld [vmem:[#allocation25 + $0x2a0] sm:$0xff] }
 0x8dc   : > { %v8110_v9 = vpop.f32.mrf.mxu0  ;;  %v8181_v10 = vpop.f32.mrf.mxu1  ;;  %v9043_v55 = vld [vmem:[#allocation25 + $0x8a8] sm:$0xff]  ;;  %v9042_v51 = vld [vmem:[#allocation25 + $0x8a0] sm:$0xff] }
 0x8dd   : > { %v8185_v17 = vadd.f32 %v8110_v9, %v8022_v53  ;;  %v8187_v18 = vadd.f32 %v8181_v10, %v8024_v6  ;;  %v8845_v53 = vld [vmem:[#allocation25 + $0x278] sm:$0xff]  ;;  %v8844_v9 = vld [vmem:[#allocation25 + $0x270] sm:$0xff] }
 0x8de   : > { %v9037_v6 = vld [vmem:[#allocation25 + $0x878] sm:$0xff]  ;;  %v9036_v10 = vld [vmem:[#allocation25 + $0x870] sm:$0xff] }
 0x8ec   : > { %v8271_v35 = vpop.f32.mrf.mxu0  ;;  %v8342_v16 = vpop.f32.mrf.mxu1 }
 0x8ed   : > { %v8347_v21 = vadd.f32 %v8271_v35, %v8184_v14  ;;  %v8349_v24 = vadd.f32 %v8342_v16, %v8186_v15  ;;  %v9031_v14 = vld [vmem:[#allocation25 + $0x848] sm:$0xff]  ;;  %v8838_v15 = vld [vmem:[#allocation25 + $0x240] sm:$0xff]  ;;  %v8833_v16 = vld [vmem:[#allocation25 + $0x218] sm:$0xff] }
 0x8ee   : > { %v8273_v28 = vpop.f32.mrf.mxu0  ;;  %v8344_v27 = vpop.f32.mrf.mxu1  ;;  %v9030_v35 = vld [vmem:[#allocation25 + $0x840] sm:$0xff] }
 0x8ef   : > { %v8348_v25 = vadd.f32 %v8273_v28, %v8185_v17  ;;  %v8350_v29 = vadd.f32 %v8344_v27, %v8187_v18  ;;  %v8373_v23 = vadd.f32 %v8356_v22, %v8347_v21  ;;  %v8375_v32 = vadd.f32 %v8364_v26, %v8349_v24  ;;  %v9025_v17 = vld [vmem:[#allocation25 + $0x818] sm:$0xff]  ;;  %v8832_v18 = vld [vmem:[#allocation25 + $0x210] sm:$0xff]  ;;  %v9019_v21 = vld [vmem:[#allocation25 + $0x7e8] sm:$0xff] }
 0x8f0   : > { %v8826_v22 = vld [vmem:[#allocation25 + $0x1e0] sm:$0xff]  ;;  %v8821_v26 = vld [vmem:[#allocation25 + $0x1b8] sm:$0xff]  ;;  %v8820_v27 = vld [vmem:[#allocation25 + $0x1b0] sm:$0xff] }
 0x8f1   : > { %v8374_v30 = vadd.f32 %v8360_v19, %v8348_v25  ;;  %v8376_v31 = vadd.f32 %v8368_v20, %v8350_v29  ;;  %v9024_v19 = vld [vmem:[#allocation25 + $0x810] sm:$0xff]  ;;  %v8827_v20 = vld [vmem:[#allocation25 + $0x1e8] sm:$0xff]  ;;  %v9018_v24 = vld [vmem:[#allocation25 + $0x7e0] sm:$0xff] }
 0x8f2   : > { %v9013_v28 = vld [vmem:[#allocation25 + $0x7b8] sm:$0xff]  ;;  %v9012_v25 = vld [vmem:[#allocation25 + $0x7b0] sm:$0xff]  ;;  %v8815_v29 = vld [vmem:[#allocation25 + $0x188] sm:$0xff] }
 0x8f3   : > { %8506 = vmatprep.mubr.f32.mxu0 %v8374_v30  ;;  %8576 = vmatprep.mubr.f32.mxu1 %v8376_v31  ;;  %v9007_v30 = vld [vmem:[#allocation25 + $0x788] sm:$0xff]  ;;  %v8814_v31 = vld [vmem:[#allocation25 + $0x180] sm:$0xff] }
 0x8f4   : > { %8507 = vmatmul.mubr.f32.vlgmr.msra.gmra.mxu0 %v8373_v23  ;;  %8577 = vmatmul.mubr.f32.vlgmr.msra.gmra.mxu1 %v8375_v32  ;;  %v9006_v23 = vld [vmem:[#allocation25 + $0x780] sm:$0xff]  ;;  %v8809_v32 = vld [vmem:[#allocation25 + $0x158] sm:$0xff] }
 0x8f5   : > { %8688 = vmatprep.mubr.f32.mxu0 %v19290_v0  ;;  %8759 = vmatprep.mubr.f32.mxu1 %v19290_v0 }
 0x8f6   : > { %8649 = vmatpush1.msra.mxu0 %v8594_v36  ;;  %8720 = vmatpush1.msra.mxu1 %v8596_v37  ;;  %v9000_v36 = vld [vmem:[#allocation25 + $0x750] sm:$0xff]  ;;  %v8803_v37 = vld [vmem:[#allocation25 + $0x128] sm:$0xff] }
 0x8f7   : > { %8650 = vmatprep.subr.mxu0 %v8591_v38  ;;  %8721 = vmatprep.subr.mxu1 %v8593_v39  ;;  %v8995_v38 = vld [vmem:[#allocation25 + $0x728] sm:$0xff]  ;;  %v8802_v39 = vld [vmem:[#allocation25 + $0x120] sm:$0xff] }
 0x8f8   : > { %8651 = vmatpush1.msra.mxu0 %v8590_v40  ;;  %8722 = vmatpush1.msra.mxu1 %v8592_v41  ;;  %v8994_v40 = vld [vmem:[#allocation25 + $0x720] sm:$0xff]  ;;  %v8797_v41 = vld [vmem:[#allocation25 + $0xf8] sm:$0xff] }
 0x8f9   : > { %8652 = vmatprep.subr.mxu0 %v8587_v42  ;;  %8723 = vmatprep.subr.mxu1 %v8589_v43  ;;  %v8989_v42 = vld [vmem:[#allocation25 + $0x6f8] sm:$0xff]  ;;  %v8796_v43 = vld [vmem:[#allocation25 + $0xf0] sm:$0xff] }
 0x8fa   : > { %8653 = vmatpush1.msra.mxu0 %v8586_v44  ;;  %8724 = vmatpush1.msra.mxu1 %v8588_v45  ;;  %v8988_v44 = vld [vmem:[#allocation25 + $0x6f0] sm:$0xff]  ;;  %v8791_v45 = vld [vmem:[#allocation25 + $0xc8] sm:$0xff] }
 0x8fb   : > { %8654 = vmatprep.subr.mxu0 %v8583_v46  ;;  %8725 = vmatprep.subr.mxu1 %v8585_v47  ;;  %v8983_v46 = vld [vmem:[#allocation25 + $0x6c8] sm:$0xff]  ;;  %v8790_v47 = vld [vmem:[#allocation25 + $0xc0] sm:$0xff] }
 0x8fc   : > { %8655 = vmatpush1.msra.mxu0 %v8582_v48  ;;  %8726 = vmatpush1.msra.mxu1 %v8584_v49  ;;  %v8982_v48 = vld [vmem:[#allocation25 + $0x6c0] sm:$0xff]  ;;  %v8785_v49 = vld [vmem:[#allocation25 + $0x98] sm:$0xff] }
 0x8fd   : > { %9150 = vmatprep.subr.mxu0 %v8857_v50  ;;  %9221 = vmatprep.subr.mxu1 %v9049_v52  ;;  %v8977_v50 = vld [vmem:[#allocation25 + $0x698] sm:$0xff]  ;;  %v8784_v52 = vld [vmem:[#allocation25 + $0x90] sm:$0xff] }
 0x9b4   : > { %v17027_v54 = vpop.f32.mrf.mxu0  ;;  %v17062_v58 = vpop.f32.mrf.mxu1 }
 0x9b6   : > { %v17028_v56 = vpop.f32.mrf.mxu0  ;;  %v17063_v61 = vpop.f32.mrf.mxu1 }
 0x9b7   : > { %v17029_v62 = vadd.f32 %v17028_v56, %v17027_v54  ;;  %v17064_v2 = vadd.f32 %v17063_v61, %v17062_v58  ;;  %v8976_v54 = vld [vmem:[#allocation25 + $0x690] sm:$0xff]  ;;  %v8779_v58 = vld [vmem:[#allocation25 + $0x68] sm:$0xff]  ;;  %v8778_v56 = vld [vmem:[#allocation25 + $0x60] sm:$0xff] }
 0x9b8   : > { %v8970_v61 = vld [vmem:[#allocation25 + $0x660] sm:$0xff] }
 0x9b9   : > { %v8509_v1 = vadd.f32 %v17029_v62, %v8441_v59  ;;  %v8971_v59 = vld [vmem:[#allocation25 + $0x668] sm:$0xff]  ;;  %v8773_v62 = vld [vmem:[#allocation25 + $0x38] sm:$0xff] }
 0x9bb   : > { %v8579_v3 = vadd.f32 %v17064_v2, %v8509_v1  ;;  %v8965_v1 = vld [vmem:[#allocation25 + $0x638] sm:$0xff]  ;;  %v8772_v2 = vld [vmem:[#allocation25 + $0x30] sm:$0xff] }
 0x9bd   : > { %16354 = vmatmul.mubr.msk.f32.vlgmr.msra.gmra.mxu0 %vm8620_vm11, %v8579_v3  ;;  %16355 = vmatmul.mubr.msk.f32.vlgmr.msra.gmra.mxu1 %vm8620_vm11, %v8579_v3  ;;  %v8964_v3 = vld [vmem:[#allocation25 + $0x630] sm:$0xff] }
 0x9be   : > { %9151 = vmatpush1.msra.mxu0 %v8856_v60  ;;  %9222 = vmatpush1.msra.mxu1 %v9048_v4  ;;  %v8767_v60 = vld [vmem:[#allocation25 + $0x8] sm:$0xff] }
 0x9bf   : > { %9152 = vmatprep.subr.mxu0 %v8851_v63  ;;  %9223 = vmatprep.subr.mxu1 %v9043_v55  ;;  %v8959_v4 = vld [vmem:[#allocation25 + $0x608] sm:$0xff]  ;;  %v8766_v63 = vld [vmem:[#allocation25] sm:$0xff] }
 0x9c0   : > { %9153 = vmatpush1.msra.mxu0 %v8850_v5  ;;  %9224 = vmatpush1.msra.mxu1 %v9042_v51  ;;  %v8958_v55 = vld [vmem:[#allocation25 + $0x600] sm:$0xff]  ;;  %v8953_v5 = vld [vmem:[#allocation25 + $0x5d8] sm:$0xff] }
 0x9c1   : > { %9154 = vmatprep.subr.mxu0 %v8845_v53  ;;  %9225 = vmatprep.subr.mxu1 %v9037_v6  ;;  %v9145_v51 = vld [vmem:[#allocation25 + $0xbd8] sm:$0xff]  ;;  %v8952_v53 = vld [vmem:[#allocation25 + $0x5d0] sm:$0xff] }
 0x9c2   : > { %9155 = vmatpush1.msra.mxu0 %v8844_v9  ;;  %9226 = vmatpush1.msra.mxu1 %v9036_v10  ;;  %v9144_v6 = vld [vmem:[#allocation25 + $0xbd0] sm:$0xff]  ;;  %v8947_v9 = vld [vmem:[#allocation25 + $0x5a8] sm:$0xff] }
 0x9c3   : > { %9156 = vmatprep.subr.mxu0 %v8839_v13  ;;  %9227 = vmatprep.subr.mxu1 %v9031_v14  ;;  %v9139_v10 = vld [vmem:[#allocation25 + $0xba8] sm:$0xff]  ;;  %v8946_v13 = vld [vmem:[#allocation25 + $0x5a0] sm:$0xff] }
 0x9c4   : > { %9157 = vmatpush1.msra.mxu0 %v8838_v15  ;;  %9228 = vmatpush1.msra.mxu1 %v9030_v35  ;;  %v9138_v14 = vld [vmem:[#allocation25 + $0xba0] sm:$0xff]  ;;  %v8941_v15 = vld [vmem:[#allocation25 + $0x578] sm:$0xff] }
 0x9c5   : > { %9158 = vmatprep.subr.mxu0 %v8833_v16  ;;  %9229 = vmatprep.subr.mxu1 %v9025_v17  ;;  %v9133_v35 = vld [vmem:[#allocation25 + $0xb78] sm:$0xff]  ;;  %v8940_v16 = vld [vmem:[#allocation25 + $0x570] sm:$0xff] }
 0x9c6   : > { %9159 = vmatpush1.msra.mxu0 %v8832_v18  ;;  %9230 = vmatpush1.msra.mxu1 %v9024_v19  ;;  %v9132_v17 = vld [vmem:[#allocation25 + $0xb70] sm:$0xff]  ;;  %v8935_v18 = vld [vmem:[#allocation25 + $0x548] sm:$0xff] }
 0x9c7   : > { %9160 = vmatprep.subr.mxu0 %v8827_v20  ;;  %9231 = vmatprep.subr.mxu1 %v9019_v21  ;;  %v9127_v19 = vld [vmem:[#allocation25 + $0xb48] sm:$0xff]  ;;  %v8934_v20 = vld [vmem:[#allocation25 + $0x540] sm:$0xff] }
 0x9c8   : > { %9161 = vmatpush1.msra.mxu0 %v8826_v22  ;;  %9232 = vmatpush1.msra.mxu1 %v9018_v24  ;;  %v9126_v21 = vld [vmem:[#allocation25 + $0xb40] sm:$0xff]  ;;  %v8929_v22 = vld [vmem:[#allocation25 + $0x518] sm:$0xff] }
 0x9c9   : > { %9162 = vmatprep.subr.mxu0 %v8821_v26  ;;  %9233 = vmatprep.subr.mxu1 %v9013_v28  ;;  %v9121_v24 = vld [vmem:[#allocation25 + $0xb18] sm:$0xff]  ;;  %v8928_v26 = vld [vmem:[#allocation25 + $0x510] sm:$0xff] }
 0x9ca   : > { %9163 = vmatpush1.msra.mxu0 %v8820_v27  ;;  %9234 = vmatpush1.msra.mxu1 %v9012_v25  ;;  %v9120_v28 = vld [vmem:[#allocation25 + $0xb10] sm:$0xff]  ;;  %v8923_v27 = vld [vmem:[#allocation25 + $0x4e8] sm:$0xff] }
 0x9cb   : > { %9164 = vmatprep.subr.mxu0 %v8815_v29  ;;  %9235 = vmatprep.subr.mxu1 %v9007_v30  ;;  %v9115_v25 = vld [vmem:[#allocation25 + $0xae8] sm:$0xff]  ;;  %v8922_v29 = vld [vmem:[#allocation25 + $0x4e0] sm:$0xff] }
 0x9cc   : > { %9165 = vmatpush1.msra.mxu0 %v8814_v31  ;;  %9236 = vmatpush1.msra.mxu1 %v9006_v23  ;;  %v9114_v30 = vld [vmem:[#allocation25 + $0xae0] sm:$0xff]  ;;  %v8917_v31 = vld [vmem:[#allocation25 + $0x4b8] sm:$0xff] }
 0x9cd   : > { %9166 = vmatprep.subr.mxu0 %v8809_v32  ;;  %9237 = vmatprep.subr.mxu1 %v9001_v33  ;;  %v9109_v23 = vld [vmem:[#allocation25 + $0xab8] sm:$0xff]  ;;  %v8916_v32 = vld [vmem:[#allocation25 + $0x4b0] sm:$0xff] }
 0x9ce   : > { %9167 = vmatpush1.msra.mxu0 %v8808_v34  ;;  %9238 = vmatpush1.msra.mxu1 %v9000_v36  ;;  %v9108_v33 = vld [vmem:[#allocation25 + $0xab0] sm:$0xff]  ;;  %v8911_v34 = vld [vmem:[#allocation25 + $0x488] sm:$0xff] }
 0x9cf   : > { %9168 = vmatprep.subr.mxu0 %v8803_v37  ;;  %9239 = vmatprep.subr.mxu1 %v8995_v38  ;;  %v9103_v36 = vld [vmem:[#allocation25 + $0xa88] sm:$0xff]  ;;  %v8910_v37 = vld [vmem:[#allocation25 + $0x480] sm:$0xff] }
 0x9d0   : > { %9169 = vmatpush1.msra.mxu0 %v8802_v39  ;;  %9240 = vmatpush1.msra.mxu1 %v8994_v40  ;;  %v9102_v38 = vld [vmem:[#allocation25 + $0xa80] sm:$0xff]  ;;  %v8905_v39 = vld [vmem:[#allocation25 + $0x458] sm:$0xff] }
 0x9d1   : > { %9170 = vmatprep.subr.mxu0 %v8797_v41  ;;  %9241 = vmatprep.subr.mxu1 %v8989_v42  ;;  %v9097_v40 = vld [vmem:[#allocation25 + $0xa58] sm:$0xff]  ;;  %v8904_v41 = vld [vmem:[#allocation25 + $0x450] sm:$0xff] }
 0x9d2   : > { %9171 = vmatpush1.msra.mxu0 %v8796_v43  ;;  %9242 = vmatpush1.msra.mxu1 %v8988_v44  ;;  %v9096_v42 = vld [vmem:[#allocation25 + $0xa50] sm:$0xff]  ;;  %v8899_v43 = vld [vmem:[#allocation25 + $0x428] sm:$0xff] }
 0x9d3   : > { %9172 = vmatprep.subr.mxu0 %v8791_v45  ;;  %9243 = vmatprep.subr.mxu1 %v8983_v46  ;;  %v9091_v44 = vld [vmem:[#allocation25 + $0xa28] sm:$0xff]  ;;  %v8898_v45 = vld [vmem:[#allocation25 + $0x420] sm:$0xff] }
 0x9d4   : > { %9173 = vmatpush1.msra.mxu0 %v8790_v47  ;;  %9244 = vmatpush1.msra.mxu1 %v8982_v48  ;;  %v9090_v46 = vld [vmem:[#allocation25 + $0xa20] sm:$0xff]  ;;  %v8893_v47 = vld [vmem:[#allocation25 + $0x3f8] sm:$0xff] }
 0x9d5   : > { %9174 = vmatprep.subr.mxu0 %v8785_v49  ;;  %9245 = vmatprep.subr.mxu1 %v8977_v50  ;;  %v9085_v48 = vld [vmem:[#allocation25 + $0x9f8] sm:$0xff]  ;;  %v8892_v49 = vld [vmem:[#allocation25 + $0x3f0] sm:$0xff] }
 0x9d6   : > { %9175 = vmatpush1.msra.mxu0 %v8784_v52  ;;  %9246 = vmatpush1.msra.mxu1 %v8976_v54  ;;  %v9084_v50 = vld [vmem:[#allocation25 + $0x9f0] sm:$0xff]  ;;  %v8887_v52 = vld [vmem:[#allocation25 + $0x3c8] sm:$0xff] }
 0x9d7   : > { %9176 = vmatprep.subr.mxu0 %v8779_v58  ;;  %9247 = vmatprep.subr.mxu1 %v8971_v59  ;;  %v9079_v54 = vld [vmem:[#allocation25 + $0x9c8] sm:$0xff]  ;;  %v8886_v58 = vld [vmem:[#allocation25 + $0x3c0] sm:$0xff] }
 0x9d8   : > { %9177 = vmatpush1.msra.mxu0 %v8778_v56  ;;  %9248 = vmatpush1.msra.mxu1 %v8970_v61  ;;  %v9078_v59 = vld [vmem:[#allocation25 + $0x9c0] sm:$0xff]  ;;  %v8881_v56 = vld [vmem:[#allocation25 + $0x398] sm:$0xff] }
 0x9d9   : > { %9178 = vmatprep.subr.mxu0 %v8773_v62  ;;  %9249 = vmatprep.subr.mxu1 %v8965_v1  ;;  %v9073_v61 = vld [vmem:[#allocation25 + $0x998] sm:$0xff]  ;;  %v8880_v62 = vld [vmem:[#allocation25 + $0x390] sm:$0xff] }
 0x9da   : > { %9179 = vmatpush1.msra.mxu0 %v8772_v2  ;;  %9250 = vmatpush1.msra.mxu1 %v8964_v3  ;;  %v9072_v1 = vld [vmem:[#allocation25 + $0x990] sm:$0xff]  ;;  %v8875_v2 = vld [vmem:[#allocation25 + $0x368] sm:$0xff] }
 0x9db   : > { %9180 = vmatprep.subr.mxu0 %v8767_v60  ;;  %9251 = vmatprep.subr.mxu1 %v8959_v4  ;;  %v9067_v3 = vld [vmem:[#allocation25 + $0x968] sm:$0xff]  ;;  %v8874_v60 = vld [vmem:[#allocation25 + $0x360] sm:$0xff] }
 0x9dc   : > { %9181 = vmatpush1.msra.mxu0 %v8766_v63  ;;  %9252 = vmatpush1.msra.mxu1 %v8958_v55  ;;  %v9066_v4 = vld [vmem:[#allocation25 + $0x960] sm:$0xff]  ;;  %v8869_v63 = vld [vmem:[#allocation25 + $0x338] sm:$0xff] }
 0x9dd   : > { %9182 = vmatprep.subr.mxu0 %v8953_v5  ;;  %9253 = vmatprep.subr.mxu1 %v9145_v51  ;;  %v9061_v55 = vld [vmem:[#allocation25 + $0x938] sm:$0xff]  ;;  %v8868_v5 = vld [vmem:[#allocation25 + $0x330] sm:$0xff] }
 0x9de   : > { %9183 = vmatpush2.msra.mxu0 %v8952_v53  ;;  %9254 = vmatpush2.msra.mxu1 %v9144_v6  ;;  %v9060_v51 = vld [vmem:[#allocation25 + $0x930] sm:$0xff]  ;;  %v8863_v53 = vld [vmem:[#allocation25 + $0x308] sm:$0xff] }
 0x9df   : > { %9184 = vmatprep.subr.mxu0 %v8947_v9  ;;  %9255 = vmatprep.subr.mxu1 %v9139_v10  ;;  %v9055_v6 = vld [vmem:[#allocation25 + $0x908] sm:$0xff]  ;;  %v8862_v9 = vld [vmem:[#allocation25 + $0x300] sm:$0xff] }
 0x9e0   : > { %9185 = vmatpush2.msra.mxu0 %v8946_v13  ;;  %9256 = vmatpush2.msra.mxu1 %v9138_v14  ;;  %v9054_v10 = vld [vmem:[#allocation25 + $0x900] sm:$0xff]  ;;  %v8859_v13 = vld [vmem:[#allocation25 + $0x2e8] sm:$0xff] }
 0x9e1   : > { %9186 = vmatprep.subr.mxu0 %v8941_v15  ;;  %9257 = vmatprep.subr.mxu1 %v9133_v35  ;;  %v9051_v14 = vld [vmem:[#allocation25 + $0x8e8] sm:$0xff]  ;;  %v8598_v15 = vld [vmem:[#allocation24] sm:$0xf] }
 0x9e2   : > { %9187 = vmatpush2.msra.mxu0 %v8940_v16  ;;  %9258 = vmatpush2.msra.mxu1 %v9132_v17  ;;  %v8607_v35 = vrot.slane %v8598_v15, %v8359_v7  ;;  %v8615_v16 = vrot.slane %v8598_v15, %v8367_v8  ;;  %v8603_v17 = vrot.slane %v8598_v15, %v8355_v11  ;;  %v9050_v8 = vld [vmem:[#allocation25 + $0x8e0] sm:$0xff]  ;;  %v8853_v11 = vld [vmem:[#allocation25 + $0x2b8] sm:$0xff] }
 0x9e3   : > { %9188 = vmatprep.subr.mxu0 %v8935_v18  ;;  %9259 = vmatprep.subr.mxu1 %v9127_v19  ;;  %v8611_v19 = vrot.slane %v8598_v15, %v8363_v12  ;;  %v8852_v12 = vld [vmem:[#allocation25 + $0x2b0] sm:$0xff]  ;;  %v8781_v15 = vld [vmem:[#allocation25 + $0x78] sm:$0xff] }
 0x9e4   : > { %9189 = vmatpush2.msra.mxu0 %v8934_v20  ;;  %9260 = vmatpush2.msra.mxu1 %v9126_v21 }
 0x9e5   : > { %9190 = vmatprep.subr.mxu0 %v8929_v22  ;;  %9261 = vmatprep.subr.mxu1 %v9121_v24 }
 0x9e6   : > { %9191 = vmatpush2.msra.mxu0 %v8928_v26  ;;  %9262 = vmatpush2.msra.mxu1 %v9120_v28 }
 0x9e7   : > { %9192 = vmatprep.subr.mxu0 %v8923_v27  ;;  %9263 = vmatprep.subr.mxu1 %v9115_v25  ;;  %v8858_v27 = vld [vmem:[#allocation25 + $0x2e0] sm:$0xff]  ;;  %v9044_v25 = vld [vmem:[#allocation25 + $0x8b0] sm:$0xff] }
 0x9e8   : > { %9193 = vmatpush2.msra.mxu0 %v8922_v29  ;;  %9264 = vmatpush2.msra.mxu1 %v9114_v30  ;;  %v8847_v29 = vld [vmem:[#allocation25 + $0x288] sm:$0xff] }
 0x9e9   : > { %9194 = vmatprep.subr.mxu0 %v8917_v31  ;;  %9265 = vmatprep.subr.mxu1 %v9109_v23  ;;  %v9039_v30 = vld [vmem:[#allocation25 + $0x888] sm:$0xff]  ;;  %v8846_v31 = vld [vmem:[#allocation25 + $0x280] sm:$0xff] }
 0x9ea   : > { %9195 = vmatpush2.msra.mxu0 %v8916_v32  ;;  %9266 = vmatpush2.msra.mxu1 %v9108_v33  ;;  %v9038_v23 = vld [vmem:[#allocation25 + $0x880] sm:$0xff]  ;;  %v8841_v32 = vld [vmem:[#allocation25 + $0x258] sm:$0xff] }
 0x9eb   : > { %9196 = vmatprep.subr.mxu0 %v8911_v34  ;;  %9267 = vmatprep.subr.mxu1 %v9103_v36  ;;  %v9033_v33 = vld [vmem:[#allocation25 + $0x858] sm:$0xff]  ;;  %v8840_v34 = vld [vmem:[#allocation25 + $0x250] sm:$0xff] }
 0x9ec   : > { %9197 = vmatpush2.msra.mxu0 %v8910_v37  ;;  %9268 = vmatpush2.msra.mxu1 %v9102_v38  ;;  %v9032_v36 = vld [vmem:[#allocation25 + $0x850] sm:$0xff]  ;;  %v8835_v37 = vld [vmem:[#allocation25 + $0x228] sm:$0xff] }
 0x9ed   : > { %9198 = vmatprep.subr.mxu0 %v8905_v39  ;;  %9269 = vmatprep.subr.mxu1 %v9097_v40  ;;  %v9027_v38 = vld [vmem:[#allocation25 + $0x828] sm:$0xff]  ;;  %v8834_v39 = vld [vmem:[#allocation25 + $0x220] sm:$0xff] }
 0x9ee   : > { %9199 = vmatpush2.msra.mxu0 %v8904_v41  ;;  %9270 = vmatpush2.msra.mxu1 %v9096_v42  ;;  %v9026_v40 = vld [vmem:[#allocation25 + $0x820] sm:$0xff]  ;;  %v8829_v41 = vld [vmem:[#allocation25 + $0x1f8] sm:$0xff] }
 0x9ef   : > { %9200 = vmatprep.subr.mxu0 %v8899_v43  ;;  %9271 = vmatprep.subr.mxu1 %v9091_v44  ;;  %v9021_v42 = vld [vmem:[#allocation25 + $0x7f8] sm:$0xff]  ;;  %v8828_v43 = vld [vmem:[#allocation25 + $0x1f0] sm:$0xff] }
 0x9f0   : > { %9201 = vmatpush2.msra.mxu0 %v8898_v45  ;;  %9272 = vmatpush2.msra.mxu1 %v9090_v46  ;;  %v9020_v44 = vld [vmem:[#allocation25 + $0x7f0] sm:$0xff]  ;;  %v8823_v45 = vld [vmem:[#allocation25 + $0x1c8] sm:$0xff] }
 0x9f1   : > { %9202 = vmatprep.subr.mxu0 %v8893_v47  ;;  %9273 = vmatprep.subr.mxu1 %v9085_v48  ;;  %v9015_v46 = vld [vmem:[#allocation25 + $0x7c8] sm:$0xff]  ;;  %v8822_v47 = vld [vmem:[#allocation25 + $0x1c0] sm:$0xff] }
 0x9f2   : > { %9203 = vmatpush2.msra.mxu0 %v8892_v49  ;;  %9274 = vmatpush2.msra.mxu1 %v9084_v50  ;;  %v9014_v48 = vld [vmem:[#allocation25 + $0x7c0] sm:$0xff]  ;;  %v8817_v49 = vld [vmem:[#allocation25 + $0x198] sm:$0xff] }
 0x9f3   : > { %9204 = vmatprep.subr.mxu0 %v8887_v52  ;;  %9275 = vmatprep.subr.mxu1 %v9079_v54  ;;  %v9009_v50 = vld [vmem:[#allocation25 + $0x798] sm:$0xff]  ;;  %v8816_v52 = vld [vmem:[#allocation25 + $0x190] sm:$0xff] }
 0x9f4   : > { %9205 = vmatpush2.msra.mxu0 %v8886_v58  ;;  %9276 = vmatpush2.msra.mxu1 %v9078_v59  ;;  %v9008_v54 = vld [vmem:[#allocation25 + $0x790] sm:$0xff]  ;;  %v8811_v58 = vld [vmem:[#allocation25 + $0x168] sm:$0xff] }
 0x9f5   : > { %9206 = vmatprep.subr.mxu0 %v8881_v56  ;;  %9277 = vmatprep.subr.mxu1 %v9073_v61  ;;  %v9003_v59 = vld [vmem:[#allocation25 + $0x768] sm:$0xff]  ;;  %v8810_v56 = vld [vmem:[#allocation25 + $0x160] sm:$0xff] }
 0x9f6   : > { %9207 = vmatpush2.msra.mxu0 %v8880_v62  ;;  %9278 = vmatpush2.msra.mxu1 %v9072_v1  ;;  %v9002_v61 = vld [vmem:[#allocation25 + $0x760] sm:$0xff]  ;;  %v8805_v62 = vld [vmem:[#allocation25 + $0x138] sm:$0xff] }
 0x9f7   : > { %9208 = vmatprep.subr.mxu0 %v8875_v2  ;;  %9279 = vmatprep.subr.mxu1 %v9067_v3  ;;  %v8997_v1 = vld [vmem:[#allocation25 + $0x738] sm:$0xff]  ;;  %v8804_v2 = vld [vmem:[#allocation25 + $0x130] sm:$0xff] }
 0x9f8   : > { %9209 = vmatpush2.msra.mxu0 %v8874_v60  ;;  %9280 = vmatpush2.msra.mxu1 %v9066_v4  ;;  %v8996_v3 = vld [vmem:[#allocation25 + $0x730] sm:$0xff]  ;;  %v8799_v60 = vld [vmem:[#allocation25 + $0x108] sm:$0xff] }
 0x9f9   : > { %9210 = vmatprep.subr.mxu0 %v8869_v63  ;;  %9281 = vmatprep.subr.mxu1 %v9061_v55  ;;  %v8991_v4 = vld [vmem:[#allocation25 + $0x708] sm:$0xff]  ;;  %v8798_v63 = vld [vmem:[#allocation25 + $0x100] sm:$0xff] }
 0x9fa   : > { %9211 = vmatpush2.msra.mxu0 %v8868_v5  ;;  %9282 = vmatpush2.msra.mxu1 %v9060_v51  ;;  %v8990_v55 = vld [vmem:[#allocation25 + $0x700] sm:$0xff]  ;;  %v8793_v5 = vld [vmem:[#allocation25 + $0xd8] sm:$0xff] }
 0x9fb   : > { %9212 = vmatprep.subr.mxu0 %v8863_v53  ;;  %9283 = vmatprep.subr.mxu1 %v9055_v6  ;;  %v8985_v51 = vld [vmem:[#allocation25 + $0x6d8] sm:$0xff]  ;;  %v8792_v53 = vld [vmem:[#allocation25 + $0xd0] sm:$0xff] }
 0x9fc   : > { %9213 = vmatpush2.msra.mxu0 %v8862_v9  ;;  %9284 = vmatpush2.msra.mxu1 %v9054_v10  ;;  %v8984_v6 = vld [vmem:[#allocation25 + $0x6d0] sm:$0xff]  ;;  %v8787_v9 = vld [vmem:[#allocation25 + $0xa8] sm:$0xff] }
 0x9fd   : > { %9292 = vmatprep.subr.mxu0 %v8859_v13  ;;  %9363 = vmatprep.subr.mxu1 %v9051_v14  ;;  %v8979_v10 = vld [vmem:[#allocation25 + $0x6a8] sm:$0xff]  ;;  %v8786_v13 = vld [vmem:[#allocation25 + $0xa0] sm:$0xff] }
 0x9fe   : > { %v8978_v14 = vld [vmem:[#allocation25 + $0x6a0] sm:$0xff] }
 0xa7d   : > { %v8690_v18 = vpop.f32.mrf.mxu0  ;;  %v8761_v20 = vpop.f32.mrf.mxu1 }
 0xa7e   : > { %v20685_v28 = vadd.f32 %v8690_v18, %v8603_v17  ;;  %v20687_v7 = vadd.f32 %v8761_v20, %v8611_v19  ;;  %v8972_v17 = vld [vmem:[#allocation25 + $0x670] sm:$0xff]  ;;  %v8775_v18 = vld [vmem:[#allocation25 + $0x48] sm:$0xff]  ;;  %v8774_v20 = vld [vmem:[#allocation25 + $0x40] sm:$0xff] }
 0xa7f   : > { %v8692_v21 = vpop.f32.mrf.mxu0  ;;  %v8763_v22 = vpop.f32.mrf.mxu1  ;;  %v8967_v19 = vld [vmem:[#allocation25 + $0x648] sm:$0xff] }
 0xa80   : > { %v20681_v24 = vadd.f32 %v8692_v21, %v8607_v35  ;;  %v20683_v26 = vadd.f32 %v8763_v22, %v8615_v16  ;;  %v8973_v35 = vld [vmem:[#allocation25 + $0x678] sm:$0xff]  ;;  %v8780_v16 = vld [vmem:[#allocation25 + $0x70] sm:$0xff]  ;;  %v8966_v21 = vld [vmem:[#allocation25 + $0x640] sm:$0xff] }
 0xa81   : > { %v8769_v22 = vld [vmem:[#allocation25 + $0x18] sm:$0xff] }
 0xa82   : > { %9214 = vmatprep.mubr.f32.mxu0 %v20681_v24  ;;  %9285 = vmatprep.mubr.f32.mxu1 %v20683_v26 }
 0xa83   : > { %9215 = vmatmul.mubr.f32.vlgmr.msra.gmra.mxu0 %v20685_v28  ;;  %9286 = vmatmul.mubr.f32.vlgmr.msra.gmra.mxu1 %v20687_v7 }
 0xa84   : > { %9293 = vmatpush1.msra.mxu0 %v8858_v27  ;;  %9364 = vmatpush1.msra.mxu1 %v9050_v8  ;;  %v8961_v27 = vld [vmem:[#allocation25 + $0x618] sm:$0xff]  ;;  %v8768_v8 = vld [vmem:[#allocation25 + $0x10] sm:$0xff] }
 0xa85   : > { %9294 = vmatprep.subr.mxu0 %v8853_v11  ;;  %9356 = vmatprep.mubr.f32.mxu0 %v20681_v24  ;;  %v8960_v11 = vld [vmem:[#allocation25 + $0x610] sm:$0xff] }
 0xa86   : > { %9365 = vmatprep.subr.mxu1 %v9045_v57  ;;  %9427 = vmatprep.mubr.f32.mxu1 %v20683_v26  ;;  %v8955_v57 = vld [vmem:[#allocation25 + $0x5e8] sm:$0xff] }
 0xa87   : > { %9295 = vmatpush1.msra.mxu0 %v8852_v12  ;;  %9366 = vmatpush1.msra.mxu1 %v9044_v25  ;;  %v9147_v12 = vld [vmem:[#allocation25 + $0xbe8] sm:$0xff]  ;;  %v8954_v25 = vld [vmem:[#allocation25 + $0x5e0] sm:$0xff] }
 0xa88   : > { %9296 = vmatprep.subr.mxu0 %v8847_v29  ;;  %9367 = vmatprep.subr.mxu1 %v9039_v30  ;;  %v9146_v29 = vld [vmem:[#allocation25 + $0xbe0] sm:$0xff]  ;;  %v8949_v30 = vld [vmem:[#allocation25 + $0x5b8] sm:$0xff] }
 0xa89   : > { %9297 = vmatpush1.msra.mxu0 %v8846_v31  ;;  %9368 = vmatpush1.msra.mxu1 %v9038_v23  ;;  %v9141_v31 = vld [vmem:[#allocation25 + $0xbb8] sm:$0xff]  ;;  %v8948_v23 = vld [vmem:[#allocation25 + $0x5b0] sm:$0xff] }
 0xa8a   : > { %9298 = vmatprep.subr.mxu0 %v8841_v32  ;;  %9369 = vmatprep.subr.mxu1 %v9033_v33  ;;  %v9140_v32 = vld [vmem:[#allocation25 + $0xbb0] sm:$0xff]  ;;  %v8943_v33 = vld [vmem:[#allocation25 + $0x588] sm:$0xff] }
 0xa8b   : > { %9299 = vmatpush1.msra.mxu0 %v8840_v34  ;;  %9370 = vmatpush1.msra.mxu1 %v9032_v36  ;;  %v9135_v34 = vld [vmem:[#allocation25 + $0xb88] sm:$0xff]  ;;  %v8942_v36 = vld [vmem:[#allocation25 + $0x580] sm:$0xff] }
 0xa8c   : > { %9300 = vmatprep.subr.mxu0 %v8835_v37  ;;  %9371 = vmatprep.subr.mxu1 %v9027_v38  ;;  %v9134_v37 = vld [vmem:[#allocation25 + $0xb80] sm:$0xff]  ;;  %v8937_v38 = vld [vmem:[#allocation25 + $0x558] sm:$0xff] }
 0xa8d   : > { %9301 = vmatpush1.msra.mxu0 %v8834_v39  ;;  %9372 = vmatpush1.msra.mxu1 %v9026_v40  ;;  %v9129_v39 = vld [vmem:[#allocation25 + $0xb58] sm:$0xff]  ;;  %v8936_v40 = vld [vmem:[#allocation25 + $0x550] sm:$0xff] }
 0xa8e   : > { %9302 = vmatprep.subr.mxu0 %v8829_v41  ;;  %9373 = vmatprep.subr.mxu1 %v9021_v42  ;;  %v9128_v41 = vld [vmem:[#allocation25 + $0xb50] sm:$0xff]  ;;  %v8931_v42 = vld [vmem:[#allocation25 + $0x528] sm:$0xff] }
 0xa8f   : > { %9303 = vmatpush1.msra.mxu0 %v8828_v43  ;;  %9374 = vmatpush1.msra.mxu1 %v9020_v44  ;;  %v9123_v43 = vld [vmem:[#allocation25 + $0xb28] sm:$0xff]  ;;  %v8930_v44 = vld [vmem:[#allocation25 + $0x520] sm:$0xff] }
 0xa90   : > { %9304 = vmatprep.subr.mxu0 %v8823_v45  ;;  %9375 = vmatprep.subr.mxu1 %v9015_v46  ;;  %v9122_v45 = vld [vmem:[#allocation25 + $0xb20] sm:$0xff]  ;;  %v8925_v46 = vld [vmem:[#allocation25 + $0x4f8] sm:$0xff] }
 0xa91   : > { %9305 = vmatpush1.msra.mxu0 %v8822_v47  ;;  %9376 = vmatpush1.msra.mxu1 %v9014_v48  ;;  %v9117_v47 = vld [vmem:[#allocation25 + $0xaf8] sm:$0xff]  ;;  %v8924_v48 = vld [vmem:[#allocation25 + $0x4f0] sm:$0xff] }
 0xa92   : > { %9306 = vmatprep.subr.mxu0 %v8817_v49  ;;  %9377 = vmatprep.subr.mxu1 %v9009_v50  ;;  %v9116_v49 = vld [vmem:[#allocation25 + $0xaf0] sm:$0xff]  ;;  %v8919_v50 = vld [vmem:[#allocation25 + $0x4c8] sm:$0xff] }
 0xa93   : > { %9307 = vmatpush1.msra.mxu0 %v8816_v52  ;;  %9378 = vmatpush1.msra.mxu1 %v9008_v54  ;;  %v9111_v52 = vld [vmem:[#allocation25 + $0xac8] sm:$0xff]  ;;  %v8918_v54 = vld [vmem:[#allocation25 + $0x4c0] sm:$0xff] }
 0xa94   : > { %9308 = vmatprep.subr.mxu0 %v8811_v58  ;;  %9379 = vmatprep.subr.mxu1 %v9003_v59  ;;  %v9110_v58 = vld [vmem:[#allocation25 + $0xac0] sm:$0xff]  ;;  %v8913_v59 = vld [vmem:[#allocation25 + $0x498] sm:$0xff] }
 0xa95   : > { %9309 = vmatpush1.msra.mxu0 %v8810_v56  ;;  %9380 = vmatpush1.msra.mxu1 %v9002_v61  ;;  %v9105_v56 = vld [vmem:[#allocation25 + $0xa98] sm:$0xff]  ;;  %v8912_v61 = vld [vmem:[#allocation25 + $0x490] sm:$0xff] }
 0xa96   : > { %9310 = vmatprep.subr.mxu0 %v8805_v62  ;;  %9381 = vmatprep.subr.mxu1 %v8997_v1  ;;  %v9104_v62 = vld [vmem:[#allocation25 + $0xa90] sm:$0xff]  ;;  %v8907_v1 = vld [vmem:[#allocation25 + $0x468] sm:$0xff] }
 0xa97   : > { %9311 = vmatpush1.msra.mxu0 %v8804_v2  ;;  %9382 = vmatpush1.msra.mxu1 %v8996_v3  ;;  %v9099_v2 = vld [vmem:[#allocation25 + $0xa68] sm:$0xff]  ;;  %v8906_v3 = vld [vmem:[#allocation25 + $0x460] sm:$0xff] }
 0xa98   : > { %9312 = vmatprep.subr.mxu0 %v8799_v60  ;;  %9383 = vmatprep.subr.mxu1 %v8991_v4  ;;  %v9098_v60 = vld [vmem:[#allocation25 + $0xa60] sm:$0xff]  ;;  %v8901_v4 = vld [vmem:[#allocation25 + $0x438] sm:$0xff] }
 0xa99   : > { %9313 = vmatpush1.msra.mxu0 %v8798_v63  ;;  %9384 = vmatpush1.msra.mxu1 %v8990_v55  ;;  %v9093_v63 = vld [vmem:[#allocation25 + $0xa38] sm:$0xff]  ;;  %v8900_v55 = vld [vmem:[#allocation25 + $0x430] sm:$0xff] }
 0xa9a   : > { %9314 = vmatprep.subr.mxu0 %v8793_v5  ;;  %9385 = vmatprep.subr.mxu1 %v8985_v51  ;;  %v9092_v5 = vld [vmem:[#allocation25 + $0xa30] sm:$0xff]  ;;  %v8895_v51 = vld [vmem:[#allocation25 + $0x408] sm:$0xff] }
 0xa9b   : > { %9315 = vmatpush1.msra.mxu0 %v8792_v53  ;;  %9386 = vmatpush1.msra.mxu1 %v8984_v6  ;;  %v9087_v53 = vld [vmem:[#allocation25 + $0xa08] sm:$0xff]  ;;  %v8894_v6 = vld [vmem:[#allocation25 + $0x400] sm:$0xff] }
 0xa9c   : > { %9316 = vmatprep.subr.mxu0 %v8787_v9  ;;  %9387 = vmatprep.subr.mxu1 %v8979_v10  ;;  %v9086_v9 = vld [vmem:[#allocation25 + $0xa00] sm:$0xff]  ;;  %v8889_v10 = vld [vmem:[#allocation25 + $0x3d8] sm:$0xff] }
 0xa9d   : > { %9317 = vmatpush1.msra.mxu0 %v8786_v13  ;;  %9388 = vmatpush1.msra.mxu1 %v8978_v14  ;;  %v9081_v13 = vld [vmem:[#allocation25 + $0x9d8] sm:$0xff]  ;;  %v8888_v14 = vld [vmem:[#allocation25 + $0x3d0] sm:$0xff] }
 0xa9e   : > { %9318 = vmatprep.subr.mxu0 %v8781_v15  ;;  %9389 = vmatprep.subr.mxu1 %v8973_v35  ;;  %v9080_v15 = vld [vmem:[#allocation25 + $0x9d0] sm:$0xff]  ;;  %v8883_v35 = vld [vmem:[#allocation25 + $0x3a8] sm:$0xff] }
 0xa9f   : > { %9319 = vmatpush1.msra.mxu0 %v8780_v16  ;;  %9390 = vmatpush1.msra.mxu1 %v8972_v17  ;;  %v9075_v16 = vld [vmem:[#allocation25 + $0x9a8] sm:$0xff]  ;;  %v8882_v17 = vld [vmem:[#allocation25 + $0x3a0] sm:$0xff] }
 0xaa0   : > { %9320 = vmatprep.subr.mxu0 %v8775_v18  ;;  %9391 = vmatprep.subr.mxu1 %v8967_v19  ;;  %v9074_v18 = vld [vmem:[#allocation25 + $0x9a0] sm:$0xff]  ;;  %v8877_v19 = vld [vmem:[#allocation25 + $0x378] sm:$0xff] }
 0xaa1   : > { %9321 = vmatpush1.msra.mxu0 %v8774_v20  ;;  %9392 = vmatpush1.msra.mxu1 %v8966_v21  ;;  %v9069_v20 = vld [vmem:[#allocation25 + $0x978] sm:$0xff]  ;;  %v8876_v21 = vld [vmem:[#allocation25 + $0x370] sm:$0xff] }
 0xaa2   : > { %9322 = vmatprep.subr.mxu0 %v8769_v22  ;;  %9393 = vmatprep.subr.mxu1 %v8961_v27  ;;  %v9068_v22 = vld [vmem:[#allocation25 + $0x970] sm:$0xff]  ;;  %v8871_v27 = vld [vmem:[#allocation25 + $0x348] sm:$0xff] }
 0xaa3   : > { %9323 = vmatpush1.msra.mxu0 %v8768_v8  ;;  %9394 = vmatpush1.msra.mxu1 %v8960_v11  ;;  %v9063_v8 = vld [vmem:[#allocation25 + $0x948] sm:$0xff]  ;;  %v8870_v11 = vld [vmem:[#allocation25 + $0x340] sm:$0xff] }
 0xaa4   : > { %9324 = vmatprep.subr.mxu0 %v8955_v57  ;;  %9395 = vmatprep.subr.mxu1 %v9147_v12  ;;  %v9062_v57 = vld [vmem:[#allocation25 + $0x940] sm:$0xff]  ;;  %v8865_v12 = vld [vmem:[#allocation25 + $0x318] sm:$0xff] }
 0xaa5   : > { %9325 = vmatpush2.msra.mxu0 %v8954_v25  ;;  %9396 = vmatpush2.msra.mxu1 %v9146_v29  ;;  %v9057_v25 = vld [vmem:[#allocation25 + $0x918] sm:$0xff]  ;;  %v8864_v29 = vld [vmem:[#allocation25 + $0x310] sm:$0xff] }
 0xaa6   : > { %9326 = vmatprep.subr.mxu0 %v8949_v30  ;;  %9397 = vmatprep.subr.mxu1 %v9141_v31  ;;  %v9056_v30 = vld [vmem:[#allocation25 + $0x910] sm:$0xff]  ;;  %v8861_v31 = vld [vmem:[#allocation25 + $0x2f8] sm:$0xff] }
 0xaa7   : > { %9327 = vmatpush2.msra.mxu0 %v8948_v23  ;;  %9398 = vmatpush2.msra.mxu1 %v9140_v32  ;;  %v9053_v23 = vld [vmem:[#allocation25 + $0x8f8] sm:$0xff]  ;;  %v8860_v32 = vld [vmem:[#allocation25 + $0x2f0] sm:$0xff] }
 0xaa8   : > { %9328 = vmatprep.subr.mxu0 %v8943_v33  ;;  %9399 = vmatprep.subr.mxu1 %v9135_v34  ;;  %v9052_v33 = vld [vmem:[#allocation25 + $0x8f0] sm:$0xff]  ;;  %v8855_v34 = vld [vmem:[#allocation25 + $0x2c8] sm:$0xff] }
 0xaa9   : > { %9329 = vmatpush2.msra.mxu0 %v8942_v36  ;;  %9400 = vmatpush2.msra.mxu1 %v9134_v37  ;;  %v9047_v36 = vld [vmem:[#allocation25 + $0x8c8] sm:$0xff]  ;;  %v8854_v37 = vld [vmem:[#allocation25 + $0x2c0] sm:$0xff] }
 0xaaa   : > { %9330 = vmatprep.subr.mxu0 %v8937_v38  ;;  %9401 = vmatprep.subr.mxu1 %v9129_v39  ;;  %v9046_v38 = vld [vmem:[#allocation25 + $0x8c0] sm:$0xff]  ;;  %v8849_v39 = vld [vmem:[#allocation25 + $0x298] sm:$0xff] }
 0xaab   : > { %9331 = vmatpush2.msra.mxu0 %v8936_v40  ;;  %9402 = vmatpush2.msra.mxu1 %v9128_v41  ;;  %v9041_v40 = vld [vmem:[#allocation25 + $0x898] sm:$0xff]  ;;  %v8848_v41 = vld [vmem:[#allocation25 + $0x290] sm:$0xff] }
 0xaac   : > { %9332 = vmatprep.subr.mxu0 %v8931_v42  ;;  %9403 = vmatprep.subr.mxu1 %v9123_v43  ;;  %v9040_v42 = vld [vmem:[#allocation25 + $0x890] sm:$0xff]  ;;  %v8843_v43 = vld [vmem:[#allocation25 + $0x268] sm:$0xff] }
 0xaad   : > { %9333 = vmatpush2.msra.mxu0 %v8930_v44  ;;  %9404 = vmatpush2.msra.mxu1 %v9122_v45  ;;  %v9035_v44 = vld [vmem:[#allocation25 + $0x868] sm:$0xff]  ;;  %v8842_v45 = vld [vmem:[#allocation25 + $0x260] sm:$0xff] }
 0xaae   : > { %9334 = vmatprep.subr.mxu0 %v8925_v46  ;;  %9405 = vmatprep.subr.mxu1 %v9117_v47  ;;  %v9034_v46 = vld [vmem:[#allocation25 + $0x860] sm:$0xff]  ;;  %v9029_v47 = vld [vmem:[#allocation25 + $0x838] sm:$0xff] }
 0xaaf   : > { %9335 = vmatpush2.msra.mxu0 %v8924_v48  ;;  %9406 = vmatpush2.msra.mxu1 %v9116_v49  ;;  %v9028_v48 = vld [vmem:[#allocation25 + $0x830] sm:$0xff]  ;;  %v8831_v49 = vld [vmem:[#allocation25 + $0x208] sm:$0xff] }
 0xab0   : > { %9336 = vmatprep.subr.mxu0 %v8919_v50  ;;  %9407 = vmatprep.subr.mxu1 %v9111_v52  ;;  %v9023_v50 = vld [vmem:[#allocation25 + $0x808] sm:$0xff]  ;;  %v8830_v52 = vld [vmem:[#allocation25 + $0x200] sm:$0xff] }
 0xab1   : > { %9337 = vmatpush2.msra.mxu0 %v8918_v54  ;;  %9408 = vmatpush2.msra.mxu1 %v9110_v58  ;;  %v9022_v54 = vld [vmem:[#allocation25 + $0x800] sm:$0xff]  ;;  %v8825_v58 = vld [vmem:[#allocation25 + $0x1d8] sm:$0xff] }
 0xab2   : > { %9338 = vmatprep.subr.mxu0 %v8913_v59  ;;  %9409 = vmatprep.subr.mxu1 %v9105_v56  ;;  %v9017_v59 = vld [vmem:[#allocation25 + $0x7d8] sm:$0xff]  ;;  %v8824_v56 = vld [vmem:[#allocation25 + $0x1d0] sm:$0xff] }
 0xab3   : > { %9339 = vmatpush2.msra.mxu0 %v8912_v61  ;;  %9410 = vmatpush2.msra.mxu1 %v9104_v62  ;;  %v9016_v61 = vld [vmem:[#allocation25 + $0x7d0] sm:$0xff]  ;;  %v8819_v62 = vld [vmem:[#allocation25 + $0x1a8] sm:$0xff] }
 0xab4   : > { %9340 = vmatprep.subr.mxu0 %v8907_v1  ;;  %9411 = vmatprep.subr.mxu1 %v9099_v2  ;;  %v9011_v1 = vld [vmem:[#allocation25 + $0x7a8] sm:$0xff]  ;;  %v8818_v2 = vld [vmem:[#allocation25 + $0x1a0] sm:$0xff] }
 0xab5   : > { %9341 = vmatpush2.msra.mxu0 %v8906_v3  ;;  %9412 = vmatpush2.msra.mxu1 %v9098_v60  ;;  %v9010_v3 = vld [vmem:[#allocation25 + $0x7a0] sm:$0xff]  ;;  %v8813_v60 = vld [vmem:[#allocation25 + $0x178] sm:$0xff] }
 0xab6   : > { %9342 = vmatprep.subr.mxu0 %v8901_v4  ;;  %9413 = vmatprep.subr.mxu1 %v9093_v63  ;;  %v9005_v4 = vld [vmem:[#allocation25 + $0x778] sm:$0xff]  ;;  %v8812_v63 = vld [vmem:[#allocation25 + $0x170] sm:$0xff] }
 0xab7   : > { %9343 = vmatpush2.msra.mxu0 %v8900_v55  ;;  %9414 = vmatpush2.msra.mxu1 %v9092_v5  ;;  %v9004_v55 = vld [vmem:[#allocation25 + $0x770] sm:$0xff]  ;;  %v8807_v5 = vld [vmem:[#allocation25 + $0x148] sm:$0xff] }
 0xab8   : > { %9344 = vmatprep.subr.mxu0 %v8895_v51  ;;  %9415 = vmatprep.subr.mxu1 %v9087_v53  ;;  %v8999_v51 = vld [vmem:[#allocation25 + $0x748] sm:$0xff]  ;;  %v8806_v53 = vld [vmem:[#allocation25 + $0x140] sm:$0xff] }
 0xab9   : > { %9345 = vmatpush2.msra.mxu0 %v8894_v6  ;;  %9416 = vmatpush2.msra.mxu1 %v9086_v9  ;;  %v8998_v6 = vld [vmem:[#allocation25 + $0x740] sm:$0xff]  ;;  %v8801_v9 = vld [vmem:[#allocation25 + $0x118] sm:$0xff] }
 0xaba   : > { %9346 = vmatprep.subr.mxu0 %v8889_v10  ;;  %9417 = vmatprep.subr.mxu1 %v9081_v13  ;;  %v8993_v10 = vld [vmem:[#allocation25 + $0x718] sm:$0xff]  ;;  %v8800_v13 = vld [vmem:[#allocation25 + $0x110] sm:$0xff] }
 0xabb   : > { %9347 = vmatpush2.msra.mxu0 %v8888_v14  ;;  %9418 = vmatpush2.msra.mxu1 %v9080_v15  ;;  %v8992_v14 = vld [vmem:[#allocation25 + $0x710] sm:$0xff]  ;;  %v8795_v15 = vld [vmem:[#allocation25 + $0xe8] sm:$0xff] }
 0xabc   : > { %9348 = vmatprep.subr.mxu0 %v8883_v35  ;;  %9419 = vmatprep.subr.mxu1 %v9075_v16  ;;  %v8987_v35 = vld [vmem:[#allocation25 + $0x6e8] sm:$0xff]  ;;  %v8794_v16 = vld [vmem:[#allocation25 + $0xe0] sm:$0xff] }
 0xabd   : > { %9349 = vmatpush2.msra.mxu0 %v8882_v17  ;;  %9420 = vmatpush2.msra.mxu1 %v9074_v18  ;;  %v8986_v17 = vld [vmem:[#allocation25 + $0x6e0] sm:$0xff]  ;;  %v8789_v18 = vld [vmem:[#allocation25 + $0xb8] sm:$0xff] }
 0xabe   : > { %9350 = vmatprep.subr.mxu0 %v8877_v19  ;;  %9421 = vmatprep.subr.mxu1 %v9069_v20  ;;  %v8981_v19 = vld [vmem:[#allocation25 + $0x6b8] sm:$0xff]  ;;  %v8788_v20 = vld [vmem:[#allocation25 + $0xb0] sm:$0xff] }
 0xabf   : > { %9351 = vmatpush2.msra.mxu0 %v8876_v21  ;;  %9422 = vmatpush2.msra.mxu1 %v9068_v22  ;;  %v8980_v21 = vld [vmem:[#allocation25 + $0x6b0] sm:$0xff]  ;;  %v8783_v22 = vld [vmem:[#allocation25 + $0x88] sm:$0xff] }
 0xac0   : > { %9352 = vmatprep.subr.mxu0 %v8871_v27  ;;  %9423 = vmatprep.subr.mxu1 %v9063_v8  ;;  %v8975_v27 = vld [vmem:[#allocation25 + $0x688] sm:$0xff]  ;;  %v8782_v8 = vld [vmem:[#allocation25 + $0x80] sm:$0xff] }
 0xac1   : > { %9353 = vmatpush2.msra.mxu0 %v8870_v11  ;;  %9424 = vmatpush2.msra.mxu1 %v9062_v57  ;;  %v8974_v11 = vld [vmem:[#allocation25 + $0x680] sm:$0xff]  ;;  %v8777_v57 = vld [vmem:[#allocation25 + $0x58] sm:$0xff] }
 0xac2   : > { %9354 = vmatprep.subr.mxu0 %v8865_v12  ;;  %9425 = vmatprep.subr.mxu1 %v9057_v25  ;;  %v8969_v12 = vld [vmem:[#allocation25 + $0x658] sm:$0xff]  ;;  %v8776_v25 = vld [vmem:[#allocation25 + $0x50] sm:$0xff] }
 0xac3   : > { %9355 = vmatpush2.msra.mxu0 %v8864_v29  ;;  %9426 = vmatpush2.msra.mxu1 %v9056_v30  ;;  %v8968_v29 = vld [vmem:[#allocation25 + $0x650] sm:$0xff]  ;;  %v8771_v30 = vld [vmem:[#allocation25 + $0x28] sm:$0xff] }
 0xac4   : > { %9357 = vmatmul.mubr.f32.vlgmr.msra.gmra.mxu0 %v20685_v28  ;;  %9428 = vmatmul.mubr.f32.vlgmr.msra.gmra.mxu1 %v20687_v7 }
 0xac5   : > { %9434 = vmatprep.subr.mxu0 %v8861_v31  ;;  %9505 = vmatprep.subr.mxu1 %v9053_v23  ;;  %v8963_v31 = vld [vmem:[#allocation25 + $0x628] sm:$0xff]  ;;  %v8770_v23 = vld [vmem:[#allocation25 + $0x20] sm:$0xff] }
 0xac6   : > { %9435 = vmatpush1.msra.mxu0 %v8860_v32  ;;  %9498 = vmatprep.mubr.f32.mxu0 %v20681_v24  ;;  %v8837_v24 = vld [vmem:[#allocation25 + $0x238] sm:$0xff]  ;;  %v8962_v32 = vld [vmem:[#allocation25 + $0x620] sm:$0xff] }
 0xac7   : > { %9506 = vmatpush1.msra.mxu1 %v9052_v33  ;;  %9569 = vmatprep.mubr.f32.mxu1 %v20683_v26  ;;  %v8836_v26 = vld [vmem:[#allocation25 + $0x230] sm:$0xff]  ;;  %v8957_v33 = vld [vmem:[#allocation25 + $0x5f8] sm:$0xff] }
 0xac8   : > { %9436 = vmatprep.subr.mxu0 %v8855_v34  ;;  %9507 = vmatprep.subr.mxu1 %v9047_v36  ;;  %v9149_v34 = vld [vmem:[#allocation25 + $0xbf8] sm:$0xff]  ;;  %v8956_v36 = vld [vmem:[#allocation25 + $0x5f0] sm:$0xff] }
 0xac9   : > { %9437 = vmatpush1.msra.mxu0 %v8854_v37  ;;  %9508 = vmatpush1.msra.mxu1 %v9046_v38  ;;  %v9148_v37 = vld [vmem:[#allocation25 + $0xbf0] sm:$0xff]  ;;  %v8951_v38 = vld [vmem:[#allocation25 + $0x5c8] sm:$0xff] }
 0xaca   : > { %9438 = vmatprep.subr.mxu0 %v8849_v39  ;;  %9509 = vmatprep.subr.mxu1 %v9041_v40  ;;  %v9143_v39 = vld [vmem:[#allocation25 + $0xbc8] sm:$0xff]  ;;  %v8950_v40 = vld [vmem:[#allocation25 + $0x5c0] sm:$0xff] }
 0xacb   : > { %9439 = vmatpush1.msra.mxu0 %v8848_v41  ;;  %9510 = vmatpush1.msra.mxu1 %v9040_v42  ;;  %v9142_v41 = vld [vmem:[#allocation25 + $0xbc0] sm:$0xff]  ;;  %v8945_v42 = vld [vmem:[#allocation25 + $0x598] sm:$0xff] }
 0xacc   : > { %9440 = vmatprep.subr.mxu0 %v8843_v43  ;;  %9511 = vmatprep.subr.mxu1 %v9035_v44  ;;  %v9137_v43 = vld [vmem:[#allocation25 + $0xb98] sm:$0xff]  ;;  %v8944_v44 = vld [vmem:[#allocation25 + $0x590] sm:$0xff] }
 0xacd   : > { %9441 = vmatpush1.msra.mxu0 %v8842_v45  ;;  %9512 = vmatpush1.msra.mxu1 %v9034_v46  ;;  %v9136_v45 = vld [vmem:[#allocation25 + $0xb90] sm:$0xff]  ;;  %v8939_v46 = vld [vmem:[#allocation25 + $0x568] sm:$0xff] }
 0xace   : > { %9442 = vmatprep.subr.mxu0 %v8837_v24  ;;  %9513 = vmatprep.subr.mxu1 %v9029_v47  ;;  %v9131_v24 = vld [vmem:[#allocation25 + $0xb68] sm:$0xff]  ;;  %v8938_v47 = vld [vmem:[#allocation25 + $0x560] sm:$0xff] }
 0xacf   : > { %9443 = vmatpush1.msra.mxu0 %v8836_v26  ;;  %9514 = vmatpush1.msra.mxu1 %v9028_v48  ;;  %v9130_v26 = vld [vmem:[#allocation25 + $0xb60] sm:$0xff]  ;;  %v8933_v48 = vld [vmem:[#allocation25 + $0x538] sm:$0xff] }
 0xad0   : > { %9444 = vmatprep.subr.mxu0 %v8831_v49  ;;  %9515 = vmatprep.subr.mxu1 %v9023_v50  ;;  %v9125_v49 = vld [vmem:[#allocation25 + $0xb38] sm:$0xff]  ;;  %v8932_v50 = vld [vmem:[#allocation25 + $0x530] sm:$0xff] }
 0xad1   : > { %9445 = vmatpush1.msra.mxu0 %v8830_v52  ;;  %9516 = vmatpush1.msra.mxu1 %v9022_v54  ;;  %v9124_v52 = vld [vmem:[#allocation25 + $0xb30] sm:$0xff]  ;;  %v8927_v54 = vld [vmem:[#allocation25 + $0x508] sm:$0xff] }
 0xad2   : > { %9446 = vmatprep.subr.mxu0 %v8825_v58  ;;  %9517 = vmatprep.subr.mxu1 %v9017_v59  ;;  %v9119_v58 = vld [vmem:[#allocation25 + $0xb08] sm:$0xff]  ;;  %v8926_v59 = vld [vmem:[#allocation25 + $0x500] sm:$0xff] }
 0xad3   : > { %9447 = vmatpush1.msra.mxu0 %v8824_v56  ;;  %9518 = vmatpush1.msra.mxu1 %v9016_v61  ;;  %v9118_v56 = vld [vmem:[#allocation25 + $0xb00] sm:$0xff]  ;;  %v8921_v61 = vld [vmem:[#allocation25 + $0x4d8] sm:$0xff] }
 0xad4   : > { %9448 = vmatprep.subr.mxu0 %v8819_v62  ;;  %9519 = vmatprep.subr.mxu1 %v9011_v1  ;;  %v9113_v62 = vld [vmem:[#allocation25 + $0xad8] sm:$0xff]  ;;  %v8920_v1 = vld [vmem:[#allocation25 + $0x4d0] sm:$0xff] }
 0xad5   : > { %9449 = vmatpush1.msra.mxu0 %v8818_v2  ;;  %9520 = vmatpush1.msra.mxu1 %v9010_v3  ;;  %v9112_v2 = vld [vmem:[#allocation25 + $0xad0] sm:$0xff]  ;;  %v8915_v3 = vld [vmem:[#allocation25 + $0x4a8] sm:$0xff] }
 0xad6   : > { %9450 = vmatprep.subr.mxu0 %v8813_v60  ;;  %9521 = vmatprep.subr.mxu1 %v9005_v4  ;;  %v9107_v60 = vld [vmem:[#allocation25 + $0xaa8] sm:$0xff]  ;;  %v8914_v4 = vld [vmem:[#allocation25 + $0x4a0] sm:$0xff] }
 0xad7   : > { %9451 = vmatpush1.msra.mxu0 %v8812_v63  ;;  %9522 = vmatpush1.msra.mxu1 %v9004_v55  ;;  %v9106_v63 = vld [vmem:[#allocation25 + $0xaa0] sm:$0xff]  ;;  %v8909_v55 = vld [vmem:[#allocation25 + $0x478] sm:$0xff] }
 0xad8   : > { %9452 = vmatprep.subr.mxu0 %v8807_v5  ;;  %9523 = vmatprep.subr.mxu1 %v8999_v51  ;;  %v9101_v5 = vld [vmem:[#allocation25 + $0xa78] sm:$0xff]  ;;  %v8908_v51 = vld [vmem:[#allocation25 + $0x470] sm:$0xff] }
 0xad9   : > { %9453 = vmatpush1.msra.mxu0 %v8806_v53  ;;  %9524 = vmatpush1.msra.mxu1 %v8998_v6  ;;  %v9100_v53 = vld [vmem:[#allocation25 + $0xa70] sm:$0xff]  ;;  %v8903_v6 = vld [vmem:[#allocation25 + $0x448] sm:$0xff] }
 0xada   : > { %9454 = vmatprep.subr.mxu0 %v8801_v9  ;;  %9525 = vmatprep.subr.mxu1 %v8993_v10  ;;  %v9095_v9 = vld [vmem:[#allocation25 + $0xa48] sm:$0xff]  ;;  %v8902_v10 = vld [vmem:[#allocation25 + $0x440] sm:$0xff] }
 0xadb   : > { %9455 = vmatpush1.msra.mxu0 %v8800_v13  ;;  %9526 = vmatpush1.msra.mxu1 %v8992_v14  ;;  %v9094_v13 = vld [vmem:[#allocation25 + $0xa40] sm:$0xff]  ;;  %v8897_v14 = vld [vmem:[#allocation25 + $0x418] sm:$0xff] }
 0xadc   : > { %9456 = vmatprep.subr.mxu0 %v8795_v15  ;;  %9527 = vmatprep.subr.mxu1 %v8987_v35  ;;  %v9089_v15 = vld [vmem:[#allocation25 + $0xa18] sm:$0xff]  ;;  %v8896_v35 = vld [vmem:[#allocation25 + $0x410] sm:$0xff] }
 0xadd   : > { %9457 = vmatpush1.msra.mxu0 %v8794_v16  ;;  %9528 = vmatpush1.msra.mxu1 %v8986_v17  ;;  %v9088_v16 = vld [vmem:[#allocation25 + $0xa10] sm:$0xff]  ;;  %v8891_v17 = vld [vmem:[#allocation25 + $0x3e8] sm:$0xff] }
 0xade   : > { %9458 = vmatprep.subr.mxu0 %v8789_v18  ;;  %9529 = vmatprep.subr.mxu1 %v8981_v19  ;;  %v9083_v18 = vld [vmem:[#allocation25 + $0x9e8] sm:$0xff]  ;;  %v8890_v19 = vld [vmem:[#allocation25 + $0x3e0] sm:$0xff] }
 0xadf   : > { %9459 = vmatpush1.msra.mxu0 %v8788_v20  ;;  %9530 = vmatpush1.msra.mxu1 %v8980_v21  ;;  %v9082_v20 = vld [vmem:[#allocation25 + $0x9e0] sm:$0xff]  ;;  %v8885_v21 = vld [vmem:[#allocation25 + $0x3b8] sm:$0xff] }
 0xae0   : > { %9460 = vmatprep.subr.mxu0 %v8783_v22  ;;  %9531 = vmatprep.subr.mxu1 %v8975_v27  ;;  %v9077_v22 = vld [vmem:[#allocation25 + $0x9b8] sm:$0xff]  ;;  %v8884_v27 = vld [vmem:[#allocation25 + $0x3b0] sm:$0xff] }
 0xae1   : > { %9461 = vmatpush1.msra.mxu0 %v8782_v8  ;;  %9532 = vmatpush1.msra.mxu1 %v8974_v11  ;;  %v9076_v8 = vld [vmem:[#allocation25 + $0x9b0] sm:$0xff]  ;;  %v8879_v11 = vld [vmem:[#allocation25 + $0x388] sm:$0xff] }
 0xae2   : > { %9462 = vmatprep.subr.mxu0 %v8777_v57  ;;  %9533 = vmatprep.subr.mxu1 %v8969_v12  ;;  %v9071_v57 = vld [vmem:[#allocation25 + $0x988] sm:$0xff]  ;;  %v8878_v12 = vld [vmem:[#allocation25 + $0x380] sm:$0xff] }
 0xae3   : > { %9463 = vmatpush1.msra.mxu0 %v8776_v25  ;;  %9534 = vmatpush1.msra.mxu1 %v8968_v29  ;;  %v9070_v25 = vld [vmem:[#allocation25 + $0x980] sm:$0xff]  ;;  %v8873_v29 = vld [vmem:[#allocation25 + $0x358] sm:$0xff] }
 0xae4   : > { %9464 = vmatprep.subr.mxu0 %v8771_v30  ;;  %9535 = vmatprep.subr.mxu1 %v8963_v31  ;;  %v9065_v30 = vld [vmem:[#allocation25 + $0x958] sm:$0xff]  ;;  %v8872_v31 = vld [vmem:[#allocation25 + $0x350] sm:$0xff] }
 0xae5   : > { %9465 = vmatpush1.msra.mxu0 %v8770_v23  ;;  %9536 = vmatpush1.msra.mxu1 %v8962_v32  ;;  %v9064_v23 = vld [vmem:[#allocation25 + $0x950] sm:$0xff]  ;;  %v8867_v32 = vld [vmem:[#allocation25 + $0x328] sm:$0xff] }
 0xae6   : > { %9466 = vmatprep.subr.mxu0 %v8957_v33  ;;  %9537 = vmatprep.subr.mxu1 %v9149_v34  ;;  %v9059_v33 = vld [vmem:[#allocation25 + $0x928] sm:$0xff]  ;;  %v8866_v34 = vld [vmem:[#allocation25 + $0x320] sm:$0xff] }
 0xae7   : > { %9467 = vmatpush2.msra.mxu0 %v8956_v36  ;;  %9538 = vmatpush2.msra.mxu1 %v9148_v37  ;;  %v9058_v36 = vld [vmem:[#allocation25 + $0x920] sm:$0xff] }
 0xae8   : > { %9468 = vmatprep.subr.mxu0 %v8951_v38  ;;  %9539 = vmatprep.subr.mxu1 %v9143_v39 }
 0xae9   : > { %9469 = vmatpush2.msra.mxu0 %v8950_v40  ;;  %9540 = vmatpush2.msra.mxu1 %v9142_v41  ;;  %v9576_v40 = vld [vmem:[%s21703_s13] sm:$0x3f] }
 0xaea   : > { %9470 = vmatprep.subr.mxu0 %v8945_v42  ;;  %9541 = vmatprep.subr.mxu1 %v9137_v43 }
 0xaeb   : > { %9471 = vmatpush2.msra.mxu0 %v8944_v44  ;;  %9542 = vmatpush2.msra.mxu1 %v9136_v45 }
 0xaec   : > { %9472 = vmatprep.subr.mxu0 %v8939_v46  ;;  %9543 = vmatprep.subr.mxu1 %v9131_v24  ;;  %v16361_v46 = vld [vmem:[%s21703_s13 + $0x10] sm:$0x3f] }
 0xaed   : > { %9473 = vmatpush2.msra.mxu0 %v8938_v47  ;;  %9544 = vmatpush2.msra.mxu1 %v9130_v26 }
 0xaee   : > { %9474 = vmatprep.subr.mxu0 %v8933_v48  ;;  %9545 = vmatprep.subr.mxu1 %v9125_v49  ;;  %v16364_v48 = vld [vmem:[%s21703_s13 + $0x18] sm:$0x3f] }
 0xaef   : > { %9475 = vmatpush2.msra.mxu0 %v8932_v50  ;;  %9546 = vmatpush2.msra.mxu1 %v9124_v52 }
 0xaf0   : > { %9476 = vmatprep.subr.mxu0 %v8927_v54  ;;  %9547 = vmatprep.subr.mxu1 %v9119_v58  ;;  %v16367_v54 = vld [vmem:[%s21703_s13 + $0x20] sm:$0x3f]  ;;  %v10135_v58 = vld [vmem:[#allocation28 + $0x2a8] sm:$0xff] }
 0xaf1   : > { %9477 = vmatpush2.msra.mxu0 %v8926_v59  ;;  %9548 = vmatpush2.msra.mxu1 %v9118_v56 }
 0xaf2   : > { %9478 = vmatprep.subr.mxu0 %v8921_v61  ;;  %9549 = vmatprep.subr.mxu1 %v9113_v62  ;;  %v10134_v61 = vld [vmem:[#allocation28 + $0x2a0] sm:$0xff] }
 0xaf3   : > { %9479 = vmatpush2.msra.mxu0 %v8920_v1  ;;  %9550 = vmatpush2.msra.mxu1 %v9112_v2  ;;  %v16370_v1 = vld [vmem:[%s21703_s13 + $0x28] sm:$0x3f]  ;;  %v10137_v2 = vld [vmem:[#allocation28 + $0x2b8] sm:$0xff] }
 0xaf4   : > { %9480 = vmatprep.subr.mxu0 %v8915_v3  ;;  %9551 = vmatprep.subr.mxu1 %v9107_v60  ;;  %v10136_v3 = vld [vmem:[#allocation28 + $0x2b0] sm:$0xff]  ;;  %v10123_v60 = vld [vmem:[#allocation28 + $0x248] sm:$0xff] }
 0xaf5   : > { %9481 = vmatpush2.msra.mxu0 %v8914_v4  ;;  %9552 = vmatpush2.msra.mxu1 %v9106_v63  ;;  %v10125_v4 = vld [vmem:[#allocation28 + $0x258] sm:$0xff]  ;;  %v10122_v63 = vld [vmem:[#allocation28 + $0x240] sm:$0xff] }
 0xaf6   : > { %9482 = vmatprep.subr.mxu0 %v8909_v55  ;;  %9553 = vmatprep.subr.mxu1 %v9101_v5  ;;  %v10124_v55 = vld [vmem:[#allocation28 + $0x250] sm:$0xff]  ;;  %v10111_v5 = vld [vmem:[#allocation28 + $0x1e8] sm:$0xff] }
 0xaf7   : > { %9483 = vmatpush2.msra.mxu0 %v8908_v51  ;;  %9554 = vmatpush2.msra.mxu1 %v9100_v53  ;;  %v10113_v51 = vld [vmem:[#allocation28 + $0x1f8] sm:$0xff]  ;;  %v10110_v53 = vld [vmem:[#allocation28 + $0x1e0] sm:$0xff] }
 0xaf8   : > { %9484 = vmatprep.subr.mxu0 %v8903_v6  ;;  %9555 = vmatprep.subr.mxu1 %v9095_v9  ;;  %v10112_v6 = vld [vmem:[#allocation28 + $0x1f0] sm:$0xff]  ;;  %v10099_v9 = vld [vmem:[#allocation28 + $0x188] sm:$0xff] }
 0xaf9   : > { %9485 = vmatpush2.msra.mxu0 %v8902_v10  ;;  %9556 = vmatpush2.msra.mxu1 %v9094_v13  ;;  %v10101_v10 = vld [vmem:[#allocation28 + $0x198] sm:$0xff]  ;;  %v10098_v13 = vld [vmem:[#allocation28 + $0x180] sm:$0xff] }
 0xafa   : > { %9486 = vmatprep.subr.mxu0 %v8897_v14  ;;  %9557 = vmatprep.subr.mxu1 %v9089_v15  ;;  %v10100_v14 = vld [vmem:[#allocation28 + $0x190] sm:$0xff]  ;;  %v10087_v15 = vld [vmem:[#allocation28 + $0x128] sm:$0xff] }
 0xafb   : > { %9487 = vmatpush2.msra.mxu0 %v8896_v35  ;;  %9558 = vmatpush2.msra.mxu1 %v9088_v16  ;;  %v10089_v35 = vld [vmem:[#allocation28 + $0x138] sm:$0xff]  ;;  %v10086_v16 = vld [vmem:[#allocation28 + $0x120] sm:$0xff] }
 0xafc   : > { %9488 = vmatprep.subr.mxu0 %v8891_v17  ;;  %9559 = vmatprep.subr.mxu1 %v9083_v18  ;;  %v10088_v17 = vld [vmem:[#allocation28 + $0x130] sm:$0xff] }
 0xafd   : > { %9489 = vmatpush2.msra.mxu0 %v8890_v19  ;;  %9560 = vmatpush2.msra.mxu1 %v9082_v20 }
 0xafe   : > { %9490 = vmatprep.subr.mxu0 %v8885_v21  ;;  %9561 = vmatprep.subr.mxu1 %v9077_v22  ;;  %v10075_v21 = vld [vmem:[#allocation28 + $0xc8] sm:$0xff]  ;;  %v10077_v22 = vld [vmem:[#allocation28 + $0xd8] sm:$0xff] }
 0xaff   : > { %9491 = vmatpush2.msra.mxu0 %v8884_v27  ;;  %9562 = vmatpush2.msra.mxu1 %v9076_v8  ;;  %v10074_v8 = vld [vmem:[#allocation28 + $0xc0] sm:$0xff] }
 0xb00   : > { %9492 = vmatprep.subr.mxu0 %v8879_v11  ;;  %9563 = vmatprep.subr.mxu1 %v9071_v57  ;;  %v10076_v11 = vld [vmem:[#allocation28 + $0xd0] sm:$0xff] }
 0xb01   : > { %9493 = vmatpush2.msra.mxu0 %v8878_v12  ;;  %9564 = vmatpush2.msra.mxu1 %v9070_v25  ;;  %v10063_v12 = vld [vmem:[#allocation28 + $0x68] sm:$0xff]  ;;  %v10065_v25 = vld [vmem:[#allocation28 + $0x78] sm:$0xff] }
 0xb02   : > { %9494 = vmatprep.subr.mxu0 %v8873_v29  ;;  %9565 = vmatprep.subr.mxu1 %v9065_v30  ;;  %v10062_v29 = vld [vmem:[#allocation28 + $0x60] sm:$0xff]  ;;  %v10064_v30 = vld [vmem:[#allocation28 + $0x70] sm:$0xff] }
 0xb03   : > { %9495 = vmatpush2.msra.mxu0 %v8872_v31  ;;  %9566 = vmatpush2.msra.mxu1 %v9064_v23  ;;  %v10051_v31 = vld [vmem:[#allocation28 + $0x8] sm:$0xff]  ;;  %v10053_v23 = vld [vmem:[#allocation28 + $0x18] sm:$0xff] }
 0xb04   : > { %9496 = vmatprep.subr.mxu0 %v8867_v32  ;;  %9567 = vmatprep.subr.mxu1 %v9059_v33  ;;  %v10050_v32 = vld [vmem:[#allocation28] sm:$0xff]  ;;  %v10052_v33 = vld [vmem:[#allocation28 + $0x10] sm:$0xff] }
 0xb05   : > { %9497 = vmatpush2.msra.mxu0 %v8866_v34  ;;  %9568 = vmatpush2.msra.mxu1 %v9058_v36  ;;  %v10139_v34 = vld [vmem:[#allocation28 + $0x2c8] sm:$0xff]  ;;  %v10141_v36 = vld [vmem:[#allocation28 + $0x2d8] sm:$0xff] }
 0xb06   : > { %9499 = vmatmul.mubr.f32.vlgmr.msra.gmra.mxu0 %v20685_v28  ;;  %9570 = vmatmul.mubr.f32.vlgmr.msra.gmra.mxu1 %v20687_v7  ;;  %v16356_v7 = vld [vmem:[%s21703_s13 + $0x8] sm:$0x3f] }
 0xb07   : > { %17778 = vmatprep.subr.mxu1 %v19290_v0  ;;  %17773 = vmatprep.subr.mxu0 %v19290_v0 }
 0xb08   : > { %17775 = vmatprep.mubr.msk.f32.mxu0 %vm19291_vm6, %v19290_v0  ;;  %17780 = vmatprep.mubr.msk.f32.mxu1 %vm19291_vm6, %v19290_v0 }
 0xb43   : > { %v9216_v37 = vpop.f32.mrf.mxu0  ;;  %v9287_v38 = vpop.f32.mrf.mxu1 }
 0xb44   : > { %v9288_v39 = vadd.f32 %v9287_v38, %v9216_v37 }
 0xb45   : > { %v9218_v41 = vpop.f32.mrf.mxu0  ;;  %v9289_v42 = vpop.f32.mrf.mxu1 }
 0xb46   : > { %v9290_v28 = vadd.f32 %v9289_v42, %v9218_v41  ;;  %17779 = vmatpush3.msk.msra.mxu1 %vm3749_vm4, %v9288_v39 }
 0xb47   : > { %17788 = vmatprep.subr.mxu1 %v19290_v0  ;;  %17781 = vmatmul.mubr.msk.f32.vlgmr.msra.gmra.mxu1 %vm9579_vm12, %v9576_v40 }
 0xb48   : > { %17774 = vmatpush3.msk.msra.mxu0 %vm3749_vm4, %v9290_v28  ;;  %17790 = vmatprep.mubr.msk.f32.mxu1 %vm19291_vm6, %v19290_v0 }
 0xb49   : > { %17783 = vmatprep.subr.mxu0 %v19290_v0  ;;  %17776 = vmatmul.mubr.msk.f32.vlgmr.msra.gmra.mxu0 %vm9579_vm12, %v16356_v7 }
 0xb4a   : > { %17785 = vmatprep.mubr.msk.f32.mxu0 %vm19291_vm6, %v19290_v0 }
 0xb84   : > { %v9358_v43 = vpop.f32.mrf.mxu0  ;;  %v9429_v44 = vpop.f32.mrf.mxu1 }
 0xb85   : > { %v9430_v45 = vadd.f32 %v9429_v44, %v9358_v43  ;;  %v10048_v44 = vld [vmem:[#allocation27] sm:$0x3f] }
 0xb86   : > { %v9360_v24 = vpop.f32.mrf.mxu0  ;;  %v9431_v47 = vpop.f32.mrf.mxu1 }
 0xb87   : > { %v9432_v26 = vadd.f32 %v9431_v47, %v9360_v24  ;;  %17784 = vmatpush3.msk.msra.mxu0 %vm3749_vm4, %v9430_v45 }
 0xb88   : > { %17786 = vmatmul.mubr.msk.f32.vlgmr.msra.gmra.mxu0 %vm9579_vm12, %v16361_v46  ;;  %17793 = vmatprep.subr.mxu0 %v19290_v0 }
 0xb89   : > { %17789 = vmatpush3.msk.msra.mxu1 %vm3749_vm4, %v9432_v26  ;;  %17795 = vmatprep.mubr.msk.f32.mxu0 %vm19291_vm6, %v19290_v0  ;;  %v10138_v26 = vld [vmem:[#allocation28 + $0x2c0] sm:$0xff] }
 0xb8a   : > { %17791 = vmatmul.mubr.msk.f32.vlgmr.msra.gmra.mxu1 %vm9579_vm12, %v16364_v48  ;;  %17798 = vmatprep.subr.mxu1 %v19290_v0  ;;  %v10140_v48 = vld [vmem:[#allocation28 + $0x2d0] sm:$0xff] }
 0xb8b   : > { %17800 = vmatprep.mubr.msk.f32.mxu1 %vm19291_vm6, %v19290_v0 }
 0xbc6   : > { %v9500_v49 = vpop.f32.mrf.mxu0  ;;  %v9571_v50 = vpop.f32.mrf.mxu1 }
 0xbc7   : > { %v9572_v52 = vadd.f32 %v9571_v50, %v9500_v49  ;;  %v10127_v49 = vld [vmem:[#allocation28 + $0x268] sm:$0xff]  ;;  %v10129_v50 = vld [vmem:[#allocation28 + $0x278] sm:$0xff] }
 0xbc8   : > { %v9502_v59 = vpop.f32.mrf.mxu0  ;;  %v9573_v56 = vpop.f32.mrf.mxu1 }
 0xbc9   : > { %v9574_v62 = vadd.f32 %v9573_v56, %v9502_v59  ;;  %17794 = vmatpush3.msk.msra.mxu0 %vm3749_vm4, %v9572_v52  ;;  %v10126_v52 = vld [vmem:[#allocation28 + $0x260] sm:$0xff]  ;;  %v10117_v59 = vld [vmem:[#allocation28 + $0x218] sm:$0xff] }
 0xbca   : > { %17796 = vmatmul.mubr.msk.f32.vlgmr.msra.gmra.mxu0 %vm9579_vm12, %v16367_v54  ;;  %10165 = vmatprep.subr.mxu0 %v10135_v58  ;;  %v10128_v54 = vld [vmem:[#allocation28 + $0x270] sm:$0xff]  ;;  %v10115_v58 = vld [vmem:[#allocation28 + $0x208] sm:$0xff]  ;;  %v10114_v56 = vld [vmem:[#allocation28 + $0x200] sm:$0xff] }
 0xbcb   : > { %17799 = vmatpush3.msk.msra.mxu1 %vm3749_vm4, %v9574_v62  ;;  %10166 = vmatpush1.msra.mxu0 %v10134_v61  ;;  %v10116_v61 = vld [vmem:[#allocation28 + $0x210] sm:$0xff]  ;;  %v10103_v62 = vld [vmem:[#allocation28 + $0x1a8] sm:$0xff] }
 0xbcc   : > { %17801 = vmatmul.mubr.msk.f32.vlgmr.msra.gmra.mxu1 %vm9579_vm12, %v16370_v1  ;;  %10236 = vmatprep.subr.mxu1 %v10137_v2  ;;  %v10105_v1 = vld [vmem:[#allocation28 + $0x1b8] sm:$0xff]  ;;  %v10102_v2 = vld [vmem:[#allocation28 + $0x1a0] sm:$0xff] }
 0xbcd   : > { %10237 = vmatpush1.msra.mxu1 %v10136_v3  ;;  %10167 = vmatprep.subr.mxu0 %v10123_v60  ;;  %v10104_v3 = vld [vmem:[#allocation28 + $0x1b0] sm:$0xff]  ;;  %v10091_v60 = vld [vmem:[#allocation28 + $0x148] sm:$0xff] }
 0xbce   : > { %10238 = vmatprep.subr.mxu1 %v10125_v4  ;;  %10168 = vmatpush1.msra.mxu0 %v10122_v63  ;;  %v10093_v4 = vld [vmem:[#allocation28 + $0x158] sm:$0xff]  ;;  %v10090_v63 = vld [vmem:[#allocation28 + $0x140] sm:$0xff] }
 0xbcf   : > { %10239 = vmatpush1.msra.mxu1 %v10124_v55  ;;  %10169 = vmatprep.subr.mxu0 %v10111_v5  ;;  %v10092_v55 = vld [vmem:[#allocation28 + $0x150] sm:$0xff]  ;;  %v10079_v5 = vld [vmem:[#allocation28 + $0xe8] sm:$0xff] }
 0xbd0   : > { %10240 = vmatprep.subr.mxu1 %v10113_v51  ;;  %10170 = vmatpush1.msra.mxu0 %v10110_v53  ;;  %v10081_v51 = vld [vmem:[#allocation28 + $0xf8] sm:$0xff]  ;;  %v10078_v53 = vld [vmem:[#allocation28 + $0xe0] sm:$0xff] }
 0xbd1   : > { %10241 = vmatpush1.msra.mxu1 %v10112_v6  ;;  %10171 = vmatprep.subr.mxu0 %v10099_v9  ;;  %v10080_v6 = vld [vmem:[#allocation28 + $0xf0] sm:$0xff]  ;;  %v10067_v9 = vld [vmem:[#allocation28 + $0x88] sm:$0xff] }
 0xbd2   : > { %10242 = vmatprep.subr.mxu1 %v10101_v10  ;;  %10172 = vmatpush1.msra.mxu0 %v10098_v13  ;;  %v10069_v10 = vld [vmem:[#allocation28 + $0x98] sm:$0xff]  ;;  %v10066_v13 = vld [vmem:[#allocation28 + $0x80] sm:$0xff] }
 0xbd3   : > { %10243 = vmatpush1.msra.mxu1 %v10100_v14  ;;  %10173 = vmatprep.subr.mxu0 %v10087_v15  ;;  %v10068_v14 = vld [vmem:[#allocation28 + $0x90] sm:$0xff]  ;;  %v10055_v15 = vld [vmem:[#allocation28 + $0x28] sm:$0xff] }
 0xbd4   : > { %10244 = vmatprep.subr.mxu1 %v10089_v35  ;;  %10174 = vmatpush1.msra.mxu0 %v10086_v16  ;;  %v10057_v35 = vld [vmem:[#allocation28 + $0x38] sm:$0xff]  ;;  %v10054_v16 = vld [vmem:[#allocation28 + $0x20] sm:$0xff] }
 0xbd5   : > { %10245 = vmatpush1.msra.mxu1 %v10088_v17  ;;  %10213 = vmatprep.mubr.f32.mxu0 %v19290_v0  ;;  %v10056_v17 = vld [vmem:[#allocation28 + $0x30] sm:$0xff] }
 0xbd6   : > { %10284 = vmatprep.mubr.f32.mxu1 %v19290_v0  ;;  %10175 = vmatprep.subr.mxu0 %v10075_v21  ;;  %v10144_v21 = vld [vmem:[#allocation28 + $0x2f0] sm:$0xff] }
 0xbd7   : > { %10246 = vmatprep.subr.mxu1 %v10077_v22  ;;  %10176 = vmatpush1.msra.mxu0 %v10074_v8  ;;  %v10131_v22 = vld [vmem:[#allocation28 + $0x288] sm:$0xff]  ;;  %v10130_v8 = vld [vmem:[#allocation28 + $0x280] sm:$0xff] }
 0xbd8   : > { %10247 = vmatpush1.msra.mxu1 %v10076_v11  ;;  %10177 = vmatprep.subr.mxu0 %v10063_v12  ;;  %v10132_v11 = vld [vmem:[#allocation28 + $0x290] sm:$0xff]  ;;  %v10121_v12 = vld [vmem:[#allocation28 + $0x238] sm:$0xff] }
 0xbd9   : > { %10248 = vmatprep.subr.mxu1 %v10065_v25  ;;  %10178 = vmatpush1.msra.mxu0 %v10062_v29  ;;  %v10118_v25 = vld [vmem:[#allocation28 + $0x220] sm:$0xff]  ;;  %v10120_v29 = vld [vmem:[#allocation28 + $0x230] sm:$0xff] }
 0xbda   : > { %10249 = vmatpush1.msra.mxu1 %v10064_v30  ;;  %10179 = vmatprep.subr.mxu0 %v10051_v31  ;;  %v10107_v30 = vld [vmem:[#allocation28 + $0x1c8] sm:$0xff]  ;;  %v10109_v31 = vld [vmem:[#allocation28 + $0x1d8] sm:$0xff] }
 0xbdb   : > { %10250 = vmatprep.subr.mxu1 %v10053_v23  ;;  %10180 = vmatpush1.msra.mxu0 %v10050_v32  ;;  %v10106_v23 = vld [vmem:[#allocation28 + $0x1c0] sm:$0xff]  ;;  %v10108_v32 = vld [vmem:[#allocation28 + $0x1d0] sm:$0xff] }
 0xbdc   : > { %10251 = vmatpush1.msra.mxu1 %v10052_v33  ;;  %10307 = vmatprep.subr.mxu0 %v10139_v34  ;;  %v10095_v33 = vld [vmem:[#allocation28 + $0x168] sm:$0xff]  ;;  %v10097_v34 = vld [vmem:[#allocation28 + $0x178] sm:$0xff] }
 0xbdd   : > { %10378 = vmatprep.subr.mxu1 %v10141_v36  ;;  %v10094_v36 = vld [vmem:[#allocation28 + $0x160] sm:$0xff] }
 0xc07   : > { %v9728_v18 = vpop.f32.mrf.mxu1 }
 0xc09   : > { %v9652_v19 = vpop.f32.mrf.mxu0  ;;  %v17782_v20 = vpop.f32.mrf.mxu1 }
 0xc0a   : > { %v9729_v27 = vadd.f32 %v9728_v18, %v9652_v19  ;;  %v10143_v18 = vld [vmem:[#allocation28 + $0x2e8] sm:$0xff]  ;;  %v10145_v19 = vld [vmem:[#allocation28 + $0x2f8] sm:$0xff]  ;;  %v10142_v20 = vld [vmem:[#allocation28 + $0x2e0] sm:$0xff] }
 0xc0b   : > { %v17777_v57 = vpop.f32.mrf.mxu0 }
 0xc0c   : > { %v10119_v57 = vld [vmem:[#allocation28 + $0x228] sm:$0xff] }
 0xc48   : > { %v9806_v37 = vpop.f32.mrf.mxu0 }
 0xc49   : > { %v9810_v41 = vadd.f32 %v9806_v37, %v9729_v27  ;;  %v10133_v27 = vld [vmem:[#allocation28 + $0x298] sm:$0xff]  ;;  %v10096_v37 = vld [vmem:[#allocation28 + $0x170] sm:$0xff] }
 0xc4a   : > { %v17787_v38 = vpop.f32.mrf.mxu0  ;;  %v9885_v39 = vpop.f32.mrf.mxu1 }
 0xc4b   : > { %v9889_v42 = vadd.f32 %v9885_v39, %v9810_v41  ;;  %v10083_v38 = vld [vmem:[#allocation28 + $0x108] sm:$0xff]  ;;  %v10085_v39 = vld [vmem:[#allocation28 + $0x118] sm:$0xff]  ;;  %v10084_v41 = vld [vmem:[#allocation28 + $0x110] sm:$0xff] }
 0xc4c   : > { %v17792_v40 = vpop.f32.mrf.mxu1 }
 0xc4d   : > { %v10082_v40 = vld [vmem:[#allocation28 + $0x100] sm:$0xff] }
 0xc8a   : > { %v9964_v28 = vpop.f32.mrf.mxu0 }
 0xc8b   : > { %v9968_v7 = vadd.f32 %v9964_v28, %v9889_v42  ;;  %v10071_v42 = vld [vmem:[#allocation28 + $0xa8] sm:$0xff]  ;;  %v10073_v28 = vld [vmem:[#allocation28 + $0xb8] sm:$0xff] }
 0xc8c   : > { %v10043_v43 = vpop.f32.mrf.mxu1  ;;  %v17797_v45 = vpop.f32.mrf.mxu0 }
 0xc8d   : > { %v10047_v46 = vadd.f32 %v10043_v43, %v9968_v7  ;;  %v10070_v7 = vld [vmem:[#allocation28 + $0xa0] sm:$0xff]  ;;  %v10072_v43 = vld [vmem:[#allocation28 + $0xb0] sm:$0xff]  ;;  %v10061_v45 = vld [vmem:[#allocation28 + $0x58] sm:$0xff] }
 0xc8e   : > { %v17802_v24 = vpop.f32.mrf.mxu1 }
 0xc8f   : > { %v20739_v47 = vadd.f32 %v10048_v44, %v10047_v46  ;;  %v10059_v44 = vld [vmem:[#allocation28 + $0x48] sm:$0xff]  ;;  %v10058_v46 = vld [vmem:[#allocation28 + $0x40] sm:$0xff]  ;;  %v10060_v24 = vld [vmem:[#allocation28 + $0x50] sm:$0xff] }
 0xc91   : > { %16373 = vmatmul.mubr.msk.f32.vlgmr.msra.gmra.mxu0 %vm4909_vm5, %v20739_v47  ;;  %16374 = vmatmul.mubr.msk.f32.vlgmr.msra.gmra.mxu1 %vm4909_vm5, %v20739_v47 }
 0xc92   : > { %10308 = vmatpush1.msra.mxu0 %v10138_v26  ;;  %10379 = vmatpush1.msra.mxu1 %v10140_v48  ;;  %v10575_v26 = vld [vmem:[%s21704_s6] sm:$0xff]  ;;  %v16379_v48 = vld [vmem:[%s21704_s6 + $0x10] sm:$0xff] }
 0xc93   : > { %10309 = vmatprep.subr.mxu0 %v10127_v49  ;;  %10380 = vmatprep.subr.mxu1 %v10129_v50 }
 0xc94   : > { %10310 = vmatpush1.msra.mxu0 %v10126_v52  ;;  %10381 = vmatpush1.msra.mxu1 %v10128_v54  ;;  %v10576_v52 = vld [vmem:[%s21704_s6 + $0x8] sm:$0x1f] }
 0xc95   : > { %10311 = vmatprep.subr.mxu0 %v10115_v58  ;;  %10382 = vmatprep.subr.mxu1 %v10117_v59  ;;  %v16392_v59 = vld [vmem:[%s21704_s6 + $0x30] sm:$0xff] }
 0xc96   : > { %10312 = vmatpush1.msra.mxu0 %v10114_v56  ;;  %10383 = vmatpush1.msra.mxu1 %v10116_v61  ;;  %v16387_v56 = vld [vmem:[%s21704_s6 + $0x20] sm:$0xff]  ;;  %v16393_v61 = vld [vmem:[%s21704_s6 + $0x38] sm:$0x1f] }
 0xc97   : > { %10313 = vmatprep.subr.mxu0 %v10103_v62  ;;  %10384 = vmatprep.subr.mxu1 %v10105_v1  ;;  %v16402_v62 = vld [vmem:[%s21704_s6 + $0x50] sm:$0xff]  ;;  %v16388_v1 = vld [vmem:[%s21704_s6 + $0x28] sm:$0x1f] }
 0xc98   : > { %10314 = vmatpush1.msra.mxu0 %v10102_v2  ;;  %10385 = vmatpush1.msra.mxu1 %v10104_v3  ;;  %v16397_v2 = vld [vmem:[%s21704_s6 + $0x40] sm:$0xff] }
 0xc99   : > { %10315 = vmatprep.subr.mxu0 %v10091_v60  ;;  %10386 = vmatprep.subr.mxu1 %v10093_v4  ;;  %v16398_v4 = vld [vmem:[%s21704_s6 + $0x48] sm:$0x1f] }
 0xc9a   : > { %10316 = vmatpush1.msra.mxu0 %v10090_v63  ;;  %10387 = vmatpush1.msra.mxu1 %v10092_v55  ;;  %v16403_v55 = vld [vmem:[%s21704_s6 + $0x58] sm:$0x1f] }
 0xc9b   : > { %10317 = vmatprep.subr.mxu0 %v10079_v5  ;;  %10388 = vmatprep.subr.mxu1 %v10081_v51  ;;  %v16407_v5 = vld [vmem:[%s21704_s6 + $0x60] sm:$0xff] }
 0xc9c   : > { %10318 = vmatpush1.msra.mxu0 %v10078_v53  ;;  %10389 = vmatpush1.msra.mxu1 %v10080_v6  ;;  %v16412_v53 = vld [vmem:[%s21704_s6 + $0x70] sm:$0xff]  ;;  %v16408_v6 = vld [vmem:[%s21704_s6 + $0x68] sm:$0x1f] }
 0xc9d   : > { %10319 = vmatprep.subr.mxu0 %v10067_v9  ;;  %10390 = vmatprep.subr.mxu1 %v10069_v10  ;;  %v16417_v9 = vld [vmem:[%s21704_s6 + $0x80] sm:$0xff]  ;;  %v16413_v10 = vld [vmem:[%s21704_s6 + $0x78] sm:$0x1f] }
 0xc9e   : > { %10320 = vmatpush1.msra.mxu0 %v10066_v13  ;;  %10391 = vmatpush1.msra.mxu1 %v10068_v14  ;;  %v16422_v13 = vld [vmem:[%s21704_s6 + $0x90] sm:$0xff] }
 0xc9f   : > { %10321 = vmatprep.subr.mxu0 %v10055_v15  ;;  %10392 = vmatprep.subr.mxu1 %v10057_v35  ;;  %v16418_v15 = vld [vmem:[%s21704_s6 + $0x88] sm:$0x1f] }
 0xca0   : > { %10322 = vmatpush1.msra.mxu0 %v10054_v16  ;;  %10355 = vmatprep.mubr.f32.mxu0 %v19290_v0 }
 0xca1   : > { %10393 = vmatpush1.msra.mxu1 %v10056_v17  ;;  %10426 = vmatprep.mubr.f32.mxu1 %v19290_v0  ;;  %v16423_v17 = vld [vmem:[%s21704_s6 + $0x98] sm:$0x1f] }
 0xca2   : > { %16375 = vmatmul.mubr.msk.f32.vlgmr.msra.gmra.mxu0 %vm4909_vm5, %v20739_v47  ;;  %16376 = vmatmul.mubr.msk.f32.vlgmr.msra.gmra.mxu1 %vm4909_vm5, %v20739_v47 }
 0xca3   : > { %10449 = vmatprep.subr.mxu0 %v10143_v18  ;;  %10520 = vmatprep.subr.mxu1 %v10145_v19  ;;  %v16427_v18 = vld [vmem:[%s21704_s6 + $0xa0] sm:$0xff]  ;;  %v16428_v19 = vld [vmem:[%s21704_s6 + $0xa8] sm:$0x1f] }
 0xca4   : > { %10450 = vmatpush1.msra.mxu0 %v10142_v20  ;;  %10521 = vmatpush1.msra.mxu1 %v10144_v21  ;;  %v16432_v21 = vld [vmem:[%s21704_s6 + $0xb0] sm:$0xff] }
 0xca5   : > { %10451 = vmatprep.subr.mxu0 %v10131_v22  ;;  %10522 = vmatprep.subr.mxu1 %v10133_v27  ;;  %v16433_v22 = vld [vmem:[%s21704_s6 + $0xb8] sm:$0x1f]  ;;  %v11732_v27 = vld [vmem:[%s21705_s22 + $0x2a8] sm:$0xff] }
 0xca6   : > { %10452 = vmatpush1.msra.mxu0 %v10130_v8  ;;  %10523 = vmatpush1.msra.mxu1 %v10132_v11  ;;  %v11734_v8 = vld [vmem:[%s21705_s22 + $0x2b8] sm:$0xff]  ;;  %v11731_v11 = vld [vmem:[%s21705_s22 + $0x2a0] sm:$0xff] }
 0xca7   : > { %10453 = vmatprep.subr.mxu0 %v10119_v57  ;;  %10524 = vmatprep.subr.mxu1 %v10121_v12  ;;  %v11733_v57 = vld [vmem:[%s21705_s22 + $0x2b0] sm:$0xff]  ;;  %v11720_v12 = vld [vmem:[%s21705_s22 + $0x248] sm:$0xff] }
 0xca8   : > { %10454 = vmatpush1.msra.mxu0 %v10118_v25  ;;  %10525 = vmatpush1.msra.mxu1 %v10120_v29  ;;  %v11722_v25 = vld [vmem:[%s21705_s22 + $0x258] sm:$0xff]  ;;  %v11719_v29 = vld [vmem:[%s21705_s22 + $0x240] sm:$0xff] }
 0xca9   : > { %10455 = vmatprep.subr.mxu0 %v10107_v30  ;;  %10526 = vmatprep.subr.mxu1 %v10109_v31  ;;  %v11721_v30 = vld [vmem:[%s21705_s22 + $0x250] sm:$0xff]  ;;  %v11708_v31 = vld [vmem:[%s21705_s22 + $0x1e8] sm:$0xff] }
 0xcaa   : > { %10456 = vmatpush1.msra.mxu0 %v10106_v23  ;;  %10527 = vmatpush1.msra.mxu1 %v10108_v32  ;;  %v11710_v23 = vld [vmem:[%s21705_s22 + $0x1f8] sm:$0xff]  ;;  %v11707_v32 = vld [vmem:[%s21705_s22 + $0x1e0] sm:$0xff] }
 0xcab   : > { %10457 = vmatprep.subr.mxu0 %v10095_v33  ;;  %10528 = vmatprep.subr.mxu1 %v10097_v34  ;;  %v11709_v33 = vld [vmem:[%s21705_s22 + $0x1f0] sm:$0xff]  ;;  %v11696_v34 = vld [vmem:[%s21705_s22 + $0x188] sm:$0xff] }
 0xcac   : > { %10458 = vmatpush1.msra.mxu0 %v10094_v36  ;;  %10529 = vmatpush1.msra.mxu1 %v10096_v37  ;;  %v11698_v36 = vld [vmem:[%s21705_s22 + $0x198] sm:$0xff]  ;;  %v11695_v37 = vld [vmem:[%s21705_s22 + $0x180] sm:$0xff] }
 0xcad   : > { %10459 = vmatprep.subr.mxu0 %v10083_v38  ;;  %10530 = vmatprep.subr.mxu1 %v10085_v39  ;;  %v11697_v38 = vld [vmem:[%s21705_s22 + $0x190] sm:$0xff]  ;;  %v11684_v39 = vld [vmem:[%s21705_s22 + $0x128] sm:$0xff] }
 0xcae   : > { %10460 = vmatpush1.msra.mxu0 %v10082_v40  ;;  %10531 = vmatpush1.msra.mxu1 %v10084_v41  ;;  %v11686_v40 = vld [vmem:[%s21705_s22 + $0x138] sm:$0xff]  ;;  %v11683_v41 = vld [vmem:[%s21705_s22 + $0x120] sm:$0xff] }
 0xcaf   : > { %10461 = vmatprep.subr.mxu0 %v10071_v42  ;;  %10532 = vmatprep.subr.mxu1 %v10073_v28  ;;  %v11685_v42 = vld [vmem:[%s21705_s22 + $0x130] sm:$0xff]  ;;  %v11672_v28 = vld [vmem:[%s21705_s22 + $0xc8] sm:$0xff] }
 0xcb0   : > { %10462 = vmatpush1.msra.mxu0 %v10070_v7  ;;  %10533 = vmatpush1.msra.mxu1 %v10072_v43  ;;  %v11674_v7 = vld [vmem:[%s21705_s22 + $0xd8] sm:$0xff]  ;;  %v11671_v43 = vld [vmem:[%s21705_s22 + $0xc0] sm:$0xff] }
 0xcb1   : > { %10463 = vmatprep.subr.mxu0 %v10059_v44  ;;  %10534 = vmatprep.subr.mxu1 %v10061_v45  ;;  %v11673_v44 = vld [vmem:[%s21705_s22 + $0xd0] sm:$0xff]  ;;  %v11660_v45 = vld [vmem:[%s21705_s22 + $0x68] sm:$0xff] }
 0xcb2   : > { %10464 = vmatpush1.msra.mxu0 %v10058_v46  ;;  %10497 = vmatprep.mubr.f32.mxu0 %v19290_v0  ;;  %v11662_v46 = vld [vmem:[%s21705_s22 + $0x78] sm:$0xff] }
 0xcb3   : > { %10535 = vmatpush1.msra.mxu1 %v10060_v24  ;;  %10568 = vmatprep.mubr.f32.mxu1 %v19290_v0  ;;  %v11659_v24 = vld [vmem:[%s21705_s22 + $0x60] sm:$0xff] }
 0xcb4   : > { %16377 = vmatmul.mubr.msk.f32.vlgmr.msra.gmra.mxu0 %vm4909_vm5, %v20739_v47  ;;  %16378 = vmatmul.mubr.msk.f32.vlgmr.msra.gmra.mxu1 %vm4909_vm5, %v20739_v47  ;;  %v16380_v47 = vld [vmem:[%s21704_s6 + $0x18] sm:$0x1f] }
 0xcb5   : > { %17810 = vmatprep.mubr.msk.f32.mxu1 %vm7383_vm10, %v10575_v26  ;;  %17805 = vmatprep.mubr.msk.f32.mxu0 %vm7383_vm10, %v16379_v48  ;;  %v11661_v26 = vld [vmem:[%s21705_s22 + $0x70] sm:$0xff]  ;;  %v11648_v48 = vld [vmem:[%s21705_s22 + $0x8] sm:$0xff] }
 0xd51   : > { %v10215_v49 = vpop.f32.mrf.mxu0  ;;  %v10286_v50 = vpop.f32.mrf.mxu1 }
 0xd52   : > { %17808 = vmatprep.subr.msk.mxu1 %vm7387_vm9, %v10215_v49 }
 0xd53   : > { %v10217_v54 = vpop.f32.mrf.mxu0  ;;  %v10288_v58 = vpop.f32.mrf.mxu1  ;;  %17809 = vmatpush3.msk.msra.mxu1 %vm7387_vm9, %v10215_v49  ;;  %v11650_v49 = vld [vmem:[%s21705_s22 + $0x18] sm:$0xff] }
 0xd54   : > { %17803 = vmatprep.subr.msk.mxu0 %vm7387_vm9, %v10217_v54  ;;  %17818 = vmatprep.subr.msk.mxu1 %vm7387_vm9, %v10288_v58 }
 0xd55   : > { %17804 = vmatpush3.msk.msra.mxu0 %vm7387_vm9, %v10217_v54  ;;  %17811 = vmatmul.mubr.msk.f32.vlgmr.msra.gmra.mxu1 %vm7383_vm10, %v10576_v52  ;;  %v11649_v52 = vld [vmem:[%s21705_s22 + $0x10] sm:$0xff]  ;;  %v11736_v54 = vld [vmem:[%s21705_s22 + $0x2c8] sm:$0xff] }
 0xd56   : > { %17819 = vmatpush3.msk.msra.mxu1 %vm7387_vm9, %v10288_v58  ;;  %17813 = vmatprep.subr.msk.mxu0 %vm7387_vm9, %v10286_v50  ;;  %v11738_v58 = vld [vmem:[%s21705_s22 + $0x2d8] sm:$0xff] }
 0xd57   : > { %17806 = vmatmul.mubr.msk.f32.vlgmr.msra.gmra.mxu0 %vm7383_vm10, %v16380_v47  ;;  %17820 = vmatprep.mubr.msk.f32.mxu1 %vm7383_vm10, %v16392_v59 }
 0xd58   : > { %17814 = vmatpush3.msk.msra.mxu0 %vm7387_vm9, %v10286_v50  ;;  %17815 = vmatprep.mubr.msk.f32.mxu0 %vm7383_vm10, %v16387_v56  ;;  %v11647_v50 = vld [vmem:[%s21705_s22] sm:$0xff] }
 0xd59   : > { %17821 = vmatmul.mubr.msk.f32.vlgmr.msra.gmra.mxu1 %vm7383_vm10, %v16393_v61 }
 0xd5a   : > { %17830 = vmatprep.mubr.msk.f32.mxu1 %vm7383_vm10, %v16402_v62 }
 0xd5b   : > { %17816 = vmatmul.mubr.msk.f32.vlgmr.msra.gmra.mxu0 %vm7383_vm10, %v16388_v1 }
 0xd5c   : > { %17825 = vmatprep.mubr.msk.f32.mxu0 %vm7383_vm10, %v16397_v2 }
 0xd62   : > { %v10357_v3 = vpop.f32.mrf.mxu0  ;;  %v10428_v60 = vpop.f32.mrf.mxu1 }
 0xd63   : > { %17823 = vmatprep.subr.msk.mxu0 %vm7387_vm9, %v10357_v3 }
 0xd64   : > { %v10359_v63 = vpop.f32.mrf.mxu0  ;;  %17824 = vmatpush3.msk.msra.mxu0 %vm7387_vm9, %v10357_v3  ;;  %v10430_v51 = vpop.f32.mrf.mxu1 }
 0xd65   : > { %17828 = vmatprep.subr.msk.mxu1 %vm7387_vm9, %v10359_v63  ;;  %17833 = vmatprep.subr.msk.mxu0 %vm7387_vm9, %v10428_v60 }
 0xd66   : > { %17826 = vmatmul.mubr.msk.f32.vlgmr.msra.gmra.mxu0 %vm7383_vm10, %v16398_v4  ;;  %17829 = vmatpush3.msk.msra.mxu1 %vm7387_vm9, %v10359_v63 }
 0xd67   : > { %17834 = vmatpush3.msk.msra.mxu0 %vm7387_vm9, %v10428_v60  ;;  %17838 = vmatprep.subr.msk.mxu1 %vm7387_vm9, %v10430_v51 }
 0xd68   : > { %17831 = vmatmul.mubr.msk.f32.vlgmr.msra.gmra.mxu1 %vm7383_vm10, %v16403_v55  ;;  %17835 = vmatprep.mubr.msk.f32.mxu0 %vm7383_vm10, %v16407_v5 }
 0xd69   : > { %17839 = vmatpush3.msk.msra.mxu1 %vm7387_vm9, %v10430_v51  ;;  %17840 = vmatprep.mubr.msk.f32.mxu1 %vm7383_vm10, %v16412_v53 }
 0xd6a   : > { %17836 = vmatmul.mubr.msk.f32.vlgmr.msra.gmra.mxu0 %vm7383_vm10, %v16408_v6 }
 0xd6b   : > { %17845 = vmatprep.mubr.msk.f32.mxu0 %vm7383_vm10, %v16417_v9 }
 0xd6c   : > { %17841 = vmatmul.mubr.msk.f32.vlgmr.msra.gmra.mxu1 %vm7383_vm10, %v16413_v10 }
 0xd6d   : > { %17850 = vmatprep.mubr.msk.f32.mxu1 %vm7383_vm10, %v16422_v13 }
 0xd74   : > { %v10499_v14 = vpop.f32.mrf.mxu0  ;;  %v10570_v35 = vpop.f32.mrf.mxu1 }
 0xd75   : > { %17843 = vmatprep.subr.msk.mxu0 %vm7387_vm9, %v10499_v14 }
 0xd76   : > { %v10501_v16 = vpop.f32.mrf.mxu0  ;;  %17844 = vmatpush3.msk.msra.mxu0 %vm7387_vm9, %v10499_v14  ;;  %v10572_v20 = vpop.f32.mrf.mxu1 }
 0xd77   : > { %17846 = vmatmul.mubr.msk.f32.vlgmr.msra.gmra.mxu0 %vm7383_vm10, %v16418_v15  ;;  %17848 = vmatprep.subr.msk.mxu1 %vm7387_vm9, %v10501_v16 }
 0xd78   : > { %17853 = vmatprep.subr.msk.mxu0 %vm7387_vm9, %v10570_v35  ;;  %17849 = vmatpush3.msk.msra.mxu1 %vm7387_vm9, %v10501_v16 }
 0xd79   : > { %17854 = vmatpush3.msk.msra.mxu0 %vm7387_vm9, %v10570_v35  ;;  %17851 = vmatmul.mubr.msk.f32.vlgmr.msra.gmra.mxu1 %vm7383_vm10, %v16423_v17 }
 0xd7a   : > { %17858 = vmatprep.subr.msk.mxu1 %vm7387_vm9, %v10572_v20  ;;  %17855 = vmatprep.mubr.msk.f32.mxu0 %vm7383_vm10, %v16427_v18 }
 0xd7b   : > { %17859 = vmatpush3.msk.msra.mxu1 %vm7387_vm9, %v10572_v20  ;;  %17856 = vmatmul.mubr.msk.f32.vlgmr.msra.gmra.mxu0 %vm7383_vm10, %v16428_v19 }
 0xd7c   : > { %17860 = vmatprep.mubr.msk.f32.mxu1 %vm7383_vm10, %v16432_v21  ;;  %11813 = vmatprep.mubr.f32.mxu0 %v19290_v0 }
 0xd7d   : > { %17861 = vmatmul.mubr.msk.f32.vlgmr.msra.gmra.mxu1 %vm7383_vm10, %v16433_v22  ;;  %11765 = vmatprep.subr.mxu0 %v11732_v27 }
 0xd7e   : > { %11890 = vmatprep.mubr.f32.mxu1 %v19290_v0  ;;  %11842 = vmatprep.subr.mxu1 %v11734_v8 }
 0xd7f   : > { %11766 = vmatpush1.msra.mxu0 %v11731_v11  ;;  %11843 = vmatpush1.msra.mxu1 %v11733_v57 }
 0xd80   : > { %11767 = vmatprep.subr.mxu0 %v11720_v12  ;;  %11844 = vmatprep.subr.mxu1 %v11722_v25 }
 0xd81   : > { %11768 = vmatpush1.msra.mxu0 %v11719_v29  ;;  %11845 = vmatpush1.msra.mxu1 %v11721_v30 }
 0xd82   : > { %11769 = vmatprep.subr.mxu0 %v11708_v31  ;;  %11846 = vmatprep.subr.mxu1 %v11710_v23 }
 0xd83   : > { %11770 = vmatpush1.msra.mxu0 %v11707_v32  ;;  %11847 = vmatpush1.msra.mxu1 %v11709_v33 }
 0xd84   : > { %11771 = vmatprep.subr.mxu0 %v11696_v34  ;;  %11848 = vmatprep.subr.mxu1 %v11698_v36 }
 0xd85   : > { %11772 = vmatpush1.msra.mxu0 %v11695_v37  ;;  %11849 = vmatpush1.msra.mxu1 %v11697_v38 }
 0xd86   : > { %11773 = vmatprep.subr.mxu0 %v11684_v39  ;;  %11850 = vmatprep.subr.mxu1 %v11686_v40  ;;  %v16437_v39 = vld [vmem:[#allocation30] ss:$0 sm:$0xff] }
 0xd87   : > { %11774 = vmatpush1.msra.mxu0 %v11683_v41  ;;  %11851 = vmatpush1.msra.mxu1 %v11685_v42  ;;  %v11735_v41 = vld [vmem:[%s21705_s22 + $0x2c0] sm:$0xff]  ;;  %v11737_v42 = vld [vmem:[%s21705_s22 + $0x2d0] sm:$0xff] }
 0xd88   : > { %11775 = vmatprep.subr.mxu0 %v11672_v28  ;;  %11852 = vmatprep.subr.mxu1 %v11674_v7  ;;  %v11724_v28 = vld [vmem:[%s21705_s22 + $0x268] sm:$0xff]  ;;  %v11726_v7 = vld [vmem:[%s21705_s22 + $0x278] sm:$0xff] }
 0xd89   : > { %11776 = vmatpush1.msra.mxu0 %v11671_v43  ;;  %11853 = vmatpush1.msra.mxu1 %v11673_v44  ;;  %v11723_v44 = vld [vmem:[%s21705_s22 + $0x260] sm:$0xff] }
 0xd8a   : > { %11777 = vmatprep.subr.mxu0 %v11660_v45  ;;  %11854 = vmatprep.subr.mxu1 %v11662_v46  ;;  %v11725_v45 = vld [vmem:[%s21705_s22 + $0x270] sm:$0xff]  ;;  %v11712_v46 = vld [vmem:[%s21705_s22 + $0x208] sm:$0xff] }
 0xd8b   : > { %11778 = vmatpush1.msra.mxu0 %v11659_v24  ;;  %11855 = vmatpush1.msra.mxu1 %v11661_v26  ;;  %v11714_v24 = vld [vmem:[%s21705_s22 + $0x218] sm:$0xff] }
 0xd8c   : > { %11779 = vmatprep.subr.mxu0 %v11648_v48  ;;  %11856 = vmatprep.subr.mxu1 %v11650_v49  ;;  %v11711_v48 = vld [vmem:[%s21705_s22 + $0x200] sm:$0xff]  ;;  %v11713_v49 = vld [vmem:[%s21705_s22 + $0x210] sm:$0xff] }
 0xd8d   : > { %11780 = vmatpush1.msra.mxu0 %v11647_v50  ;;  %11857 = vmatpush1.msra.mxu1 %v11649_v52  ;;  %v11700_v50 = vld [vmem:[%s21705_s22 + $0x1a8] sm:$0xff]  ;;  %v11702_v52 = vld [vmem:[%s21705_s22 + $0x1b8] sm:$0xff] }
 0xd8e   : > { %11919 = vmatprep.subr.mxu0 %v11736_v54  ;;  %11996 = vmatprep.subr.mxu1 %v11738_v58  ;;  %v11699_v54 = vld [vmem:[%s21705_s22 + $0x1a0] sm:$0xff]  ;;  %v11701_v58 = vld [vmem:[%s21705_s22 + $0x1b0] sm:$0xff] }
 0xe15   : > { %v17812_v56 = vpop.f32.mrf.mxu1 }
 0xe17   : > { %v17807_v47 = vpop.f32.mrf.mxu0  ;;  %v10739_v61 = vpop.f32.mrf.mxu1 }
 0xe18   : > { %v10745_v1 = vadd.f32 %v17812_v56, %v17807_v47  ;;  %v11688_v47 = vld [vmem:[%s21705_s22 + $0x148] sm:$0xff]  ;;  %v11687_v56 = vld [vmem:[%s21705_s22 + $0x140] sm:$0xff] }
 0xe19   : > { %v10655_v59 = vpop.f32.mrf.mxu0  ;;  %v17822_v60 = vpop.f32.mrf.mxu1 }
 0xe1a   : > { %v10740_v2 = vadd.f32 %v10739_v61, %v10655_v59  ;;  %v11690_v59 = vld [vmem:[%s21705_s22 + $0x158] sm:$0xff]  ;;  %v11689_v61 = vld [vmem:[%s21705_s22 + $0x150] sm:$0xff] }
 0xe1b   : > { %v17817_v62 = vpop.f32.mrf.mxu0  ;;  %v10915_v55 = vpop.f32.mrf.mxu1 }
 0xe1c   : > { %v10836_v4 = vadd.f32 %v17817_v62, %v10745_v1  ;;  %v11676_v62 = vld [vmem:[%s21705_s22 + $0xe8] sm:$0xff]  ;;  %v11678_v1 = vld [vmem:[%s21705_s22 + $0xf8] sm:$0xff] }
 0xe1d   : > { %v10826_v3 = vpop.f32.mrf.mxu0 }
 0xe1e   : > { %v10835_v63 = vadd.f32 %v10826_v3, %v10740_v2  ;;  %v10925_v5 = vadd.f32 %v17822_v60, %v10836_v4  ;;  %v11675_v2 = vld [vmem:[%s21705_s22 + $0xe0] sm:$0xff]  ;;  %v11677_v3 = vld [vmem:[%s21705_s22 + $0xf0] sm:$0xff]  ;;  %v11664_v60 = vld [vmem:[%s21705_s22 + $0x88] sm:$0xff] }
 0xe1f   : > { %v11666_v4 = vld [vmem:[%s21705_s22 + $0x98] sm:$0xff] }
 0xe20   : > { %v10924_v53 = vadd.f32 %v10915_v55, %v10835_v63  ;;  %v11663_v63 = vld [vmem:[%s21705_s22 + $0x80] sm:$0xff]  ;;  %v11665_v55 = vld [vmem:[%s21705_s22 + $0x90] sm:$0xff] }
 0xe26   : > { %v17827_v51 = vpop.f32.mrf.mxu0 }
 0xe27   : > { %v11014_v10 = vadd.f32 %v17827_v51, %v10925_v5  ;;  %v11652_v5 = vld [vmem:[%s21705_s22 + $0x28] sm:$0xff]  ;;  %v11654_v51 = vld [vmem:[%s21705_s22 + $0x38] sm:$0xff] }
 0xe28   : > { %v11004_v6 = vpop.f32.mrf.mxu0  ;;  %v17832_v9 = vpop.f32.mrf.mxu1 }
 0xe29   : > { %v11013_v13 = vadd.f32 %v11004_v6, %v10924_v53  ;;  %v11103_v35 = vadd.f32 %v17832_v9, %v11014_v10  ;;  %v11651_v53 = vld [vmem:[%s21705_s22 + $0x20] sm:$0xff]  ;;  %v11653_v6 = vld [vmem:[%s21705_s22 + $0x30] sm:$0xff]  ;;  %v11740_v9 = vld [vmem:[%s21705_s22 + $0x2e8] sm:$0xff] }
 0xe2a   : > { %v11093_v14 = vpop.f32.mrf.mxu1  ;;  %v17837_v15 = vpop.f32.mrf.mxu0  ;;  %v11742_v10 = vld [vmem:[%s21705_s22 + $0x2f8] sm:$0xff] }
 0xe2b   : > { %v11102_v16 = vadd.f32 %v11093_v14, %v11013_v13  ;;  %v11192_v19 = vadd.f32 %v17837_v15, %v11103_v35  ;;  %v11739_v13 = vld [vmem:[%s21705_s22 + $0x2e0] sm:$0xff]  ;;  %v11741_v14 = vld [vmem:[%s21705_s22 + $0x2f0] sm:$0xff]  ;;  %v11728_v15 = vld [vmem:[%s21705_s22 + $0x288] sm:$0xff] }
 0xe2c   : > { %v11182_v17 = vpop.f32.mrf.mxu0  ;;  %v17842_v18 = vpop.f32.mrf.mxu1  ;;  %v11730_v35 = vld [vmem:[%s21705_s22 + $0x298] sm:$0xff] }
 0xe2d   : > { %v11191_v20 = vadd.f32 %v11182_v17, %v11102_v16  ;;  %v11281_v22 = vadd.f32 %v17842_v18, %v11192_v19  ;;  %v11727_v16 = vld [vmem:[%s21705_s22 + $0x280] sm:$0xff]  ;;  %v11729_v17 = vld [vmem:[%s21705_s22 + $0x290] sm:$0xff]  ;;  %v11716_v18 = vld [vmem:[%s21705_s22 + $0x228] sm:$0xff] }
 0xe2e   : > { %v11271_v21 = vpop.f32.mrf.mxu1  ;;  %v11718_v19 = vld [vmem:[%s21705_s22 + $0x238] sm:$0xff] }
 0xe2f   : > { %v11280_v8 = vadd.f32 %v11271_v21, %v11191_v20  ;;  %v11715_v20 = vld [vmem:[%s21705_s22 + $0x220] sm:$0xff]  ;;  %v11717_v21 = vld [vmem:[%s21705_s22 + $0x230] sm:$0xff] }
 0xe37   : > { %v17847_v27 = vpop.f32.mrf.mxu0 }
 0xe38   : > { %v11370_v11 = vadd.f32 %v17847_v27, %v11281_v22  ;;  %v11704_v22 = vld [vmem:[%s21705_s22 + $0x1c8] sm:$0xff]  ;;  %v11706_v27 = vld [vmem:[%s21705_s22 + $0x1d8] sm:$0xff] }
 0xe39   : > { %v11360_v57 = vpop.f32.mrf.mxu0  ;;  %v17852_v12 = vpop.f32.mrf.mxu1 }
 0xe3a   : > { %v11369_v25 = vadd.f32 %v11360_v57, %v11280_v8  ;;  %v11459_v31 = vadd.f32 %v17852_v12, %v11370_v11  ;;  %v11703_v8 = vld [vmem:[%s21705_s22 + $0x1c0] sm:$0xff]  ;;  %v11705_v11 = vld [vmem:[%s21705_s22 + $0x1d0] sm:$0xff]  ;;  %v11692_v57 = vld [vmem:[%s21705_s22 + $0x168] sm:$0xff] }
 0xe3b   : > { %v11449_v29 = vpop.f32.mrf.mxu1  ;;  %v17857_v30 = vpop.f32.mrf.mxu0  ;;  %v11694_v12 = vld [vmem:[%s21705_s22 + $0x178] sm:$0xff] }
 0xe3c   : > { %v11458_v23 = vadd.f32 %v11449_v29, %v11369_v25  ;;  %v11548_v37 = vadd.f32 %v17857_v30, %v11459_v31  ;;  %v11691_v25 = vld [vmem:[%s21705_s22 + $0x160] sm:$0xff]  ;;  %v11693_v29 = vld [vmem:[%s21705_s22 + $0x170] sm:$0xff]  ;;  %v11680_v30 = vld [vmem:[%s21705_s22 + $0x108] sm:$0xff] }
 0xe3d   : > { %v11538_v32 = vpop.f32.mrf.mxu0  ;;  %v17862_v33 = vpop.f32.mrf.mxu1  ;;  %v11682_v31 = vld [vmem:[%s21705_s22 + $0x118] sm:$0xff] }
 0xe3e   : > { %v11547_v34 = vadd.f32 %v11538_v32, %v11458_v23  ;;  %v11637_v43 = vadd.f32 %v17862_v33, %v11548_v37  ;;  %v11679_v23 = vld [vmem:[%s21705_s22 + $0x100] sm:$0xff]  ;;  %v11681_v32 = vld [vmem:[%s21705_s22 + $0x110] sm:$0xff]  ;;  %v11668_v33 = vld [vmem:[%s21705_s22 + $0xa8] sm:$0xff] }
 0xe3f   : > { %v11627_v36 = vpop.f32.mrf.mxu1  ;;  %v11669_v37 = vld [vmem:[%s21705_s22 + $0xb0] sm:$0xff] }
 0xe40   : > { %v11636_v38 = vadd.f32 %v11627_v36, %v11547_v34  ;;  %v20879_v26 = vadd.f32 %v16437_v39, %v11637_v43  ;;  %v11670_v34 = vld [vmem:[%s21705_s22 + $0xb8] sm:$0xff]  ;;  %v11667_v36 = vld [vmem:[%s21705_s22 + $0xa0] sm:$0xff] }
 0xe42   : > { %v20865_v40 = vadd.f32 %v16437_v39, %v11636_v38  ;;  %v11656_v38 = vld [vmem:[%s21705_s22 + $0x48] sm:$0xff]  ;;  %v11658_v39 = vld [vmem:[%s21705_s22 + $0x58] sm:$0xff] }
 0xe44   : > { %16438 = vmatmul.mubr.msk.f32.vlgmr.msra.gmra.mxu0 %vm4909_vm5, %v20865_v40  ;;  %16440 = vmatmul.mubr.msk.f32.vlgmr.msra.gmra.mxu1 %vm4909_vm5, %v20865_v40 }
 0xe45   : > { %11920 = vmatpush1.msra.mxu0 %v11735_v41  ;;  %11997 = vmatpush1.msra.mxu1 %v11737_v42  ;;  %v11655_v41 = vld [vmem:[%s21705_s22 + $0x40] sm:$0xff]  ;;  %v11657_v42 = vld [vmem:[%s21705_s22 + $0x50] sm:$0xff] }
 0xe46   : > { %11921 = vmatprep.subr.mxu0 %v11724_v28  ;;  %11998 = vmatprep.subr.mxu1 %v11726_v7  ;;  %v12211_v28 = vld [vmem:[%s21706_s10] sm:$0xff] }
 0xe47   : > { %11922 = vmatpush1.msra.mxu0 %v11723_v44  ;;  %11999 = vmatpush1.msra.mxu1 %v11725_v45  ;;  %v16450_v7 = vld [vmem:[%s21706_s10 + $0x20] sm:$0xff] }
 0xe48   : > { %11819 = vmatprep.mubr.f32.mxu0 %v19290_v0  ;;  %11896 = vmatprep.mubr.f32.mxu1 %v19290_v0 }
 0xe49   : > { %11923 = vmatprep.subr.mxu0 %v11712_v46  ;;  %12000 = vmatprep.subr.mxu1 %v11714_v24 }
 0xe4a   : > { %16439 = vmatmul.mubr.msk.f32.gmra.mxu0 %vm4909_vm5, %v20879_v26  ;;  %16441 = vmatmul.mubr.msk.f32.gmra.mxu1 %vm4909_vm5, %v20879_v26 }
 0xe4b   : > { %11924 = vmatpush1.msra.mxu0 %v11711_v48  ;;  %12001 = vmatpush1.msra.mxu1 %v11713_v49  ;;  %v12212_v48 = vld [vmem:[%s21706_s10 + $0x8] sm:$0xff] }
 0xe4c   : > { %11925 = vmatprep.subr.mxu0 %v11700_v50  ;;  %12002 = vmatprep.subr.mxu1 %v11702_v52  ;;  %v16451_v50 = vld [vmem:[%s21706_s10 + $0x28] sm:$0xff]  ;;  %v16452_v52 = vld [vmem:[%s21706_s10 + $0x30] sm:$0xff] }
 0xe4d   : > { %11926 = vmatpush1.msra.mxu0 %v11699_v54  ;;  %12003 = vmatpush1.msra.mxu1 %v11701_v58  ;;  %v12213_v54 = vld [vmem:[%s21706_s10 + $0x10] sm:$0xff]  ;;  %v16453_v58 = vld [vmem:[%s21706_s10 + $0x38] sm:$0x7] }
 0xe4e   : > { %11927 = vmatprep.subr.mxu0 %v11688_v47  ;;  %12004 = vmatprep.subr.mxu1 %v11690_v59  ;;  %v12214_v47 = vld [vmem:[%s21706_s10 + $0x18] sm:$0x7]  ;;  %v16464_v59 = vld [vmem:[%s21706_s10 + $0x40] sm:$0xff] }
 0xe4f   : > { %11928 = vmatpush1.msra.mxu0 %v11687_v56  ;;  %12005 = vmatpush1.msra.mxu1 %v11689_v61  ;;  %v16473_v56 = vld [vmem:[%s21706_s10 + $0x60] sm:$0xff] }
 0xe50   : > { %11929 = vmatprep.subr.mxu0 %v11676_v62  ;;  %12006 = vmatprep.subr.mxu1 %v11678_v1  ;;  %v16465_v1 = vld [vmem:[%s21706_s10 + $0x48] sm:$0xff] }
 0xe51   : > { %11930 = vmatpush1.msra.mxu0 %v11675_v2  ;;  %12007 = vmatpush1.msra.mxu1 %v11677_v3  ;;  %v16474_v2 = vld [vmem:[%s21706_s10 + $0x68] sm:$0xff]  ;;  %v16466_v3 = vld [vmem:[%s21706_s10 + $0x50] sm:$0xff] }
 0xe52   : > { %11931 = vmatprep.subr.mxu0 %v11664_v60  ;;  %12008 = vmatprep.subr.mxu1 %v11666_v4  ;;  %v16475_v60 = vld [vmem:[%s21706_s10 + $0x70] sm:$0xff] }
 0xe53   : > { %11932 = vmatpush1.msra.mxu0 %v11663_v63  ;;  %12009 = vmatpush1.msra.mxu1 %v11665_v55  ;;  %v16467_v55 = vld [vmem:[%s21706_s10 + $0x58] sm:$0x7] }
 0xe54   : > { %11933 = vmatprep.subr.mxu0 %v11652_v5  ;;  %12010 = vmatprep.subr.mxu1 %v11654_v51  ;;  %v16476_v5 = vld [vmem:[%s21706_s10 + $0x78] sm:$0x7] }
 0xe55   : > { %11934 = vmatpush1.msra.mxu0 %v11651_v53  ;;  %11967 = vmatprep.mubr.f32.mxu0 %v19290_v0 }
 0xe56   : > { %12011 = vmatpush1.msra.mxu1 %v11653_v6  ;;  %12044 = vmatprep.mubr.f32.mxu1 %v19290_v0 }
 0xe57   : > { %16442 = vmatmul.mubr.msk.f32.vlgmr.msra.gmra.mxu0 %vm4909_vm5, %v20865_v40  ;;  %16444 = vmatmul.mubr.msk.f32.vlgmr.msra.gmra.mxu1 %vm4909_vm5, %v20865_v40 }
 0xe58   : > { %12073 = vmatprep.subr.mxu0 %v11740_v9  ;;  %12150 = vmatprep.subr.mxu1 %v11742_v10  ;;  %v16482_v9 = vld [vmem:[%s21706_s10 + $0x80] sm:$0xff] }
 0xe59   : > { %12074 = vmatpush1.msra.mxu0 %v11739_v13  ;;  %12151 = vmatpush1.msra.mxu1 %v11741_v14  ;;  %v16491_v10 = vld [vmem:[%s21706_s10 + $0xa0] sm:$0xff]  ;;  %v16483_v13 = vld [vmem:[%s21706_s10 + $0x88] sm:$0xff] }
 0xe5a   : > { %12075 = vmatprep.subr.mxu0 %v11728_v15  ;;  %12152 = vmatprep.subr.mxu1 %v11730_v35  ;;  %v16492_v14 = vld [vmem:[%s21706_s10 + $0xa8] sm:$0xff]  ;;  %v16484_v35 = vld [vmem:[%s21706_s10 + $0x90] sm:$0xff] }
 0xe5b   : > { %11973 = vmatprep.mubr.f32.mxu0 %v19290_v0  ;;  %12050 = vmatprep.mubr.f32.mxu1 %v19290_v0 }
 0xe5c   : > { %12076 = vmatpush1.msra.mxu0 %v11727_v16  ;;  %12153 = vmatpush1.msra.mxu1 %v11729_v17  ;;  %v16493_v16 = vld [vmem:[%s21706_s10 + $0xb0] sm:$0xff]  ;;  %v16485_v17 = vld [vmem:[%s21706_s10 + $0x98] sm:$0x7] }
 0xe5d   : > { %16443 = vmatmul.mubr.msk.f32.gmra.mxu0 %vm4909_vm5, %v20879_v26  ;;  %16445 = vmatmul.mubr.msk.f32.gmra.mxu1 %vm4909_vm5, %v20879_v26 }
 0xe5e   : > { %12077 = vmatprep.subr.mxu0 %v11716_v18  ;;  %12154 = vmatprep.subr.mxu1 %v11718_v19  ;;  %v16494_v18 = vld [vmem:[%s21706_s10 + $0xb8] sm:$0x7]  ;;  %v16500_v19 = vld [vmem:[%s21706_s10 + $0xc0] sm:$0xff] }
 0xe5f   : > { %12078 = vmatpush1.msra.mxu0 %v11715_v20  ;;  %12155 = vmatpush1.msra.mxu1 %v11717_v21  ;;  %v16509_v20 = vld [vmem:[%s21706_s10 + $0xe0] sm:$0xff] }
 0xe60   : > { %12079 = vmatprep.subr.mxu0 %v11704_v22  ;;  %12156 = vmatprep.subr.mxu1 %v11706_v27  ;;  %v16501_v27 = vld [vmem:[%s21706_s10 + $0xc8] sm:$0xff] }
 0xe61   : > { %12080 = vmatpush1.msra.mxu0 %v11703_v8  ;;  %12157 = vmatpush1.msra.mxu1 %v11705_v11  ;;  %v16510_v8 = vld [vmem:[%s21706_s10 + $0xe8] sm:$0xff]  ;;  %v16502_v11 = vld [vmem:[%s21706_s10 + $0xd0] sm:$0xff] }
 0xe62   : > { %12081 = vmatprep.subr.mxu0 %v11692_v57  ;;  %12158 = vmatprep.subr.mxu1 %v11694_v12  ;;  %v16511_v57 = vld [vmem:[%s21706_s10 + $0xf0] sm:$0xff] }
 0xe63   : > { %12082 = vmatpush1.msra.mxu0 %v11691_v25  ;;  %12159 = vmatpush1.msra.mxu1 %v11693_v29 }
 0xe64   : > { %12083 = vmatprep.subr.mxu0 %v11680_v30  ;;  %12160 = vmatprep.subr.mxu1 %v11682_v31  ;;  %v16503_v30 = vld [vmem:[%s21706_s10 + $0xd8] sm:$0x7] }
 0xe65   : > { %12084 = vmatpush1.msra.mxu0 %v11679_v23  ;;  %12161 = vmatpush1.msra.mxu1 %v11681_v32  ;;  %v16512_v31 = vld [vmem:[%s21706_s10 + $0xf8] sm:$0x7] }
 0xe66   : > { %12085 = vmatprep.subr.mxu0 %v11668_v33  ;;  %12162 = vmatprep.subr.mxu1 %v11670_v34  ;;  %v16518_v33 = vld [vmem:[%s21706_s10 + $0x100] sm:$0xff] }
 0xe67   : > { %12086 = vmatpush1.msra.mxu0 %v11667_v36  ;;  %12163 = vmatpush1.msra.mxu1 %v11669_v37  ;;  %v16527_v34 = vld [vmem:[%s21706_s10 + $0x120] sm:$0xff]  ;;  %v16519_v36 = vld [vmem:[%s21706_s10 + $0x108] sm:$0xff] }
 0xe68   : > { %12087 = vmatprep.subr.mxu0 %v11656_v38  ;;  %12164 = vmatprep.subr.mxu1 %v11658_v39  ;;  %v16528_v37 = vld [vmem:[%s21706_s10 + $0x128] sm:$0xff]  ;;  %v16520_v39 = vld [vmem:[%s21706_s10 + $0x110] sm:$0xff] }
 0xe69   : > { %12088 = vmatpush1.msra.mxu0 %v11655_v41  ;;  %12121 = vmatprep.mubr.f32.mxu0 %v19290_v0  ;;  %v16529_v41 = vld [vmem:[%s21706_s10 + $0x130] sm:$0xff] }
 0xe6a   : > { %12165 = vmatpush1.msra.mxu1 %v11657_v42  ;;  %12198 = vmatprep.mubr.f32.mxu1 %v19290_v0  ;;  %v16521_v42 = vld [vmem:[%s21706_s10 + $0x118] sm:$0x7] }
 0xe6b   : > { %16446 = vmatmul.mubr.msk.f32.vlgmr.msra.gmra.mxu0 %vm4909_vm5, %v20865_v40  ;;  %16448 = vmatmul.mubr.msk.f32.vlgmr.msra.gmra.mxu1 %vm4909_vm5, %v20865_v40 }
 0xe6c   : > { %12127 = vmatprep.mubr.f32.mxu0 %v19290_v0  ;;  %12204 = vmatprep.mubr.f32.mxu1 %v19290_v0 }
 0xe6f   : > { %16447 = vmatmul.mubr.msk.f32.gmra.mxu0 %vm4909_vm5, %v20879_v26  ;;  %16449 = vmatmul.mubr.msk.f32.gmra.mxu1 %vm4909_vm5, %v20879_v26 }
 0xe70   : > { %17877 = vmatprep.mubr.msk.f32.mxu1 %vm12220_vm13, %v12211_v28  ;;  %17867 = vmatprep.mubr.msk.f32.mxu0 %vm12220_vm13, %v16450_v7  ;;  %v16530_v28 = vld [vmem:[%s21706_s10 + $0x138] sm:$0x7]  ;;  %v16536_v7 = vld [vmem:[%s21706_s10 + $0x140] sm:$0xff] }
 0xf04   : > { %v11815_v43 = vpop.f32.mrf.mxu0  ;;  %v11892_v40 = vpop.f32.mrf.mxu1 }
 0xf06   : > { %v11817_v44 = vpop.f32.mrf.mxu0  ;;  %v11894_v45 = vpop.f32.mrf.mxu1 }
 0xf0a   : > { %v11821_v46 = vpop.f32.mrf.mxu0  ;;  %v11898_v24 = vpop.f32.mrf.mxu1 }
 0xf0b   : > { %17873 = vmatprep.subr.msk.mxu1 %vm12233_vm14, %v11821_v46 }
 0xf0c   : > { %v11823_v26 = vpop.f32.mrf.mxu0  ;;  %17874 = vmatpush3.msk.msra.mxu1 %vm12233_vm14, %v11821_v46  ;;  %v11900_v49 = vpop.f32.mrf.mxu1  ;;  %v16547_v46 = vld [vmem:[%s21706_s10 + $0x170] sm:$0xff] }
 0xf0d   : > { %17863 = vmatprep.subr.msk.mxu0 %vm12233_vm14, %v11823_v26  ;;  %17875 = vmatprep.subr.mxu1 %v11815_v43 }
 0xf0e   : > { %17864 = vmatpush3.msk.msra.mxu0 %vm12233_vm14, %v11823_v26  ;;  %17876 = vmatpush3.msra.mxu1 %v11815_v43  ;;  %v16545_v43 = vld [vmem:[%s21706_s10 + $0x160] sm:$0xff]  ;;  %v16548_v26 = vld [vmem:[%s21706_s10 + $0x178] sm:$0x7] }
 0xf0f   : > { %17865 = vmatprep.subr.mxu0 %v11817_v44  ;;  %17893 = vmatprep.subr.msk.mxu1 %vm12233_vm14, %v11900_v49 }
 0xf10   : > { %17866 = vmatpush3.msra.mxu0 %v11817_v44  ;;  %17878 = vmatmul.mubr.msk.f32.vlgmr.msra.gmra.mxu1 %vm12220_vm13, %v12212_v48  ;;  %v16546_v44 = vld [vmem:[%s21706_s10 + $0x168] sm:$0xff] }
 0xf11   : > { %17894 = vmatpush3.msk.msra.mxu1 %vm12233_vm14, %v11900_v49  ;;  %17868 = vmatmul.mubr.msk.f32.vlgmr.msra.gmra.mxu0 %vm12220_vm13, %v16451_v50  ;;  %v13536_v48 = vld [vmem:[#allocation33 + $0x68] sm:$0xff]  ;;  %v13538_v49 = vld [vmem:[#allocation33 + $0x78] sm:$0xff]  ;;  %v13535_v50 = vld [vmem:[#allocation33 + $0x60] sm:$0xff] }
 0xf12   : > { %17883 = vmatprep.subr.msk.mxu0 %vm12233_vm14, %v11898_v24  ;;  %17895 = vmatprep.subr.mxu1 %v11894_v45 }
 0xf13   : > { %17884 = vmatpush3.msk.msra.mxu0 %vm12233_vm14, %v11898_v24  ;;  %17896 = vmatpush3.msra.mxu1 %v11894_v45  ;;  %v16538_v45 = vld [vmem:[%s21706_s10 + $0x150] sm:$0xff]  ;;  %v16539_v24 = vld [vmem:[%s21706_s10 + $0x158] sm:$0x7] }
 0xf14   : > { %17885 = vmatprep.subr.mxu0 %v11892_v40  ;;  %17870 = vmatprep.mubr.msk.f32.mxu0 %vm12220_vm13, %v16452_v52  ;;  %v13537_v52 = vld [vmem:[#allocation33 + $0x70] sm:$0xff] }
 0xf15   : > { %17880 = vmatprep.mubr.msk.f32.mxu1 %vm12220_vm13, %v12213_v54  ;;  %17886 = vmatpush3.msra.mxu0 %v11892_v40  ;;  %v16537_v40 = vld [vmem:[%s21706_s10 + $0x148] sm:$0xff] }
 0xf16   : > { %17871 = vmatmul.mubr.msk.f32.gmra.mxu0 %vm12220_vm13, %v16453_v58  ;;  %17881 = vmatmul.mubr.msk.f32.gmra.mxu1 %vm12220_vm13, %v12214_v47  ;;  %v13524_v54 = vld [vmem:[#allocation33 + $0x8] sm:$0xff]  ;;  %v13526_v58 = vld [vmem:[#allocation33 + $0x18] sm:$0xff]  ;;  %v13523_v47 = vld [vmem:[#allocation33] sm:$0xff] }
 0xf17   : > { %v11969_v61 = vpop.f32.mrf.mxu0  ;;  %v12046_v62 = vpop.f32.mrf.mxu1  ;;  %17887 = vmatprep.mubr.msk.f32.mxu0 %vm12220_vm13, %v16464_v59  ;;  %17897 = vmatprep.mubr.msk.f32.mxu1 %vm12220_vm13, %v16473_v56  ;;  %v13525_v59 = vld [vmem:[#allocation33 + $0x10] sm:$0xff]  ;;  %v13540_v56 = vld [vmem:[#allocation33 + $0x88] sm:$0xff] }
 0xf19   : > { %v11971_v4 = vpop.f32.mrf.mxu0  ;;  %v12048_v63 = vpop.f32.mrf.mxu1 }
 0xf1a   : > { %17888 = vmatmul.mubr.msk.f32.vlgmr.msra.gmra.mxu0 %vm12220_vm13, %v16465_v1  ;;  %17898 = vmatmul.mubr.msk.f32.vlgmr.msra.gmra.mxu1 %vm12220_vm13, %v16474_v2 }
 0xf1b   : > { %17890 = vmatprep.mubr.msk.f32.mxu0 %vm12220_vm13, %v16466_v3  ;;  %17900 = vmatprep.mubr.msk.f32.mxu1 %vm12220_vm13, %v16475_v60 }
 0xf1d   : > { %v11975_v51 = vpop.f32.mrf.mxu0  ;;  %v12052_v53 = vpop.f32.mrf.mxu1 }
 0xf1e   : > { %17903 = vmatprep.subr.msk.mxu0 %vm12233_vm14, %v11975_v51  ;;  %17891 = vmatmul.mubr.msk.f32.gmra.mxu0 %vm12220_vm13, %v16467_v55 }
 0xf1f   : > { %v11977_v6 = vpop.f32.mrf.mxu0  ;;  %17904 = vmatpush3.msk.msra.mxu0 %vm12233_vm14, %v11975_v51  ;;  %17901 = vmatmul.mubr.msk.f32.gmra.mxu1 %vm12220_vm13, %v16476_v5  ;;  %v12054_v15 = vpop.f32.mrf.mxu1 }
 0xf20   : > { %17905 = vmatprep.subr.mxu0 %v11969_v61  ;;  %17913 = vmatprep.subr.msk.mxu1 %vm12233_vm14, %v11977_v6 }
 0xf21   : > { %17906 = vmatpush3.msra.mxu0 %v11969_v61  ;;  %17914 = vmatpush3.msk.msra.mxu1 %vm12233_vm14, %v11977_v6  ;;  %v13542_v61 = vld [vmem:[#allocation33 + $0x98] sm:$0xff] }
 0xf22   : > { %17915 = vmatprep.subr.mxu1 %v11971_v4  ;;  %17923 = vmatprep.subr.msk.mxu0 %vm12233_vm14, %v12052_v53 }
 0xf23   : > { %17916 = vmatpush3.msra.mxu1 %v11971_v4  ;;  %17907 = vmatprep.mubr.msk.f32.mxu0 %vm12220_vm13, %v16482_v9 }
 0xf24   : > { %17917 = vmatprep.mubr.msk.f32.mxu1 %vm12220_vm13, %v16491_v10  ;;  %17933 = vmatprep.subr.msk.mxu1 %vm12233_vm14, %v12054_v15 }
 0xf25   : > { %17908 = vmatmul.mubr.msk.f32.vlgmr.msra.gmra.mxu0 %vm12220_vm13, %v16483_v13  ;;  %17918 = vmatmul.mubr.msk.f32.vlgmr.msra.gmra.mxu1 %vm12220_vm13, %v16492_v14 }
 0xf26   : > { %17924 = vmatpush3.msk.msra.mxu0 %vm12233_vm14, %v12052_v53  ;;  %17934 = vmatpush3.msk.msra.mxu1 %vm12233_vm14, %v12054_v15 }
 0xf27   : > { %17925 = vmatprep.subr.mxu0 %v12046_v62  ;;  %17935 = vmatprep.subr.mxu1 %v12048_v63 }
 0xf28   : > { %17926 = vmatpush3.msra.mxu0 %v12046_v62  ;;  %17936 = vmatpush3.msra.mxu1 %v12048_v63 }
 0xf29   : > { %17910 = vmatprep.mubr.msk.f32.mxu0 %vm12220_vm13, %v16484_v35  ;;  %17920 = vmatprep.mubr.msk.f32.mxu1 %vm12220_vm13, %v16493_v16 }
 0xf2a   : > { %17911 = vmatmul.mubr.msk.f32.gmra.mxu0 %vm12220_vm13, %v16485_v17  ;;  %17921 = vmatmul.mubr.msk.f32.gmra.mxu1 %vm12220_vm13, %v16494_v18 }
 0xf2b   : > { %v12123_v21 = vpop.f32.mrf.mxu0  ;;  %v12200_v22 = vpop.f32.mrf.mxu1  ;;  %17927 = vmatprep.mubr.msk.f32.mxu0 %vm12220_vm13, %v16500_v19  ;;  %17937 = vmatprep.mubr.msk.f32.mxu1 %vm12220_vm13, %v16509_v20 }
 0xf2d   : > { %v12125_v12 = vpop.f32.mrf.mxu0  ;;  %v12202_v25 = vpop.f32.mrf.mxu1 }
 0xf2e   : > { %17928 = vmatmul.mubr.msk.f32.vlgmr.msra.gmra.mxu0 %vm12220_vm13, %v16501_v27  ;;  %17938 = vmatmul.mubr.msk.f32.vlgmr.msra.gmra.mxu1 %vm12220_vm13, %v16510_v8 }
 0xf2f   : > { %v12129_v29 = vpop.f32.mrf.mxu0  ;;  %17930 = vmatprep.mubr.msk.f32.mxu0 %vm12220_vm13, %v16502_v11  ;;  %17940 = vmatprep.mubr.msk.f32.mxu1 %vm12220_vm13, %v16511_v57  ;;  %v12206_v32 = vpop.f32.mrf.mxu1 }
 0xf30   : > { %17943 = vmatprep.subr.msk.mxu0 %vm12233_vm14, %v12129_v29 }
 0xf31   : > { %v12131_v23 = vpop.f32.mrf.mxu0  ;;  %17944 = vmatpush3.msk.msra.mxu0 %vm12233_vm14, %v12129_v29  ;;  %v12208_v38 = vpop.f32.mrf.mxu1 }
 0xf32   : > { %17945 = vmatprep.subr.mxu0 %v12123_v21  ;;  %17953 = vmatprep.subr.msk.mxu1 %vm12233_vm14, %v12131_v23 }
 0xf33   : > { %17931 = vmatmul.mubr.msk.f32.gmra.mxu0 %vm12220_vm13, %v16503_v30  ;;  %17941 = vmatmul.mubr.msk.f32.gmra.mxu1 %vm12220_vm13, %v16512_v31 }
 0xf34   : > { %17946 = vmatpush3.msra.mxu0 %v12123_v21  ;;  %17954 = vmatpush3.msk.msra.mxu1 %vm12233_vm14, %v12131_v23 }
 0xf35   : > { %17955 = vmatprep.subr.mxu1 %v12125_v12  ;;  %17963 = vmatprep.subr.msk.mxu0 %vm12233_vm14, %v12206_v32 }
 0xf36   : > { %17956 = vmatpush3.msra.mxu1 %v12125_v12  ;;  %17947 = vmatprep.mubr.msk.f32.mxu0 %vm12220_vm13, %v16518_v33 }
 0xf37   : > { %17957 = vmatprep.mubr.msk.f32.mxu1 %vm12220_vm13, %v16527_v34  ;;  %17973 = vmatprep.subr.msk.mxu1 %vm12233_vm14, %v12208_v38 }
 0xf38   : > { %17948 = vmatmul.mubr.msk.f32.vlgmr.msra.gmra.mxu0 %vm12220_vm13, %v16519_v36  ;;  %17958 = vmatmul.mubr.msk.f32.vlgmr.msra.gmra.mxu1 %vm12220_vm13, %v16528_v37 }
 0xf39   : > { %17964 = vmatpush3.msk.msra.mxu0 %vm12233_vm14, %v12206_v32  ;;  %17974 = vmatpush3.msk.msra.mxu1 %vm12233_vm14, %v12208_v38 }
 0xf3a   : > { %17965 = vmatprep.subr.mxu0 %v12200_v22  ;;  %17975 = vmatprep.subr.mxu1 %v12202_v25 }
 0xf3b   : > { %17966 = vmatpush3.msra.mxu0 %v12200_v22  ;;  %17976 = vmatpush3.msra.mxu1 %v12202_v25 }
 0xf3c   : > { %17950 = vmatprep.mubr.msk.f32.mxu0 %vm12220_vm13, %v16520_v39  ;;  %17960 = vmatprep.mubr.msk.f32.mxu1 %vm12220_vm13, %v16529_v41 }
 0xf3d   : > { %17951 = vmatmul.mubr.msk.f32.gmra.mxu0 %vm12220_vm13, %v16521_v42  ;;  %17961 = vmatmul.mubr.msk.f32.gmra.mxu1 %vm12220_vm13, %v16530_v28 }
 0xf3e   : > { %17967 = vmatprep.mubr.msk.f32.mxu0 %vm12220_vm13, %v16536_v7  ;;  %17977 = vmatprep.mubr.msk.f32.mxu1 %vm12220_vm13, %v16545_v43 }
 0xf3f   : > { %13587 = vmatprep.subr.mxu0 %v13536_v48  ;;  %13676 = vmatprep.subr.mxu1 %v13538_v49 }
 0xf41   : > { %17968 = vmatmul.mubr.msk.f32.vlgmr.msra.gmra.mxu0 %vm12220_vm13, %v16537_v40  ;;  %17978 = vmatmul.mubr.msk.f32.vlgmr.msra.gmra.mxu1 %vm12220_vm13, %v16546_v44 }
 0xf42   : > { %17970 = vmatprep.mubr.msk.f32.mxu0 %vm12220_vm13, %v16538_v45  ;;  %17980 = vmatprep.mubr.msk.f32.mxu1 %vm12220_vm13, %v16547_v46 }
 0xf43   : > { %13588 = vmatpush1.msra.mxu0 %v13535_v50  ;;  %13677 = vmatpush1.msra.mxu1 %v13537_v52 }
 0xf44   : > { %13589 = vmatprep.subr.mxu0 %v13524_v54  ;;  %13678 = vmatprep.subr.mxu1 %v13526_v58 }
 0xf45   : > { %17971 = vmatmul.mubr.msk.f32.gmra.mxu0 %vm12220_vm13, %v16539_v24  ;;  %17981 = vmatmul.mubr.msk.f32.gmra.mxu1 %vm12220_vm13, %v16548_v26 }
 0xf46   : > { %13623 = vmatprep.mubr.f32.mxu0 %v19290_v0  ;;  %13712 = vmatprep.mubr.f32.mxu1 %v19290_v0 }
 0xf47   : > { %13590 = vmatpush1.msra.mxu0 %v13523_v47  ;;  %13679 = vmatpush1.msra.mxu1 %v13525_v59 }
 0xf48   : > { %13765 = vmatprep.subr.mxu0 %v13540_v56  ;;  %13854 = vmatprep.subr.mxu1 %v13542_v61 }
 0xfd0   : > { %v17879_v62 = vpop.f32.mrf.mxu1 }
 0xfd1   : > { %v17869_v1 = vpop.f32.mrf.mxu0 }
 0xfd2   : > { %v12403_v2 = vpop.f32.mrf.mxu1  ;;  %v12409_v18 = vadd.f32 %v17879_v62, %v17869_v1 }
 0xfd3   : > { %v12303_v3 = vpop.f32.mrf.mxu0 }
 0xfd4   : > { %v12404_v19 = vadd.f32 %v12403_v2, %v12303_v3 }
 0xfd6   : > { %v17872_v60 = vpop.f32.mrf.mxu0  ;;  %v17882_v4 = vpop.f32.mrf.mxu1 }
 0xfd7   : > { %v12419_v33 = vadd.f32 %v17882_v4, %v17872_v60 }
 0xfd8   : > { %v12313_v63 = vpop.f32.mrf.mxu0  ;;  %v12413_v55 = vpop.f32.mrf.mxu1 }
 0xfd9   : > { %v12414_v57 = vadd.f32 %v12413_v55, %v12313_v63 }
 0xfda   : > { %v17889_v5 = vpop.f32.mrf.mxu0  ;;  %v17899_v51 = vpop.f32.mrf.mxu1 }
 0xfdb   : > { %v12528_v22 = vadd.f32 %v17889_v5, %v12409_v18 }
 0xfdc   : > { %v12508_v53 = vpop.f32.mrf.mxu0  ;;  %v12617_v6 = vpop.f32.mrf.mxu1 }
 0xfdd   : > { %v12527_v27 = vadd.f32 %v12508_v53, %v12404_v19  ;;  %v12637_v29 = vadd.f32 %v17899_v51, %v12528_v22  ;;  %v16554_v19 = vld [vmem:[#allocation31] ss:$0 sm:$0xff] }
 0xfde   : > { %v17892_v9 = vpop.f32.mrf.mxu0 }
 0xfdf   : > { %v17902_v10 = vpop.f32.mrf.mxu1  ;;  %v12636_v30 = vadd.f32 %v12617_v6, %v12527_v27  ;;  %v12530_v39 = vadd.f32 %v17892_v9, %v12419_v33  ;;  %v13529_v33 = vld [vmem:[#allocation33 + $0x30] sm:$0xff] }
 0xfe0   : > { %v12518_v13 = vpop.f32.mrf.mxu0 }
 0xfe1   : > { %v12627_v14 = vpop.f32.mrf.mxu1  ;;  %v12529_v31 = vadd.f32 %v12518_v13, %v12414_v57  ;;  %v12639_v44 = vadd.f32 %v17902_v10, %v12530_v39  ;;  %v13541_v57 = vld [vmem:[#allocation33 + $0x90] sm:$0xff] }
 0xfe3   : > { %v12638_v41 = vadd.f32 %v12627_v14, %v12529_v31 }
 0xfe5   : > { %v17909_v15 = vpop.f32.mrf.mxu0  ;;  %v17919_v35 = vpop.f32.mrf.mxu1 }
 0xfe6   : > { %v12746_v34 = vadd.f32 %v17909_v15, %v12637_v29  ;;  %v13530_v29 = vld [vmem:[#allocation33 + $0x38] sm:$0xff] }
 0xfe7   : > { %v12726_v16 = vpop.f32.mrf.mxu0  ;;  %v12835_v17 = vpop.f32.mrf.mxu1 }
 0xfe8   : > { %v12745_v36 = vadd.f32 %v12726_v16, %v12636_v30  ;;  %v12855_v7 = vadd.f32 %v17919_v35, %v12746_v34  ;;  %v13544_v34 = vld [vmem:[#allocation33 + $0xa8] sm:$0xff] }
 0xfea   : > { %v17912_v20 = vpop.f32.mrf.mxu0  ;;  %v17922_v21 = vpop.f32.mrf.mxu1  ;;  %v12854_v43 = vadd.f32 %v12835_v17, %v12745_v36  ;;  %v13546_v36 = vld [vmem:[#allocation33 + $0xb8] sm:$0xff] }
 0xfeb   : > { %v12748_v48 = vadd.f32 %v17912_v20, %v12639_v44 }
 0xfec   : > { %v12736_v8 = vpop.f32.mrf.mxu0  ;;  %v12845_v11 = vpop.f32.mrf.mxu1 }
 0xfed   : > { %v12747_v40 = vadd.f32 %v12736_v8, %v12638_v41  ;;  %v12857_v61 = vadd.f32 %v17922_v21, %v12748_v48  ;;  %v13543_v41 = vld [vmem:[#allocation33 + $0xa0] sm:$0xff] }
 0xfee   : > { %v17929_v12 = vpop.f32.mrf.mxu0  ;;  %v17939_v25 = vpop.f32.mrf.mxu1 }
 0xfef   : > { %v12964_v45 = vadd.f32 %v17929_v12, %v12855_v7  ;;  %v12856_v49 = vadd.f32 %v12845_v11, %v12747_v40  ;;  %v13539_v11 = vld [vmem:[#allocation33 + $0x80] sm:$0xff]  ;;  %v13534_v7 = vld [vmem:[#allocation33 + $0x58] sm:$0xff]  ;;  %v13533_v40 = vld [vmem:[#allocation33 + $0x50] sm:$0xff] }
 0xff0   : > { %v12944_v23 = vpop.f32.mrf.mxu0  ;;  %v13053_v32 = vpop.f32.mrf.mxu1 }
 0xff1   : > { %v12963_v46 = vadd.f32 %v12944_v23, %v12854_v43  ;;  %v13073_v54 = vadd.f32 %v17939_v25, %v12964_v45  ;;  %v13528_v25 = vld [vmem:[#allocation33 + $0x28] sm:$0xff]  ;;  %v13531_v43 = vld [vmem:[#allocation33 + $0x40] sm:$0xff] }
 0xff3   : > { %v17932_v37 = vpop.f32.mrf.mxu0  ;;  %v17942_v38 = vpop.f32.mrf.mxu1  ;;  %v13072_v58 = vadd.f32 %v13053_v32, %v12963_v46  ;;  %v13527_v32 = vld [vmem:[#allocation33 + $0x20] sm:$0xff] }
 0xff4   : > { %v12966_v60 = vadd.f32 %v17932_v37, %v12857_v61 }
 0xff5   : > { %v12954_v42 = vpop.f32.mrf.mxu0  ;;  %v13063_v28 = vpop.f32.mrf.mxu1 }
 0xff6   : > { %v12965_v47 = vadd.f32 %v12954_v42, %v12856_v49  ;;  %v13075_v10 = vadd.f32 %v17942_v38, %v12966_v60  ;;  %v13545_v42 = vld [vmem:[#allocation33 + $0xb0] sm:$0xff] }
 0xff8   : > { %v17949_v24 = vpop.f32.mrf.mxu0  ;;  %v17959_v26 = vpop.f32.mrf.mxu1  ;;  %v13074_v4 = vadd.f32 %v13063_v28, %v12965_v47  ;;  %v13532_v28 = vld [vmem:[#allocation33 + $0x48] sm:$0xff] }
 0xff9   : > { %v13182_v62 = vadd.f32 %v17949_v24, %v13073_v54 }
 0xffa   : > { %v13162_v50 = vpop.f32.mrf.mxu0  ;;  %v13271_v52 = vpop.f32.mrf.mxu1 }
 0xffb   : > { %v13181_v1 = vadd.f32 %v13162_v50, %v13072_v58  ;;  %v13291_v5 = vadd.f32 %v17959_v26, %v13182_v62  ;;  %v14093_v62 = vld [vmem:[%s19440_s14] sm:$0xff] }
 0xffd   : > { %v17952_v59 = vpop.f32.mrf.mxu0  ;;  %v17962_v56 = vpop.f32.mrf.mxu1  ;;  %v13290_v51 = vadd.f32 %v13271_v52, %v13181_v1  ;;  %v16579_v1 = vld [vmem:[%s19440_s14 + $0x38] sm:$0xff] }
 0xffe   : > { %v13184_v16 = vadd.f32 %v17952_v59, %v13075_v10  ;;  %v14097_v10 = vld [vmem:[%s19440_s14 + $0x20] sm:$0xff] }
 0xfff   : > { %v13172_v2 = vpop.f32.mrf.mxu0  ;;  %v13281_v3 = vpop.f32.mrf.mxu1 }
0x1000   : > { %v13183_v53 = vadd.f32 %v13172_v2, %v13074_v4  ;;  %v13293_v12 = vadd.f32 %v17962_v56, %v13184_v16  ;;  %v16580_v4 = vld [vmem:[%s19440_s14 + $0x40] sm:$0xff] }
0x1001   : > { %v17969_v63 = vpop.f32.mrf.mxu0  ;;  %v17979_v55 = vpop.f32.mrf.mxu1 }
0x1002   : > { %v13400_v13 = vadd.f32 %v17969_v63, %v13291_v5  ;;  %v13292_v17 = vadd.f32 %v13281_v3, %v13183_v53  ;;  %v14094_v3 = vld [vmem:[%s19440_s14 + $0x8] sm:$0xff]  ;;  %v14096_v53 = vld [vmem:[%s19440_s14 + $0x18] sm:$0xff] }
0x1003   : > { %v13380_v6 = vpop.f32.mrf.mxu0  ;;  %v13489_v9 = vpop.f32.mrf.mxu1  ;;  %v16581_v5 = vld [vmem:[%s19440_s14 + $0x48] sm:$0xff] }
0x1004   : > { %v13399_v14 = vadd.f32 %v13380_v6, %v13290_v51  ;;  %v13509_v21 = vadd.f32 %v17979_v55, %v13400_v13  ;;  %v14095_v55 = vld [vmem:[%s19440_s14 + $0x10] sm:$0xff]  ;;  %v16583_v13 = vld [vmem:[%s19440_s14 + $0x58] sm:$0xff] }
0x1005   : > { %v17972_v15 = vpop.f32.mrf.mxu0  ;;  %v17982_v35 = vpop.f32.mrf.mxu1  ;;  %v16582_v6 = vld [vmem:[%s19440_s14 + $0x50] sm:$0xff] }
0x1006   : > { %v13508_v18 = vadd.f32 %v13489_v9, %v13399_v14  ;;  %v21095_v30 = vadd.f32 %v16554_v19, %v13509_v21  ;;  %v13402_v31 = vadd.f32 %v17972_v15, %v13293_v12  ;;  %v14098_v15 = vld [vmem:[%s19440_s14 + $0x28] sm:$0xff]  ;;  %v16602_v21 = vld [vmem:[%s19440_s14 + $0x70] sm:$0xff]  ;;  %v16619_v12 = vld [vmem:[%s19440_s14 + $0xb8] sm:$0xff] }
0x1007   : > { %v13390_v20 = vpop.f32.mrf.mxu0  ;;  %v13499_v8 = vpop.f32.mrf.mxu1 }
0x1008   : > { %v21087_v22 = vadd.f32 %v16554_v19, %v13508_v18  ;;  %v13401_v27 = vadd.f32 %v13390_v20, %v13292_v17  ;;  %v13511_v37 = vadd.f32 %v17982_v35, %v13402_v31  ;;  %v16584_v35 = vld [vmem:[%s19440_s14 + $0x60] sm:$0xff]  ;;  %v14099_v17 = vld [vmem:[%s19440_s14 + $0x30] sm:$0xff]  ;;  %v16585_v18 = vld [vmem:[%s19440_s14 + $0x68] sm:$0xff] }
0x1009   : > { %v16617_v20 = vld [vmem:[%s19440_s14 + $0xa8] sm:$0xff] }
0x100a   : > { %16555 = vmatmul.mubr.msk.f32.vlgmr.msra.gmra.mxu0 %vm3190_vm2, %v21087_v22  ;;  %16559 = vmatmul.mubr.msk.f32.vlgmr.msra.gmra.mxu1 %vm3190_vm2, %v21087_v22  ;;  %v13510_v23 = vadd.f32 %v13499_v8, %v13401_v27  ;;  %v13522_v39 = vadd.f32 %v16554_v19, %v13511_v37  ;;  %v16618_v8 = vld [vmem:[%s19440_s14 + $0xb0] sm:$0xff]  ;;  %v16605_v31 = vld [vmem:[%s19440_s14 + $0x88] sm:$0xff]  ;;  %v16607_v37 = vld [vmem:[%s19440_s14 + $0x98] sm:$0xff] }
0x100b   : > { %13629 = vmatprep.mubr.f32.mxu0 %v19290_v0  ;;  %13718 = vmatprep.mubr.f32.mxu1 %v19290_v0 }
0x100c   : > { %13766 = vmatpush1.msra.mxu0 %v13539_v11  ;;  %13855 = vmatpush1.msra.mxu1 %v13541_v57  ;;  %v13521_v38 = vadd.f32 %v16554_v19, %v13510_v23  ;;  %v16603_v11 = vld [vmem:[%s19440_s14 + $0x78] sm:$0xff] }
0x100d   : > { %13767 = vmatprep.subr.mxu0 %v13528_v25  ;;  %13856 = vmatprep.subr.mxu1 %v13530_v29  ;;  %v16604_v25 = vld [vmem:[%s19440_s14 + $0x80] sm:$0xff] }
0x100e   : > { %16556 = vmatmul.mubr.msk.f32.gmra.mxu0 %vm3190_vm2, %v21095_v30  ;;  %16560 = vmatmul.mubr.msk.f32.gmra.mxu1 %vm3190_vm2, %v21095_v30 }
0x100f   : > { %13635 = vmatprep.mubr.f32.mxu0 %v19290_v0  ;;  %13724 = vmatprep.mubr.f32.mxu1 %v19290_v0 }
0x1010   : > { %13768 = vmatpush1.msra.mxu0 %v13527_v32  ;;  %13857 = vmatpush1.msra.mxu1 %v13529_v33  ;;  %v16621_v32 = vld [vmem:[%s19440_s14 + $0xc8] sm:$0xff]  ;;  %v16606_v33 = vld [vmem:[%s19440_s14 + $0x90] sm:$0xff] }
0x1011   : > { %13943 = vmatprep.subr.mxu0 %v13544_v34  ;;  %14032 = vmatprep.subr.mxu1 %v13546_v36  ;;  %v16622_v36 = vld [vmem:[%s19440_s14 + $0xd0] sm:$0xff] }
0x1012   : > { %16557 = vmatmul.mubr.msk.f32.gmra.mxu0 %vm3190_vm2, %v13521_v38  ;;  %16561 = vmatmul.mubr.msk.f32.gmra.mxu1 %vm3190_vm2, %v13521_v38 }
0x1013   : > { %13641 = vmatprep.mubr.f32.mxu0 %v19290_v0  ;;  %13730 = vmatprep.mubr.f32.mxu1 %v19290_v0 }
0x1016   : > { %16558 = vmatmul.mubr.msk.f32.gmra.mxu0 %vm3190_vm2, %v13522_v39  ;;  %16562 = vmatmul.mubr.msk.f32.gmra.mxu1 %vm3190_vm2, %v13522_v39 }
0x1017   : > { %13801 = vmatprep.mubr.f32.mxu0 %v19290_v0  ;;  %13890 = vmatprep.mubr.f32.mxu1 %v19290_v0 }
0x101a   : > { %16563 = vmatmul.mubr.msk.f32.vlgmr.msra.gmra.mxu0 %vm3190_vm2, %v21087_v22  ;;  %16567 = vmatmul.mubr.msk.f32.vlgmr.msra.gmra.mxu1 %vm3190_vm2, %v21087_v22 }
0x101b   : > { %13807 = vmatprep.mubr.f32.mxu0 %v19290_v0  ;;  %13896 = vmatprep.mubr.f32.mxu1 %v19290_v0 }
0x101c   : > { %13944 = vmatpush1.msra.mxu0 %v13543_v41  ;;  %14033 = vmatpush1.msra.mxu1 %v13545_v42  ;;  %v16608_v41 = vld [vmem:[%s19440_s14 + $0xa0] sm:$0xff] }
0x101d   : > { %13945 = vmatprep.subr.mxu0 %v13532_v28  ;;  %14034 = vmatprep.subr.mxu1 %v13534_v7  ;;  %v16647_v28 = vld [vmem:[%s19440_s14 + $0x118] sm:$0xff]  ;;  %v16632_v7 = vld [vmem:[%s19440_s14 + $0xe0] sm:$0xff] }
0x101e   : > { %16564 = vmatmul.mubr.msk.f32.gmra.mxu0 %vm3190_vm2, %v21095_v30  ;;  %16568 = vmatmul.mubr.msk.f32.gmra.mxu1 %vm3190_vm2, %v21095_v30 }
0x101f   : > { %13813 = vmatprep.mubr.f32.mxu0 %v19290_v0  ;;  %13902 = vmatprep.mubr.f32.mxu1 %v19290_v0 }
0x1020   : > { %13946 = vmatpush1.msra.mxu0 %v13531_v43  ;;  %14035 = vmatpush1.msra.mxu1 %v13533_v40 }
0x1021   : > { %18012 = vmatprep.subr.mxu1 %v19290_v0  ;;  %17983 = vmatprep.subr.mxu0 %v19290_v0 }
0x1022   : > { %16565 = vmatmul.mubr.msk.f32.gmra.mxu0 %vm3190_vm2, %v13521_v38  ;;  %16569 = vmatmul.mubr.msk.f32.gmra.mxu1 %vm3190_vm2, %v13521_v38 }
0x1023   : > { %13819 = vmatprep.mubr.f32.mxu0 %v19290_v0  ;;  %13908 = vmatprep.mubr.f32.mxu1 %v19290_v0 }
0x1026   : > { %16566 = vmatmul.mubr.msk.f32.gmra.mxu0 %vm3190_vm2, %v13522_v39  ;;  %16570 = vmatmul.mubr.msk.f32.gmra.mxu1 %vm3190_vm2, %v13522_v39 }
0x1027   : > { %13979 = vmatprep.mubr.f32.mxu0 %v19290_v0  ;;  %14068 = vmatprep.mubr.f32.mxu1 %v19290_v0 }
0x102a   : > { %16571 = vmatmul.mubr.msk.f32.vlgmr.msra.gmra.mxu0 %vm3190_vm2, %v21087_v22  ;;  %16575 = vmatmul.mubr.msk.f32.vlgmr.msra.gmra.mxu1 %vm3190_vm2, %v21087_v22 }
0x102b   : > { %13985 = vmatprep.mubr.f32.mxu0 %v19290_v0  ;;  %14074 = vmatprep.mubr.f32.mxu1 %v19290_v0 }
0x102e   : > { %16572 = vmatmul.mubr.msk.f32.gmra.mxu0 %vm3190_vm2, %v21095_v30  ;;  %16576 = vmatmul.mubr.msk.f32.gmra.mxu1 %vm3190_vm2, %v21095_v30  ;;  %v16620_v30 = vld [vmem:[%s19440_s14 + $0xc0] sm:$0xff] }
0x102f   : > { %13991 = vmatprep.mubr.f32.mxu0 %v19290_v0  ;;  %14080 = vmatprep.mubr.f32.mxu1 %v19290_v0 }
0x1032   : > { %16573 = vmatmul.mubr.msk.f32.gmra.mxu0 %vm3190_vm2, %v13521_v38  ;;  %16577 = vmatmul.mubr.msk.f32.gmra.mxu1 %vm3190_vm2, %v13521_v38 }
0x1033   : > { %13997 = vmatprep.mubr.f32.mxu0 %v19290_v0  ;;  %14086 = vmatprep.mubr.f32.mxu1 %v19290_v0 }
0x1036   : > { %16574 = vmatmul.mubr.msk.f32.gmra.mxu0 %vm3190_vm2, %v13522_v39  ;;  %16578 = vmatmul.mubr.msk.f32.gmra.mxu1 %vm3190_vm2, %v13522_v39  ;;  %v16623_v39 = vld [vmem:[%s19440_s14 + $0xd8] sm:$0xff] }
0x1037   : > { %18020 = vmatprep.mubr.msk.f32.mxu1 %vm19291_vm6, %v19290_v0  ;;  %17991 = vmatprep.mubr.msk.f32.mxu0 %vm19291_vm6, %v19290_v0 }
0x10ca   : > { %v13625_v44 = vpop.f32.mrf.mxu0  ;;  %v21155_v45 = vpop.f32.mrf.mxu1 }
0x10cc   : > { %v13627_v46 = vpop.f32.mrf.mxu0  ;;  %v13716_v24 = vpop.f32.mrf.mxu1 }
0x10ce   : > { %v13631_v26 = vpop.f32.mrf.mxu0  ;;  %v13720_v48 = vpop.f32.mrf.mxu1 }
0x10d0   : > { %v13633_v49 = vpop.f32.mrf.mxu0  ;;  %v13722_v50 = vpop.f32.mrf.mxu1 }
0x10d2   : > { %v13637_v52 = vpop.f32.mrf.mxu0  ;;  %v13726_v54 = vpop.f32.mrf.mxu1 }
0x10d4   : > { %v13639_v58 = vpop.f32.mrf.mxu0  ;;  %v13728_v59 = vpop.f32.mrf.mxu1 }
0x10d6   : > { %v13643_v47 = vpop.f32.mrf.mxu0  ;;  %v13732_v61 = vpop.f32.mrf.mxu1 }
0x10d7   : > { %18013 = vmatpush3.msk.msra.mxu1 %vm14130_vm15, %v13643_v47 }
0x10d8   : > { %v13645_v56 = vpop.f32.mrf.mxu0  ;;  %18014 = vmatprep.subr.mxu1 %v19290_v0  ;;  %v13734_v2 = vpop.f32.mrf.mxu1 }
0x10d9   : > { %17984 = vmatpush3.msk.msra.mxu0 %vm14130_vm15, %v13645_v56  ;;  %18015 = vmatpush3.msra.mxu1 %v13637_v52  ;;  %v16637_v56 = vld [vmem:[%s19440_s14 + $0x108] sm:$0xff] }
0x10da   : > { %17985 = vmatprep.subr.mxu0 %v19290_v0  ;;  %18016 = vmatprep.subr.mxu1 %v19290_v0  ;;  %v21174_v60 = vpop.f32.mrf.mxu0  ;;  %v21244_v27 = vpop.f32.mrf.mxu1 }
0x10db   : > { %17986 = vmatpush3.msra.mxu0 %v13639_v58  ;;  %18017 = vmatpush3.msra.mxu1 %v13631_v26  ;;  %v16634_v26 = vld [vmem:[%s19440_s14 + $0xf0] sm:$0xff]  ;;  %v16636_v58 = vld [vmem:[%s19440_s14 + $0x100] sm:$0xff] }
0x10dc   : > { %17987 = vmatprep.subr.mxu0 %v19290_v0  ;;  %18018 = vmatprep.subr.mxu1 %v19290_v0  ;;  %v21185_v63 = vpop.f32.mrf.mxu0  ;;  %v21254_v57 = vpop.f32.mrf.mxu1 }
0x10dd   : > { %17988 = vmatpush3.msra.mxu0 %v13633_v49  ;;  %18019 = vmatpush3.msra.mxu1 %v13625_v44  ;;  %v16648_v44 = vld [vmem:[%s19440_s14 + $0x120] sm:$0xff]  ;;  %v16650_v49 = vld [vmem:[%s19440_s14 + $0x130] sm:$0xff] }
0x10de   : > { %17989 = vmatprep.subr.mxu0 %v19290_v0  ;;  %18021 = vmatmul.mubr.msk.f32.vlgmr.msra.gmra.mxu1 %vm14108_vm0, %v14093_v62  ;;  %v13809_v51 = vpop.f32.mrf.mxu0  ;;  %v13898_v29 = vpop.f32.mrf.mxu1  ;;  %v16653_v62 = vld [vmem:[%s19440_s14 + $0x148] sm:$0xff] }
0x10df   : > { %18070 = vmatprep.subr.mxu1 %v19290_v0  ;;  %17990 = vmatpush3.msra.mxu0 %v13627_v46 }
0x10e0   : > { %18071 = vmatpush3.msk.msra.mxu1 %vm14130_vm15, %v13734_v2  ;;  %17992 = vmatmul.mubr.msk.f32.vlgmr.msra.gmra.mxu0 %vm14108_vm0, %v16579_v1  ;;  %v13811_v9 = vpop.f32.mrf.mxu0  ;;  %v13900_v23 = vpop.f32.mrf.mxu1  ;;  %v16638_v1 = vld [vmem:[%s19440_s14 + $0x110] sm:$0xff] }
0x10e1   : > { %18041 = vmatprep.subr.mxu0 %v19290_v0  ;;  %18072 = vmatprep.subr.mxu1 %v19290_v0 }
0x10e2   : > { %18023 = vmatprep.mubr.msk.f32.mxu1 %vm19291_vm6, %v19290_v0  ;;  %18042 = vmatpush3.msk.msra.mxu0 %vm14130_vm15, %v13732_v61  ;;  %v13815_v14 = vpop.f32.mrf.mxu0  ;;  %v13904_v34 = vpop.f32.mrf.mxu1 }
0x10e3   : > { %18073 = vmatpush3.msra.mxu1 %v13728_v59  ;;  %18043 = vmatprep.subr.mxu0 %v19290_v0  ;;  %v16652_v59 = vld [vmem:[%s19440_s14 + $0x140] sm:$0xff] }
0x10e4   : > { %18024 = vmatmul.mubr.msk.f32.gmra.mxu1 %vm14108_vm0, %v14094_v3  ;;  %18074 = vmatprep.subr.mxu1 %v19290_v0  ;;  %v13817_v16 = vpop.f32.mrf.mxu0  ;;  %v13906_v38 = vpop.f32.mrf.mxu1  ;;  %v16677_v3 = vld [vmem:[%s19440_s14 + $0x188] sm:$0xff] }
0x10e5   : > { %17994 = vmatprep.mubr.msk.f32.mxu0 %vm19291_vm6, %v19290_v0  ;;  %18044 = vmatpush3.msra.mxu0 %v13726_v54  ;;  %v16651_v54 = vld [vmem:[%s19440_s14 + $0x138] sm:$0xff] }
0x10e6   : > { %18075 = vmatpush3.msra.mxu1 %v13722_v50  ;;  %17995 = vmatmul.mubr.msk.f32.gmra.mxu0 %vm14108_vm0, %v16580_v4  ;;  %v13821_v19 = vpop.f32.mrf.mxu0  ;;  %v13910_v42 = vpop.f32.mrf.mxu1  ;;  %v16635_v50 = vld [vmem:[%s19440_s14 + $0xf8] sm:$0xff] }
0x10e7   : > { %18045 = vmatprep.subr.mxu0 %v19290_v0  ;;  %18076 = vmatprep.subr.mxu1 %v19290_v0 }
0x10e8   : > { %18026 = vmatprep.mubr.msk.f32.mxu1 %vm19291_vm6, %v19290_v0  ;;  %18046 = vmatpush3.msra.mxu0 %v13720_v48  ;;  %v13823_v22 = vpop.f32.mrf.mxu0  ;;  %v13912_v43 = vpop.f32.mrf.mxu1 }
0x10e9   : > { %18077 = vmatpush3.msra.mxu1 %v13716_v24  ;;  %18047 = vmatprep.subr.mxu0 %v19290_v0  ;;  %v16649_v24 = vld [vmem:[%s19440_s14 + $0x128] sm:$0xff] }
0x10ea   : > { %18027 = vmatmul.mubr.msk.f32.gmra.mxu1 %vm14108_vm0, %v14095_v55  ;;  %17997 = vmatprep.mubr.msk.f32.mxu0 %vm19291_vm6, %v19290_v0  ;;  %v21316_v40 = vpop.f32.mrf.mxu0  ;;  %v16678_v55 = vld [vmem:[%s19440_s14 + $0x190] sm:$0xff] }
0x10eb   : > { %18048 = vmatpush3.msra.mxu0 %v21155_v45  ;;  %18029 = vmatprep.mubr.msk.f32.mxu1 %vm19291_vm6, %v19290_v0  ;;  %v16633_v45 = vld [vmem:[%s19440_s14 + $0xe8] sm:$0xff] }
0x10ec   : > { %17998 = vmatmul.mubr.msk.f32.gmra.mxu0 %vm14108_vm0, %v16581_v5  ;;  %18128 = vmatprep.subr.mxu1 %v19290_v0  ;;  %v21326_v46 = vpop.f32.mrf.mxu0  ;;  %v16663_v5 = vld [vmem:[%s19440_s14 + $0x158] sm:$0xff] }
0x10ed   : > { %18000 = vmatprep.mubr.msk.f32.mxu0 %vm19291_vm6, %v19290_v0  ;;  %18099 = vmatprep.subr.mxu0 %v19290_v0 }
0x10ee   : > { %18030 = vmatmul.mubr.msk.f32.gmra.mxu1 %vm14108_vm0, %v14096_v53  ;;  %v13987_v48 = vpop.f32.mrf.mxu0  ;;  %v16679_v53 = vld [vmem:[%s19440_s14 + $0x198] sm:$0xff] }
0x10ef   : > { %18032 = vmatprep.mubr.msk.f32.mxu1 %vm19291_vm6, %v19290_v0 }
0x10f0   : > { %18001 = vmatmul.mubr.msk.f32.gmra.mxu0 %vm14108_vm0, %v16582_v6  ;;  %v13989_v52 = vpop.f32.mrf.mxu0  ;;  %v16664_v6 = vld [vmem:[%s19440_s14 + $0x160] sm:$0xff] }
0x10f1   : > { %18003 = vmatprep.mubr.msk.f32.mxu0 %vm19291_vm6, %v19290_v0 }
0x10f2   : > { %18033 = vmatmul.mubr.msk.f32.gmra.mxu1 %vm14108_vm0, %v14097_v10  ;;  %v13993_v47 = vpop.f32.mrf.mxu0  ;;  %v16680_v10 = vld [vmem:[%s19440_s14 + $0x1a0] sm:$0xff] }
0x10f3   : > { %18035 = vmatprep.mubr.msk.f32.mxu1 %vm19291_vm6, %v19290_v0 }
0x10f4   : > { %18004 = vmatmul.mubr.msk.f32.gmra.mxu0 %vm14108_vm0, %v16583_v13  ;;  %v13995_v61 = vpop.f32.mrf.mxu0  ;;  %v16665_v13 = vld [vmem:[%s19440_s14 + $0x168] sm:$0xff] }
0x10f5   : > { %18006 = vmatprep.mubr.msk.f32.mxu0 %vm19291_vm6, %v19290_v0 }
0x10f6   : > { %18036 = vmatmul.mubr.msk.f32.gmra.mxu1 %vm14108_vm0, %v14098_v15  ;;  %v13999_v2 = vpop.f32.mrf.mxu0  ;;  %v16681_v15 = vld [vmem:[%s19440_s14 + $0x1a8] sm:$0xff] }
0x10f7   : > { %18038 = vmatprep.mubr.msk.f32.mxu1 %vm19291_vm6, %v19290_v0 }
0x10f8   : > { %18007 = vmatmul.mubr.msk.f32.gmra.mxu0 %vm14108_vm0, %v16584_v35  ;;  %v14001_v4 = vpop.f32.mrf.mxu0  ;;  %v16666_v35 = vld [vmem:[%s19440_s14 + $0x170] sm:$0xff] }
0x10f9   : > { %18009 = vmatprep.mubr.msk.f32.mxu0 %vm19291_vm6, %v19290_v0 }
0x10fa   : > { %18039 = vmatmul.mubr.msk.f32.gmra.mxu1 %vm14108_vm0, %v14099_v17  ;;  %v16682_v17 = vld [vmem:[%s19440_s14 + $0x1b0] sm:$0xff] }
0x10fb   : > { %18078 = vmatprep.mubr.msk.f32.mxu1 %vm19291_vm6, %v19290_v0 }
0x10fc   : > { %18010 = vmatmul.mubr.msk.f32.gmra.mxu0 %vm14108_vm0, %v16585_v18  ;;  %v16667_v18 = vld [vmem:[%s19440_s14 + $0x178] sm:$0xff] }
0x10fd   : > { %18049 = vmatprep.mubr.msk.f32.mxu0 %vm19291_vm6, %v19290_v0 }
0x10fe   : > { %18079 = vmatmul.mubr.msk.f32.vlgmr.msra.gmra.mxu1 %vm14108_vm0, %v16617_v20  ;;  %v16683_v20 = vld [vmem:[%s19440_s14 + $0x1b8] sm:$0xff] }
0x10ff   : > { %18129 = vmatpush3.msk.msra.mxu1 %vm14130_vm15, %v13823_v22  ;;  %18081 = vmatprep.mubr.msk.f32.mxu1 %vm19291_vm6, %v19290_v0 }
0x1100   : > { %18130 = vmatprep.subr.mxu1 %v19290_v0  ;;  %18050 = vmatmul.mubr.msk.f32.vlgmr.msra.gmra.mxu0 %vm14108_vm0, %v16602_v21  ;;  %v16668_v21 = vld [vmem:[%s19440_s14 + $0x180] sm:$0xff] }
0x1101   : > { %18100 = vmatpush3.msk.msra.mxu0 %vm14130_vm15, %v13821_v19  ;;  %18131 = vmatpush3.msra.mxu1 %v13817_v16 }
0x1102   : > { %18101 = vmatprep.subr.mxu0 %v19290_v0  ;;  %18132 = vmatprep.subr.mxu1 %v19290_v0 }
0x1103   : > { %18082 = vmatmul.mubr.msk.f32.gmra.mxu1 %vm14108_vm0, %v16618_v8  ;;  %18102 = vmatpush3.msra.mxu0 %v13815_v14  ;;  %v16692_v8 = vld [vmem:[%s19440_s14 + $0x1c0] sm:$0xff] }
0x1104   : > { %18133 = vmatpush3.msra.mxu1 %v13811_v9  ;;  %18052 = vmatprep.mubr.msk.f32.mxu0 %vm19291_vm6, %v19290_v0 }
0x1105   : > { %18103 = vmatprep.subr.mxu0 %v19290_v0  ;;  %18134 = vmatprep.subr.mxu1 %v19290_v0 }
0x1106   : > { %18053 = vmatmul.mubr.msk.f32.gmra.mxu0 %vm14108_vm0, %v16603_v11  ;;  %18135 = vmatpush3.msra.mxu1 %v21185_v63  ;;  %v21388_v63 = vpop.f32.mrf.mxu1 }
0x1107   : > { %18104 = vmatpush3.msra.mxu0 %v13809_v51  ;;  %18084 = vmatprep.mubr.msk.f32.mxu1 %vm19291_vm6, %v19290_v0 }
0x1108   : > { %18105 = vmatprep.subr.mxu0 %v19290_v0  ;;  %18085 = vmatmul.mubr.msk.f32.gmra.mxu1 %vm14108_vm0, %v16619_v12  ;;  %v21398_v51 = vpop.f32.mrf.mxu1  ;;  %v16708_v12 = vld [vmem:[%s19440_s14 + $0x200] sm:$0xff] }
0x1109   : > { %18106 = vmatpush3.msra.mxu0 %v21174_v60  ;;  %18055 = vmatprep.mubr.msk.f32.mxu0 %vm19291_vm6, %v19290_v0  ;;  %v16662_v60 = vld [vmem:[%s19440_s14 + $0x150] sm:$0xff] }
0x110a   : > { %18056 = vmatmul.mubr.msk.f32.gmra.mxu0 %vm14108_vm0, %v16604_v25  ;;  %18087 = vmatprep.mubr.msk.f32.mxu1 %vm19291_vm6, %v19290_v0  ;;  %v14076_v9 = vpop.f32.mrf.mxu1  ;;  %v16694_v25 = vld [vmem:[%s19440_s14 + $0x1d0] sm:$0xff] }
0x110b   : > { %18058 = vmatprep.mubr.msk.f32.mxu0 %vm19291_vm6, %v19290_v0  ;;  %18186 = vmatprep.subr.mxu1 %v19290_v0 }
0x110c   : > { %18088 = vmatmul.mubr.msk.f32.gmra.mxu1 %vm14108_vm0, %v16620_v30  ;;  %18157 = vmatprep.subr.mxu0 %v19290_v0  ;;  %v14078_v14 = vpop.f32.mrf.mxu1  ;;  %v16695_v30 = vld [vmem:[%s19440_s14 + $0x1d8] sm:$0xff] }
0x110d   : > { %18090 = vmatprep.mubr.msk.f32.mxu1 %vm19291_vm6, %v19290_v0 }
0x110e   : > { %18059 = vmatmul.mubr.msk.f32.gmra.mxu0 %vm14108_vm0, %v16605_v31  ;;  %v14082_v16 = vpop.f32.mrf.mxu1  ;;  %v16710_v31 = vld [vmem:[%s19440_s14 + $0x210] sm:$0xff] }
0x110f   : > { %18061 = vmatprep.mubr.msk.f32.mxu0 %vm19291_vm6, %v19290_v0 }
0x1110   : > { %18091 = vmatmul.mubr.msk.f32.gmra.mxu1 %vm14108_vm0, %v16621_v32  ;;  %v14084_v19 = vpop.f32.mrf.mxu1  ;;  %v16711_v32 = vld [vmem:[%s19440_s14 + $0x218] sm:$0xff] }
0x1111   : > { %18093 = vmatprep.mubr.msk.f32.mxu1 %vm19291_vm6, %v19290_v0 }
0x1112   : > { %18062 = vmatmul.mubr.msk.f32.gmra.mxu0 %vm14108_vm0, %v16606_v33  ;;  %v14088_v22 = vpop.f32.mrf.mxu1  ;;  %v16697_v33 = vld [vmem:[%s19440_s14 + $0x1e8] sm:$0xff] }
0x1113   : > { %18064 = vmatprep.mubr.msk.f32.mxu0 %vm19291_vm6, %v19290_v0 }
0x1114   : > { %18094 = vmatmul.mubr.msk.f32.gmra.mxu1 %vm14108_vm0, %v16622_v36  ;;  %v14090_v11 = vpop.f32.mrf.mxu1  ;;  %v16698_v36 = vld [vmem:[%s19440_s14 + $0x1f0] sm:$0xff] }
0x1115   : > { %18096 = vmatprep.mubr.msk.f32.mxu1 %vm19291_vm6, %v19290_v0 }
0x1116   : > { %18065 = vmatmul.mubr.msk.f32.gmra.mxu0 %vm14108_vm0, %v16607_v37  ;;  %v16713_v37 = vld [vmem:[%s19440_s14 + $0x228] sm:$0xff] }
0x1117   : > { %18067 = vmatprep.mubr.msk.f32.mxu0 %vm19291_vm6, %v19290_v0 }
0x1118   : > { %18097 = vmatmul.mubr.msk.f32.gmra.mxu1 %vm14108_vm0, %v16623_v39  ;;  %v16737_v39 = vld [vmem:[%s19440_s14 + $0x268] sm:$0xff] }
0x1119   : > { %18136 = vmatprep.mubr.msk.f32.mxu1 %vm19291_vm6, %v19290_v0 }
0x111a   : > { %18068 = vmatmul.mubr.msk.f32.gmra.mxu0 %vm14108_vm0, %v16608_v41  ;;  %v16723_v41 = vld [vmem:[%s19440_s14 + $0x238] sm:$0xff] }
0x111b   : > { %18107 = vmatprep.mubr.msk.f32.mxu0 %vm19291_vm6, %v19290_v0 }
0x111c   : > { %18137 = vmatmul.mubr.msk.f32.vlgmr.msra.gmra.mxu1 %vm14108_vm0, %v16647_v28  ;;  %v16724_v28 = vld [vmem:[%s19440_s14 + $0x240] sm:$0xff] }
0x111d   : > { %18187 = vmatpush3.msk.msra.mxu1 %vm14130_vm15, %v13912_v43  ;;  %18139 = vmatprep.mubr.msk.f32.mxu1 %vm19291_vm6, %v19290_v0  ;;  %v16725_v43 = vld [vmem:[%s19440_s14 + $0x248] sm:$0xff] }
0x111e   : > { %18188 = vmatprep.subr.mxu1 %v19290_v0  ;;  %18108 = vmatmul.mubr.msk.f32.vlgmr.msra.gmra.mxu0 %vm14108_vm0, %v16632_v7  ;;  %v16739_v7 = vld [vmem:[%s19440_s14 + $0x278] sm:$0xff] }
0x111f   : > { %18158 = vmatpush3.msk.msra.mxu0 %vm14130_vm15, %v13910_v42  ;;  %18189 = vmatpush3.msra.mxu1 %v13906_v38  ;;  %v16722_v38 = vld [vmem:[%s19440_s14 + $0x230] sm:$0xff] }
0x1120   : > { %18159 = vmatprep.subr.mxu0 %v19290_v0  ;;  %18190 = vmatprep.subr.mxu1 %v19290_v0  ;;  %v16738_v42 = vld [vmem:[%s19440_s14 + $0x270] sm:$0xff] }
0x1121   : > { %18140 = vmatmul.mubr.msk.f32.gmra.mxu1 %vm14108_vm0, %v16648_v44  ;;  %18160 = vmatpush3.msra.mxu0 %v13904_v34  ;;  %v16712_v34 = vld [vmem:[%s19440_s14 + $0x220] sm:$0xff]  ;;  %v16726_v44 = vld [vmem:[%s19440_s14 + $0x250] sm:$0xff] }
0x1122   : > { %18191 = vmatpush3.msra.mxu1 %v13900_v23  ;;  %18110 = vmatprep.mubr.msk.f32.mxu0 %vm19291_vm6, %v19290_v0  ;;  %v16696_v23 = vld [vmem:[%s19440_s14 + $0x1e0] sm:$0xff] }
0x1123   : > { %18161 = vmatprep.subr.mxu0 %v19290_v0  ;;  %18192 = vmatprep.subr.mxu1 %v19290_v0 }
0x1124   : > { %18111 = vmatmul.mubr.msk.f32.gmra.mxu0 %vm14108_vm0, %v16633_v45  ;;  %18193 = vmatpush3.msra.mxu1 %v21254_v57  ;;  %v16693_v57 = vld [vmem:[%s19440_s14 + $0x1c8] sm:$0xff] }
0x1125   : > { %18162 = vmatpush3.msra.mxu0 %v13898_v29  ;;  %18142 = vmatprep.mubr.msk.f32.mxu1 %vm19291_vm6, %v19290_v0  ;;  %v16709_v29 = vld [vmem:[%s19440_s14 + $0x208] sm:$0xff] }
0x1126   : > { %18163 = vmatprep.subr.mxu0 %v19290_v0  ;;  %18143 = vmatmul.mubr.msk.f32.gmra.mxu1 %vm14108_vm0, %v16649_v24  ;;  %v16741_v45 = vld [vmem:[%s19440_s14 + $0x288] sm:$0xff]  ;;  %v16742_v24 = vld [vmem:[%s19440_s14 + $0x290] sm:$0xff] }
0x1127   : > { %18164 = vmatpush3.msra.mxu0 %v21244_v27  ;;  %18113 = vmatprep.mubr.msk.f32.mxu0 %vm19291_vm6, %v19290_v0  ;;  %v16707_v27 = vld [vmem:[%s19440_s14 + $0x1f8] sm:$0xff] }
0x1128   : > { %18114 = vmatmul.mubr.msk.f32.gmra.mxu0 %vm14108_vm0, %v16634_v26  ;;  %18145 = vmatprep.mubr.msk.f32.mxu1 %vm19291_vm6, %v19290_v0  ;;  %v16728_v26 = vld [vmem:[%s19440_s14 + $0x260] sm:$0xff] }
0x1129   : > { %18116 = vmatprep.mubr.msk.f32.mxu0 %vm19291_vm6, %v19290_v0  ;;  %18244 = vmatprep.subr.mxu1 %v19290_v0 }
0x112a   : > { %18146 = vmatmul.mubr.msk.f32.gmra.mxu1 %vm14108_vm0, %v16650_v49  ;;  %18215 = vmatprep.subr.mxu0 %v19290_v0 }
0x112b   : > { %18148 = vmatprep.mubr.msk.f32.mxu1 %vm19291_vm6, %v19290_v0 }
0x112c   : > { %18117 = vmatmul.mubr.msk.f32.gmra.mxu0 %vm14108_vm0, %v16635_v50 }
0x112d   : > { %18119 = vmatprep.mubr.msk.f32.mxu0 %vm19291_vm6, %v19290_v0 }
0x112e   : > { %18149 = vmatmul.mubr.msk.f32.gmra.mxu1 %vm14108_vm0, %v16651_v54 }
0x112f   : > { %18151 = vmatprep.mubr.msk.f32.mxu1 %vm19291_vm6, %v19290_v0 }
0x1130   : > { %18120 = vmatmul.mubr.msk.f32.gmra.mxu0 %vm14108_vm0, %v16636_v58 }
0x1131   : > { %18122 = vmatprep.mubr.msk.f32.mxu0 %vm19291_vm6, %v19290_v0 }
0x1132   : > { %18152 = vmatmul.mubr.msk.f32.gmra.mxu1 %vm14108_vm0, %v16652_v59 }
0x1133   : > { %18154 = vmatprep.mubr.msk.f32.mxu1 %vm19291_vm6, %v19290_v0 }
0x1134   : > { %18123 = vmatmul.mubr.msk.f32.gmra.mxu0 %vm14108_vm0, %v16637_v56 }
0x1135   : > { %18125 = vmatprep.mubr.msk.f32.mxu0 %vm19291_vm6, %v19290_v0 }
0x1136   : > { %18155 = vmatmul.mubr.msk.f32.gmra.mxu1 %vm14108_vm0, %v16653_v62 }
0x1137   : > { %18194 = vmatprep.mubr.msk.f32.mxu1 %vm19291_vm6, %v19290_v0 }
0x1138   : > { %18126 = vmatmul.mubr.msk.f32.gmra.mxu0 %vm14108_vm0, %v16638_v1 }
0x1139   : > { %18165 = vmatprep.mubr.msk.f32.mxu0 %vm19291_vm6, %v19290_v0 }
0x113a   : > { %18195 = vmatmul.mubr.msk.f32.vlgmr.msra.gmra.mxu1 %vm14108_vm0, %v16677_v3 }
0x113b   : > { %18245 = vmatpush3.msk.msra.mxu1 %vm14130_vm15, %v14001_v4  ;;  %18197 = vmatprep.mubr.msk.f32.mxu1 %vm19291_vm6, %v19290_v0 }
0x113c   : > { %18246 = vmatprep.subr.mxu1 %v19290_v0  ;;  %18166 = vmatmul.mubr.msk.f32.vlgmr.msra.gmra.mxu0 %vm14108_vm0, %v16662_v60 }
0x113d   : > { %18216 = vmatpush3.msk.msra.mxu0 %vm14130_vm15, %v13999_v2  ;;  %18247 = vmatpush3.msra.mxu1 %v13995_v61 }
0x113e   : > { %18217 = vmatprep.subr.mxu0 %v19290_v0  ;;  %18248 = vmatprep.subr.mxu1 %v19290_v0 }
0x113f   : > { %18198 = vmatmul.mubr.msk.f32.gmra.mxu1 %vm14108_vm0, %v16678_v55  ;;  %18218 = vmatpush3.msra.mxu0 %v13993_v47 }
0x1140   : > { %18249 = vmatpush3.msra.mxu1 %v13989_v52  ;;  %18168 = vmatprep.mubr.msk.f32.mxu0 %vm19291_vm6, %v19290_v0 }
0x1141   : > { %18219 = vmatprep.subr.mxu0 %v19290_v0  ;;  %18250 = vmatprep.subr.mxu1 %v19290_v0 }
0x1142   : > { %18169 = vmatmul.mubr.msk.f32.gmra.mxu0 %vm14108_vm0, %v16663_v5  ;;  %18251 = vmatpush3.msra.mxu1 %v21326_v46  ;;  %v16727_v46 = vld [vmem:[%s19440_s14 + $0x258] sm:$0xff] }
0x1143   : > { %18220 = vmatpush3.msra.mxu0 %v13987_v48  ;;  %18200 = vmatprep.mubr.msk.f32.mxu1 %vm19291_vm6, %v19290_v0  ;;  %v16743_v48 = vld [vmem:[%s19440_s14 + $0x298] sm:$0xff] }
0x1144   : > { %18221 = vmatprep.subr.mxu0 %v19290_v0  ;;  %18201 = vmatmul.mubr.msk.f32.gmra.mxu1 %vm14108_vm0, %v16679_v53 }
0x1145   : > { %18222 = vmatpush3.msra.mxu0 %v21316_v40  ;;  %18171 = vmatprep.mubr.msk.f32.mxu0 %vm19291_vm6, %v19290_v0  ;;  %v16740_v40 = vld [vmem:[%s19440_s14 + $0x280] sm:$0xff] }
0x1146   : > { %18172 = vmatmul.mubr.msk.f32.gmra.mxu0 %vm14108_vm0, %v16664_v6  ;;  %18203 = vmatprep.mubr.msk.f32.mxu1 %vm19291_vm6, %v19290_v0 }
0x1147   : > { %18174 = vmatprep.mubr.msk.f32.mxu0 %vm19291_vm6, %v19290_v0  ;;  %18302 = vmatprep.subr.mxu1 %v19290_v0 }
0x1148   : > { %18204 = vmatmul.mubr.msk.f32.gmra.mxu1 %vm14108_vm0, %v16680_v10  ;;  %18273 = vmatprep.subr.mxu0 %v19290_v0 }
0x1149   : > { %18206 = vmatprep.mubr.msk.f32.mxu1 %vm19291_vm6, %v19290_v0 }
0x114a   : > { %18175 = vmatmul.mubr.msk.f32.gmra.mxu0 %vm14108_vm0, %v16665_v13 }
0x114b   : > { %18177 = vmatprep.mubr.msk.f32.mxu0 %vm19291_vm6, %v19290_v0 }
0x114c   : > { %18207 = vmatmul.mubr.msk.f32.gmra.mxu1 %vm14108_vm0, %v16681_v15 }
0x114d   : > { %18209 = vmatprep.mubr.msk.f32.mxu1 %vm19291_vm6, %v19290_v0 }
0x114e   : > { %18178 = vmatmul.mubr.msk.f32.gmra.mxu0 %vm14108_vm0, %v16666_v35 }
0x114f   : > { %18180 = vmatprep.mubr.msk.f32.mxu0 %vm19291_vm6, %v19290_v0 }
0x1150   : > { %18210 = vmatmul.mubr.msk.f32.gmra.mxu1 %vm14108_vm0, %v16682_v17 }
0x1151   : > { %18212 = vmatprep.mubr.msk.f32.mxu1 %vm19291_vm6, %v19290_v0 }
0x1152   : > { %18181 = vmatmul.mubr.msk.f32.gmra.mxu0 %vm14108_vm0, %v16667_v18 }
0x1153   : > { %18183 = vmatprep.mubr.msk.f32.mxu0 %vm19291_vm6, %v19290_v0 }
0x1154   : > { %18213 = vmatmul.mubr.msk.f32.gmra.mxu1 %vm14108_vm0, %v16683_v20 }
0x1155   : > { %18252 = vmatprep.mubr.msk.f32.mxu1 %vm19291_vm6, %v19290_v0 }
0x1156   : > { %18184 = vmatmul.mubr.msk.f32.gmra.mxu0 %vm14108_vm0, %v16668_v21 }
0x1157   : > { %18223 = vmatprep.mubr.msk.f32.mxu0 %vm19291_vm6, %v19290_v0 }
0x1158   : > { %18253 = vmatmul.mubr.msk.f32.vlgmr.msra.gmra.mxu1 %vm14108_vm0, %v16707_v27 }
0x1159   : > { %18303 = vmatpush3.msk.msra.mxu1 %vm14130_vm15, %v14090_v11  ;;  %18255 = vmatprep.mubr.msk.f32.mxu1 %vm19291_vm6, %v19290_v0 }
0x115a   : > { %18304 = vmatprep.subr.mxu1 %v19290_v0  ;;  %18224 = vmatmul.mubr.msk.f32.vlgmr.msra.gmra.mxu0 %vm14108_vm0, %v16692_v8 }
0x115b   : > { %18274 = vmatpush3.msk.msra.mxu0 %vm14130_vm15, %v14088_v22  ;;  %18305 = vmatpush3.msra.mxu1 %v14084_v19 }
0x115c   : > { %18275 = vmatprep.subr.mxu0 %v19290_v0  ;;  %18306 = vmatprep.subr.mxu1 %v19290_v0 }
0x115d   : > { %18276 = vmatpush3.msra.mxu0 %v14082_v16  ;;  %18307 = vmatpush3.msra.mxu1 %v14078_v14 }
0x115e   : > { %18226 = vmatprep.mubr.msk.f32.mxu0 %vm19291_vm6, %v19290_v0  ;;  %18277 = vmatprep.subr.mxu0 %v19290_v0 }
0x115f   : > { %18308 = vmatprep.subr.mxu1 %v19290_v0  ;;  %18227 = vmatmul.mubr.msk.f32.gmra.mxu0 %vm14108_vm0, %v16693_v57 }
0x1160   : > { %18278 = vmatpush3.msra.mxu0 %v14076_v9  ;;  %18309 = vmatpush3.msra.mxu1 %v21398_v51 }
0x1161   : > { %18279 = vmatprep.subr.mxu0 %v19290_v0  ;;  %18256 = vmatmul.mubr.msk.f32.gmra.mxu1 %vm14108_vm0, %v16708_v12 }
0x1162   : > { %18280 = vmatpush3.msra.mxu0 %v21388_v63  ;;  %18229 = vmatprep.mubr.msk.f32.mxu0 %vm19291_vm6, %v19290_v0 }
0x1163   : > { %18230 = vmatmul.mubr.msk.f32.gmra.mxu0 %vm14108_vm0, %v16694_v25  ;;  %18258 = vmatprep.mubr.msk.f32.mxu1 %vm19291_vm6, %v19290_v0 }
0x1164   : > { %18232 = vmatprep.mubr.msk.f32.mxu0 %vm19291_vm6, %v19290_v0 }
0x1165   : > { %18259 = vmatmul.mubr.msk.f32.gmra.mxu1 %vm14108_vm0, %v16709_v29 }
0x1166   : > { %18261 = vmatprep.mubr.msk.f32.mxu1 %vm19291_vm6, %v19290_v0 }
0x1167   : > { %18233 = vmatmul.mubr.msk.f32.gmra.mxu0 %vm14108_vm0, %v16695_v30 }
0x1168   : > { %18235 = vmatprep.mubr.msk.f32.mxu0 %vm19291_vm6, %v19290_v0 }
0x1169   : > { %18262 = vmatmul.mubr.msk.f32.gmra.mxu1 %vm14108_vm0, %v16710_v31 }
0x116a   : > { %18264 = vmatprep.mubr.msk.f32.mxu1 %vm19291_vm6, %v19290_v0 }
0x116b   : > { %18236 = vmatmul.mubr.msk.f32.gmra.mxu0 %vm14108_vm0, %v16696_v23 }
0x116c   : > { %18238 = vmatprep.mubr.msk.f32.mxu0 %vm19291_vm6, %v19290_v0 }
0x116d   : > { %18265 = vmatmul.mubr.msk.f32.gmra.mxu1 %vm14108_vm0, %v16711_v32 }
0x116e   : > { %18267 = vmatprep.mubr.msk.f32.mxu1 %vm19291_vm6, %v19290_v0 }
0x116f   : > { %18239 = vmatmul.mubr.msk.f32.gmra.mxu0 %vm14108_vm0, %v16697_v33 }
0x1170   : > { %18241 = vmatprep.mubr.msk.f32.mxu0 %vm19291_vm6, %v19290_v0 }
0x1171   : > { %18268 = vmatmul.mubr.msk.f32.gmra.mxu1 %vm14108_vm0, %v16712_v34 }
0x1172   : > { %18270 = vmatprep.mubr.msk.f32.mxu1 %vm19291_vm6, %v19290_v0 }
0x1173   : > { %18242 = vmatmul.mubr.msk.f32.gmra.mxu0 %vm14108_vm0, %v16698_v36 }
0x1174   : > { %18281 = vmatprep.mubr.msk.f32.mxu0 %vm19291_vm6, %v19290_v0 }
0x1175   : > { %18271 = vmatmul.mubr.msk.f32.gmra.mxu1 %vm14108_vm0, %v16713_v37 }
0x1176   : > { %18310 = vmatprep.mubr.msk.f32.mxu1 %vm19291_vm6, %v19290_v0 }
0x1177   : > { %18282 = vmatmul.mubr.msk.f32.vlgmr.msra.gmra.mxu0 %vm14108_vm0, %v16722_v38 }
0x1178   : > { %18284 = vmatprep.mubr.msk.f32.mxu0 %vm19291_vm6, %v19290_v0 }
0x1179   : > { %18311 = vmatmul.mubr.msk.f32.vlgmr.msra.gmra.mxu1 %vm14108_vm0, %v16737_v39 }
0x117a   : > { %18313 = vmatprep.mubr.msk.f32.mxu1 %vm19291_vm6, %v19290_v0 }
0x117b   : > { %18285 = vmatmul.mubr.msk.f32.gmra.mxu0 %vm14108_vm0, %v16723_v41 }
0x117c   : > { %18287 = vmatprep.mubr.msk.f32.mxu0 %vm19291_vm6, %v19290_v0 }
0x117d   : > { %18314 = vmatmul.mubr.msk.f32.gmra.mxu1 %vm14108_vm0, %v16738_v42 }
0x117e   : > { %18316 = vmatprep.mubr.msk.f32.mxu1 %vm19291_vm6, %v19290_v0 }
0x117f   : > { %18288 = vmatmul.mubr.msk.f32.gmra.mxu0 %vm14108_vm0, %v16724_v28 }
0x1180   : > { %18290 = vmatprep.mubr.msk.f32.mxu0 %vm19291_vm6, %v19290_v0 }
0x1181   : > { %18317 = vmatmul.mubr.msk.f32.gmra.mxu1 %vm14108_vm0, %v16739_v7 }
0x1182   : > { %18319 = vmatprep.mubr.msk.f32.mxu1 %vm19291_vm6, %v19290_v0 }
0x1183   : > { %18291 = vmatmul.mubr.msk.f32.gmra.mxu0 %vm14108_vm0, %v16725_v43 }
0x1184   : > { %18293 = vmatprep.mubr.msk.f32.mxu0 %vm19291_vm6, %v19290_v0 }
0x1185   : > { %18320 = vmatmul.mubr.msk.f32.gmra.mxu1 %vm14108_vm0, %v16740_v40 }
0x1186   : > { %18322 = vmatprep.mubr.msk.f32.mxu1 %vm19291_vm6, %v19290_v0 }
0x1187   : > { %18294 = vmatmul.mubr.msk.f32.gmra.mxu0 %vm14108_vm0, %v16726_v44 }
0x1188   : > { %18296 = vmatprep.mubr.msk.f32.mxu0 %vm19291_vm6, %v19290_v0 }
0x1189   : > { %18323 = vmatmul.mubr.msk.f32.gmra.mxu1 %vm14108_vm0, %v16741_v45 }
0x118a   : > { %18325 = vmatprep.mubr.msk.f32.mxu1 %vm19291_vm6, %v19290_v0 }
0x118b   : > { %18297 = vmatmul.mubr.msk.f32.gmra.mxu0 %vm14108_vm0, %v16727_v46 }
0x118c   : > { %18299 = vmatprep.mubr.msk.f32.mxu0 %vm19291_vm6, %v19290_v0 }
0x118d   : > { %18326 = vmatmul.mubr.msk.f32.gmra.mxu1 %vm14108_vm0, %v16742_v24 }
0x118e   : > { %18328 = vmatprep.mubr.msk.f32.mxu1 %vm19291_vm6, %v19290_v0 }
0x118f   : > { %18300 = vmatmul.mubr.msk.f32.gmra.mxu0 %vm14108_vm0, %v16728_v26 }
0x1191   : > { %18329 = vmatmul.mubr.msk.f32.gmra.mxu1 %vm14108_vm0, %v16743_v48 }
0x119e   : > { %v14324_v49 = vpop.f32.mrf.mxu1 }
0x11a0   : > { %v14200_v50 = vpop.f32.mrf.mxu0  ;;  %v18022_v52 = vpop.f32.mrf.mxu1 }
0x11a1   : > { %v14325_v54 = vadd.f32 %v14324_v49, %v14200_v50 }
0x11a2   : > { %v17993_v58 = vpop.f32.mrf.mxu0 }
0x11a4   : > { %v14329_v47 = vpop.f32.mrf.mxu1 }
0x11a6   : > { %v14205_v59 = vpop.f32.mrf.mxu0  ;;  %v18025_v56 = vpop.f32.mrf.mxu1 }
0x11a7   : > { %v14330_v61 = vadd.f32 %v14329_v47, %v14205_v59 }
0x11a8   : > { %v17996_v62 = vpop.f32.mrf.mxu0 }
0x11aa   : > { %v14334_v1 = vpop.f32.mrf.mxu1 }
0x11ac   : > { %v14210_v2 = vpop.f32.mrf.mxu0  ;;  %v18028_v3 = vpop.f32.mrf.mxu1 }
0x11ad   : > { %v14335_v60 = vadd.f32 %v14334_v1, %v14210_v2 }
0x11ae   : > { %v17999_v0 = vpop.f32.mrf.mxu0  ;;  %v14339_v4 = vpop.f32.mrf.mxu1 }
0x11b0   : > { %v14215_v63 = vpop.f32.mrf.mxu0  ;;  %v18031_v55 = vpop.f32.mrf.mxu1 }
0x11b1   : > { %v14340_v5 = vadd.f32 %v14339_v4, %v14215_v63 }
0x11b2   : > { %v18002_v51 = vpop.f32.mrf.mxu0  ;;  %v14344_v53 = vpop.f32.mrf.mxu1 }
0x11b4   : > { %v14220_v6 = vpop.f32.mrf.mxu0  ;;  %v18034_v9 = vpop.f32.mrf.mxu1 }
0x11b5   : > { %v14345_v10 = vadd.f32 %v14344_v53, %v14220_v6 }
0x11b6   : > { %v18005_v13 = vpop.f32.mrf.mxu0  ;;  %v14349_v14 = vpop.f32.mrf.mxu1 }
0x11b8   : > { %v14225_v15 = vpop.f32.mrf.mxu0  ;;  %v18037_v35 = vpop.f32.mrf.mxu1 }
0x11b9   : > { %v14350_v16 = vadd.f32 %v14349_v14, %v14225_v15 }
0x11ba   : > { %v18008_v17 = vpop.f32.mrf.mxu0  ;;  %v14354_v18 = vpop.f32.mrf.mxu1 }
0x11bc   : > { %v14230_v19 = vpop.f32.mrf.mxu0  ;;  %v18040_v20 = vpop.f32.mrf.mxu1 }
0x11bd   : > { %v14355_v21 = vadd.f32 %v14354_v18, %v14230_v19 }
0x11be   : > { %v18011_v22 = vpop.f32.mrf.mxu0  ;;  %v14595_v27 = vpop.f32.mrf.mxu1 }
0x11c0   : > { %v14456_v8 = vpop.f32.mrf.mxu0  ;;  %v18080_v11 = vpop.f32.mrf.mxu1 }
0x11c1   : > { %v14490_v57 = vadd.f32 %v14456_v8, %v14325_v54 }
0x11c2   : > { %v18051_v12 = vpop.f32.mrf.mxu0 }
0x11c3   : > { %v14629_v25 = vadd.f32 %v14595_v27, %v14490_v57  ;;  %v14600_v29 = vpop.f32.mrf.mxu1 }
0x11c5   : > { %v18083_v30 = vpop.f32.mrf.mxu1 }
0x11c6   : > { %v14461_v31 = vpop.f32.mrf.mxu0 }
0x11c7   : > { %v14491_v23 = vadd.f32 %v14461_v31, %v14330_v61 }
0x11c8   : > { %v18054_v32 = vpop.f32.mrf.mxu0  ;;  %v14605_v33 = vpop.f32.mrf.mxu1 }
0x11c9   : > { %v14630_v34 = vadd.f32 %v14600_v29, %v14491_v23 }
0x11ca   : > { %v14466_v36 = vpop.f32.mrf.mxu0  ;;  %v18086_v37 = vpop.f32.mrf.mxu1 }
0x11cb   : > { %v14492_v38 = vadd.f32 %v14466_v36, %v14335_v60 }
0x11cc   : > { %v18057_v39 = vpop.f32.mrf.mxu0  ;;  %v14610_v41 = vpop.f32.mrf.mxu1 }
0x11cd   : > { %v14631_v42 = vadd.f32 %v14605_v33, %v14492_v38 }
0x11ce   : > { %v14471_v28 = vpop.f32.mrf.mxu0  ;;  %v18089_v7 = vpop.f32.mrf.mxu1 }
0x11cf   : > { %v14493_v43 = vadd.f32 %v14471_v28, %v14340_v5 }
0x11d0   : > { %v18060_v40 = vpop.f32.mrf.mxu0  ;;  %v14615_v44 = vpop.f32.mrf.mxu1 }
0x11d1   : > { %v14632_v45 = vadd.f32 %v14610_v41, %v14493_v43 }
0x11d2   : > { %v14476_v46 = vpop.f32.mrf.mxu0  ;;  %v18092_v24 = vpop.f32.mrf.mxu1 }
0x11d3   : > { %v14494_v26 = vadd.f32 %v14476_v46, %v14345_v10 }
0x11d4   : > { %v18063_v48 = vpop.f32.mrf.mxu0  ;;  %v14620_v49 = vpop.f32.mrf.mxu1 }
0x11d5   : > { %v14633_v50 = vadd.f32 %v14615_v44, %v14494_v26 }
0x11d6   : > { %v14481_v52 = vpop.f32.mrf.mxu0  ;;  %v18095_v54 = vpop.f32.mrf.mxu1 }
0x11d7   : > { %v14495_v58 = vadd.f32 %v14481_v52, %v14350_v16 }
0x11d8   : > { %v18066_v47 = vpop.f32.mrf.mxu0  ;;  %v14625_v59 = vpop.f32.mrf.mxu1 }
0x11d9   : > { %v14634_v56 = vadd.f32 %v14620_v49, %v14495_v58 }
0x11da   : > { %v14486_v61 = vpop.f32.mrf.mxu0  ;;  %v18098_v62 = vpop.f32.mrf.mxu1 }
0x11db   : > { %v14496_v1 = vadd.f32 %v14486_v61, %v14355_v21 }
0x11dc   : > { %v18069_v2 = vpop.f32.mrf.mxu0  ;;  %v14873_v3 = vpop.f32.mrf.mxu1 }
0x11dd   : > { %v14635_v60 = vadd.f32 %v14625_v59, %v14496_v1 }
0x11de   : > { %v14734_v0 = vpop.f32.mrf.mxu0  ;;  %v18138_v4 = vpop.f32.mrf.mxu1 }
0x11df   : > { %v14768_v63 = vadd.f32 %v14734_v0, %v14629_v25 }
0x11e0   : > { %v18109_v55 = vpop.f32.mrf.mxu0 }
0x11e1   : > { %v21572_v5 = vadd.f32 %v14873_v3, %v14768_v63  ;;  %v14878_v51 = vpop.f32.mrf.mxu1 }
0x11e3   : > { %v18141_v53 = vpop.f32.mrf.mxu1 }
0x11e4   : > { %v14739_v6 = vpop.f32.mrf.mxu0 }
0x11e5   : > { %v14769_v9 = vadd.f32 %v14739_v6, %v14630_v34 }
0x11e6   : > { %v18112_v10 = vpop.f32.mrf.mxu0  ;;  %v14883_v13 = vpop.f32.mrf.mxu1 }
0x11e7   : > { %v21574_v14 = vadd.f32 %v14878_v51, %v14769_v9 }
0x11e8   : > { %v14744_v15 = vpop.f32.mrf.mxu0  ;;  %v18144_v35 = vpop.f32.mrf.mxu1 }
0x11e9   : > { %v14770_v16 = vadd.f32 %v14744_v15, %v14631_v42 }
0x11ea   : > { %v18115_v17 = vpop.f32.mrf.mxu0  ;;  %v14888_v18 = vpop.f32.mrf.mxu1 }
0x11eb   : > { %v21576_v19 = vadd.f32 %v14883_v13, %v14770_v16 }
0x11ec   : > { %v14749_v20 = vpop.f32.mrf.mxu0  ;;  %v18147_v21 = vpop.f32.mrf.mxu1 }
0x11ed   : > { %v14771_v22 = vadd.f32 %v14749_v20, %v14632_v45 }
0x11ee   : > { %v18118_v27 = vpop.f32.mrf.mxu0  ;;  %v14893_v8 = vpop.f32.mrf.mxu1 }
0x11ef   : > { %v21578_v11 = vadd.f32 %v14888_v18, %v14771_v22 }
0x11f0   : > { %v14754_v57 = vpop.f32.mrf.mxu0  ;;  %v18150_v12 = vpop.f32.mrf.mxu1 }
0x11f1   : > { %v14772_v25 = vadd.f32 %v14754_v57, %v14633_v50 }
0x11f2   : > { %v18121_v29 = vpop.f32.mrf.mxu0  ;;  %v14898_v30 = vpop.f32.mrf.mxu1 }
0x11f3   : > { %v21580_v31 = vadd.f32 %v14893_v8, %v14772_v25 }
0x11f4   : > { %v14759_v23 = vpop.f32.mrf.mxu0  ;;  %v18153_v32 = vpop.f32.mrf.mxu1 }
0x11f5   : > { %v14773_v33 = vadd.f32 %v14759_v23, %v14634_v56 }
0x11f6   : > { %v18124_v34 = vpop.f32.mrf.mxu0  ;;  %v14903_v36 = vpop.f32.mrf.mxu1 }
0x11f7   : > { %v21582_v37 = vadd.f32 %v14898_v30, %v14773_v33 }
0x11f8   : > { %v14764_v38 = vpop.f32.mrf.mxu0  ;;  %v18156_v39 = vpop.f32.mrf.mxu1 }
0x11f9   : > { %v14774_v41 = vadd.f32 %v14764_v38, %v14635_v60 }
0x11fa   : > { %v18127_v42 = vpop.f32.mrf.mxu0  ;;  %v15151_v28 = vpop.f32.mrf.mxu1 }
0x11fb   : > { %v21584_v7 = vadd.f32 %v14903_v36, %v14774_v41 }
0x11fc   : > { %v15012_v43 = vpop.f32.mrf.mxu0  ;;  %v18196_v40 = vpop.f32.mrf.mxu1 }
0x11fd   : > { %v15046_v25 = vadd.f32 %v15012_v43, %v21572_v5 }
0x11fe   : > { %v18167_v44 = vpop.f32.mrf.mxu0 }
0x11ff   : > { %v15156_v45 = vpop.f32.mrf.mxu1  ;;  %v15185_v33 = vadd.f32 %v15151_v28, %v15046_v25 }
0x1201   : > { %v18199_v46 = vpop.f32.mrf.mxu1 }
0x1202   : > { %v15017_v24 = vpop.f32.mrf.mxu0 }
0x1203   : > { %v15047_v34 = vadd.f32 %v15017_v24, %v21574_v14 }
0x1204   : > { %v18170_v26 = vpop.f32.mrf.mxu0  ;;  %v15161_v48 = vpop.f32.mrf.mxu1 }
0x1205   : > { %v15186_v40 = vadd.f32 %v15156_v45, %v15047_v34 }
0x1206   : > { %v15022_v49 = vpop.f32.mrf.mxu0  ;;  %v18202_v50 = vpop.f32.mrf.mxu1 }
0x1207   : > { %v15048_v44 = vadd.f32 %v15022_v49, %v21576_v19 }
0x1208   : > { %v18173_v52 = vpop.f32.mrf.mxu0  ;;  %v21586_v54 = vpop.f32.mrf.mxu1 }
0x1209   : > { %v15187_v14 = vadd.f32 %v15161_v48, %v15048_v44 }
0x120a   : > { %v15027_v58 = vpop.f32.mrf.mxu0  ;;  %v18205_v47 = vpop.f32.mrf.mxu1 }
0x120b   : > { %v15049_v24 = vadd.f32 %v15027_v58, %v21578_v11 }
0x120c   : > { %v18176_v59 = vpop.f32.mrf.mxu0  ;;  %v21588_v56 = vpop.f32.mrf.mxu1 }
0x120e   : > { %v15032_v61 = vpop.f32.mrf.mxu0  ;;  %v18208_v62 = vpop.f32.mrf.mxu1 }
0x120f   : > { %v21608_v62 = vld [vmem:[#allocation34] ss:$0 sm:$0xff]  ;;  %v15050_v48 = vadd.f32 %v15032_v61, %v21580_v31 }
0x1210   : > { %v18179_v1 = vpop.f32.mrf.mxu0  ;;  %v21590_v2 = vpop.f32.mrf.mxu1 }
0x1212   : > { %v21592_v3 = vpop.f32.mrf.mxu0  ;;  %v18211_v60 = vpop.f32.mrf.mxu1 }
0x1214   : > { %v18182_v0 = vpop.f32.mrf.mxu0  ;;  %v21594_v4 = vpop.f32.mrf.mxu1 }
0x1215   : > { %v15188_v0 = vadd.f32 %v21586_v54, %v15049_v24 }
0x1216   : > { %v21596_v63 = vpop.f32.mrf.mxu0  ;;  %v18214_v55 = vpop.f32.mrf.mxu1 }
0x1218   : > { %v18185_v51 = vpop.f32.mrf.mxu0  ;;  %v15429_v53 = vpop.f32.mrf.mxu1 }
0x121a   : > { %v15290_v6 = vpop.f32.mrf.mxu0  ;;  %v18254_v9 = vpop.f32.mrf.mxu1 }
0x121b   : > { %v15324_v39 = vadd.f32 %v15290_v6, %v15185_v33 }
0x121c   : > { %v18225_v10 = vpop.f32.mrf.mxu0 }
0x121d   : > { %v15463_v46 = vadd.f32 %v15429_v53, %v15324_v39 }
0x121f   : > { %v15295_v13 = vpop.f32.mrf.mxu0 }
0x1220   : > { %v15325_v26 = vadd.f32 %v15295_v13, %v15186_v40 }
0x1221   : > { %v18228_v15 = vpop.f32.mrf.mxu0  ;;  %v15434_v35 = vpop.f32.mrf.mxu1 }
0x1222   : > { %v15464_v45 = vadd.f32 %v15434_v35, %v15325_v26  ;;  %v15189_v15 = vadd.f32 %v21588_v56, %v15050_v48  ;;  %v15051_v35 = vadd.f32 %v21592_v3, %v21582_v37  ;;  %v15052_v56 = vadd.f32 %v21596_v63, %v21584_v7 }
0x1223   : > { %v15300_v16 = vpop.f32.mrf.mxu0  ;;  %v18257_v17 = vpop.f32.mrf.mxu1 }
0x1224   : > { %v15326_v1 = vadd.f32 %v15300_v16, %v15187_v14  ;;  %v15191_v34 = vadd.f32 %v21594_v4, %v15052_v56 }
0x1225   : > { %v18231_v18 = vpop.f32.mrf.mxu0  ;;  %v15439_v20 = vpop.f32.mrf.mxu1 }
0x1226   : > { %v15465_v53 = vadd.f32 %v15439_v20, %v15326_v1 }
0x1227   : > { %v15305_v21 = vpop.f32.mrf.mxu0  ;;  %v18260_v22 = vpop.f32.mrf.mxu1 }
0x1228   : > { %v15327_v6 = vadd.f32 %v15305_v21, %v15188_v0 }
0x1229   : > { %v18234_v27 = vpop.f32.mrf.mxu0  ;;  %v15444_v8 = vpop.f32.mrf.mxu1 }
0x122a   : > { %v15466_v17 = vadd.f32 %v15444_v8, %v15327_v6  ;;  %v15190_v27 = vadd.f32 %v21590_v2, %v15051_v35 }
0x122b   : > { %v15310_v57 = vpop.f32.mrf.mxu0  ;;  %v18263_v12 = vpop.f32.mrf.mxu1 }
0x122c   : > { %v15328_v18 = vadd.f32 %v15310_v57, %v15189_v15 }
0x122d   : > { %v18237_v29 = vpop.f32.mrf.mxu0  ;;  %v15449_v30 = vpop.f32.mrf.mxu1 }
0x122e   : > { %v15467_v29 = vadd.f32 %v15449_v30, %v15328_v18 }
0x122f   : > { %v15315_v23 = vpop.f32.mrf.mxu0  ;;  %v18266_v32 = vpop.f32.mrf.mxu1 }
0x1230   : > { %v15329_v32 = vadd.f32 %v15315_v23, %v15190_v27 }
0x1231   : > { %v18240_v36 = vpop.f32.mrf.mxu0  ;;  %v21600_v38 = vpop.f32.mrf.mxu1 }
0x1232   : > { %v15468_v63 = vadd.f32 %v21600_v38, %v15329_v32 }
0x1233   : > { %v21602_v41 = vpop.f32.mrf.mxu0  ;;  %v18269_v42 = vpop.f32.mrf.mxu1 }
0x1234   : > { %v15330_v42 = vadd.f32 %v21602_v41, %v15191_v34 }
0x1235   : > { %v18243_v5 = vpop.f32.mrf.mxu0  ;;  %v21605_v43 = vpop.f32.mrf.mxu1 }
0x1236   : > { %v15469_v26 = vadd.f32 %v21605_v43, %v15330_v42 }
0x1237   : > { %v18272_v28 = vpop.f32.mrf.mxu1  ;;  %v15568_v50 = vpop.f32.mrf.mxu0 }
0x1238   : > { %v15602_v52 = vadd.f32 %v15568_v50, %v15463_v46 }
0x1239   : > { %v18283_v47 = vpop.f32.mrf.mxu0  ;;  %v15707_v59 = vpop.f32.mrf.mxu1 }
0x123a   : > { %v15741_v19 = vadd.f32 %v15707_v59, %v15602_v52 }
0x123b   : > { %v15573_v49 = vpop.f32.mrf.mxu0  ;;  %v18312_v60 = vpop.f32.mrf.mxu1 }
0x123c   : > { %v15755_v11 = vadd.f32 %v21608_v62, %v15741_v19  ;;  %v15603_v58 = vadd.f32 %v15573_v49, %v15464_v45 }
0x123d   : > { %v18286_v55 = vpop.f32.mrf.mxu0  ;;  %v15712_v51 = vpop.f32.mrf.mxu1 }
0x123e   : > { %15762 = vst [vmem:[%s21613_s3] sm:$0xff] %v15755_v11  ;;  %v15742_v9 = vadd.f32 %v15712_v51, %v15603_v58 }
0x123f   : > { %v15578_v10 = vpop.f32.mrf.mxu0  ;;  %v18315_v13 = vpop.f32.mrf.mxu1 }
0x1240   : > { %v15756_v54 = vadd.f32 %v21608_v62, %v15742_v9  ;;  %v15604_v31 = vadd.f32 %v15578_v10, %v15465_v53 }
0x1241   : > { %v18289_v61 = vpop.f32.mrf.mxu0  ;;  %v15717_v16 = vpop.f32.mrf.mxu1 }
0x1242   : > { %15763 = vst [vmem:[%s21613_s3 + $0x8] sm:$0xff] %v15756_v54  ;;  %v15743_v20 = vadd.f32 %v15717_v16, %v15604_v31 }
0x1243   : > { %v15583_v21 = vpop.f32.mrf.mxu0  ;;  %v18318_v22 = vpop.f32.mrf.mxu1 }
0x1244   : > { %v15757_v12 = vadd.f32 %v21608_v62, %v15743_v20  ;;  %v15605_v37 = vadd.f32 %v15583_v21, %v15466_v17 }
0x1245   : > { %v18292_v3 = vpop.f32.mrf.mxu0  ;;  %v15722_v25 = vpop.f32.mrf.mxu1 }
0x1246   : > { %15764 = vst [vmem:[%s21613_s3 + $0x10] sm:$0xff] %v15757_v12  ;;  %v15744_v8 = vadd.f32 %v15722_v25, %v15605_v37 }
0x1247   : > { %v15588_v57 = vpop.f32.mrf.mxu0  ;;  %v18321_v33 = vpop.f32.mrf.mxu1 }
0x1248   : > { %v15758_v2 = vadd.f32 %v21608_v62, %v15744_v8  ;;  %v15606_v36 = vadd.f32 %v15588_v57, %v15467_v29 }
0x1249   : > { %v18295_v39 = vpop.f32.mrf.mxu0  ;;  %v15727_v7 = vpop.f32.mrf.mxu1 }
0x124a   : > { %15765 = vst [vmem:[%s21613_s3 + $0x18] sm:$0xff] %v15758_v2  ;;  %v15745_v40 = vadd.f32 %v15727_v7, %v15606_v36 }
0x124b   : > { %v15593_v30 = vpop.f32.mrf.mxu0  ;;  %v18324_v23 = vpop.f32.mrf.mxu1 }
0x124c   : > { %v15759_v44 = vadd.f32 %v21608_v62, %v15745_v40  ;;  %v15607_v5 = vadd.f32 %v15593_v30, %v15468_v63 }
0x124d   : > { %v18298_v4 = vpop.f32.mrf.mxu0  ;;  %v15732_v46 = vpop.f32.mrf.mxu1 }
0x124e   : > { %15766 = vst [vmem:[%s21613_s3 + $0x20] sm:$0xff] %v15759_v44  ;;  %v15746_v28 = vadd.f32 %v15732_v46, %v15607_v5 }
0x124f   : > { %v15598_v50 = vpop.f32.mrf.mxu0  ;;  %v18327_v14 = vpop.f32.mrf.mxu1 }
0x1250   : > { %v15760_v38 = vadd.f32 %v21608_v62, %v15746_v28  ;;  %v15608_v41 = vadd.f32 %v15598_v50, %v15469_v26 }
0x1251   : > { %v15737_v24 = vpop.f32.mrf.mxu1  ;;  %v18301_v52 = vpop.f32.mrf.mxu0 }
0x1252   : > { %15767 = vst [vmem:[%s21613_s3 + $0x28] sm:$0xff] %v15760_v38  ;;  %v15747_v47 = vadd.f32 %v15737_v24, %v15608_v41 }
0x1253   : > { %v18330_v59 = vpop.f32.mrf.mxu1 }
0x1254   : > { %v15761_v45 = vadd.f32 %v21608_v62, %v15747_v47 }
0x1256   : > { %15768 = vst [vmem:[%s21613_s3 + $0x30] sm:$0xff] %v15761_v45 }
0x1257 PF: > { %s81_s7 = sadd.s32 1, %s19227_s7  }
0x1258   : > { %p78_p6 = scmp.ge.s32.totalorder %s81_s7, 4  }
0x125a   :  { %80 = sbr.rel (!%p78_p6) target bundleno = 61 (0x3d), region = 360 }
0x125f   :  { %15791 = vsyncpa [#allocation3], 1 }
0x1260   :  { %15793 = vsyncpa [#allocation3 + $0x1], 1 }
0x1261   :  { %15794 = vsyncpa [#allocation5], 1 }
0x1262   :  { %15795 = vsyncpa [#allocation8], 1 }
0x1263   :  { %15796 = vsyncpa [#allocation11], 1 }
0x1264   :  { %15797 = vsyncpa [#allocation14], 1 }
0x1265   :  { %15798 = vsyncpa [#allocation17], 1 }
0x1266   :  { %15799 = vsyncpa [#allocation20], 1 }
0x1267   :  { %15800 = vsyncpa [#allocation23], 1 }
0x1268   :  { %15801 = vsyncpa [#allocation26], 1 }
0x1269   :  { %15802 = vsyncpa [#allocation29], 1 }
0x126a   :  { %15803 = vsyncpa [#allocation32], 1 }
0x126b   :  { %15804 = vsyncpa [#allocation35], 1 }

</bundles_post_ra>
